<compile_context>
chip_gen: v7x
topology: tpu7x:2x2x1
jax: 0.10.0
libtpu: 0.0.40
codegen_flags: <defaults>
</compile_context>

<pallas_src>
import functools

import numpy as np

import jax
import jax.numpy as jnp
from jax.experimental import pallas as pl
from jax.experimental.pallas import tpu as pltpu


def _round_up(x, m):
    return (x + m - 1) // m * m


# ----------------------------------------------------------------------------- #
# Generic matmul + bias (+ReLU) kernel (used for e1/e2 strided convs, the
# transposed convs d4/d5 and the final 1x1 d6).
# ----------------------------------------------------------------------------- #
def _mm_bias_kernel(x_ref, w_ref, b_ref, o_ref, *, relu):
    y = jnp.dot(x_ref[...], w_ref[...], preferred_element_type=jnp.float32)
    y = y + b_ref[...]
    if relu:
        y = jnp.maximum(y, 0.0)
    o_ref[...] = y.astype(o_ref.dtype)


def matmul_bias(x, w, b, *, relu, out_dtype=jnp.bfloat16):
    """y = act(x @ w + b).  x:[M,K] bf16, w:[K,N] bf16, b:[1,N] f32.

    M is split into >=2 'parallel' tiles when large so both v7x TensorCores get
    work; grid of 1 on small M (launch-bound regime).
    """
    M, K = x.shape
    N = w.shape[1]
    tm = M if M <= 128 else min(512, _round_up(pl.cdiv(M, 2), 8))
    grid = (pl.cdiv(M, tm),)
    out_isz = jnp.dtype(out_dtype).itemsize
    cost = pl.CostEstimate(
        flops=2 * M * K * N, transcendentals=0,
        bytes_accessed=M * K * x.dtype.itemsize + K * N * w.dtype.itemsize
        + N * 4 + M * N * out_isz)
    return pl.pallas_call(
        functools.partial(_mm_bias_kernel, relu=relu),
        out_shape=jax.ShapeDtypeStruct((M, N), out_dtype),
        grid=grid,
        in_specs=[
            pl.BlockSpec((tm, K), lambda i: (i, 0)),
            pl.BlockSpec((K, N), lambda i: (0, 0)),
            pl.BlockSpec((1, N), lambda i: (0, 0)),
        ],
        out_specs=pl.BlockSpec((tm, N), lambda i: (i, 0)),
        compiler_params=pltpu.CompilerParams(dimension_semantics=("parallel",)),
        cost_estimate=cost,
    )(x, w, b)


def matmul_bias_batched(x, w, b_per_batch, *, relu, out_dtype=jnp.bfloat16):
    """Batched y[b] = act(x[b] @ w + b_eff[b]) with a per-batch bias (label fold)."""
    B, M, K = x.shape
    N = w.shape[1]
    cost = pl.CostEstimate(
        flops=2 * B * M * K * N, transcendentals=0,
        bytes_accessed=B * M * K * x.dtype.itemsize + K * N * w.dtype.itemsize
        + B * N * 4 + B * M * N * jnp.dtype(out_dtype).itemsize)
    return pl.pallas_call(
        functools.partial(_mm_bias_kernel, relu=relu),
        out_shape=jax.ShapeDtypeStruct((B, M, N), out_dtype),
        grid=(B,),
        in_specs=[
            pl.BlockSpec((None, M, K), lambda b: (b, 0, 0)),
            pl.BlockSpec((K, N), lambda b: (0, 0)),
            pl.BlockSpec((None, 1, N), lambda b: (b, 0, 0)),
        ],
        out_specs=pl.BlockSpec((None, M, N), lambda b: (b, 0, 0)),
        compiler_params=pltpu.CompilerParams(dimension_semantics=("parallel",)),
        cost_estimate=cost,
    )(x, w, b_per_batch)


# ----------------------------------------------------------------------------- #
# Fused middle kernel: e3, e4 ResBlocks -> e5 head + reparameterization -> d1 1x1
# -> d2, d3 ResBlocks.  Grid over batch ("parallel"), everything stays in VMEM.
# ----------------------------------------------------------------------------- #
def _middle_kernel(h2_ref, mask_ref, z_ref,
                   e3w1, e3b1, e3w2, e3b2,
                   e4w1, e4b1, e4w2, e4b2,
                   e5w, e5b, d1w, d1b,
                   d2w1, d2b1, d2w2, d2b2,
                   d3w1, d3b1, d3w2, d3b2,
                   mulv_ref, dec_ref,
                   xpad, hpad, *, Hq, Wq, latent):
    C = xpad.shape[-1]
    Wp = Wq + 2
    Npad = (Hq + 2) * Wp
    start = Wp + 1
    L = (Hq - 1) * Wp + Wq

    mask = mask_ref[...]                                   # (L, 1) interior-column mask

    # Zero only the border rows, every step (cheap, and megacore-safe: no reliance
    # on scratch contents surviving from a previous grid step).  Interior pad
    # columns are always written as zero (masked) below.
    zb = jnp.zeros((start, C), xpad.dtype)
    xpad[0:start, :] = zb
    xpad[start + L:Npad, :] = zb
    hpad[0:start, :] = zb
    hpad[start + L:Npad, :] = zb

    def set_window(vals):
        # vals: (Hq*Wq, C) -> interleave zero pad columns and write the full window.
        zero2 = jnp.zeros((2, C), vals.dtype)
        rows = []
        for i in range(Hq):
            rows.append(vals[i * Wq:(i + 1) * Wq, :])
            if i < Hq - 1:
                rows.append(zero2)
        xpad[start:start + L, :] = jnp.concatenate(rows, axis=0).astype(xpad.dtype)

    def gather_interior(a):
        # a: (L, C) -> (Hq*Wq, C), dropping the pad-column rows.
        return jnp.concatenate([a[i * Wp:i * Wp + Wq, :] for i in range(Hq)], axis=0)

    def conv3x3_relu(src, w_ref, b_ref):
        # 3x3 conv over the zero-padded scratch as ONE (L, 9C) @ (9C, C) matmul:
        # lane-concatenate the 9 shifted slices (vreg placement, no shuffle).
        cols = [src[dh * Wp + dw: dh * Wp + dw + L, :]
                for dh in range(3) for dw in range(3)]
        xg = jnp.concatenate(cols, axis=-1)                # (L, 9C) bf16
        y = jnp.dot(xg, w_ref[...], preferred_element_type=jnp.float32) + b_ref[...]
        return jnp.maximum(y, 0.0)

    def res_block(w1, b1, w2, b2, chain):
        h = conv3x3_relu(xpad, w1, b1) * mask              # zero the pad columns
        hpad[start:start + L, :] = h.astype(hpad.dtype)
        y = conv3x3_relu(hpad, w2, b2)
        out = (xpad[start:start + L, :].astype(jnp.float32) + y) * mask
        if chain:                                          # feed the next ResBlock
            xpad[start:start + L, :] = out.astype(xpad.dtype)
        return out

    # ---- encoder residual stack: e3, e4 -------------------------------------- #
    set_window(h2_ref[...])
    res_block(e3w1, e3b1, e3w2, e3b2, chain=True)
    x4 = gather_interior(res_block(e4w1, e4b1, e4w2, e4b2, chain=False))

    # ---- e5 head (mu / log_var merged into one dot) + reparameterization ----- #
    mulv = (jnp.dot(x4.astype(jnp.bfloat16), e5w[...],
                    preferred_element_type=jnp.float32) + e5b[...])
    mulv_ref[...] = mulv
    mu, lv = mulv[:, :latent], mulv[:, latent:]
    rz = mu + z_ref[...] * jnp.exp(0.5 * lv)               # mu + z*sqrt(exp(log_var))

    # ---- decoder: d1 1x1 (label folded into per-batch bias), d2, d3 ---------- #
    d0 = jnp.maximum(
        jnp.dot(rz.astype(jnp.bfloat16), d1w[...],
                preferred_element_type=jnp.float32) + d1b[...], 0.0)
    set_window(d0)
    res_block(d2w1, d2b1, d2w2, d2b2, chain=True)
    out = gather_interior(res_block(d3w1, d3b1, d3w2, d3b2, chain=False))
    dec_ref[...] = out.astype(dec_ref.dtype)


def _interior_mask(Hq, Wq):
    # Static (L, 1) mask of valid (non pad-column) positions in the flat window.
    Wp = Wq + 2
    start = Wp + 1
    L = (Hq - 1) * Wp + Wq
    pos = np.arange(L) + start
    col = pos % Wp
    return jnp.asarray(((col >= 1) & (col <= Wq)).astype(np.float32)[:, None])


def middle_block(h2, mask, z, d1_beff, p, Hq, Wq, latent):
    B, _, C = h2.shape
    Wp = Wq + 2
    L = (Hq - 1) * Wp + Wq
    Npad = (Hq + 2) * Wp
    e3, e4, d2, d3 = p["e3"], p["e4"], p["d2"], p["d3"]

    def shared(shape):
        return pl.BlockSpec(shape, lambda b: (0,) * len(shape))

    def perb(shape):
        return pl.BlockSpec((None,) + shape, lambda b: (b,) + (0,) * len(shape))

    res_specs = [shared((9 * C, C)), shared((1, C)),
                 shared((9 * C, C)), shared((1, C))]

    cost = pl.CostEstimate(
        flops=2 * B * 8 * L * 9 * C * C
        + 2 * B * Hq * Wq * C * (2 * latent) + 2 * B * Hq * Wq * latent * C,
        transcendentals=B * Hq * Wq * latent,
        bytes_accessed=B * Hq * Wq * (2 * C * 2 + latent * 4 + 2 * latent * 4)
        + 8 * 9 * C * C * 2 + 8 * C * 4 + C * 2 * latent * 2 + latent * C * 2)

    return pl.pallas_call(
        functools.partial(_middle_kernel, Hq=Hq, Wq=Wq, latent=latent),
        out_shape=(jax.ShapeDtypeStruct((B, Hq * Wq, 2 * latent), jnp.float32),
                   jax.ShapeDtypeStruct((B, Hq * Wq, C), jnp.bfloat16)),
        grid=(B,),
        in_specs=([perb((Hq * Wq, C)), shared((L, 1)), perb((Hq * Wq, latent))]
                  + res_specs + res_specs
                  + [shared((C, 2 * latent)), shared((1, 2 * latent)),
                     shared((latent, C)), perb((1, C))]
                  + res_specs + res_specs),
        out_specs=(perb((Hq * Wq, 2 * latent)), perb((Hq * Wq, C))),
        scratch_shapes=[pltpu.VMEM((Npad, C), jnp.bfloat16),
                        pltpu.VMEM((Npad, C), jnp.bfloat16)],
        compiler_params=pltpu.CompilerParams(
            dimension_semantics=("parallel",),
            vmem_limit_bytes=32 * 1024 * 1024),
        cost_estimate=cost,
    )(h2, mask, z,
      e3["w1"], e3["b1"], e3["w2"], e3["b2"],
      e4["w1"], e4["b1"], e4["w2"], e4["b2"],
      p["e5_w"], p["e5_b"], p["d1_w"], d1_beff,
      d2["w1"], d2["b1"], d2["w2"], d2["b2"],
      d3["w1"], d3["b1"], d3["w2"], d3["b2"])


# ----------------------------------------------------------------------------- #
# Parameters, built once in kernel-ready layout:
#   * bf16 weights, (1, N) f32 biases
#   * ResBlock 3x3 weights pre-stacked to (9C, C)
#   * e5 mu/log_var weights merged into one (128, 2*latent) matrix
#   * label-channel weights split out (folded into per-batch biases at call time)
#   * transpose-conv biases pre-tiled over the 4 taps; d6 output lane-padded to 8
# ----------------------------------------------------------------------------- #
def build_params(key, img_dim=3, latent_dim=8):
    keys = iter(jax.random.split(key, 32))

    def uni(shape, fan_in):
        bound = 1.0 / float(fan_in) ** 0.5
        return jax.random.uniform(next(keys), shape, jnp.float32, -bound, bound)

    def res_p(C=128):
        fan = 9 * C
        return {"w1": uni((9 * C, C), fan).astype(jnp.bfloat16),
                "b1": uni((1, C), fan),
                "w2": uni((9 * C, C), fan).astype(jnp.bfloat16),
                "b2": uni((1, C), fan)}

    p = {}
    # ---- encoder ----
    fan = (img_dim + 1) * 4                       # e1: 2x2/s2 conv, in = img_dim + label
    w1_full = uni((4, img_dim + 1, 64), fan)      # (tap, cin, out)
    p["e1_w"] = w1_full[:, :img_dim, :].reshape(4 * img_dim, 64).astype(jnp.bfloat16)
    p["e1_wlab"] = w1_full[:, img_dim, :].sum(axis=0, keepdims=True)   # (1, 64) f32
    p["e1_b"] = uni((1, 64), fan)

    fan = 64 * 4                                  # e2: 2x2/s2 conv 64 -> 128
    p["e2_w"] = uni((256, 128), fan).astype(jnp.bfloat16)
    p["e2_b"] = uni((1, 128), fan)

    p["e3"], p["e4"] = res_p(), res_p()

    p["e5_w"] = uni((128, 2 * latent_dim), 128).astype(jnp.bfloat16)   # mu|log_var merged
    p["e5_b"] = uni((1, 2 * latent_dim), 128)

    # ---- decoder ----
    fan = latent_dim + 1                          # d1: 1x1 conv, in = latent + label
    wd1 = uni((latent_dim + 1, 128), fan)
    p["d1_w"] = wd1[:latent_dim, :].astype(jnp.bfloat16)
    p["d1_wlab"] = wd1[latent_dim:, :]            # (1, 128) f32
    p["d1_b"] = uni((1, 128), fan)

    p["d2"], p["d3"] = res_p(), res_p()

    def convT(cin, cout):
        fan_t = cin * 4
        w = uni((cin, 4 * cout), fan_t).astype(jnp.bfloat16)   # columns ordered (kh,kw,o)
        b = uni((1, cout), fan_t)
        return w, jnp.tile(b, (1, 4))                          # bias pre-tiled once

    p["d4_w"], p["d4_b"] = convT(128, 64)
    p["d5_w"], p["d5_b"] = convT(64, 64)

    fan = 64                                      # d6: 1x1 conv 64 -> img_dim (lane-padded)
    w6 = uni((64, img_dim), fan)
    b6 = uni((1, img_dim), fan)
    p["d6_w"] = jnp.pad(w6, ((0, 0), (0, 8 - img_dim))).astype(jnp.bfloat16)
    p["d6_b"] = jnp.pad(b6, ((0, 0), (0, 8 - img_dim)))
    return p


# ----------------------------------------------------------------------------- #
# Model forward (eval-mode semantics of CondiontalVAE.forward)
# ----------------------------------------------------------------------------- #
def cvae_forward(params, x_nchw, label, z_key, latent_dim=8):
    B, Cimg, H, W = x_nchw.shape
    Hq, Wq = H // 4, W // 4

    # ----- encoder front: e1, e2 (2x2/s2 convs as space-to-depth matmuls) -----
    x = jnp.transpose(x_nchw, (0, 2, 3, 1)).astype(jnp.bfloat16)        # NHWC
    xs = x.reshape(B, H // 2, 2, W // 2, 2, Cimg).transpose(0, 1, 3, 2, 4, 5)
    xs = xs.reshape(B, (H // 2) * (W // 2), 4 * Cimg)
    # label plane is spatially constant -> fold into a per-batch effective bias
    e1_beff = (params["e1_b"] + label[:, None] * params["e1_wlab"])[:, None, :]
    h1 = matmul_bias_batched(xs, params["e1_w"], e1_beff, relu=True)    # (B, HW/4, 64)

    h1 = h1.reshape(B, H // 2, W // 2, 64)
    hs = h1.reshape(B, Hq, 2, Wq, 2, 64).transpose(0, 1, 3, 2, 4, 5)
    hs = hs.reshape(B * Hq * Wq, 4 * 64)
    h2 = matmul_bias(hs, params["e2_w"], params["e2_b"], relu=True)     # (B*HqWq, 128)
    h2 = h2.reshape(B, Hq * Wq, 128)

    # ----- fused middle: e3, e4, e5 (+reparameterization), d1, d2, d3 -----
    # TODO(synk): z could be generated in-kernel (pltpu.prng_seed/prng_random_bits);
    # kept as a tiny host-side normal input for robustness.
    z = jax.random.normal(z_key, (B, Hq * Wq, latent_dim), jnp.float32)
    d1_beff = (params["d1_b"] + label[:, None] * params["d1_wlab"])[:, None, :]
    mask = _interior_mask(Hq, Wq)
    mulv, dec = middle_block(h2, mask, z, d1_beff, params, Hq, Wq, latent_dim)

    mu = mulv[..., :latent_dim].reshape(B, Hq, Wq, latent_dim)
    log_var = mulv[..., latent_dim:].reshape(B, Hq, Wq, latent_dim)

    # ----- decoder tail: d4, d5 transposed convs, d6 1x1 -----
    d = matmul_bias(dec.reshape(B * Hq * Wq, 128), params["d4_w"], params["d4_b"],
                    relu=True)                                           # (B*HqWq, 4*64)
    d = d.reshape(B, Hq, Wq, 2, 2, 64).transpose(0, 1, 3, 2, 4, 5)
    d = d.reshape(B, 2 * Hq, 2 * Wq, 64)

    d = matmul_bias(d.reshape(B * 2 * Hq * 2 * Wq, 64), params["d5_w"], params["d5_b"],
                    relu=True)
    d = d.reshape(B, 2 * Hq, 2 * Wq, 2, 2, 64).transpose(0, 1, 3, 2, 4, 5)
    d = d.reshape(B, H, W, 64)

    d = matmul_bias(d.reshape(B * H * W, 64), params["d6_w"], params["d6_b"],
                    relu=False, out_dtype=jnp.float32)                   # (B*H*W, 8)
    x_rec = d.reshape(B, H, W, 8)[..., :Cimg]                            # strip lane pad

    # back to PyTorch NCHW convention
    return {
        "x_pred": jnp.transpose(x_rec, (0, 3, 1, 2)),
        "mu_pred": jnp.transpose(mu, (0, 3, 1, 2)),
        "log_var_pred": jnp.transpose(log_var, (0, 3, 1, 2)),
    }


# ----------------------------------------------------------------------------- #
if __name__ == "__main__":
    IMG_DIM, LATENT_DIM = 3, 8
    B, H, W = 2, 16, 16

    key = jax.random.PRNGKey(0)
    pkey, xkey, lkey, zkey = jax.random.split(key, 4)

    params = build_params(pkey, img_dim=IMG_DIM, latent_dim=LATENT_DIM)
    x = jax.random.normal(xkey, (B, IMG_DIM, H, W), jnp.float32)
    label = jax.random.randint(lkey, (B,), 0, 10).astype(jnp.float32)

    fwd = jax.jit(functools.partial(cvae_forward, latent_dim=LATENT_DIM))
    out = fwd(params, x, label, zkey)
    out = jax.tree_util.tree_map(jax.block_until_ready, out)

    assert out["x_pred"].shape == (B, IMG_DIM, H, W)
    assert out["mu_pred"].shape == (B, LATENT_DIM, H // 4, W // 4)
    assert out["log_var_pred"].shape == (B, LATENT_DIM, H // 4, W // 4)
    assert all(bool(jnp.isfinite(v).all()) for v in out.values())

    # TODO(synk): training-mode path (multi-sample loop + compute_loss) not implemented;
    # this is the eval-mode forward.
    print("KERNEL_OK")
</pallas_src>

<mosaic_0001>
module attributes {stable_mosaic.version = 11 : i64} {
  func.func @_mm_bias_kernel(%arg0: i32, %arg1: memref<1x64x12xbf16, #tpu.memory_space<vmem>>, %arg2: memref<12x64xbf16, #tpu.memory_space<vmem>>, %arg3: memref<1x1x64xf32, #tpu.memory_space<vmem>>, %arg4: memref<1x64x64xbf16, #tpu.memory_space<vmem>>) attributes {dimension_semantics = [#tpu.dimension_semantics<parallel>], iteration_bounds = array<i64: 2>, scalar_prefetch = 0 : i64, scratch_operands = 0 : i64, tpu.core_type = #tpu.core_type<tc>, window_params = [{transform_indices = @transform_0, window_bounds = array<i64: 1, 64, 12>}, {pipeline_mode = #tpu.pipeline_mode<synchronous>, transform_indices = @transform_1, window_bounds = array<i64: 12, 64>}, {transform_indices = @transform_2, window_bounds = array<i64: 1, 1, 64>}, {transform_indices = @transform_3, window_bounds = array<i64: 1, 64, 64>}]} {
    %c0 = arith.constant 0 : index
    %c0_0 = arith.constant 0 : index
    %c0_1 = arith.constant 0 : index
    %0 = vector.load %arg1[%c0, %c0_0, %c0_1] : memref<1x64x12xbf16, #tpu.memory_space<vmem>>, vector<1x64x12xbf16>
    %1 = vector.shape_cast %0 : vector<1x64x12xbf16> to vector<64x12xbf16>
    %c0_2 = arith.constant 0 : index
    %c0_3 = arith.constant 0 : index
    %2 = vector.load %arg2[%c0_2, %c0_3] : memref<12x64xbf16, #tpu.memory_space<vmem>>, vector<12x64xbf16>
    %cst = arith.constant dense<0.000000e+00> : vector<64x64xf32>
    %3 = tpu.matmul %1, %2, %cst {dimension_numbers = #tpu.dot_dimension_numbers<[1], [0], [0], [1], [0, 0, 1, 1], [], []>} : vector<64x12xbf16>, vector<12x64xbf16>, vector<64x64xf32> -> vector<64x64xf32>
    %c0_4 = arith.constant 0 : index
    %c0_5 = arith.constant 0 : index
    %c0_6 = arith.constant 0 : index
    %4 = vector.load %arg3[%c0_4, %c0_5, %c0_6] : memref<1x1x64xf32, #tpu.memory_space<vmem>>, vector<1x1x64xf32>
    %5 = vector.shape_cast %4 : vector<1x1x64xf32> to vector<1x64xf32>
    %6 = vector.broadcast %5 : vector<1x64xf32> to vector<64x64xf32>
    %7 = arith.addf %3, %6 : vector<64x64xf32>
    %cst_7 = arith.constant 0.000000e+00 : f32
    %8 = vector.broadcast %cst_7 : f32 to vector<64x64xf32>
    %9 = arith.maximumf %7, %8 : vector<64x64xf32>
    %10 = arith.truncf %9 : vector<64x64xf32> to vector<64x64xbf16>
    %c0_8 = arith.constant 0 : index
    %c0_9 = arith.constant 0 : index
    %c0_10 = arith.constant 0 : index
    %11 = vector.load %arg4[%c0_8, %c0_9, %c0_10] : memref<1x64x64xbf16, #tpu.memory_space<vmem>>, vector<1x64x64xbf16>
    %12 = vector.shape_cast %11 : vector<1x64x64xbf16> to vector<64x64xbf16>
    %13 = vector.shape_cast %10 : vector<64x64xbf16> to vector<1x64x64xbf16>
    tpu.vector_store %arg4[%c0_8, %c0_9, %c0_10], %13 {strides = array<i32>} : memref<1x64x64xbf16, #tpu.memory_space<vmem>>, vector<1x64x64xbf16>,
    return
  }
  func.func @transform_0(%arg0: i32) -> (i32, i32, i32) {
    %c0_i32 = arith.constant 0 : i32
    %c0_i32_0 = arith.constant 0 : i32
    %c0_i32_1 = arith.constant 0 : i32
    return %arg0, %c0_i32, %c0_i32_0 : i32, i32, i32
  }
  func.func @transform_1(%arg0: i32) -> (i32, i32) {
    %c0_i32 = arith.constant 0 : i32
    %c0_i32_0 = arith.constant 0 : i32
    %c0_i32_1 = arith.constant 0 : i32
    return %c0_i32, %c0_i32_0 : i32, i32
  }
  func.func @transform_2(%arg0: i32) -> (i32, i32, i32) {
    %c0_i32 = arith.constant 0 : i32
    %c0_i32_0 = arith.constant 0 : i32
    %c0_i32_1 = arith.constant 0 : i32
    return %arg0, %c0_i32, %c0_i32_0 : i32, i32, i32
  }
  func.func @transform_3(%arg0: i32) -> (i32, i32, i32) {
    %c0_i32 = arith.constant 0 : i32
    %c0_i32_0 = arith.constant 0 : i32
    %c0_i32_1 = arith.constant 0 : i32
    return %arg0, %c0_i32, %c0_i32_0 : i32, i32, i32
  }
}

module attributes {stable_mosaic.version = 11 : i64} {
  func.func @_middle_kernel(%arg0: i32, %arg1: memref<1x16x128xbf16, #tpu.memory_space<vmem>>, %arg2: memref<22x1xf32, #tpu.memory_space<vmem>>, %arg3: memref<1x16x8xf32, #tpu.memory_space<vmem>>, %arg4: memref<1152x128xbf16, #tpu.memory_space<vmem>>, %arg5: memref<1x128xf32, #tpu.memory_space<vmem>>, %arg6: memref<1152x128xbf16, #tpu.memory_space<vmem>>, %arg7: memref<1x128xf32, #tpu.memory_space<vmem>>, %arg8: memref<1152x128xbf16, #tpu.memory_space<vmem>>, %arg9: memref<1x128xf32, #tpu.memory_space<vmem>>, %arg10: memref<1152x128xbf16, #tpu.memory_space<vmem>>, %arg11: memref<1x128xf32, #tpu.memory_space<vmem>>, %arg12: memref<128x16xbf16, #tpu.memory_space<vmem>>, %arg13: memref<1x16xf32, #tpu.memory_space<vmem>>, %arg14: memref<8x128xbf16, #tpu.memory_space<vmem>>, %arg15: memref<1x1x128xf32, #tpu.memory_space<vmem>>, %arg16: memref<1152x128xbf16, #tpu.memory_space<vmem>>, %arg17: memref<1x128xf32, #tpu.memory_space<vmem>>, %arg18: memref<1152x128xbf16, #tpu.memory_space<vmem>>, %arg19: memref<1x128xf32, #tpu.memory_space<vmem>>, %arg20: memref<1152x128xbf16, #tpu.memory_space<vmem>>, %arg21: memref<1x128xf32, #tpu.memory_space<vmem>>, %arg22: memref<1152x128xbf16, #tpu.memory_space<vmem>>, %arg23: memref<1x128xf32, #tpu.memory_space<vmem>>, %arg24: memref<1x16x16xf32, #tpu.memory_space<vmem>>, %arg25: memref<1x16x128xbf16, #tpu.memory_space<vmem>>, %arg26: memref<36x128xbf16, #tpu.memory_space<vmem>>, %arg27: memref<36x128xbf16, #tpu.memory_space<vmem>>) attributes {dimension_semantics = [#tpu.dimension_semantics<parallel>], iteration_bounds = array<i64: 2>, scalar_prefetch = 0 : i64, scratch_operands = 2 : i64, tpu.core_type = #tpu.core_type<tc>, window_params = [{transform_indices = @transform_0, window_bounds = array<i64: 1, 16, 128>}, {pipeline_mode = #tpu.pipeline_mode<synchronous>, transform_indices = @transform_1, window_bounds = array<i64: 22, 1>}, {transform_indices = @transform_2, window_bounds = array<i64: 1, 16, 8>}, {pipeline_mode = #tpu.pipeline_mode<synchronous>, transform_indices = @transform_3, window_bounds = array<i64: 1152, 128>}, {pipeline_mode = #tpu.pipeline_mode<synchronous>, transform_indices = @transform_4, window_bounds = array<i64: 1, 128>}, {pipeline_mode = #tpu.pipeline_mode<synchronous>, transform_indices = @transform_5, window_bounds = array<i64: 1152, 128>}, {pipeline_mode = #tpu.pipeline_mode<synchronous>, transform_indices = @transform_6, window_bounds = array<i64: 1, 128>}, {pipeline_mode = #tpu.pipeline_mode<synchronous>, transform_indices = @transform_7, window_bounds = array<i64: 1152, 128>}, {pipeline_mode = #tpu.pipeline_mode<synchronous>, transform_indices = @transform_8, window_bounds = array<i64: 1, 128>}, {pipeline_mode = #tpu.pipeline_mode<synchronous>, transform_indices = @transform_9, window_bounds = array<i64: 1152, 128>}, {pipeline_mode = #tpu.pipeline_mode<synchronous>, transform_indices = @transform_10, window_bounds = array<i64: 1, 128>}, {pipeline_mode = #tpu.pipeline_mode<synchronous>, transform_indices = @transform_11, window_bounds = array<i64: 128, 16>}, {pipeline_mode = #tpu.pipeline_mode<synchronous>, transform_indices = @transform_12, window_bounds = array<i64: 1, 16>}, {pipeline_mode = #tpu.pipeline_mode<synchronous>, transform_indices = @transform_13, window_bounds = array<i64: 8, 128>}, {transform_indices = @transform_14, window_bounds = array<i64: 1, 1, 128>}, {pipeline_mode = #tpu.pipeline_mode<synchronous>, transform_indices = @transform_15, window_bounds = array<i64: 1152, 128>}, {pipeline_mode = #tpu.pipeline_mode<synchronous>, transform_indices = @transform_16, window_bounds = array<i64: 1, 128>}, {pipeline_mode = #tpu.pipeline_mode<synchronous>, transform_indices = @transform_17, window_bounds = array<i64: 1152, 128>}, {pipeline_mode = #tpu.pipeline_mode<synchronous>, transform_indices = @transform_18, window_bounds = array<i64: 1, 128>}, {pipeline_mode = #tpu.pipeline_mode<synchronous>, transform_indices = @transform_19, window_bounds = array<i64: 1152, 128>}, {pipeline_mode = #tpu.pipeline_mode<synchronous>, transform_indices = @transform_20, window_bounds = array<i64: 1, 128>}, {pipeline_mode = #tpu.pipeline_mode<synchronous>, transform_indices = @transform_21, window_bounds = array<i64: 1152, 128>}, {pipeline_mode = #tpu.pipeline_mode<synchronous>, transform_indices = @transform_22, window_bounds = array<i64: 1, 128>}, {transform_indices = @transform_23, window_bounds = array<i64: 1, 16, 16>}, {transform_indices = @transform_24, window_bounds = array<i64: 1, 16, 128>}]} {
    %c0 = arith.constant 0 : index
    %c0_0 = arith.constant 0 : index
    %0 = vector.load %arg2[%c0, %c0_0] : memref<22x1xf32, #tpu.memory_space<vmem>>, vector<22x1xf32>
    %cst = arith.constant 0.000000e+00 : bf16
    %1 = vector.broadcast %cst : bf16 to vector<7x128xbf16>
    %c0_1 = arith.constant 0 : index
    %c0_2 = arith.constant 0 : index
    %2 = vector.load %arg26[%c0_1, %c0_2] : memref<36x128xbf16, #tpu.memory_space<vmem>>, vector<7x128xbf16>
    tpu.vector_store %arg26[%c0_1, %c0_2], %1 {strides = array<i32>} : memref<36x128xbf16, #tpu.memory_space<vmem>>, vector<7x128xbf16>,
    %c29 = arith.constant 29 : index
    %c0_3 = arith.constant 0 : index
    %3 = vector.load %arg26[%c29, %c0_3] : memref<36x128xbf16, #tpu.memory_space<vmem>>, vector<7x128xbf16>
    tpu.vector_store %arg26[%c29, %c0_3], %1 {strides = array<i32>} : memref<36x128xbf16, #tpu.memory_space<vmem>>, vector<7x128xbf16>,
    %c0_4 = arith.constant 0 : index
    %c0_5 = arith.constant 0 : index
    %4 = vector.load %arg27[%c0_4, %c0_5] : memref<36x128xbf16, #tpu.memory_space<vmem>>, vector<7x128xbf16>
    tpu.vector_store %arg27[%c0_4, %c0_5], %1 {strides = array<i32>} : memref<36x128xbf16, #tpu.memory_space<vmem>>, vector<7x128xbf16>,
    %c29_6 = arith.constant 29 : index
    %c0_7 = arith.constant 0 : index
    %5 = vector.load %arg27[%c29_6, %c0_7] : memref<36x128xbf16, #tpu.memory_space<vmem>>, vector<7x128xbf16>
    tpu.vector_store %arg27[%c29_6, %c0_7], %1 {strides = array<i32>} : memref<36x128xbf16, #tpu.memory_space<vmem>>, vector<7x128xbf16>,
    %c0_8 = arith.constant 0 : index
    %c0_9 = arith.constant 0 : index
    %c0_10 = arith.constant 0 : index
    %6 = vector.load %arg1[%c0_8, %c0_9, %c0_10] : memref<1x16x128xbf16, #tpu.memory_space<vmem>>, vector<1x16x128xbf16>
    %7 = vector.shape_cast %6 : vector<1x16x128xbf16> to vector<16x128xbf16>
    %cst_11 = arith.constant 0.000000e+00 : bf16
    %8 = vector.broadcast %cst_11 : bf16 to vector<2x128xbf16>
    %9 = vector.extract_strided_slice %7 {offsets = [0, 0], sizes = [4, 128], strides = [1, 1]} : vector<16x128xbf16> to vector<4x128xbf16>
    %10 = vector.extract_strided_slice %7 {offsets = [4, 0], sizes = [4, 128], strides = [1, 1]} : vector<16x128xbf16> to vector<4x128xbf16>
    %11 = vector.extract_strided_slice %7 {offsets = [8, 0], sizes = [4, 128], strides = [1, 1]} : vector<16x128xbf16> to vector<4x128xbf16>
    %12 = vector.extract_strided_slice %7 {offsets = [12, 0], sizes = [4, 128], strides = [1, 1]} : vector<16x128xbf16> to vector<4x128xbf16>
    %13 = tpu.concatenate %9, %8, %10, %8, %11, %8, %12 in 0 : vector<4x128xbf16>, vector<2x128xbf16>, vector<4x128xbf16>, vector<2x128xbf16>, vector<4x128xbf16>, vector<2x128xbf16>, vector<4x128xbf16> -> vector<22x128xbf16>
    %c7 = arith.constant 7 : index
    %c0_12 = arith.constant 0 : index
    %14 = vector.load %arg26[%c7, %c0_12] : memref<36x128xbf16, #tpu.memory_space<vmem>>, vector<22x128xbf16>
    tpu.vector_store %arg26[%c7, %c0_12], %13 {strides = array<i32>} : memref<36x128xbf16, #tpu.memory_space<vmem>>, vector<22x128xbf16>,
    %c0_13 = arith.constant 0 : index
    %c0_14 = arith.constant 0 : index
    %15 = vector.load %arg26[%c0_13, %c0_14] : memref<36x128xbf16, #tpu.memory_space<vmem>>, vector<22x128xbf16>
    %c1 = arith.constant 1 : index
    %c0_15 = arith.constant 0 : index
    %16 = vector.load %arg26[%c1, %c0_15] : memref<36x128xbf16, #tpu.memory_space<vmem>>, vector<22x128xbf16>
    %c2 = arith.constant 2 : index
    %c0_16 = arith.constant 0 : index
    %17 = vector.load %arg26[%c2, %c0_16] : memref<36x128xbf16, #tpu.memory_space<vmem>>, vector<22x128xbf16>
    %c6 = arith.constant 6 : index
    %c0_17 = arith.constant 0 : index
    %18 = vector.load %arg26[%c6, %c0_17] : memref<36x128xbf16, #tpu.memory_space<vmem>>, vector<22x128xbf16>
    %c7_18 = arith.constant 7 : index
    %c0_19 = arith.constant 0 : index
    %19 = vector.load %arg26[%c7_18, %c0_19] : memref<36x128xbf16, #tpu.memory_space<vmem>>, vector<22x128xbf16>
    %c8 = arith.constant 8 : index
    %c0_20 = arith.constant 0 : index
    %20 = vector.load %arg26[%c8, %c0_20] : memref<36x128xbf16, #tpu.memory_space<vmem>>, vector<22x128xbf16>
    %c12 = arith.constant 12 : index
    %c0_21 = arith.constant 0 : index
    %21 = vector.load %arg26[%c12, %c0_21] : memref<36x128xbf16, #tpu.memory_space<vmem>>, vector<22x128xbf16>
    %c13 = arith.constant 13 : index
    %c0_22 = arith.constant 0 : index
    %22 = vector.load %arg26[%c13, %c0_22] : memref<36x128xbf16, #tpu.memory_space<vmem>>, vector<22x128xbf16>
    %c14 = arith.constant 14 : index
    %c0_23 = arith.constant 0 : index
    %23 = vector.load %arg26[%c14, %c0_23] : memref<36x128xbf16, #tpu.memory_space<vmem>>, vector<22x128xbf16>
    %24 = tpu.concatenate %15, %16, %17, %18, %19, %20, %21, %22, %23 in 1 : vector<22x128xbf16>, vector<22x128xbf16>, vector<22x128xbf16>, vector<22x128xbf16>, vector<22x128xbf16>, vector<22x128xbf16>, vector<22x128xbf16>, vector<22x128xbf16>, vector<22x128xbf16> -> vector<22x1152xbf16>
    %c0_24 = arith.constant 0 : index
    %c0_25 = arith.constant 0 : index
    %25 = vector.load %arg4[%c0_24, %c0_25] : memref<1152x128xbf16, #tpu.memory_space<vmem>>, vector<1152x128xbf16>
    %cst_26 = arith.constant dense<0.000000e+00> : vector<22x128xf32>
    %26 = tpu.matmul %24, %25, %cst_26 {dimension_numbers = #tpu.dot_dimension_numbers<[1], [0], [0], [1], [0, 0, 1, 1], [], []>} : vector<22x1152xbf16>, vector<1152x128xbf16>, vector<22x128xf32> -> vector<22x128xf32>
    %c0_27 = arith.constant 0 : index
    %c0_28 = arith.constant 0 : index
    %27 = vector.load %arg5[%c0_27, %c0_28] : memref<1x128xf32, #tpu.memory_space<vmem>>, vector<1x128xf32>
    %28 = vector.broadcast %27 : vector<1x128xf32> to vector<22x128xf32>
    %29 = arith.addf %26, %28 : vector<22x128xf32>
    %cst_29 = arith.constant 0.000000e+00 : f32
    %30 = vector.broadcast %cst_29 : f32 to vector<22x128xf32>
    %31 = arith.maximumf %29, %30 : vector<22x128xf32>
    %32 = vector.broadcast %0 : vector<22x1xf32> to vector<22x128xf32>
    %33 = arith.mulf %31, %32 : vector<22x128xf32>
    %34 = arith.truncf %33 : vector<22x128xf32> to vector<22x128xbf16>
    %c7_30 = arith.constant 7 : index
    %c0_31 = arith.constant 0 : index
    %35 = vector.load %arg27[%c7_30, %c0_31] : memref<36x128xbf16, #tpu.memory_space<vmem>>, vector<22x128xbf16>
    tpu.vector_store %arg27[%c7_30, %c0_31], %34 {strides = array<i32>} : memref<36x128xbf16, #tpu.memory_space<vmem>>, vector<22x128xbf16>,
    %c0_32 = arith.constant 0 : index
    %c0_33 = arith.constant 0 : index
    %36 = vector.load %arg27[%c0_32, %c0_33] : memref<36x128xbf16, #tpu.memory_space<vmem>>, vector<22x128xbf16>
    %c1_34 = arith.constant 1 : index
    %c0_35 = arith.constant 0 : index
    %37 = vector.load %arg27[%c1_34, %c0_35] : memref<36x128xbf16, #tpu.memory_space<vmem>>, vector<22x128xbf16>
    %c2_36 = arith.constant 2 : index
    %c0_37 = arith.constant 0 : index
    %38 = vector.load %arg27[%c2_36, %c0_37] : memref<36x128xbf16, #tpu.memory_space<vmem>>, vector<22x128xbf16>
    %c6_38 = arith.constant 6 : index
    %c0_39 = arith.constant 0 : index
    %39 = vector.load %arg27[%c6_38, %c0_39] : memref<36x128xbf16, #tpu.memory_space<vmem>>, vector<22x128xbf16>
    %c7_40 = arith.constant 7 : index
    %c0_41 = arith.constant 0 : index
    %40 = vector.load %arg27[%c7_40, %c0_41] : memref<36x128xbf16, #tpu.memory_space<vmem>>, vector<22x128xbf16>
    %c8_42 = arith.constant 8 : index
    %c0_43 = arith.constant 0 : index
    %41 = vector.load %arg27[%c8_42, %c0_43] : memref<36x128xbf16, #tpu.memory_space<vmem>>, vector<22x128xbf16>
    %c12_44 = arith.constant 12 : index
    %c0_45 = arith.constant 0 : index
    %42 = vector.load %arg27[%c12_44, %c0_45] : memref<36x128xbf16, #tpu.memory_space<vmem>>, vector<22x128xbf16>
    %c13_46 = arith.constant 13 : index
    %c0_47 = arith.constant 0 : index
    %43 = vector.load %arg27[%c13_46, %c0_47] : memref<36x128xbf16, #tpu.memory_space<vmem>>, vector<22x128xbf16>
    %c14_48 = arith.constant 14 : index
    %c0_49 = arith.constant 0 : index
    %44 = vector.load %arg27[%c14_48, %c0_49] : memref<36x128xbf16, #tpu.memory_space<vmem>>, vector<22x128xbf16>
    %45 = tpu.concatenate %36, %37, %38, %39, %40, %41, %42, %43, %44 in 1 : vector<22x128xbf16>, vector<22x128xbf16>, vector<22x128xbf16>, vector<22x128xbf16>, vector<22x128xbf16>, vector<22x128xbf16>, vector<22x128xbf16>, vector<22x128xbf16>, vector<22x128xbf16> -> vector<22x1152xbf16>
    %c0_50 = arith.constant 0 : index
    %c0_51 = arith.constant 0 : index
    %46 = vector.load %arg6[%c0_50, %c0_51] : memref<1152x128xbf16, #tpu.memory_space<vmem>>, vector<1152x128xbf16>
    %cst_52 = arith.constant dense<0.000000e+00> : vector<22x128xf32>
    %47 = tpu.matmul %45, %46, %cst_52 {dimension_numbers = #tpu.dot_dimension_numbers<[1], [0], [0], [1], [0, 0, 1, 1], [], []>} : vector<22x1152xbf16>, vector<1152x128xbf16>, vector<22x128xf32> -> vector<22x128xf32>
    %c0_53 = arith.constant 0 : index
    %c0_54 = arith.constant 0 : index
    %48 = vector.load %arg7[%c0_53, %c0_54] : memref<1x128xf32, #tpu.memory_space<vmem>>, vector<1x128xf32>
    %49 = vector.broadcast %48 : vector<1x128xf32> to vector<22x128xf32>
    %50 = arith.addf %47, %49 : vector<22x128xf32>
    %cst_55 = arith.constant 0.000000e+00 : f32
    %51 = vector.broadcast %cst_55 : f32 to vector<22x128xf32>
    %52 = arith.maximumf %50, %51 : vector<22x128xf32>
    %c7_56 = arith.constant 7 : index
    %c0_57 = arith.constant 0 : index
    %53 = vector.load %arg26[%c7_56, %c0_57] : memref<36x128xbf16, #tpu.memory_space<vmem>>, vector<22x128xbf16>
    %54 = arith.extf %53 : vector<22x128xbf16> to vector<22x128xf32>
    %55 = arith.addf %54, %52 : vector<22x128xf32>
    %56 = vector.broadcast %0 : vector<22x1xf32> to vector<22x128xf32>
    %57 = arith.mulf %55, %56 : vector<22x128xf32>
    %58 = arith.truncf %57 : vector<22x128xf32> to vector<22x128xbf16>
    %c7_58 = arith.constant 7 : index
    %c0_59 = arith.constant 0 : index
    %59 = vector.load %arg26[%c7_58, %c0_59] : memref<36x128xbf16, #tpu.memory_space<vmem>>, vector<22x128xbf16>
    tpu.vector_store %arg26[%c7_58, %c0_59], %58 {strides = array<i32>} : memref<36x128xbf16, #tpu.memory_space<vmem>>, vector<22x128xbf16>,
    %c0_60 = arith.constant 0 : index
    %c0_61 = arith.constant 0 : index
    %60 = vector.load %arg26[%c0_60, %c0_61] : memref<36x128xbf16, #tpu.memory_space<vmem>>, vector<22x128xbf16>
    %c1_62 = arith.constant 1 : index
    %c0_63 = arith.constant 0 : index
    %61 = vector.load %arg26[%c1_62, %c0_63] : memref<36x128xbf16, #tpu.memory_space<vmem>>, vector<22x128xbf16>
    %c2_64 = arith.constant 2 : index
    %c0_65 = arith.constant 0 : index
    %62 = vector.load %arg26[%c2_64, %c0_65] : memref<36x128xbf16, #tpu.memory_space<vmem>>, vector<22x128xbf16>
    %c6_66 = arith.constant 6 : index
    %c0_67 = arith.constant 0 : index
    %63 = vector.load %arg26[%c6_66, %c0_67] : memref<36x128xbf16, #tpu.memory_space<vmem>>, vector<22x128xbf16>
    %c7_68 = arith.constant 7 : index
    %c0_69 = arith.constant 0 : index
    %64 = vector.load %arg26[%c7_68, %c0_69] : memref<36x128xbf16, #tpu.memory_space<vmem>>, vector<22x128xbf16>
    %c8_70 = arith.constant 8 : index
    %c0_71 = arith.constant 0 : index
    %65 = vector.load %arg26[%c8_70, %c0_71] : memref<36x128xbf16, #tpu.memory_space<vmem>>, vector<22x128xbf16>
    %c12_72 = arith.constant 12 : index
    %c0_73 = arith.constant 0 : index
    %66 = vector.load %arg26[%c12_72, %c0_73] : memref<36x128xbf16, #tpu.memory_space<vmem>>, vector<22x128xbf16>
    %c13_74 = arith.constant 13 : index
    %c0_75 = arith.constant 0 : index
    %67 = vector.load %arg26[%c13_74, %c0_75] : memref<36x128xbf16, #tpu.memory_space<vmem>>, vector<22x128xbf16>
    %c14_76 = arith.constant 14 : index
    %c0_77 = arith.constant 0 : index
    %68 = vector.load %arg26[%c14_76, %c0_77] : memref<36x128xbf16, #tpu.memory_space<vmem>>, vector<22x128xbf16>
    %69 = tpu.concatenate %60, %61, %62, %63, %64, %65, %66, %67, %68 in 1 : vector<22x128xbf16>, vector<22x128xbf16>, vector<22x128xbf16>, vector<22x128xbf16>, vector<22x128xbf16>, vector<22x128xbf16>, vector<22x128xbf16>, vector<22x128xbf16>, vector<22x128xbf16> -> vector<22x1152xbf16>
    %c0_78 = arith.constant 0 : index
    %c0_79 = arith.constant 0 : index
    %70 = vector.load %arg8[%c0_78, %c0_79] : memref<1152x128xbf16, #tpu.memory_space<vmem>>, vector<1152x128xbf16>
    %cst_80 = arith.constant dense<0.000000e+00> : vector<22x128xf32>
    %71 = tpu.matmul %69, %70, %cst_80 {dimension_numbers = #tpu.dot_dimension_numbers<[1], [0], [0], [1], [0, 0, 1, 1], [], []>} : vector<22x1152xbf16>, vector<1152x128xbf16>, vector<22x128xf32> -> vector<22x128xf32>
    %c0_81 = arith.constant 0 : index
    %c0_82 = arith.constant 0 : index
    %72 = vector.load %arg9[%c0_81, %c0_82] : memref<1x128xf32, #tpu.memory_space<vmem>>, vector<1x128xf32>
    %73 = vector.broadcast %72 : vector<1x128xf32> to vector<22x128xf32>
    %74 = arith.addf %71, %73 : vector<22x128xf32>
    %cst_83 = arith.constant 0.000000e+00 : f32
    %75 = vector.broadcast %cst_83 : f32 to vector<22x128xf32>
    %76 = arith.maximumf %74, %75 : vector<22x128xf32>
    %77 = vector.broadcast %0 : vector<22x1xf32> to vector<22x128xf32>
    %78 = arith.mulf %76, %77 : vector<22x128xf32>
    %79 = arith.truncf %78 : vector<22x128xf32> to vector<22x128xbf16>
    %c7_84 = arith.constant 7 : index
    %c0_85 = arith.constant 0 : index
    %80 = vector.load %arg27[%c7_84, %c0_85] : memref<36x128xbf16, #tpu.memory_space<vmem>>, vector<22x128xbf16>
    tpu.vector_store %arg27[%c7_84, %c0_85], %79 {strides = array<i32>} : memref<36x128xbf16, #tpu.memory_space<vmem>>, vector<22x128xbf16>,
    %c0_86 = arith.constant 0 : index
    %c0_87 = arith.constant 0 : index
    %81 = vector.load %arg27[%c0_86, %c0_87] : memref<36x128xbf16, #tpu.memory_space<vmem>>, vector<22x128xbf16>
    %c1_88 = arith.constant 1 : index
    %c0_89 = arith.constant 0 : index
    %82 = vector.load %arg27[%c1_88, %c0_89] : memref<36x128xbf16, #tpu.memory_space<vmem>>, vector<22x128xbf16>
    %c2_90 = arith.constant 2 : index
    %c0_91 = arith.constant 0 : index
    %83 = vector.load %arg27[%c2_90, %c0_91] : memref<36x128xbf16, #tpu.memory_space<vmem>>, vector<22x128xbf16>
    %c6_92 = arith.constant 6 : index
    %c0_93 = arith.constant 0 : index
    %84 = vector.load %arg27[%c6_92, %c0_93] : memref<36x128xbf16, #tpu.memory_space<vmem>>, vector<22x128xbf16>
    %c7_94 = arith.constant 7 : index
    %c0_95 = arith.constant 0 : index
    %85 = vector.load %arg27[%c7_94, %c0_95] : memref<36x128xbf16, #tpu.memory_space<vmem>>, vector<22x128xbf16>
    %c8_96 = arith.constant 8 : index
    %c0_97 = arith.constant 0 : index
    %86 = vector.load %arg27[%c8_96, %c0_97] : memref<36x128xbf16, #tpu.memory_space<vmem>>, vector<22x128xbf16>
    %c12_98 = arith.constant 12 : index
    %c0_99 = arith.constant 0 : index
    %87 = vector.load %arg27[%c12_98, %c0_99] : memref<36x128xbf16, #tpu.memory_space<vmem>>, vector<22x128xbf16>
    %c13_100 = arith.constant 13 : index
    %c0_101 = arith.constant 0 : index
    %88 = vector.load %arg27[%c13_100, %c0_101] : memref<36x128xbf16, #tpu.memory_space<vmem>>, vector<22x128xbf16>
    %c14_102 = arith.constant 14 : index
    %c0_103 = arith.constant 0 : index
    %89 = vector.load %arg27[%c14_102, %c0_103] : memref<36x128xbf16, #tpu.memory_space<vmem>>, vector<22x128xbf16>
    %90 = tpu.concatenate %81, %82, %83, %84, %85, %86, %87, %88, %89 in 1 : vector<22x128xbf16>, vector<22x128xbf16>, vector<22x128xbf16>, vector<22x128xbf16>, vector<22x128xbf16>, vector<22x128xbf16>, vector<22x128xbf16>, vector<22x128xbf16>, vector<22x128xbf16> -> vector<22x1152xbf16>
    %c0_104 = arith.constant 0 : index
    %c0_105 = arith.constant 0 : index
    %91 = vector.load %arg10[%c0_104, %c0_105] : memref<1152x128xbf16, #tpu.memory_space<vmem>>, vector<1152x128xbf16>
    %cst_106 = arith.constant dense<0.000000e+00> : vector<22x128xf32>
    %92 = tpu.matmul %90, %91, %cst_106 {dimension_numbers = #tpu.dot_dimension_numbers<[1], [0], [0], [1], [0, 0, 1, 1], [], []>} : vector<22x1152xbf16>, vector<1152x128xbf16>, vector<22x128xf32> -> vector<22x128xf32>
    %c0_107 = arith.constant 0 : index
    %c0_108 = arith.constant 0 : index
    %93 = vector.load %arg11[%c0_107, %c0_108] : memref<1x128xf32, #tpu.memory_space<vmem>>, vector<1x128xf32>
    %94 = vector.broadcast %93 : vector<1x128xf32> to vector<22x128xf32>
    %95 = arith.addf %92, %94 : vector<22x128xf32>
    %cst_109 = arith.constant 0.000000e+00 : f32
    %96 = vector.broadcast %cst_109 : f32 to vector<22x128xf32>
    %97 = arith.maximumf %95, %96 : vector<22x128xf32>
    %c7_110 = arith.constant 7 : index
    %c0_111 = arith.constant 0 : index
    %98 = vector.load %arg26[%c7_110, %c0_111] : memref<36x128xbf16, #tpu.memory_space<vmem>>, vector<22x128xbf16>
    %99 = arith.extf %98 : vector<22x128xbf16> to vector<22x128xf32>
    %100 = arith.addf %99, %97 : vector<22x128xf32>
    %101 = vector.broadcast %0 : vector<22x1xf32> to vector<22x128xf32>
    %102 = arith.mulf %100, %101 : vector<22x128xf32>
    %103 = vector.extract_strided_slice %102 {offsets = [0, 0], sizes = [4, 128], strides = [1, 1]} : vector<22x128xf32> to vector<4x128xf32>
    %104 = vector.extract_strided_slice %102 {offsets = [6, 0], sizes = [4, 128], strides = [1, 1]} : vector<22x128xf32> to vector<4x128xf32>
    %105 = vector.extract_strided_slice %102 {offsets = [12, 0], sizes = [4, 128], strides = [1, 1]} : vector<22x128xf32> to vector<4x128xf32>
    %106 = vector.extract_strided_slice %102 {offsets = [18, 0], sizes = [4, 128], strides = [1, 1]} : vector<22x128xf32> to vector<4x128xf32>
    %107 = tpu.concatenate %103, %104, %105, %106 in 0 : vector<4x128xf32>, vector<4x128xf32>, vector<4x128xf32>, vector<4x128xf32> -> vector<16x128xf32>
    %108 = arith.truncf %107 : vector<16x128xf32> to vector<16x128xbf16>
    %c0_112 = arith.constant 0 : index
    %c0_113 = arith.constant 0 : index
    %109 = vector.load %arg12[%c0_112, %c0_113] : memref<128x16xbf16, #tpu.memory_space<vmem>>, vector<128x16xbf16>
    %cst_114 = arith.constant dense<0.000000e+00> : vector<16x16xf32>
    %110 = tpu.matmul %108, %109, %cst_114 {dimension_numbers = #tpu.dot_dimension_numbers<[1], [0], [0], [1], [0, 0, 1, 1], [], []>} : vector<16x128xbf16>, vector<128x16xbf16>, vector<16x16xf32> -> vector<16x16xf32>
    %c0_115 = arith.constant 0 : index
    %c0_116 = arith.constant 0 : index
    %111 = vector.load %arg13[%c0_115, %c0_116] : memref<1x16xf32, #tpu.memory_space<vmem>>, vector<1x16xf32>
    %112 = vector.broadcast %111 : vector<1x16xf32> to vector<16x16xf32>
    %113 = arith.addf %110, %112 : vector<16x16xf32>
    %c0_117 = arith.constant 0 : index
    %c0_118 = arith.constant 0 : index
    %c0_119 = arith.constant 0 : index
    %114 = vector.load %arg24[%c0_117, %c0_118, %c0_119] : memref<1x16x16xf32, #tpu.memory_space<vmem>>, vector<1x16x16xf32>
    %115 = vector.shape_cast %114 : vector<1x16x16xf32> to vector<16x16xf32>
    %116 = vector.shape_cast %113 : vector<16x16xf32> to vector<1x16x16xf32>
    tpu.vector_store %arg24[%c0_117, %c0_118, %c0_119], %116 {strides = array<i32>} : memref<1x16x16xf32, #tpu.memory_space<vmem>>, vector<1x16x16xf32>,
    %117 = vector.extract_strided_slice %113 {offsets = [0, 0], sizes = [16, 8], strides = [1, 1]} : vector<16x16xf32> to vector<16x8xf32>
    %118 = vector.extract_strided_slice %113 {offsets = [0, 8], sizes = [16, 8], strides = [1, 1]} : vector<16x16xf32> to vector<16x8xf32>
    %c0_120 = arith.constant 0 : index
    %c0_121 = arith.constant 0 : index
    %c0_122 = arith.constant 0 : index
    %119 = vector.load %arg3[%c0_120, %c0_121, %c0_122] : memref<1x16x8xf32, #tpu.memory_space<vmem>>, vector<1x16x8xf32>
    %120 = vector.shape_cast %119 : vector<1x16x8xf32> to vector<16x8xf32>
    %cst_123 = arith.constant 5.000000e-01 : f32
    %121 = vector.broadcast %cst_123 : f32 to vector<16x8xf32>
    %122 = arith.mulf %121, %118 : vector<16x8xf32>
    %123 = math.exp %122 : vector<16x8xf32>
    %124 = arith.mulf %120, %123 : vector<16x8xf32>
    %125 = arith.addf %117, %124 : vector<16x8xf32>
    %126 = arith.truncf %125 : vector<16x8xf32> to vector<16x8xbf16>
    %c0_124 = arith.constant 0 : index
    %c0_125 = arith.constant 0 : index
    %127 = vector.load %arg14[%c0_124, %c0_125] : memref<8x128xbf16, #tpu.memory_space<vmem>>, vector<8x128xbf16>
    %cst_126 = arith.constant dense<0.000000e+00> : vector<16x128xf32>
    %128 = tpu.matmul %126, %127, %cst_126 {dimension_numbers = #tpu.dot_dimension_numbers<[1], [0], [0], [1], [0, 0, 1, 1], [], []>} : vector<16x8xbf16>, vector<8x128xbf16>, vector<16x128xf32> -> vector<16x128xf32>
    %c0_127 = arith.constant 0 : index
    %c0_128 = arith.constant 0 : index
    %c0_129 = arith.constant 0 : index
    %129 = vector.load %arg15[%c0_127, %c0_128, %c0_129] : memref<1x1x128xf32, #tpu.memory_space<vmem>>, vector<1x1x128xf32>
    %130 = vector.shape_cast %129 : vector<1x1x128xf32> to vector<1x128xf32>
    %131 = vector.broadcast %130 : vector<1x128xf32> to vector<16x128xf32>
    %132 = arith.addf %128, %131 : vector<16x128xf32>
    %cst_130 = arith.constant 0.000000e+00 : f32
    %133 = vector.broadcast %cst_130 : f32 to vector<16x128xf32>
    %134 = arith.maximumf %132, %133 : vector<16x128xf32>
    %cst_131 = arith.constant 0.000000e+00 : f32
    %135 = vector.broadcast %cst_131 : f32 to vector<2x128xf32>
    %136 = vector.extract_strided_slice %134 {offsets = [0, 0], sizes = [4, 128], strides = [1, 1]} : vector<16x128xf32> to vector<4x128xf32>
    %137 = vector.extract_strided_slice %134 {offsets = [4, 0], sizes = [4, 128], strides = [1, 1]} : vector<16x128xf32> to vector<4x128xf32>
    %138 = vector.extract_strided_slice %134 {offsets = [8, 0], sizes = [4, 128], strides = [1, 1]} : vector<16x128xf32> to vector<4x128xf32>
    %139 = vector.extract_strided_slice %134 {offsets = [12, 0], sizes = [4, 128], strides = [1, 1]} : vector<16x128xf32> to vector<4x128xf32>
    %140 = tpu.concatenate %136, %135, %137, %135, %138, %135, %139 in 0 : vector<4x128xf32>, vector<2x128xf32>, vector<4x128xf32>, vector<2x128xf32>, vector<4x128xf32>, vector<2x128xf32>, vector<4x128xf32> -> vector<22x128xf32>
    %141 = arith.truncf %140 : vector<22x128xf32> to vector<22x128xbf16>
    %c7_132 = arith.constant 7 : index
    %c0_133 = arith.constant 0 : index
    %142 = vector.load %arg26[%c7_132, %c0_133] : memref<36x128xbf16, #tpu.memory_space<vmem>>, vector<22x128xbf16>
    tpu.vector_store %arg26[%c7_132, %c0_133], %141 {strides = array<i32>} : memref<36x128xbf16, #tpu.memory_space<vmem>>, vector<22x128xbf16>,
    %c0_134 = arith.constant 0 : index
    %c0_135 = arith.constant 0 : index
    %143 = vector.load %arg26[%c0_134, %c0_135] : memref<36x128xbf16, #tpu.memory_space<vmem>>, vector<22x128xbf16>
    %c1_136 = arith.constant 1 : index
    %c0_137 = arith.constant 0 : index
    %144 = vector.load %arg26[%c1_136, %c0_137] : memref<36x128xbf16, #tpu.memory_space<vmem>>, vector<22x128xbf16>
    %c2_138 = arith.constant 2 : index
    %c0_139 = arith.constant 0 : index
    %145 = vector.load %arg26[%c2_138, %c0_139] : memref<36x128xbf16, #tpu.memory_space<vmem>>, vector<22x128xbf16>
    %c6_140 = arith.constant 6 : index
    %c0_141 = arith.constant 0 : index
    %146 = vector.load %arg26[%c6_140, %c0_141] : memref<36x128xbf16, #tpu.memory_space<vmem>>, vector<22x128xbf16>
    %c7_142 = arith.constant 7 : index
    %c0_143 = arith.constant 0 : index
    %147 = vector.load %arg26[%c7_142, %c0_143] : memref<36x128xbf16, #tpu.memory_space<vmem>>, vector<22x128xbf16>
    %c8_144 = arith.constant 8 : index
    %c0_145 = arith.constant 0 : index
    %148 = vector.load %arg26[%c8_144, %c0_145] : memref<36x128xbf16, #tpu.memory_space<vmem>>, vector<22x128xbf16>
    %c12_146 = arith.constant 12 : index
    %c0_147 = arith.constant 0 : index
    %149 = vector.load %arg26[%c12_146, %c0_147] : memref<36x128xbf16, #tpu.memory_space<vmem>>, vector<22x128xbf16>
    %c13_148 = arith.constant 13 : index
    %c0_149 = arith.constant 0 : index
    %150 = vector.load %arg26[%c13_148, %c0_149] : memref<36x128xbf16, #tpu.memory_space<vmem>>, vector<22x128xbf16>
    %c14_150 = arith.constant 14 : index
    %c0_151 = arith.constant 0 : index
    %151 = vector.load %arg26[%c14_150, %c0_151] : memref<36x128xbf16, #tpu.memory_space<vmem>>, vector<22x128xbf16>
    %152 = tpu.concatenate %143, %144, %145, %146, %147, %148, %149, %150, %151 in 1 : vector<22x128xbf16>, vector<22x128xbf16>, vector<22x128xbf16>, vector<22x128xbf16>, vector<22x128xbf16>, vector<22x128xbf16>, vector<22x128xbf16>, vector<22x128xbf16>, vector<22x128xbf16> -> vector<22x1152xbf16>
    %c0_152 = arith.constant 0 : index
    %c0_153 = arith.constant 0 : index
    %153 = vector.load %arg16[%c0_152, %c0_153] : memref<1152x128xbf16, #tpu.memory_space<vmem>>, vector<1152x128xbf16>
    %cst_154 = arith.constant dense<0.000000e+00> : vector<22x128xf32>
    %154 = tpu.matmul %152, %153, %cst_154 {dimension_numbers = #tpu.dot_dimension_numbers<[1], [0], [0], [1], [0, 0, 1, 1], [], []>} : vector<22x1152xbf16>, vector<1152x128xbf16>, vector<22x128xf32> -> vector<22x128xf32>
    %c0_155 = arith.constant 0 : index
    %c0_156 = arith.constant 0 : index
    %155 = vector.load %arg17[%c0_155, %c0_156] : memref<1x128xf32, #tpu.memory_space<vmem>>, vector<1x128xf32>
    %156 = vector.broadcast %155 : vector<1x128xf32> to vector<22x128xf32>
    %157 = arith.addf %154, %156 : vector<22x128xf32>
    %cst_157 = arith.constant 0.000000e+00 : f32
    %158 = vector.broadcast %cst_157 : f32 to vector<22x128xf32>
    %159 = arith.maximumf %157, %158 : vector<22x128xf32>
    %160 = vector.broadcast %0 : vector<22x1xf32> to vector<22x128xf32>
    %161 = arith.mulf %159, %160 : vector<22x128xf32>
    %162 = arith.truncf %161 : vector<22x128xf32> to vector<22x128xbf16>
    %c7_158 = arith.constant 7 : index
    %c0_159 = arith.constant 0 : index
    %163 = vector.load %arg27[%c7_158, %c0_159] : memref<36x128xbf16, #tpu.memory_space<vmem>>, vector<22x128xbf16>
    tpu.vector_store %arg27[%c7_158, %c0_159], %162 {strides = array<i32>} : memref<36x128xbf16, #tpu.memory_space<vmem>>, vector<22x128xbf16>,
    %c0_160 = arith.constant 0 : index
    %c0_161 = arith.constant 0 : index
    %164 = vector.load %arg27[%c0_160, %c0_161] : memref<36x128xbf16, #tpu.memory_space<vmem>>, vector<22x128xbf16>
    %c1_162 = arith.constant 1 : index
    %c0_163 = arith.constant 0 : index
    %165 = vector.load %arg27[%c1_162, %c0_163] : memref<36x128xbf16, #tpu.memory_space<vmem>>, vector<22x128xbf16>
    %c2_164 = arith.constant 2 : index
    %c0_165 = arith.constant 0 : index
    %166 = vector.load %arg27[%c2_164, %c0_165] : memref<36x128xbf16, #tpu.memory_space<vmem>>, vector<22x128xbf16>
    %c6_166 = arith.constant 6 : index
    %c0_167 = arith.constant 0 : index
    %167 = vector.load %arg27[%c6_166, %c0_167] : memref<36x128xbf16, #tpu.memory_space<vmem>>, vector<22x128xbf16>
    %c7_168 = arith.constant 7 : index
    %c0_169 = arith.constant 0 : index
    %168 = vector.load %arg27[%c7_168, %c0_169] : memref<36x128xbf16, #tpu.memory_space<vmem>>, vector<22x128xbf16>
    %c8_170 = arith.constant 8 : index
    %c0_171 = arith.constant 0 : index
    %169 = vector.load %arg27[%c8_170, %c0_171] : memref<36x128xbf16, #tpu.memory_space<vmem>>, vector<22x128xbf16>
    %c12_172 = arith.constant 12 : index
    %c0_173 = arith.constant 0 : index
    %170 = vector.load %arg27[%c12_172, %c0_173] : memref<36x128xbf16, #tpu.memory_space<vmem>>, vector<22x128xbf16>
    %c13_174 = arith.constant 13 : index
    %c0_175 = arith.constant 0 : index
    %171 = vector.load %arg27[%c13_174, %c0_175] : memref<36x128xbf16, #tpu.memory_space<vmem>>, vector<22x128xbf16>
    %c14_176 = arith.constant 14 : index
    %c0_177 = arith.constant 0 : index
    %172 = vector.load %arg27[%c14_176, %c0_177] : memref<36x128xbf16, #tpu.memory_space<vmem>>, vector<22x128xbf16>
    %173 = tpu.concatenate %164, %165, %166, %167, %168, %169, %170, %171, %172 in 1 : vector<22x128xbf16>, vector<22x128xbf16>, vector<22x128xbf16>, vector<22x128xbf16>, vector<22x128xbf16>, vector<22x128xbf16>, vector<22x128xbf16>, vector<22x128xbf16>, vector<22x128xbf16> -> vector<22x1152xbf16>
    %c0_178 = arith.constant 0 : index
    %c0_179 = arith.constant 0 : index
    %174 = vector.load %arg18[%c0_178, %c0_179] : memref<1152x128xbf16, #tpu.memory_space<vmem>>, vector<1152x128xbf16>
    %cst_180 = arith.constant dense<0.000000e+00> : vector<22x128xf32>
    %175 = tpu.matmul %173, %174, %cst_180 {dimension_numbers = #tpu.dot_dimension_numbers<[1], [0], [0], [1], [0, 0, 1, 1], [], []>} : vector<22x1152xbf16>, vector<1152x128xbf16>, vector<22x128xf32> -> vector<22x128xf32>
    %c0_181 = arith.constant 0 : index
    %c0_182 = arith.constant 0 : index
    %176 = vector.load %arg19[%c0_181, %c0_182] : memref<1x128xf32, #tpu.memory_space<vmem>>, vector<1x128xf32>
    %177 = vector.broadcast %176 : vector<1x128xf32> to vector<22x128xf32>
    %178 = arith.addf %175, %177 : vector<22x128xf32>
    %cst_183 = arith.constant 0.000000e+00 : f32
    %179 = vector.broadcast %cst_183 : f32 to vector<22x128xf32>
    %180 = arith.maximumf %178, %179 : vector<22x128xf32>
    %c7_184 = arith.constant 7 : index
    %c0_185 = arith.constant 0 : index
    %181 = vector.load %arg26[%c7_184, %c0_185] : memref<36x128xbf16, #tpu.memory_space<vmem>>, vector<22x128xbf16>
    %182 = arith.extf %181 : vector<22x128xbf16> to vector<22x128xf32>
    %183 = arith.addf %182, %180 : vector<22x128xf32>
    %184 = vector.broadcast %0 : vector<22x1xf32> to vector<22x128xf32>
    %185 = arith.mulf %183, %184 : vector<22x128xf32>
    %186 = arith.truncf %185 : vector<22x128xf32> to vector<22x128xbf16>
    %c7_186 = arith.constant 7 : index
    %c0_187 = arith.constant 0 : index
    %187 = vector.load %arg26[%c7_186, %c0_187] : memref<36x128xbf16, #tpu.memory_space<vmem>>, vector<22x128xbf16>
    tpu.vector_store %arg26[%c7_186, %c0_187], %186 {strides = array<i32>} : memref<36x128xbf16, #tpu.memory_space<vmem>>, vector<22x128xbf16>,
    %c0_188 = arith.constant 0 : index
    %c0_189 = arith.constant 0 : index
    %188 = vector.load %arg26[%c0_188, %c0_189] : memref<36x128xbf16, #tpu.memory_space<vmem>>, vector<22x128xbf16>
    %c1_190 = arith.constant 1 : index
    %c0_191 = arith.constant 0 : index
    %189 = vector.load %arg26[%c1_190, %c0_191] : memref<36x128xbf16, #tpu.memory_space<vmem>>, vector<22x128xbf16>
    %c2_192 = arith.constant 2 : index
    %c0_193 = arith.constant 0 : index
    %190 = vector.load %arg26[%c2_192, %c0_193] : memref<36x128xbf16, #tpu.memory_space<vmem>>, vector<22x128xbf16>
    %c6_194 = arith.constant 6 : index
    %c0_195 = arith.constant 0 : index
    %191 = vector.load %arg26[%c6_194, %c0_195] : memref<36x128xbf16, #tpu.memory_space<vmem>>, vector<22x128xbf16>
    %c7_196 = arith.constant 7 : index
    %c0_197 = arith.constant 0 : index
    %192 = vector.load %arg26[%c7_196, %c0_197] : memref<36x128xbf16, #tpu.memory_space<vmem>>, vector<22x128xbf16>
    %c8_198 = arith.constant 8 : index
    %c0_199 = arith.constant 0 : index
    %193 = vector.load %arg26[%c8_198, %c0_199] : memref<36x128xbf16, #tpu.memory_space<vmem>>, vector<22x128xbf16>
    %c12_200 = arith.constant 12 : index
    %c0_201 = arith.constant 0 : index
    %194 = vector.load %arg26[%c12_200, %c0_201] : memref<36x128xbf16, #tpu.memory_space<vmem>>, vector<22x128xbf16>
    %c13_202 = arith.constant 13 : index
    %c0_203 = arith.constant 0 : index
    %195 = vector.load %arg26[%c13_202, %c0_203] : memref<36x128xbf16, #tpu.memory_space<vmem>>, vector<22x128xbf16>
    %c14_204 = arith.constant 14 : index
    %c0_205 = arith.constant 0 : index
    %196 = vector.load %arg26[%c14_204, %c0_205] : memref<36x128xbf16, #tpu.memory_space<vmem>>, vector<22x128xbf16>
    %197 = tpu.concatenate %188, %189, %190, %191, %192, %193, %194, %195, %196 in 1 : vector<22x128xbf16>, vector<22x128xbf16>, vector<22x128xbf16>, vector<22x128xbf16>, vector<22x128xbf16>, vector<22x128xbf16>, vector<22x128xbf16>, vector<22x128xbf16>, vector<22x128xbf16> -> vector<22x1152xbf16>
    %c0_206 = arith.constant 0 : index
    %c0_207 = arith.constant 0 : index
    %198 = vector.load %arg20[%c0_206, %c0_207] : memref<1152x128xbf16, #tpu.memory_space<vmem>>, vector<1152x128xbf16>
    %cst_208 = arith.constant dense<0.000000e+00> : vector<22x128xf32>
    %199 = tpu.matmul %197, %198, %cst_208 {dimension_numbers = #tpu.dot_dimension_numbers<[1], [0], [0], [1], [0, 0, 1, 1], [], []>} : vector<22x1152xbf16>, vector<1152x128xbf16>, vector<22x128xf32> -> vector<22x128xf32>
    %c0_209 = arith.constant 0 : index
    %c0_210 = arith.constant 0 : index
    %200 = vector.load %arg21[%c0_209, %c0_210] : memref<1x128xf32, #tpu.memory_space<vmem>>, vector<1x128xf32>
    %201 = vector.broadcast %200 : vector<1x128xf32> to vector<22x128xf32>
    %202 = arith.addf %199, %201 : vector<22x128xf32>
    %cst_211 = arith.constant 0.000000e+00 : f32
    %203 = vector.broadcast %cst_211 : f32 to vector<22x128xf32>
    %204 = arith.maximumf %202, %203 : vector<22x128xf32>
    %205 = vector.broadcast %0 : vector<22x1xf32> to vector<22x128xf32>
    %206 = arith.mulf %204, %205 : vector<22x128xf32>
    %207 = arith.truncf %206 : vector<22x128xf32> to vector<22x128xbf16>
    %c7_212 = arith.constant 7 : index
    %c0_213 = arith.constant 0 : index
    %208 = vector.load %arg27[%c7_212, %c0_213] : memref<36x128xbf16, #tpu.memory_space<vmem>>, vector<22x128xbf16>
    tpu.vector_store %arg27[%c7_212, %c0_213], %207 {strides = array<i32>} : memref<36x128xbf16, #tpu.memory_space<vmem>>, vector<22x128xbf16>,
    %c0_214 = arith.constant 0 : index
    %c0_215 = arith.constant 0 : index
    %209 = vector.load %arg27[%c0_214, %c0_215] : memref<36x128xbf16, #tpu.memory_space<vmem>>, vector<22x128xbf16>
    %c1_216 = arith.constant 1 : index
    %c0_217 = arith.constant 0 : index
    %210 = vector.load %arg27[%c1_216, %c0_217] : memref<36x128xbf16, #tpu.memory_space<vmem>>, vector<22x128xbf16>
    %c2_218 = arith.constant 2 : index
    %c0_219 = arith.constant 0 : index
    %211 = vector.load %arg27[%c2_218, %c0_219] : memref<36x128xbf16, #tpu.memory_space<vmem>>, vector<22x128xbf16>
    %c6_220 = arith.constant 6 : index
    %c0_221 = arith.constant 0 : index
    %212 = vector.load %arg27[%c6_220, %c0_221] : memref<36x128xbf16, #tpu.memory_space<vmem>>, vector<22x128xbf16>
    %c7_222 = arith.constant 7 : index
    %c0_223 = arith.constant 0 : index
    %213 = vector.load %arg27[%c7_222, %c0_223] : memref<36x128xbf16, #tpu.memory_space<vmem>>, vector<22x128xbf16>
    %c8_224 = arith.constant 8 : index
    %c0_225 = arith.constant 0 : index
    %214 = vector.load %arg27[%c8_224, %c0_225] : memref<36x128xbf16, #tpu.memory_space<vmem>>, vector<22x128xbf16>
    %c12_226 = arith.constant 12 : index
    %c0_227 = arith.constant 0 : index
    %215 = vector.load %arg27[%c12_226, %c0_227] : memref<36x128xbf16, #tpu.memory_space<vmem>>, vector<22x128xbf16>
    %c13_228 = arith.constant 13 : index
    %c0_229 = arith.constant 0 : index
    %216 = vector.load %arg27[%c13_228, %c0_229] : memref<36x128xbf16, #tpu.memory_space<vmem>>, vector<22x128xbf16>
    %c14_230 = arith.constant 14 : index
    %c0_231 = arith.constant 0 : index
    %217 = vector.load %arg27[%c14_230, %c0_231] : memref<36x128xbf16, #tpu.memory_space<vmem>>, vector<22x128xbf16>
    %218 = tpu.concatenate %209, %210, %211, %212, %213, %214, %215, %216, %217 in 1 : vector<22x128xbf16>, vector<22x128xbf16>, vector<22x128xbf16>, vector<22x128xbf16>, vector<22x128xbf16>, vector<22x128xbf16>, vector<22x128xbf16>, vector<22x128xbf16>, vector<22x128xbf16> -> vector<22x1152xbf16>
    %c0_232 = arith.constant 0 : index
    %c0_233 = arith.constant 0 : index
    %219 = vector.load %arg22[%c0_232, %c0_233] : memref<1152x128xbf16, #tpu.memory_space<vmem>>, vector<1152x128xbf16>
    %cst_234 = arith.constant dense<0.000000e+00> : vector<22x128xf32>
    %220 = tpu.matmul %218, %219, %cst_234 {dimension_numbers = #tpu.dot_dimension_numbers<[1], [0], [0], [1], [0, 0, 1, 1], [], []>} : vector<22x1152xbf16>, vector<1152x128xbf16>, vector<22x128xf32> -> vector<22x128xf32>
    %c0_235 = arith.constant 0 : index
    %c0_236 = arith.constant 0 : index
    %221 = vector.load %arg23[%c0_235, %c0_236] : memref<1x128xf32, #tpu.memory_space<vmem>>, vector<1x128xf32>
    %222 = vector.broadcast %221 : vector<1x128xf32> to vector<22x128xf32>
    %223 = arith.addf %220, %222 : vector<22x128xf32>
    %cst_237 = arith.constant 0.000000e+00 : f32
    %224 = vector.broadcast %cst_237 : f32 to vector<22x128xf32>
    %225 = arith.maximumf %223, %224 : vector<22x128xf32>
    %c7_238 = arith.constant 7 : index
    %c0_239 = arith.constant 0 : index
    %226 = vector.load %arg26[%c7_238, %c0_239] : memref<36x128xbf16, #tpu.memory_space<vmem>>, vector<22x128xbf16>
    %227 = arith.extf %226 : vector<22x128xbf16> to vector<22x128xf32>
    %228 = arith.addf %227, %225 : vector<22x128xf32>
    %229 = vector.broadcast %0 : vector<22x1xf32> to vector<22x128xf32>
    %230 = arith.mulf %228, %229 : vector<22x128xf32>
    %231 = vector.extract_strided_slice %230 {offsets = [0, 0], sizes = [4, 128], strides = [1, 1]} : vector<22x128xf32> to vector<4x128xf32>
    %232 = vector.extract_strided_slice %230 {offsets = [6, 0], sizes = [4, 128], strides = [1, 1]} : vector<22x128xf32> to vector<4x128xf32>
    %233 = vector.extract_strided_slice %230 {offsets = [12, 0], sizes = [4, 128], strides = [1, 1]} : vector<22x128xf32> to vector<4x128xf32>
    %234 = vector.extract_strided_slice %230 {offsets = [18, 0], sizes = [4, 128], strides = [1, 1]} : vector<22x128xf32> to vector<4x128xf32>
    %235 = tpu.concatenate %231, %232, %233, %234 in 0 : vector<4x128xf32>, vector<4x128xf32>, vector<4x128xf32>, vector<4x128xf32> -> vector<16x128xf32>
    %236 = arith.truncf %235 : vector<16x128xf32> to vector<16x128xbf16>
    %c0_240 = arith.constant 0 : index
    %c0_241 = arith.constant 0 : index
    %c0_242 = arith.constant 0 : index
    %237 = vector.load %arg25[%c0_240, %c0_241, %c0_242] : memref<1x16x128xbf16, #tpu.memory_space<vmem>>, vector<1x16x128xbf16>
    %238 = vector.shape_cast %237 : vector<1x16x128xbf16> to vector<16x128xbf16>
    %239 = vector.shape_cast %236 : vector<16x128xbf16> to vector<1x16x128xbf16>
    tpu.vector_store %arg25[%c0_240, %c0_241, %c0_242], %239 {strides = array<i32>} : memref<1x16x128xbf16, #tpu.memory_space<vmem>>, vector<1x16x128xbf16>,
    return
  }
  func.func @transform_0(%arg0: i32) -> (i32, i32, i32) {
    %c0_i32 = arith.constant 0 : i32
    %c0_i32_0 = arith.constant 0 : i32
    %c0_i32_1 = arith.constant 0 : i32
    return %arg0, %c0_i32, %c0_i32_0 : i32, i32, i32
  }
  func.func @transform_1(%arg0: i32) -> (i32, i32) {
    %c0_i32 = arith.constant 0 : i32
    %c0_i32_0 = arith.constant 0 : i32
    %c0_i32_1 = arith.constant 0 : i32
    return %c0_i32, %c0_i32_0 : i32, i32
  }
  func.func @transform_2(%arg0: i32) -> (i32, i32, i32) {
    %c0_i32 = arith.constant 0 : i32
    %c0_i32_0 = arith.constant 0 : i32
    %c0_i32_1 = arith.constant 0 : i32
    return %arg0, %c0_i32, %c0_i32_0 : i32, i32, i32
  }
  func.func @transform_3(%arg0: i32) -> (i32, i32) {
    %c0_i32 = arith.constant 0 : i32
    %c0_i32_0 = arith.constant 0 : i32
    %c0_i32_1 = arith.constant 0 : i32
    return %c0_i32, %c0_i32_0 : i32, i32
  }
  func.func @transform_4(%arg0: i32) -> (i32, i32) {
    %c0_i32 = arith.constant 0 : i32
    %c0_i32_0 = arith.constant 0 : i32
    %c0_i32_1 = arith.constant 0 : i32
    return %c0_i32, %c0_i32_0 : i32, i32
  }
  func.func @transform_5(%arg0: i32) -> (i32, i32) {
    %c0_i32 = arith.constant 0 : i32
    %c0_i32_0 = arith.constant 0 : i32
    %c0_i32_1 = arith.constant 0 : i32
    return %c0_i32, %c0_i32_0 : i32, i32
  }
  func.func @transform_6(%arg0: i32) -> (i32, i32) {
    %c0_i32 = arith.constant 0 : i32
    %c0_i32_0 = arith.constant 0 : i32
    %c0_i32_1 = arith.constant 0 : i32
    return %c0_i32, %c0_i32_0 : i32, i32
  }
  func.func @transform_7(%arg0: i32) -> (i32, i32) {
    %c0_i32 = arith.constant 0 : i32
    %c0_i32_0 = arith.constant 0 : i32
    %c0_i32_1 = arith.constant 0 : i32
    return %c0_i32, %c0_i32_0 : i32, i32
  }
  func.func @transform_8(%arg0: i32) -> (i32, i32) {
    %c0_i32 = arith.constant 0 : i32
    %c0_i32_0 = arith.constant 0 : i32
    %c0_i32_1 = arith.constant 0 : i32
    return %c0_i32, %c0_i32_0 : i32, i32
  }
  func.func @transform_9(%arg0: i32) -> (i32, i32) {
    %c0_i32 = arith.constant 0 : i32
    %c0_i32_0 = arith.constant 0 : i32
    %c0_i32_1 = arith.constant 0 : i32
    return %c0_i32, %c0_i32_0 : i32, i32
  }
  func.func @transform_10(%arg0: i32) -> (i32, i32) {
    %c0_i32 = arith.constant 0 : i32
    %c0_i32_0 = arith.constant 0 : i32
    %c0_i32_1 = arith.constant 0 : i32
    return %c0_i32, %c0_i32_0 : i32, i32
  }
  func.func @transform_11(%arg0: i32) -> (i32, i32) {
    %c0_i32 = arith.constant 0 : i32
    %c0_i32_0 = arith.constant 0 : i32
    %c0_i32_1 = arith.constant 0 : i32
    return %c0_i32, %c0_i32_0 : i32, i32
  }
  func.func @transform_12(%arg0: i32) -> (i32, i32) {
    %c0_i32 = arith.constant 0 : i32
    %c0_i32_0 = arith.constant 0 : i32
    %c0_i32_1 = arith.constant 0 : i32
    return %c0_i32, %c0_i32_0 : i32, i32
  }
  func.func @transform_13(%arg0: i32) -> (i32, i32) {
    %c0_i32 = arith.constant 0 : i32
    %c0_i32_0 = arith.constant 0 : i32
    %c0_i32_1 = arith.constant 0 : i32
    return %c0_i32, %c0_i32_0 : i32, i32
  }
  func.func @transform_14(%arg0: i32) -> (i32, i32, i32) {
    %c0_i32 = arith.constant 0 : i32
    %c0_i32_0 = arith.constant 0 : i32
    %c0_i32_1 = arith.constant 0 : i32
    return %arg0, %c0_i32, %c0_i32_0 : i32, i32, i32
  }
  func.func @transform_15(%arg0: i32) -> (i32, i32) {
    %c0_i32 = arith.constant 0 : i32
    %c0_i32_0 = arith.constant 0 : i32
    %c0_i32_1 = arith.constant 0 : i32
    return %c0_i32, %c0_i32_0 : i32, i32
  }
  func.func @transform_16(%arg0: i32) -> (i32, i32) {
    %c0_i32 = arith.constant 0 : i32
    %c0_i32_0 = arith.constant 0 : i32
    %c0_i32_1 = arith.constant 0 : i32
    return %c0_i32, %c0_i32_0 : i32, i32
  }
  func.func @transform_17(%arg0: i32) -> (i32, i32) {
    %c0_i32 = arith.constant 0 : i32
    %c0_i32_0 = arith.constant 0 : i32
    %c0_i32_1 = arith.constant 0 : i32
    return %c0_i32, %c0_i32_0 : i32, i32
  }
  func.func @transform_18(%arg0: i32) -> (i32, i32) {
    %c0_i32 = arith.constant 0 : i32
    %c0_i32_0 = arith.constant 0 : i32
    %c0_i32_1 = arith.constant 0 : i32
    return %c0_i32, %c0_i32_0 : i32, i32
  }
  func.func @transform_19(%arg0: i32) -> (i32, i32) {
    %c0_i32 = arith.constant 0 : i32
    %c0_i32_0 = arith.constant 0 : i32
    %c0_i32_1 = arith.constant 0 : i32
    return %c0_i32, %c0_i32_0 : i32, i32
  }
  func.func @transform_20(%arg0: i32) -> (i32, i32) {
    %c0_i32 = arith.constant 0 : i32
    %c0_i32_0 = arith.constant 0 : i32
    %c0_i32_1 = arith.constant 0 : i32
    return %c0_i32, %c0_i32_0 : i32, i32
  }
  func.func @transform_21(%arg0: i32) -> (i32, i32) {
    %c0_i32 = arith.constant 0 : i32
    %c0_i32_0 = arith.constant 0 : i32
    %c0_i32_1 = arith.constant 0 : i32
    return %c0_i32, %c0_i32_0 : i32, i32
  }
  func.func @transform_22(%arg0: i32) -> (i32, i32) {
    %c0_i32 = arith.constant 0 : i32
    %c0_i32_0 = arith.constant 0 : i32
    %c0_i32_1 = arith.constant 0 : i32
    return %c0_i32, %c0_i32_0 : i32, i32
  }
  func.func @transform_23(%arg0: i32) -> (i32, i32, i32) {
    %c0_i32 = arith.constant 0 : i32
    %c0_i32_0 = arith.constant 0 : i32
    %c0_i32_1 = arith.constant 0 : i32
    return %arg0, %c0_i32, %c0_i32_0 : i32, i32, i32
  }
  func.func @transform_24(%arg0: i32) -> (i32, i32, i32) {
    %c0_i32 = arith.constant 0 : i32
    %c0_i32_0 = arith.constant 0 : i32
    %c0_i32_1 = arith.constant 0 : i32
    return %arg0, %c0_i32, %c0_i32_0 : i32, i32, i32
  }
}

module attributes {stable_mosaic.version = 11 : i64} {
  func.func @_mm_bias_kernel(%arg0: i32, %arg1: memref<32x256xbf16, #tpu.memory_space<vmem>>, %arg2: memref<256x128xbf16, #tpu.memory_space<vmem>>, %arg3: memref<1x128xf32, #tpu.memory_space<vmem>>, %arg4: memref<32x128xbf16, #tpu.memory_space<vmem>>) attributes {dimension_semantics = [#tpu.dimension_semantics<parallel>], iteration_bounds = array<i64: 1>, scalar_prefetch = 0 : i64, scratch_operands = 0 : i64, tpu.core_type = #tpu.core_type<tc>, window_params = [{transform_indices = @transform_0, window_bounds = array<i64: 32, 256>}, {pipeline_mode = #tpu.pipeline_mode<synchronous>, transform_indices = @transform_1, window_bounds = array<i64: 256, 128>}, {pipeline_mode = #tpu.pipeline_mode<synchronous>, transform_indices = @transform_2, window_bounds = array<i64: 1, 128>}, {transform_indices = @transform_3, window_bounds = array<i64: 32, 128>}]} {
    %c0 = arith.constant 0 : index
    %c0_0 = arith.constant 0 : index
    %0 = vector.load %arg1[%c0, %c0_0] : memref<32x256xbf16, #tpu.memory_space<vmem>>, vector<32x256xbf16>
    %c0_1 = arith.constant 0 : index
    %c0_2 = arith.constant 0 : index
    %1 = vector.load %arg2[%c0_1, %c0_2] : memref<256x128xbf16, #tpu.memory_space<vmem>>, vector<256x128xbf16>
    %cst = arith.constant dense<0.000000e+00> : vector<32x128xf32>
    %2 = tpu.matmul %0, %1, %cst {dimension_numbers = #tpu.dot_dimension_numbers<[1], [0], [0], [1], [0, 0, 1, 1], [], []>} : vector<32x256xbf16>, vector<256x128xbf16>, vector<32x128xf32> -> vector<32x128xf32>
    %c0_3 = arith.constant 0 : index
    %c0_4 = arith.constant 0 : index
    %3 = vector.load %arg3[%c0_3, %c0_4] : memref<1x128xf32, #tpu.memory_space<vmem>>, vector<1x128xf32>
    %4 = vector.broadcast %3 : vector<1x128xf32> to vector<32x128xf32>
    %5 = arith.addf %2, %4 : vector<32x128xf32>
    %cst_5 = arith.constant 0.000000e+00 : f32
    %6 = vector.broadcast %cst_5 : f32 to vector<32x128xf32>
    %7 = arith.maximumf %5, %6 : vector<32x128xf32>
    %8 = arith.truncf %7 : vector<32x128xf32> to vector<32x128xbf16>
    %c0_6 = arith.constant 0 : index
    %c0_7 = arith.constant 0 : index
    %9 = vector.load %arg4[%c0_6, %c0_7] : memref<32x128xbf16, #tpu.memory_space<vmem>>, vector<32x128xbf16>
    tpu.vector_store %arg4[%c0_6, %c0_7], %8 {strides = array<i32>} : memref<32x128xbf16, #tpu.memory_space<vmem>>, vector<32x128xbf16>,
    return
  }
  func.func @transform_0(%arg0: i32) -> (i32, i32) {
    %c0_i32 = arith.constant 0 : i32
    %c0_i32_0 = arith.constant 0 : i32
    return %arg0, %c0_i32 : i32, i32
  }
  func.func @transform_1(%arg0: i32) -> (i32, i32) {
    %c0_i32 = arith.constant 0 : i32
    %c0_i32_0 = arith.constant 0 : i32
    %c0_i32_1 = arith.constant 0 : i32
    return %c0_i32, %c0_i32_0 : i32, i32
  }
  func.func @transform_2(%arg0: i32) -> (i32, i32) {
    %c0_i32 = arith.constant 0 : i32
    %c0_i32_0 = arith.constant 0 : i32
    %c0_i32_1 = arith.constant 0 : i32
    return %c0_i32, %c0_i32_0 : i32, i32
  }
  func.func @transform_3(%arg0: i32) -> (i32, i32) {
    %c0_i32 = arith.constant 0 : i32
    %c0_i32_0 = arith.constant 0 : i32
    return %arg0, %c0_i32 : i32, i32
  }
}

module attributes {stable_mosaic.version = 11 : i64} {
  func.func @_mm_bias_kernel(%arg0: i32, %arg1: memref<32x128xbf16, #tpu.memory_space<vmem>>, %arg2: memref<128x256xbf16, #tpu.memory_space<vmem>>, %arg3: memref<1x256xf32, #tpu.memory_space<vmem>>, %arg4: memref<32x256xbf16, #tpu.memory_space<vmem>>) attributes {dimension_semantics = [#tpu.dimension_semantics<parallel>], iteration_bounds = array<i64: 1>, scalar_prefetch = 0 : i64, scratch_operands = 0 : i64, tpu.core_type = #tpu.core_type<tc>, window_params = [{transform_indices = @transform_0, window_bounds = array<i64: 32, 128>}, {pipeline_mode = #tpu.pipeline_mode<synchronous>, transform_indices = @transform_1, window_bounds = array<i64: 128, 256>}, {pipeline_mode = #tpu.pipeline_mode<synchronous>, transform_indices = @transform_2, window_bounds = array<i64: 1, 256>}, {transform_indices = @transform_3, window_bounds = array<i64: 32, 256>}]} {
    %c0 = arith.constant 0 : index
    %c0_0 = arith.constant 0 : index
    %0 = vector.load %arg1[%c0, %c0_0] : memref<32x128xbf16, #tpu.memory_space<vmem>>, vector<32x128xbf16>
    %c0_1 = arith.constant 0 : index
    %c0_2 = arith.constant 0 : index
    %1 = vector.load %arg2[%c0_1, %c0_2] : memref<128x256xbf16, #tpu.memory_space<vmem>>, vector<128x256xbf16>
    %cst = arith.constant dense<0.000000e+00> : vector<32x256xf32>
    %2 = tpu.matmul %0, %1, %cst {dimension_numbers = #tpu.dot_dimension_numbers<[1], [0], [0], [1], [0, 0, 1, 1], [], []>} : vector<32x128xbf16>, vector<128x256xbf16>, vector<32x256xf32> -> vector<32x256xf32>
    %c0_3 = arith.constant 0 : index
    %c0_4 = arith.constant 0 : index
    %3 = vector.load %arg3[%c0_3, %c0_4] : memref<1x256xf32, #tpu.memory_space<vmem>>, vector<1x256xf32>
    %4 = vector.broadcast %3 : vector<1x256xf32> to vector<32x256xf32>
    %5 = arith.addf %2, %4 : vector<32x256xf32>
    %cst_5 = arith.constant 0.000000e+00 : f32
    %6 = vector.broadcast %cst_5 : f32 to vector<32x256xf32>
    %7 = arith.maximumf %5, %6 : vector<32x256xf32>
    %8 = arith.truncf %7 : vector<32x256xf32> to vector<32x256xbf16>
    %c0_6 = arith.constant 0 : index
    %c0_7 = arith.constant 0 : index
    %9 = vector.load %arg4[%c0_6, %c0_7] : memref<32x256xbf16, #tpu.memory_space<vmem>>, vector<32x256xbf16>
    tpu.vector_store %arg4[%c0_6, %c0_7], %8 {strides = array<i32>} : memref<32x256xbf16, #tpu.memory_space<vmem>>, vector<32x256xbf16>,
    return
  }
  func.func @transform_0(%arg0: i32) -> (i32, i32) {
    %c0_i32 = arith.constant 0 : i32
    %c0_i32_0 = arith.constant 0 : i32
    return %arg0, %c0_i32 : i32, i32
  }
  func.func @transform_1(%arg0: i32) -> (i32, i32) {
    %c0_i32 = arith.constant 0 : i32
    %c0_i32_0 = arith.constant 0 : i32
    %c0_i32_1 = arith.constant 0 : i32
    return %c0_i32, %c0_i32_0 : i32, i32
  }
  func.func @transform_2(%arg0: i32) -> (i32, i32) {
    %c0_i32 = arith.constant 0 : i32
    %c0_i32_0 = arith.constant 0 : i32
    %c0_i32_1 = arith.constant 0 : i32
    return %c0_i32, %c0_i32_0 : i32, i32
  }
  func.func @transform_3(%arg0: i32) -> (i32, i32) {
    %c0_i32 = arith.constant 0 : i32
    %c0_i32_0 = arith.constant 0 : i32
    return %arg0, %c0_i32 : i32, i32
  }
}

module attributes {stable_mosaic.version = 11 : i64} {
  func.func @_mm_bias_kernel(%arg0: i32, %arg1: memref<128x64xbf16, #tpu.memory_space<vmem>>, %arg2: memref<64x256xbf16, #tpu.memory_space<vmem>>, %arg3: memref<1x256xf32, #tpu.memory_space<vmem>>, %arg4: memref<128x256xbf16, #tpu.memory_space<vmem>>) attributes {dimension_semantics = [#tpu.dimension_semantics<parallel>], iteration_bounds = array<i64: 1>, scalar_prefetch = 0 : i64, scratch_operands = 0 : i64, tpu.core_type = #tpu.core_type<tc>, window_params = [{transform_indices = @transform_0, window_bounds = array<i64: 128, 64>}, {pipeline_mode = #tpu.pipeline_mode<synchronous>, transform_indices = @transform_1, window_bounds = array<i64: 64, 256>}, {pipeline_mode = #tpu.pipeline_mode<synchronous>, transform_indices = @transform_2, window_bounds = array<i64: 1, 256>}, {transform_indices = @transform_3, window_bounds = array<i64: 128, 256>}]} {
    %c0 = arith.constant 0 : index
    %c0_0 = arith.constant 0 : index
    %0 = vector.load %arg1[%c0, %c0_0] : memref<128x64xbf16, #tpu.memory_space<vmem>>, vector<128x64xbf16>
    %c0_1 = arith.constant 0 : index
    %c0_2 = arith.constant 0 : index
    %1 = vector.load %arg2[%c0_1, %c0_2] : memref<64x256xbf16, #tpu.memory_space<vmem>>, vector<64x256xbf16>
    %cst = arith.constant dense<0.000000e+00> : vector<128x256xf32>
    %2 = tpu.matmul %0, %1, %cst {dimension_numbers = #tpu.dot_dimension_numbers<[1], [0], [0], [1], [0, 0, 1, 1], [], []>} : vector<128x64xbf16>, vector<64x256xbf16>, vector<128x256xf32> -> vector<128x256xf32>
    %c0_3 = arith.constant 0 : index
    %c0_4 = arith.constant 0 : index
    %3 = vector.load %arg3[%c0_3, %c0_4] : memref<1x256xf32, #tpu.memory_space<vmem>>, vector<1x256xf32>
    %4 = vector.broadcast %3 : vector<1x256xf32> to vector<128x256xf32>
    %5 = arith.addf %2, %4 : vector<128x256xf32>
    %cst_5 = arith.constant 0.000000e+00 : f32
    %6 = vector.broadcast %cst_5 : f32 to vector<128x256xf32>
    %7 = arith.maximumf %5, %6 : vector<128x256xf32>
    %8 = arith.truncf %7 : vector<128x256xf32> to vector<128x256xbf16>
    %c0_6 = arith.constant 0 : index
    %c0_7 = arith.constant 0 : index
    %9 = vector.load %arg4[%c0_6, %c0_7] : memref<128x256xbf16, #tpu.memory_space<vmem>>, vector<128x256xbf16>
    tpu.vector_store %arg4[%c0_6, %c0_7], %8 {strides = array<i32>} : memref<128x256xbf16, #tpu.memory_space<vmem>>, vector<128x256xbf16>,
    return
  }
  func.func @transform_0(%arg0: i32) -> (i32, i32) {
    %c0_i32 = arith.constant 0 : i32
    %c0_i32_0 = arith.constant 0 : i32
    return %arg0, %c0_i32 : i32, i32
  }
  func.func @transform_1(%arg0: i32) -> (i32, i32) {
    %c0_i32 = arith.constant 0 : i32
    %c0_i32_0 = arith.constant 0 : i32
    %c0_i32_1 = arith.constant 0 : i32
    return %c0_i32, %c0_i32_0 : i32, i32
  }
  func.func @transform_2(%arg0: i32) -> (i32, i32) {
    %c0_i32 = arith.constant 0 : i32
    %c0_i32_0 = arith.constant 0 : i32
    %c0_i32_1 = arith.constant 0 : i32
    return %c0_i32, %c0_i32_0 : i32, i32
  }
  func.func @transform_3(%arg0: i32) -> (i32, i32) {
    %c0_i32 = arith.constant 0 : i32
    %c0_i32_0 = arith.constant 0 : i32
    return %arg0, %c0_i32 : i32, i32
  }
}

module attributes {stable_mosaic.version = 11 : i64} {
  func.func @_mm_bias_kernel(%arg0: i32, %arg1: memref<256x64xbf16, #tpu.memory_space<vmem>>, %arg2: memref<64x8xbf16, #tpu.memory_space<vmem>>, %arg3: memref<1x8xf32, #tpu.memory_space<vmem>>, %arg4: memref<256x8xf32, #tpu.memory_space<vmem>>) attributes {dimension_semantics = [#tpu.dimension_semantics<parallel>], iteration_bounds = array<i64: 2>, scalar_prefetch = 0 : i64, scratch_operands = 0 : i64, tpu.core_type = #tpu.core_type<tc>, window_params = [{transform_indices = @transform_0, window_bounds = array<i64: 256, 64>}, {pipeline_mode = #tpu.pipeline_mode<synchronous>, transform_indices = @transform_1, window_bounds = array<i64: 64, 8>}, {pipeline_mode = #tpu.pipeline_mode<synchronous>, transform_indices = @transform_2, window_bounds = array<i64: 1, 8>}, {transform_indices = @transform_3, window_bounds = array<i64: 256, 8>}]} {
    %c0 = arith.constant 0 : index
    %c0_0 = arith.constant 0 : index
    %0 = vector.load %arg1[%c0, %c0_0] : memref<256x64xbf16, #tpu.memory_space<vmem>>, vector<256x64xbf16>
    %c0_1 = arith.constant 0 : index
    %c0_2 = arith.constant 0 : index
    %1 = vector.load %arg2[%c0_1, %c0_2] : memref<64x8xbf16, #tpu.memory_space<vmem>>, vector<64x8xbf16>
    %cst = arith.constant dense<0.000000e+00> : vector<256x8xf32>
    %2 = tpu.matmul %0, %1, %cst {dimension_numbers = #tpu.dot_dimension_numbers<[1], [0], [0], [1], [0, 0, 1, 1], [], []>} : vector<256x64xbf16>, vector<64x8xbf16>, vector<256x8xf32> -> vector<256x8xf32>
    %c0_3 = arith.constant 0 : index
    %c0_4 = arith.constant 0 : index
    %3 = vector.load %arg3[%c0_3, %c0_4] : memref<1x8xf32, #tpu.memory_space<vmem>>, vector<1x8xf32>
    %4 = vector.broadcast %3 : vector<1x8xf32> to vector<256x8xf32>
    %5 = arith.addf %2, %4 : vector<256x8xf32>
    %c0_5 = arith.constant 0 : index
    %c0_6 = arith.constant 0 : index
    %6 = vector.load %arg4[%c0_5, %c0_6] : memref<256x8xf32, #tpu.memory_space<vmem>>, vector<256x8xf32>
    tpu.vector_store %arg4[%c0_5, %c0_6], %5 {strides = array<i32>} : memref<256x8xf32, #tpu.memory_space<vmem>>, vector<256x8xf32>,
    return
  }
  func.func @transform_0(%arg0: i32) -> (i32, i32) {
    %c0_i32 = arith.constant 0 : i32
    %c0_i32_0 = arith.constant 0 : i32
    return %arg0, %c0_i32 : i32, i32
  }
  func.func @transform_1(%arg0: i32) -> (i32, i32) {
    %c0_i32 = arith.constant 0 : i32
    %c0_i32_0 = arith.constant 0 : i32
    %c0_i32_1 = arith.constant 0 : i32
    return %c0_i32, %c0_i32_0 : i32, i32
  }
  func.func @transform_2(%arg0: i32) -> (i32, i32) {
    %c0_i32 = arith.constant 0 : i32
    %c0_i32_0 = arith.constant 0 : i32
    %c0_i32_1 = arith.constant 0 : i32
    return %c0_i32, %c0_i32_0 : i32, i32
  }
  func.func @transform_3(%arg0: i32) -> (i32, i32) {
    %c0_i32 = arith.constant 0 : i32
    %c0_i32_0 = arith.constant 0 : i32
    return %arg0, %c0_i32 : i32, i32
  }
}

</mosaic_0001>

<bundles_post_ra>
// kernel: cvae_forward.6
= control target key start
LH: loop header
LB: loop body
LE: loop exit
PB: predicated region body
PF: predicated region fallthrough
CT: control target
= control target key end

     0   :  { %s522_s12 = smov 0   ;;  %s557_s0 = inlined_call_operand.vmem [shape: bf16[2,64,12], index: 0, kind: input, shape index: {}]   ;;  %s558_s1 = inlined_call_operand.vmem [shape: bf16[12,64], index: 1, kind: input, shape index: {}]   ;;  %s559_s2 = inlined_call_operand.vmem [shape: f32[2,1,64], index: 2, kind: input, shape index: {}]   ;;  %s560_s3 = inlined_call_operand.vmem [shape: bf16[2,64,64], index: 3, kind: output, shape index: {}]  }
   0x1 LB: > { %s423_s13 = sadd.s32 4294967295, %s500_s12   ;;  %p427_p0 = scmp.ge.s32.totalorder %s500_s12, 1  ;;  %s500_s12 = sphi %s522_s12, %s13_s12  }
   0x2   : > { %p145_p1 = scmp.lt.s32.totalorder %s500_s12, 3 }
   0x4   : > { %p146_p2 = pnand %p427_p0, %p145_p1 }
   0x5   : > { %v489_v0 = vld [vmem:[%s558_s1] sm:$0x3f] (!%p146_p2)   ;;  %vm241_vm0 = vcmask (!%p146_p2), 1045504   ;;  %p172_p3 = scmp.lt.s32.totalorder (!%p146_p2), %s423_s13, 1  ;;  %vm228_vm1 = vcmask (!%p146_p2), 97280   ;;  %vm350_vm2 = vcmask (!%p146_p2), 519168  }
   0x6   : > { %149 = sbr.rel (%p146_p2) target bundleno = 240 (0xf0), region = 32  ;;  %479 = vmatprep.subr.msk.bf16.mxu0 (!%p146_p2), %vm241_vm0, %v489_v0  ;;  %480 = vmatprep.subr.msk.bf16.mxu1 (!%p146_p2), %vm241_vm0, %v489_v0  ;;  %v243_v1 = vsel (!%p146_p2), %vm241_vm0, %v489_v0, 0 }
   0x7   : > { %468 = vmatpush3.bf16.msra.mxu0 (!%p146_p2), %v243_v1  ;;  %478 = vmatpush3.bf16.msra.mxu1 (!%p146_p2), %v243_v1 }
   0xd   : > { %s562_s13 = smov (!%p172_p3, %s423_s13), 1 }
   0xe   : > { %s452_s16 = sshll.u32 %s562_s13, 5  ;;  %s179_s22 = scalar_lea.vmem %s559_s2, %s562_s13 }
   0xf   : > { %s176_s19 = scalar_lea.vmem %s557_s0, %s452_s16  ;;  %v432_v6 = vld [vmem:[%s179_s22] ss:$0 sm:$0xff]  ;;  %s184_s25 = scalar_lea.vmem %s560_s3, %s452_s16 }
  0x10   : > { %v490_v2 = vld [vmem:[%s176_s19] sm:$0xff]   ;;  %v491_v3 = vld [vmem:[%s176_s19 + $0x10] sm:$0xff]   ;;  %v492_v4 = vld [vmem:[%s176_s19 + $0x8] sm:$0xff]  }
  0x11   : > { %469 = vmatprep.mubr.msk.bf16.mxu0 %vm228_vm1, %v490_v2  ;;  %473 = vmatprep.mubr.msk.bf16.mxu1 %vm228_vm1, %v491_v3  ;;  %v493_v5 = vld [vmem:[%s176_s19 + $0x18] sm:$0xff]  }
  0x12   : > { %470 = vmatmul.mubr.msk.bf16.vlgmr.msra.gmra.mrb[0].mxu0 %vm228_vm1, %v492_v4  ;;  %474 = vmatmul.mubr.msk.bf16.vlgmr.msra.gmra.mrb[0].mxu1 %vm228_vm1, %v493_v5 }
  0xe5   : > { %v471_v7 = vpop.f32.mrb[0].mxu0  ;;  %v475_v9 = vpop.f32.mrb[0].mxu1 }
  0xe6   : > { %v288_v8 = vadd.f32 %v471_v7, %v432_v6  ;;  %v279_v10 = vpop.f32.mrb[1].mxu0  ;;  %v304_v11 = vadd.f32 %v475_v9, %v432_v6  ;;  %v295_v13 = vpop.f32.mrb[1].mxu1 }
  0xe7   : > { %v280_v12 = vadd.f32 %v432_v6, %v279_v10  ;;  %v472_v14 = vpop.f32.mrb[2].mxu0  ;;  %v296_v16 = vadd.f32 %v432_v6, %v295_v13  ;;  %v476_v18 = vpop.f32.mrb[2].mxu1 }
  0xe8   : > { %v312_v15 = vmax.f32 %v288_v8, 0.0  ;;  %v291_v17 = vadd.f32 %v472_v14, %v432_v6  ;;  %v282_v19 = vpop.f32.mrb[3].mxu0  ;;  %v316_v20 = vmax.f32 %v304_v11, 0.0  ;;  %v307_v22 = vadd.f32 %v476_v18, %v432_v6  ;;  %v298_v24 = vpop.f32.mrb[3].mxu1 }
  0xe9   : > { %v310_v21 = vmax.f32 %v280_v12, 0.0  ;;  %v283_v23 = vadd.f32 %v432_v6, %v282_v19  ;;  %v314_v26 = vmax.f32 %v296_v16, 0.0  ;;  %v299_v28 = vadd.f32 %v432_v6, %v298_v24 }
  0xea   : > { %v456_v25 = vpack.c.bf16 %v312_v15, %v312_v15  ;;  %v313_v27 = vmax.f32 %v291_v17, 0.0  ;;  %v460_v29 = vpack.c.bf16 %v316_v20, %v316_v20  ;;  %v317_v31 = vmax.f32 %v307_v22, 0.0 }
  0xeb   : > { %v454_v30 = vpack.c.bf16 %v310_v21, %v310_v21  ;;  %v311_v32 = vmax.f32 %v283_v23, 0.0  ;;  %v458_v33 = vpack.c.bf16 %v314_v26, %v314_v26  ;;  %v315_v35 = vmax.f32 %v299_v28, 0.0 }
  0xec   : > { %353 = vst.msk [vmem:[%s184_s25 + $0x8] sm:$0xf] %vm350_vm2, %v456_v25  ;;  %v457_v34 = vpack.c.bf16 %v313_v27, %v313_v27  ;;  %357 = vst.msk [vmem:[%s184_s25 + $0x18] sm:$0xf] %vm350_vm2, %v460_v29  ;;  %v461_v36 = vpack.c.bf16 %v317_v31, %v317_v31 }
  0xed   : > { %351 = vst.msk [vmem:[%s184_s25] sm:$0xf] %vm350_vm2, %v454_v30  ;;  %v455_v37 = vpack.c.bf16 %v311_v32, %v311_v32  ;;  %355 = vst.msk [vmem:[%s184_s25 + $0x10] sm:$0xf] %vm350_vm2, %v458_v33  ;;  %v459_v38 = vpack.c.bf16 %v315_v35, %v315_v35 }
  0xee   : > { %354 = vst.msk [vmem:[%s184_s25 + $0xc] sm:$0xf] %vm350_vm2, %v457_v34  ;;  %358 = vst.msk [vmem:[%s184_s25 + $0x1c] sm:$0xf] %vm350_vm2, %v461_v36 }
  0xef   : > { %352 = vst.msk [vmem:[%s184_s25 + $0x4] sm:$0xf] %vm350_vm2, %v455_v37  ;;  %356 = vst.msk [vmem:[%s184_s25 + $0x14] sm:$0xf] %vm350_vm2, %v459_v38 }
  0xf0 PF: > { %s13_s12 = sadd.s32 1, %s500_s12  }
  0xf1   : > { %p10_p4 = scmp.ge.s32.totalorder %s13_s12, 4  }
  0xf3   :  { %12 = sbr.rel (!%p10_p4) target bundleno = 1 (0x1), region = 65 }

// kernel: cvae_forward.7
= control target key start
LH: loop header
LB: loop body
LE: loop exit
PB: predicated region body
PF: predicated region fallthrough
CT: control target
= control target key end

     0   :  { %s446_s1 = inlined_call_operand.vmem [shape: bf16[256,128], index: 1, kind: input, shape index: {}]   ;;  %s447_s0 = inlined_call_operand.vmem [shape: bf16[32,256], index: 0, kind: input, shape index: {}]   ;;  %s448_s2 = inlined_call_operand.vmem [shape: f32[1,128], index: 2, kind: input, shape index: {}]   ;;  %s449_s3 = inlined_call_operand.vmem [shape: bf16[32,128], index: 3, kind: output, shape index: {}]  }
   0x1   :  { %v335_v0 = vld [vmem:[%s446_s1 + $0x40] sm:$0xff]   ;;  %v337_v2 = vld [vmem:[%s446_s1 + $0x48] sm:$0xff]   ;;  %v339_v4 = vld [vmem:[%s446_s1 + $0x50] sm:$0xff]  }
   0x2   :  { %v336_v1 = vld [vmem:[%s446_s1] sm:$0xff]   ;;  %291 = vmatprep.subr.bf16.mxu0 %v335_v0  ;;  %319 = vmatprep.subr.bf16.mxu1 %v335_v0  ;;  %v338_v3 = vld [vmem:[%s446_s1 + $0x8] sm:$0xff]   ;;  %v340_v5 = vld [vmem:[%s446_s1 + $0x10] sm:$0xff]  }
   0x3   :  { %292 = vmatpush3.bf16.msra.mxu0 %v336_v1  ;;  %327 = vmatpush3.bf16.msra.mxu1 %v336_v1  ;;  %v341_v6 = vld [vmem:[%s446_s1 + $0x58] sm:$0xff]   ;;  %v343_v8 = vld [vmem:[%s446_s1 + $0x60] sm:$0xff]   ;;  %v345_v10 = vld [vmem:[%s446_s1 + $0x68] sm:$0xff]  }
   0x4   :  { %293 = vmatprep.subr.bf16.mxu0 %v337_v2  ;;  %320 = vmatprep.subr.bf16.mxu1 %v337_v2  ;;  %v342_v7 = vld [vmem:[%s446_s1 + $0x18] sm:$0xff]   ;;  %v344_v9 = vld [vmem:[%s446_s1 + $0x20] sm:$0xff]   ;;  %v346_v13 = vld [vmem:[%s446_s1 + $0x28] sm:$0xff]  }
   0x5   :  { %v353_v11 = vld [vmem:[%s447_s0 + $0x4] ss:$8 sps:$4 sm:$0xff]   ;;  %v356_v12 = vld [vmem:[%s447_s0 + $0x14] ss:$8 sps:$4 sm:$0xff]   ;;  %v351_v18 = vld [vmem:[%s447_s0] ss:$8 sps:$4 sm:$0xff]  }
   0x6   :  { %v347_v14 = vld [vmem:[%s446_s1 + $0x70] sm:$0xff]   ;;  %206 = vmatprep.mubr.bf16.mxu0 %v353_v11  ;;  %214 = vmatprep.mubr.bf16.mxu1 %v356_v12  ;;  %v349_v16 = vld [vmem:[%s446_s1 + $0x78] sm:$0xff]   ;;  %v251_v22 = vld [vmem:[%s448_s2] ss:$0 sm:$0xff] }
   0x7   :  { %294 = vmatpush3.bf16.msra.mxu0 %v338_v3  ;;  %328 = vmatpush3.bf16.msra.mxu1 %v338_v3  ;;  %v348_v15 = vld [vmem:[%s446_s1 + $0x30] sm:$0xff]   ;;  %v350_v17 = vld [vmem:[%s446_s1 + $0x38] sm:$0xff]  }
   0x8   :  { %295 = vmatprep.subr.bf16.mxu0 %v339_v4  ;;  %321 = vmatprep.subr.bf16.mxu1 %v339_v4  ;;  %v354_v19 = vld [vmem:[%s447_s0 + $0x10] ss:$8 sps:$4 sm:$0xff]  }
   0xb   :  { %296 = vmatpush3.bf16.msra.mxu0 %v340_v5  ;;  %329 = vmatpush3.bf16.msra.mxu1 %v340_v5 }
   0xc   :  { %297 = vmatprep.subr.bf16.mxu0 %v341_v6  ;;  %322 = vmatprep.subr.bf16.mxu1 %v341_v6 }
   0xf   :  { %298 = vmatpush3.bf16.msra.mxu0 %v342_v7  ;;  %330 = vmatpush3.bf16.msra.mxu1 %v342_v7 }
  0x10   :  { %299 = vmatprep.subr.bf16.mxu0 %v343_v8  ;;  %323 = vmatprep.subr.bf16.mxu1 %v343_v8 }
  0x13   :  { %300 = vmatpush3.bf16.msra.mxu0 %v344_v9  ;;  %331 = vmatpush3.bf16.msra.mxu1 %v344_v9 }
  0x14   :  { %301 = vmatprep.subr.bf16.mxu0 %v345_v10  ;;  %324 = vmatprep.subr.bf16.mxu1 %v345_v10 }
  0x17   :  { %302 = vmatpush3.bf16.msra.mxu0 %v346_v13  ;;  %332 = vmatpush3.bf16.msra.mxu1 %v346_v13 }
  0x18   :  { %303 = vmatprep.subr.bf16.mxu0 %v347_v14  ;;  %325 = vmatprep.subr.bf16.mxu1 %v347_v14 }
  0x1b   :  { %304 = vmatpush3.bf16.msra.mxu0 %v348_v15  ;;  %333 = vmatpush3.bf16.msra.mxu1 %v348_v15 }
  0x1c   :  { %305 = vmatprep.subr.bf16.mxu0 %v349_v16  ;;  %326 = vmatprep.subr.bf16.mxu1 %v349_v16 }
  0x1f   :  { %306 = vmatpush3.bf16.msra.mxu0 %v350_v17  ;;  %334 = vmatpush3.bf16.msra.mxu1 %v350_v17 }
  0x22   :  { %207 = vmatmul.mubr.bf16.vlgmr.msra.gmra.mrb[0].mxu0 %v351_v18  ;;  %215 = vmatmul.mubr.bf16.vlgmr.msra.gmra.mrb[0].mxu1 %v354_v19 }
  0xf5   :  { %v307_v20 = vpop.f32.mrb[0].mxu0  ;;  %v313_v21 = vpop.f32.mrb[0].mxu1 }
  0xf6   :  { %v308_v23 = vpop.f32.mrb[1].mxu0  ;;  %v314_v24 = vpop.f32.mrb[1].mxu1 }
  0xf7   :  { %v309_v25 = vadd.f32 %v308_v23, %v307_v20  ;;  %v315_v26 = vadd.f32 %v314_v24, %v313_v21  ;;  %v310_v27 = vpop.f32.mrb[2].mxu0  ;;  %v316_v28 = vpop.f32.mrb[2].mxu1 }
  0xf8   :  { %v311_v29 = vpop.f32.mrb[3].mxu0  ;;  %v317_v30 = vpop.f32.mrb[3].mxu1 }
  0xf9   :  { %v209_v31 = vadd.f32 %v309_v25, %v251_v22  ;;  %v217_v32 = vadd.f32 %v315_v26, %v251_v22  ;;  %v312_v33 = vadd.f32 %v311_v29, %v310_v27  ;;  %v318_v34 = vadd.f32 %v317_v30, %v316_v28 }
  0xfb   :  { %v212_v35 = vadd.f32 %v312_v33, %v251_v22  ;;  %v220_v36 = vadd.f32 %v318_v34, %v251_v22  ;;  %v223_v37 = vmax.f32 %v209_v31, 0.0  ;;  %v225_v38 = vmax.f32 %v217_v32, 0.0 }
  0xfd   :  { %v224_v39 = vmax.f32 %v212_v35, 0.0  ;;  %v226_v40 = vmax.f32 %v220_v36, 0.0 }
  0xff   :  { %v283_v41 = vpack.c.bf16 %v224_v39, %v223_v37  ;;  %v288_v42 = vpack.c.bf16 %v226_v40, %v225_v38 }
 0x101   :  { %284 = vst [vmem:[%s449_s3] sm:$0xff] %v283_v41   ;;  %290 = vst [vmem:[%s449_s3 + $0x8] sm:$0xff] %v288_v42  }

// kernel: cvae_forward.9
= control target key start
LH: loop header
LB: loop body
LE: loop exit
PB: predicated region body
PF: predicated region fallthrough
CT: control target
= control target key end

     0   :  { %v301_v1 = vmov 0   ;;  %v37_v19 = vlaneseq  ;;  %s391_s1 = inlined_call_operand.vmem [shape: bf16[128,256], index: 1, kind: input, shape index: {}]   ;;  %s392_s0 = inlined_call_operand.vmem [shape: bf16[32,128], index: 0, kind: input, shape index: {}]   ;;  %s393_s2 = inlined_call_operand.vmem [shape: f32[1,256], index: 2, kind: input, shape index: {}]   ;;  %s394_s3 = inlined_call_operand.vmem [shape: bf16[32,256], index: 3, kind: output, shape index: {}]  }
   0x1   :  { %v275_v0 = vld [vmem:[%s391_s1 + $0x4] ss:$8 sps:$4 sm:$0xff]   ;;  %171 = vmatprep.mubr.bf16.mxu0 %v301_v1  ;;  %181 = vmatprep.mubr.bf16.mxu1 %v301_v1  ;;  %v277_v2 = vld [vmem:[%s391_s1] ss:$8 sps:$4 sm:$0xff]   ;;  %v278_v3 = vld [vmem:[%s391_s1 + $0x14] ss:$8 sps:$4 sm:$0xff]  }
   0x2   :  { %139 = vmatprep.subr.bf16.mxu0 %v275_v0  ;;  %258 = vmatprep.subr.bf16.mxu1 %v275_v0  ;;  %v280_v4 = vld [vmem:[%s391_s1 + $0x10] ss:$8 sps:$4 sm:$0xff]   ;;  %v281_v5 = vld [vmem:[%s391_s1 + $0x24] ss:$8 sps:$4 sm:$0xff]   ;;  %v283_v6 = vld [vmem:[%s391_s1 + $0x20] ss:$8 sps:$4 sm:$0xff]  }
   0x3   :  { %140 = vmatpush1.bf16.msra.mxu0 %v277_v2  ;;  %266 = vmatpush1.bf16.msra.mxu1 %v277_v2  ;;  %v284_v7 = vld [vmem:[%s391_s1 + $0x34] ss:$8 sps:$4 sm:$0xff]   ;;  %v286_v8 = vld [vmem:[%s391_s1 + $0x30] ss:$8 sps:$4 sm:$0xff]   ;;  %v287_v9 = vld [vmem:[%s391_s1 + $0x44] ss:$8 sps:$4 sm:$0xff]  }
   0x4   :  { %141 = vmatprep.subr.bf16.mxu0 %v278_v3  ;;  %259 = vmatprep.subr.bf16.mxu1 %v278_v3  ;;  %v289_v10 = vld [vmem:[%s391_s1 + $0x40] ss:$8 sps:$4 sm:$0xff]   ;;  %v290_v11 = vld [vmem:[%s391_s1 + $0x54] ss:$8 sps:$4 sm:$0xff]   ;;  %v292_v12 = vld [vmem:[%s391_s1 + $0x50] ss:$8 sps:$4 sm:$0xff]  }
   0x5   :  { %v293_v13 = vld [vmem:[%s391_s1 + $0x64] ss:$8 sps:$4 sm:$0xff]   ;;  %v295_v14 = vld [vmem:[%s391_s1 + $0x60] ss:$8 sps:$4 sm:$0xff]   ;;  %v296_v15 = vld [vmem:[%s391_s1 + $0x74] ss:$8 sps:$4 sm:$0xff]  }
   0x6   :  { %v298_v16 = vld [vmem:[%s391_s1 + $0x70] ss:$8 sps:$4 sm:$0xff]   ;;  %v299_v17 = vld [vmem:[%s392_s0] sm:$0xff]   ;;  %v300_v18 = vld [vmem:[%s392_s0 + $0x8] sm:$0xff]   ;;  %v38_v20 = vshrl.u32 %v37_v19, 7 }
   0x7   :  { %142 = vmatpush1.bf16.msra.mxu0 %v280_v4  ;;  %267 = vmatpush1.bf16.msra.mxu1 %v280_v4  ;;  %v35_v22 = vld [vmem:[%s393_s2] sm:$0x3] }
   0x8   :  { %143 = vmatprep.subr.bf16.mxu0 %v281_v5  ;;  %260 = vmatprep.subr.bf16.mxu1 %v281_v5  ;;  %v39_v21 = vsub.s32 0, %v38_v20  ;;  %v43_v23 = vsub.s32 1, %v38_v20 }
   0xa   :  { %v40_v24 = vrot.slane %v35_v22, %v39_v21  ;;  %v44_v25 = vrot.slane %v35_v22, %v43_v23 }
   0xb   :  { %144 = vmatpush1.bf16.msra.mxu0 %v283_v6  ;;  %268 = vmatpush1.bf16.msra.mxu1 %v283_v6 }
   0xc   :  { %145 = vmatprep.subr.bf16.mxu0 %v284_v7  ;;  %261 = vmatprep.subr.bf16.mxu1 %v284_v7 }
   0xf   :  { %146 = vmatpush1.bf16.msra.mxu0 %v286_v8  ;;  %269 = vmatpush1.bf16.msra.mxu1 %v286_v8 }
  0x10   :  { %147 = vmatprep.subr.bf16.mxu0 %v287_v9  ;;  %262 = vmatprep.subr.bf16.mxu1 %v287_v9 }
  0x13   :  { %148 = vmatpush1.bf16.msra.mxu0 %v289_v10  ;;  %270 = vmatpush1.bf16.msra.mxu1 %v289_v10 }
  0x14   :  { %149 = vmatprep.subr.bf16.mxu0 %v290_v11  ;;  %263 = vmatprep.subr.bf16.mxu1 %v290_v11 }
  0x17   :  { %150 = vmatpush1.bf16.msra.mxu0 %v292_v12  ;;  %271 = vmatpush1.bf16.msra.mxu1 %v292_v12 }
  0x18   :  { %151 = vmatprep.subr.bf16.mxu0 %v293_v13  ;;  %264 = vmatprep.subr.bf16.mxu1 %v293_v13 }
  0x1b   :  { %152 = vmatpush1.bf16.msra.mxu0 %v295_v14  ;;  %272 = vmatpush1.bf16.msra.mxu1 %v295_v14 }
  0x1c   :  { %153 = vmatprep.subr.bf16.mxu0 %v296_v15  ;;  %265 = vmatprep.subr.bf16.mxu1 %v296_v15 }
  0x1f   :  { %154 = vmatpush1.bf16.msra.mxu0 %v298_v16  ;;  %273 = vmatpush1.bf16.msra.mxu1 %v298_v16 }
  0x22   :  { %172 = vmatmul.mubr.bf16.vlgmr.msra.gmra.mrb[0].mxu0 %v299_v17  ;;  %182 = vmatmul.mubr.bf16.vlgmr.msra.gmra.mrb[0].mxu1 %v300_v18 }
  0xf5   :  { %v173_v26 = vpop.f32.mrb[0].mxu0  ;;  %v183_v27 = vpop.f32.mrb[0].mxu1 }
  0xf6   :  { %v174_v28 = vadd.f32 %v173_v26, %v40_v24  ;;  %v184_v29 = vadd.f32 %v183_v27, %v40_v24  ;;  %v175_v30 = vpop.f32.mrb[1].mxu0  ;;  %v185_v31 = vpop.f32.mrb[1].mxu1 }
  0xf7   :  { %v176_v32 = vadd.f32 %v175_v30, %v44_v25  ;;  %v186_v33 = vadd.f32 %v185_v31, %v44_v25  ;;  %v177_v34 = vpop.f32.mrb[2].mxu0  ;;  %v187_v35 = vpop.f32.mrb[2].mxu1 }
  0xf8   :  { %v192_v36 = vmax.f32 %v174_v28, 0.0  ;;  %v196_v37 = vmax.f32 %v184_v29, 0.0  ;;  %v178_v38 = vadd.f32 %v177_v34, %v40_v24  ;;  %v188_v39 = vadd.f32 %v187_v35, %v40_v24  ;;  %v179_v40 = vpop.f32.mrb[3].mxu0  ;;  %v189_v41 = vpop.f32.mrb[3].mxu1 }
  0xf9   :  { %v193_v42 = vmax.f32 %v176_v32, 0.0  ;;  %v197_v43 = vmax.f32 %v186_v33, 0.0  ;;  %v180_v44 = vadd.f32 %v179_v40, %v44_v25  ;;  %v190_v45 = vadd.f32 %v189_v41, %v44_v25 }
  0xfa   :  { %v194_v46 = vmax.f32 %v178_v38, 0.0  ;;  %v198_v47 = vmax.f32 %v188_v39, 0.0 }
  0xfb   :  { %v254_v48 = vpack.c.bf16 %v193_v42, %v192_v36  ;;  %v256_v49 = vpack.c.bf16 %v197_v43, %v196_v37  ;;  %v195_v50 = vmax.f32 %v180_v44, 0.0  ;;  %v199_v51 = vmax.f32 %v190_v45, 0.0 }
  0xfd   :  { %224 = vst [vmem:[%s394_s3] sm:$0xff] %v254_v48  ;;  %226 = vst [vmem:[%s394_s3 + $0x10] sm:$0xff] %v256_v49  ;;  %v255_v52 = vpack.c.bf16 %v195_v50, %v194_v46  ;;  %v257_v53 = vpack.c.bf16 %v199_v51, %v198_v47 }
  0xff   :  { %225 = vst [vmem:[%s394_s3 + $0x8] sm:$0xff] %v255_v52  ;;  %227 = vst [vmem:[%s394_s3 + $0x18] sm:$0xff] %v257_v53 }

// kernel: cvae_forward.10
= control target key start
LH: loop header
LB: loop body
LE: loop exit
PB: predicated region body
PF: predicated region fallthrough
CT: control target
= control target key end

     0   :  { %v502_v1 = vmov 0   ;;  %vm131_vm0 = vcmask 523264   ;;  %v41_v17 = vlaneseq  ;;  %s666_s1 = inlined_call_operand.vmem [shape: bf16[64,256], index: 1, kind: input, shape index: {}]   ;;  %s667_s0 = inlined_call_operand.vmem [shape: bf16[128,64], index: 0, kind: input, shape index: {}]   ;;  %s668_s2 = inlined_call_operand.vmem [shape: f32[1,256], index: 2, kind: input, shape index: {}]   ;;  %s669_s3 = inlined_call_operand.vmem [shape: bf16[128,256], index: 3, kind: output, shape index: {}]  }
   0x1   :  { %v482_v0 = vld [vmem:[%s666_s1 + $0x4] ss:$8 sps:$4 sm:$0xff]   ;;  %188 = vmatprep.mubr.bf16.mxu0 %v502_v1  ;;  %228 = vmatprep.mubr.bf16.mxu1 %v502_v1  ;;  %v484_v2 = vld [vmem:[%s666_s1] ss:$8 sps:$4 sm:$0xff]   ;;  %v485_v3 = vld [vmem:[%s666_s1 + $0x14] ss:$8 sps:$4 sm:$0xff]  }
   0x2   :  { %156 = vmatprep.subr.bf16.mxu0 %v482_v0  ;;  %473 = vmatprep.subr.bf16.mxu1 %v482_v0  ;;  %v487_v4 = vld [vmem:[%s666_s1 + $0x10] ss:$8 sps:$4 sm:$0xff]   ;;  %v488_v5 = vld [vmem:[%s666_s1 + $0x24] ss:$8 sps:$4 sm:$0xff]   ;;  %v490_v6 = vld [vmem:[%s666_s1 + $0x20] ss:$8 sps:$4 sm:$0xff]  }
   0x3   :  { %157 = vmatpush1.bf16.msra.mxu0 %v484_v2  ;;  %477 = vmatpush1.bf16.msra.mxu1 %v484_v2  ;;  %v491_v7 = vld [vmem:[%s666_s1 + $0x34] ss:$8 sps:$4 sm:$0xff]   ;;  %v493_v8 = vld [vmem:[%s666_s1 + $0x30] ss:$8 sps:$4 sm:$0xff]   ;;  %v494_v9 = vld [vmem:[%s667_s0] sm:$0xff]   ;;  %v42_v18 = vshrl.u32 %v41_v17, 7 }
   0x4   :  { %158 = vmatprep.subr.bf16.mxu0 %v485_v3  ;;  %474 = vmatprep.subr.bf16.mxu1 %v485_v3  ;;  %v495_v10 = vld [vmem:[%s667_s0 + $0x20] sm:$0xff]   ;;  %v496_v11 = vld [vmem:[%s667_s0 + $0x8] sm:$0xff]   ;;  %v498_v13 = vld [vmem:[%s667_s0 + $0x10] sm:$0xff]  }
   0x5   :  { %v497_v12 = vld [vmem:[%s667_s0 + $0x28] sm:$0xff]   ;;  %v499_v14 = vld [vmem:[%s667_s0 + $0x30] sm:$0xff]   ;;  %v500_v15 = vld [vmem:[%s667_s0 + $0x18] sm:$0xff]   ;;  %v43_v19 = vsub.s32 0, %v42_v18  ;;  %v47_v21 = vsub.s32 1, %v42_v18 }
   0x6   :  { %v501_v16 = vld [vmem:[%s667_s0 + $0x38] sm:$0xff]   ;;  %v39_v20 = vld [vmem:[%s668_s2] sm:$0x3] }
   0x7   :  { %159 = vmatpush1.bf16.msra.mxu0 %v487_v4  ;;  %478 = vmatpush1.bf16.msra.mxu1 %v487_v4  ;;  %v582_v22 = vrot.slane %v39_v20, %v43_v19  ;;  %v584_v23 = vrot.slane %v39_v20, %v47_v21 }
   0x8   :  { %160 = vmatprep.subr.bf16.mxu0 %v488_v5  ;;  %475 = vmatprep.subr.bf16.mxu1 %v488_v5 }
   0xb   :  { %161 = vmatpush1.bf16.msra.mxu0 %v490_v6  ;;  %479 = vmatpush1.bf16.msra.mxu1 %v490_v6 }
   0xc   :  { %162 = vmatprep.subr.bf16.mxu0 %v491_v7  ;;  %476 = vmatprep.subr.bf16.mxu1 %v491_v7 }
   0xf   :  { %163 = vmatpush1.bf16.msra.mxu0 %v493_v8  ;;  %480 = vmatpush1.bf16.msra.mxu1 %v493_v8 }
  0x12   :  { %433 = vmatmul.mubr.msk.bf16.vlgmr.msra.gmra.mrb[0].mxu0 %vm131_vm0, %v494_v9  ;;  %437 = vmatmul.mubr.msk.bf16.vlgmr.msra.gmra.mrb[0].mxu1 %vm131_vm0, %v495_v10 }
  0x13   :  { %198 = vmatprep.mubr.bf16.mxu0 %v502_v1  ;;  %238 = vmatprep.mubr.bf16.mxu1 %v502_v1 }
  0x1a   :  { %434 = vmatmul.mubr.msk.bf16.gmra.mrb[4].mxu0 %vm131_vm0, %v496_v11  ;;  %438 = vmatmul.mubr.msk.bf16.gmra.mrb[4].mxu1 %vm131_vm0, %v497_v12 }
  0x1b   :  { %208 = vmatprep.mubr.bf16.mxu0 %v502_v1  ;;  %248 = vmatprep.mubr.bf16.mxu1 %v502_v1 }
  0x22   :  { %435 = vmatmul.mubr.msk.bf16.gmra.mrb[8].mxu0 %vm131_vm0, %v498_v13  ;;  %439 = vmatmul.mubr.msk.bf16.gmra.mrb[8].mxu1 %vm131_vm0, %v499_v14 }
  0x23   :  { %218 = vmatprep.mubr.bf16.mxu0 %v502_v1  ;;  %258 = vmatprep.mubr.bf16.mxu1 %v502_v1 }
  0x2a   :  { %436 = vmatmul.mubr.msk.bf16.gmra.mrb[12].mxu0 %vm131_vm0, %v500_v15  ;;  %440 = vmatmul.mubr.msk.bf16.gmra.mrb[12].mxu1 %vm131_vm0, %v501_v16 }
  0xe5   :  { %v190_v24 = vpop.f32.mrb[0].mxu0  ;;  %v230_v25 = vpop.f32.mrb[0].mxu1 }
  0xe6   :  { %v191_v26 = vadd.f32 %v190_v24, %v582_v22  ;;  %v231_v27 = vadd.f32 %v230_v25, %v582_v22  ;;  %v192_v28 = vpop.f32.mrb[1].mxu0  ;;  %v232_v29 = vpop.f32.mrb[1].mxu1 }
  0xe7   :  { %v193_v30 = vadd.f32 %v192_v28, %v584_v23  ;;  %v233_v31 = vadd.f32 %v232_v29, %v584_v23  ;;  %v194_v32 = vpop.f32.mrb[2].mxu0  ;;  %v234_v33 = vpop.f32.mrb[2].mxu1 }
  0xe8   :  { %v269_v34 = vmax.f32 %v191_v26, 0.0  ;;  %v285_v35 = vmax.f32 %v231_v27, 0.0  ;;  %v195_v36 = vadd.f32 %v194_v32, %v582_v22  ;;  %v235_v37 = vadd.f32 %v234_v33, %v582_v22  ;;  %v196_v38 = vpop.f32.mrb[3].mxu0  ;;  %v236_v39 = vpop.f32.mrb[3].mxu1 }
  0xe9   :  { %v270_v40 = vmax.f32 %v193_v30, 0.0  ;;  %v286_v41 = vmax.f32 %v233_v31, 0.0  ;;  %v197_v42 = vadd.f32 %v196_v38, %v584_v23  ;;  %v237_v43 = vadd.f32 %v236_v39, %v584_v23 }
  0xea   :  { %v271_v44 = vmax.f32 %v195_v36, 0.0  ;;  %v287_v45 = vmax.f32 %v235_v37, 0.0 }
  0xeb   :  { %v457_v46 = vpack.c.bf16 %v270_v40, %v269_v34  ;;  %v465_v47 = vpack.c.bf16 %v286_v41, %v285_v35  ;;  %v272_v48 = vmax.f32 %v197_v42, 0.0  ;;  %v288_v49 = vmax.f32 %v237_v43, 0.0 }
  0xed   :  { %397 = vst [vmem:[%s669_s3] sm:$0xff] %v457_v46  ;;  %405 = vst [vmem:[%s669_s3 + $0x40] sm:$0xff] %v465_v47  ;;  %v458_v50 = vpack.c.bf16 %v272_v48, %v271_v44  ;;  %v466_v51 = vpack.c.bf16 %v288_v49, %v287_v45  ;;  %v200_v52 = vpop.f32.mrb[4].mxu0  ;;  %v240_v53 = vpop.f32.mrb[4].mxu1 }
  0xee   :  { %v201_v54 = vadd.f32 %v200_v52, %v582_v22  ;;  %v241_v55 = vadd.f32 %v240_v53, %v582_v22  ;;  %v202_v56 = vpop.f32.mrb[5].mxu0  ;;  %v242_v57 = vpop.f32.mrb[5].mxu1 }
  0xef   :  { %398 = vst [vmem:[%s669_s3 + $0x8] sm:$0xff] %v458_v50  ;;  %406 = vst [vmem:[%s669_s3 + $0x48] sm:$0xff] %v466_v51  ;;  %v203_v58 = vadd.f32 %v202_v56, %v584_v23  ;;  %v243_v59 = vadd.f32 %v242_v57, %v584_v23  ;;  %v204_v60 = vpop.f32.mrb[6].mxu0  ;;  %v244_v61 = vpop.f32.mrb[6].mxu1 }
  0xf0   :  { %v273_v62 = vmax.f32 %v201_v54, 0.0  ;;  %v289_v63 = vmax.f32 %v241_v55, 0.0  ;;  %v205_v0 = vadd.f32 %v204_v60, %v582_v22  ;;  %v245_v1 = vadd.f32 %v244_v61, %v582_v22  ;;  %v206_v2 = vpop.f32.mrb[7].mxu0  ;;  %v246_v3 = vpop.f32.mrb[7].mxu1 }
  0xf1   :  { %v274_v4 = vmax.f32 %v203_v58, 0.0  ;;  %v290_v5 = vmax.f32 %v243_v59, 0.0  ;;  %v207_v6 = vadd.f32 %v206_v2, %v584_v23  ;;  %v247_v7 = vadd.f32 %v246_v3, %v584_v23 }
  0xf2   :  { %v275_v8 = vmax.f32 %v205_v0, 0.0  ;;  %v291_v9 = vmax.f32 %v245_v1, 0.0 }
  0xf3   :  { %v459_v10 = vpack.c.bf16 %v274_v4, %v273_v62  ;;  %v467_v11 = vpack.c.bf16 %v290_v5, %v289_v63  ;;  %v276_v12 = vmax.f32 %v207_v6, 0.0  ;;  %v292_v13 = vmax.f32 %v247_v7, 0.0 }
  0xf5   :  { %399 = vst [vmem:[%s669_s3 + $0x10] sm:$0xff] %v459_v10  ;;  %407 = vst [vmem:[%s669_s3 + $0x50] sm:$0xff] %v467_v11  ;;  %v460_v14 = vpack.c.bf16 %v276_v12, %v275_v8  ;;  %v468_v15 = vpack.c.bf16 %v292_v13, %v291_v9  ;;  %v210_v16 = vpop.f32.mrb[8].mxu0  ;;  %v250_v17 = vpop.f32.mrb[8].mxu1 }
  0xf6   :  { %v211_v18 = vadd.f32 %v210_v16, %v582_v22  ;;  %v251_v19 = vadd.f32 %v250_v17, %v582_v22  ;;  %v212_v20 = vpop.f32.mrb[9].mxu0  ;;  %v252_v21 = vpop.f32.mrb[9].mxu1 }
  0xf7   :  { %400 = vst [vmem:[%s669_s3 + $0x18] sm:$0xff] %v460_v14  ;;  %408 = vst [vmem:[%s669_s3 + $0x58] sm:$0xff] %v468_v15  ;;  %v213_v24 = vadd.f32 %v212_v20, %v584_v23  ;;  %v253_v25 = vadd.f32 %v252_v21, %v584_v23  ;;  %v214_v26 = vpop.f32.mrb[10].mxu0  ;;  %v254_v27 = vpop.f32.mrb[10].mxu1 }
  0xf8   :  { %v277_v28 = vmax.f32 %v211_v18, 0.0  ;;  %v293_v29 = vmax.f32 %v251_v19, 0.0  ;;  %v215_v30 = vadd.f32 %v214_v26, %v582_v22  ;;  %v255_v31 = vadd.f32 %v254_v27, %v582_v22  ;;  %v216_v32 = vpop.f32.mrb[11].mxu0  ;;  %v256_v33 = vpop.f32.mrb[11].mxu1 }
  0xf9   :  { %v278_v34 = vmax.f32 %v213_v24, 0.0  ;;  %v294_v35 = vmax.f32 %v253_v25, 0.0  ;;  %v217_v36 = vadd.f32 %v216_v32, %v584_v23  ;;  %v257_v37 = vadd.f32 %v256_v33, %v584_v23 }
  0xfa   :  { %v279_v38 = vmax.f32 %v215_v30, 0.0  ;;  %v295_v39 = vmax.f32 %v255_v31, 0.0 }
  0xfb   :  { %v461_v40 = vpack.c.bf16 %v278_v34, %v277_v28  ;;  %v469_v41 = vpack.c.bf16 %v294_v35, %v293_v29  ;;  %v280_v42 = vmax.f32 %v217_v36, 0.0  ;;  %v296_v43 = vmax.f32 %v257_v37, 0.0 }
  0xfd   :  { %401 = vst [vmem:[%s669_s3 + $0x20] sm:$0xff] %v461_v40  ;;  %409 = vst [vmem:[%s669_s3 + $0x60] sm:$0xff] %v469_v41  ;;  %v462_v44 = vpack.c.bf16 %v280_v42, %v279_v38  ;;  %v470_v45 = vpack.c.bf16 %v296_v43, %v295_v39  ;;  %v220_v46 = vpop.f32.mrb[12].mxu0  ;;  %v260_v47 = vpop.f32.mrb[12].mxu1 }
  0xfe   :  { %v221_v48 = vadd.f32 %v220_v46, %v582_v22  ;;  %v261_v49 = vadd.f32 %v260_v47, %v582_v22  ;;  %v222_v50 = vpop.f32.mrb[13].mxu0  ;;  %v262_v51 = vpop.f32.mrb[13].mxu1 }
  0xff   :  { %402 = vst [vmem:[%s669_s3 + $0x28] sm:$0xff] %v462_v44  ;;  %410 = vst [vmem:[%s669_s3 + $0x68] sm:$0xff] %v470_v45  ;;  %v223_v52 = vadd.f32 %v222_v50, %v584_v23  ;;  %v263_v53 = vadd.f32 %v262_v51, %v584_v23  ;;  %v224_v54 = vpop.f32.mrb[14].mxu0  ;;  %v264_v55 = vpop.f32.mrb[14].mxu1 }
 0x100   :  { %v281_v56 = vmax.f32 %v221_v48, 0.0  ;;  %v297_v57 = vmax.f32 %v261_v49, 0.0  ;;  %v225_v58 = vadd.f32 %v224_v54, %v582_v22  ;;  %v265_v59 = vadd.f32 %v264_v55, %v582_v22  ;;  %v226_v60 = vpop.f32.mrb[15].mxu0  ;;  %v266_v61 = vpop.f32.mrb[15].mxu1 }
 0x101   :  { %v282_v62 = vmax.f32 %v223_v52, 0.0  ;;  %v298_v63 = vmax.f32 %v263_v53, 0.0  ;;  %v227_v0 = vadd.f32 %v226_v60, %v584_v23  ;;  %v267_v1 = vadd.f32 %v266_v61, %v584_v23 }
 0x102   :  { %v283_v2 = vmax.f32 %v225_v58, 0.0  ;;  %v299_v3 = vmax.f32 %v265_v59, 0.0 }
 0x103   :  { %v463_v4 = vpack.c.bf16 %v282_v62, %v281_v56  ;;  %v471_v5 = vpack.c.bf16 %v298_v63, %v297_v57  ;;  %v284_v6 = vmax.f32 %v227_v0, 0.0  ;;  %v300_v7 = vmax.f32 %v267_v1, 0.0 }
 0x105   :  { %403 = vst [vmem:[%s669_s3 + $0x30] sm:$0xff] %v463_v4  ;;  %411 = vst [vmem:[%s669_s3 + $0x70] sm:$0xff] %v471_v5  ;;  %v464_v22 = vpack.c.bf16 %v284_v6, %v283_v2  ;;  %v472_v8 = vpack.c.bf16 %v300_v7, %v299_v3 }
 0x107   :  { %404 = vst [vmem:[%s669_s3 + $0x38] sm:$0xff] %v464_v22  ;;  %412 = vst [vmem:[%s669_s3 + $0x78] sm:$0xff] %v472_v8 }

// kernel: cvae_forward.11
= control target key start
LH: loop header
LB: loop body
LE: loop exit
PB: predicated region body
PF: predicated region fallthrough
CT: control target
= control target key end

     0   :  { %s797_s12 = smov 0   ;;  %s967_s0 = inlined_call_operand.vmem [shape: bf16[512,64], index: 0, kind: input, shape index: {}]   ;;  %s968_s1 = inlined_call_operand.vmem [shape: bf16[64,8], index: 1, kind: input, shape index: {}]   ;;  %s969_s2 = inlined_call_operand.vmem [shape: f32[1,8], index: 2, kind: input, shape index: {}]   ;;  %s970_s3 = inlined_call_operand.vmem [shape: f32[512,8], index: 3, kind: output, shape index: {}]  }
   0x1 LB: > { %s625_s13 = sadd.s32 4294967295, %s775_s12   ;;  %p629_p0 = scmp.ge.s32.totalorder %s775_s12, 1  ;;  %s775_s12 = sphi %s797_s12, %s13_s12  }
   0x2   : > { %p138_p1 = scmp.lt.s32.totalorder %s775_s12, 3 }
   0x4   : > { %p139_p2 = pnand %p629_p0, %p138_p1 }
   0x5   : > { %v749_v0 = vld [vmem:[%s968_s1] sm:$0xff] (!%p139_p2)   ;;  %s630_s16 = sshll.u32 (!%p139_p2), %s625_s13, 5  ;;  %v750_v1 = vld [vmem:[%s968_s1 + $0x8] sm:$0xff] (!%p139_p2)   ;;  %v751_v2 = vld [vmem:[%s968_s1 + $0x10] sm:$0xff] (!%p139_p2)   ;;  %vm326_vm0 = vcmask (!%p139_p2), 523264   ;;  %vm536_vm1 = vcmask (!%p139_p2), 64512  }
   0x6   : > { %142 = sbr.rel (%p139_p2) target bundleno = 264 (0x108), region = 32  ;;  %p163_p3 = scmp.lt.s32.totalorder (!%p139_p2), %s630_s16, 63  ;;  %693 = vmatprep.subr.bf16.mxu0 (!%p139_p2), %v749_v0  ;;  %733 = vmatprep.subr.bf16.mxu1 (!%p139_p2), %v749_v0  ;;  %v752_v3 = vld [vmem:[%s968_s1 + $0x18] sm:$0xff] (!%p139_p2)   ;;  %v861_v20 = vld [vmem:[%s969_s2] ss:$0 sm:$0xff] (!%p139_p2) }
   0x7   : > { %694 = vmatpush3.bf16.msra.mxu0 (!%p139_p2), %v749_v0  ;;  %737 = vmatpush3.bf16.msra.mxu1 (!%p139_p2), %v749_v0 }
   0x8   : > { %695 = vmatprep.subr.bf16.mxu0 (!%p139_p2), %v750_v1  ;;  %734 = vmatprep.subr.bf16.mxu1 (!%p139_p2), %v750_v1 }
   0xb   : > { %696 = vmatpush3.bf16.msra.mxu0 (!%p139_p2), %v750_v1  ;;  %738 = vmatpush3.bf16.msra.mxu1 (!%p139_p2), %v750_v1 }
   0xc   : > { %697 = vmatprep.subr.bf16.mxu0 (!%p139_p2), %v751_v2  ;;  %735 = vmatprep.subr.bf16.mxu1 (!%p139_p2), %v751_v2 }
   0xd   : > { %s972_s16 = smov (!%p163_p3, %s630_s16), 63 }
   0xe   : > { %s631_s21 = sshll.u32 %s972_s16, 2  ;;  %s633_s27 = sshll.u32 %s972_s16, 3 }
   0xf   : > { %s823_s26 = scalar_lea.vmem %s967_s0, %s631_s21  ;;  %698 = vmatpush3.bf16.msra.mxu0 %v751_v2  ;;  %739 = vmatpush3.bf16.msra.mxu1 %v751_v2  ;;  %s866_s5 = scalar_lea.vmem %s970_s3, %s633_s27 }
  0x10   : > { %v753_v4 = vld [vmem:[%s823_s26] sm:$0xff]   ;;  %699 = vmatprep.subr.bf16.mxu0 %v752_v3  ;;  %736 = vmatprep.subr.bf16.mxu1 %v752_v3  ;;  %v755_v6 = vld [vmem:[%s823_s26 + $0x8] sm:$0xff]   ;;  %v757_v8 = vld [vmem:[%s823_s26 + $0x10] sm:$0xff]  }
  0x11   : > { %v754_v5 = vld [vmem:[%s823_s26 + $0x40] sm:$0xff]   ;;  %701 = vmatprep.mubr.msk.bf16.mxu0 %vm326_vm0, %v753_v4  ;;  %v756_v7 = vld [vmem:[%s823_s26 + $0x48] sm:$0xff]   ;;  %v758_v9 = vld [vmem:[%s823_s26 + $0x50] sm:$0xff]  }
  0x12   : > { %717 = vmatprep.mubr.msk.bf16.mxu1 %vm326_vm0, %v754_v5  ;;  %v759_v10 = vld [vmem:[%s823_s26 + $0x18] sm:$0xff]   ;;  %v761_v12 = vld [vmem:[%s823_s26 + $0x20] sm:$0xff]   ;;  %v763_v14 = vld [vmem:[%s823_s26 + $0x28] sm:$0xff]  }
  0x13   : > { %700 = vmatpush3.bf16.msra.mxu0 %v752_v3  ;;  %740 = vmatpush3.bf16.msra.mxu1 %v752_v3  ;;  %v760_v11 = vld [vmem:[%s823_s26 + $0x58] sm:$0xff]   ;;  %v762_v13 = vld [vmem:[%s823_s26 + $0x60] sm:$0xff]   ;;  %v764_v15 = vld [vmem:[%s823_s26 + $0x68] sm:$0xff]  }
  0x14   : > { %v765_v16 = vld [vmem:[%s823_s26 + $0x30] sm:$0xff]   ;;  %v767_v18 = vld [vmem:[%s823_s26 + $0x38] sm:$0xff]  }
  0x15   : > { %v766_v17 = vld [vmem:[%s823_s26 + $0x70] sm:$0xff]   ;;  %v768_v19 = vld [vmem:[%s823_s26 + $0x78] sm:$0xff]  }
  0x16   : > { %702 = vmatmul.mubr.msk.bf16.vlgmr.msra.gmra.mrb[0].mxu0 %vm326_vm0, %v755_v6  ;;  %718 = vmatmul.mubr.msk.bf16.vlgmr.msra.gmra.mrb[0].mxu1 %vm326_vm0, %v756_v7 }
  0x17   : > { %705 = vmatprep.mubr.msk.bf16.mxu0 %vm326_vm0, %v757_v8  ;;  %721 = vmatprep.mubr.msk.bf16.mxu1 %vm326_vm0, %v758_v9 }
  0x1e   : > { %706 = vmatmul.mubr.msk.bf16.gmra.mrb[4].mxu0 %vm326_vm0, %v759_v10  ;;  %722 = vmatmul.mubr.msk.bf16.gmra.mrb[4].mxu1 %vm326_vm0, %v760_v11 }
  0x1f   : > { %709 = vmatprep.mubr.msk.bf16.mxu0 %vm326_vm0, %v761_v12  ;;  %725 = vmatprep.mubr.msk.bf16.mxu1 %vm326_vm0, %v762_v13 }
  0x26   : > { %710 = vmatmul.mubr.msk.bf16.gmra.mrb[8].mxu0 %vm326_vm0, %v763_v14  ;;  %726 = vmatmul.mubr.msk.bf16.gmra.mrb[8].mxu1 %vm326_vm0, %v764_v15 }
  0x27   : > { %713 = vmatprep.mubr.msk.bf16.mxu0 %vm326_vm0, %v765_v16  ;;  %729 = vmatprep.mubr.msk.bf16.mxu1 %vm326_vm0, %v766_v17 }
  0x2e   : > { %714 = vmatmul.mubr.msk.bf16.gmra.mrb[12].mxu0 %vm326_vm0, %v767_v18  ;;  %730 = vmatmul.mubr.msk.bf16.gmra.mrb[12].mxu1 %vm326_vm0, %v768_v19 }
  0xe9   : > { %v703_v21 = vpop.f32.mrb[0].mxu0  ;;  %v719_v22 = vpop.f32.mrb[0].mxu1 }
  0xea   : > { %v418_v23 = vadd.f32 %v703_v21, %v861_v20  ;;  %v482_v24 = vadd.f32 %v719_v22, %v861_v20  ;;  %v409_v25 = vpop.f32.mrb[1].mxu0  ;;  %v473_v26 = vpop.f32.mrb[1].mxu1 }
  0xeb   : > { %v410_v27 = vadd.f32 %v861_v20, %v409_v25  ;;  %v474_v28 = vadd.f32 %v861_v20, %v473_v26  ;;  %v704_v29 = vpop.f32.mrb[2].mxu0  ;;  %v720_v30 = vpop.f32.mrb[2].mxu1 }
  0xec   : > { %539 = vst.msk [vmem:[%s866_s5 + $0x10] sm:$0xff] %vm536_vm1, %v418_v23  ;;  %555 = vst.msk [vmem:[%s866_s5 + $0x90] sm:$0xff] %vm536_vm1, %v482_v24  ;;  %v421_v31 = vadd.f32 %v704_v29, %v861_v20  ;;  %v485_v32 = vadd.f32 %v720_v30, %v861_v20  ;;  %v412_v33 = vpop.f32.mrb[3].mxu0  ;;  %v476_v34 = vpop.f32.mrb[3].mxu1 }
  0xed   : > { %537 = vst.msk [vmem:[%s866_s5] sm:$0xff] %vm536_vm1, %v410_v27  ;;  %553 = vst.msk [vmem:[%s866_s5 + $0x80] sm:$0xff] %vm536_vm1, %v474_v28  ;;  %v413_v35 = vadd.f32 %v861_v20, %v412_v33  ;;  %v477_v36 = vadd.f32 %v861_v20, %v476_v34 }
  0xee   : > { %540 = vst.msk [vmem:[%s866_s5 + $0x18] sm:$0xff] %vm536_vm1, %v421_v31  ;;  %556 = vst.msk [vmem:[%s866_s5 + $0x98] sm:$0xff] %vm536_vm1, %v485_v32 }
  0xef   : > { %538 = vst.msk [vmem:[%s866_s5 + $0x8] sm:$0xff] %vm536_vm1, %v413_v35  ;;  %554 = vst.msk [vmem:[%s866_s5 + $0x88] sm:$0xff] %vm536_vm1, %v477_v36 }
  0xf1   : > { %v707_v37 = vpop.f32.mrb[4].mxu0  ;;  %v723_v38 = vpop.f32.mrb[4].mxu1 }
  0xf2   : > { %v434_v39 = vadd.f32 %v707_v37, %v861_v20  ;;  %v498_v40 = vadd.f32 %v723_v38, %v861_v20  ;;  %v425_v41 = vpop.f32.mrb[5].mxu0  ;;  %v489_v42 = vpop.f32.mrb[5].mxu1 }
  0xf3   : > { %v426_v43 = vadd.f32 %v861_v20, %v425_v41  ;;  %v490_v44 = vadd.f32 %v861_v20, %v489_v42  ;;  %v708_v45 = vpop.f32.mrb[6].mxu0  ;;  %v724_v46 = vpop.f32.mrb[6].mxu1 }
  0xf4   : > { %543 = vst.msk [vmem:[%s866_s5 + $0x30] sm:$0xff] %vm536_vm1, %v434_v39  ;;  %559 = vst.msk [vmem:[%s866_s5 + $0xb0] sm:$0xff] %vm536_vm1, %v498_v40  ;;  %v437_v47 = vadd.f32 %v708_v45, %v861_v20  ;;  %v501_v48 = vadd.f32 %v724_v46, %v861_v20  ;;  %v428_v49 = vpop.f32.mrb[7].mxu0  ;;  %v492_v50 = vpop.f32.mrb[7].mxu1 }
  0xf5   : > { %541 = vst.msk [vmem:[%s866_s5 + $0x20] sm:$0xff] %vm536_vm1, %v426_v43  ;;  %557 = vst.msk [vmem:[%s866_s5 + $0xa0] sm:$0xff] %vm536_vm1, %v490_v44  ;;  %v429_v51 = vadd.f32 %v861_v20, %v428_v49  ;;  %v493_v52 = vadd.f32 %v861_v20, %v492_v50 }
  0xf6   : > { %544 = vst.msk [vmem:[%s866_s5 + $0x38] sm:$0xff] %vm536_vm1, %v437_v47  ;;  %560 = vst.msk [vmem:[%s866_s5 + $0xb8] sm:$0xff] %vm536_vm1, %v501_v48 }
  0xf7   : > { %542 = vst.msk [vmem:[%s866_s5 + $0x28] sm:$0xff] %vm536_vm1, %v429_v51  ;;  %558 = vst.msk [vmem:[%s866_s5 + $0xa8] sm:$0xff] %vm536_vm1, %v493_v52 }
  0xf9   : > { %v711_v53 = vpop.f32.mrb[8].mxu0  ;;  %v727_v54 = vpop.f32.mrb[8].mxu1 }
  0xfa   : > { %v450_v55 = vadd.f32 %v711_v53, %v861_v20  ;;  %v514_v56 = vadd.f32 %v727_v54, %v861_v20  ;;  %v441_v57 = vpop.f32.mrb[9].mxu0  ;;  %v505_v58 = vpop.f32.mrb[9].mxu1 }
  0xfb   : > { %v442_v59 = vadd.f32 %v861_v20, %v441_v57  ;;  %v506_v60 = vadd.f32 %v861_v20, %v505_v58  ;;  %v712_v61 = vpop.f32.mrb[10].mxu0  ;;  %v728_v62 = vpop.f32.mrb[10].mxu1 }
  0xfc   : > { %547 = vst.msk [vmem:[%s866_s5 + $0x50] sm:$0xff] %vm536_vm1, %v450_v55  ;;  %563 = vst.msk [vmem:[%s866_s5 + $0xd0] sm:$0xff] %vm536_vm1, %v514_v56  ;;  %v453_v63 = vadd.f32 %v712_v61, %v861_v20  ;;  %v517_v0 = vadd.f32 %v728_v62, %v861_v20  ;;  %v444_v1 = vpop.f32.mrb[11].mxu0  ;;  %v508_v2 = vpop.f32.mrb[11].mxu1 }
  0xfd   : > { %545 = vst.msk [vmem:[%s866_s5 + $0x40] sm:$0xff] %vm536_vm1, %v442_v59  ;;  %561 = vst.msk [vmem:[%s866_s5 + $0xc0] sm:$0xff] %vm536_vm1, %v506_v60  ;;  %v445_v3 = vadd.f32 %v861_v20, %v444_v1  ;;  %v509_v4 = vadd.f32 %v861_v20, %v508_v2 }
  0xfe   : > { %548 = vst.msk [vmem:[%s866_s5 + $0x58] sm:$0xff] %vm536_vm1, %v453_v63  ;;  %564 = vst.msk [vmem:[%s866_s5 + $0xd8] sm:$0xff] %vm536_vm1, %v517_v0 }
  0xff   : > { %546 = vst.msk [vmem:[%s866_s5 + $0x48] sm:$0xff] %vm536_vm1, %v445_v3  ;;  %562 = vst.msk [vmem:[%s866_s5 + $0xc8] sm:$0xff] %vm536_vm1, %v509_v4 }
 0x101   : > { %v715_v5 = vpop.f32.mrb[12].mxu0  ;;  %v731_v6 = vpop.f32.mrb[12].mxu1 }
 0x102   : > { %v466_v7 = vadd.f32 %v715_v5, %v861_v20  ;;  %v530_v8 = vadd.f32 %v731_v6, %v861_v20  ;;  %v457_v9 = vpop.f32.mrb[13].mxu0  ;;  %v521_v10 = vpop.f32.mrb[13].mxu1 }
 0x103   : > { %v458_v11 = vadd.f32 %v861_v20, %v457_v9  ;;  %v522_v12 = vadd.f32 %v861_v20, %v521_v10  ;;  %v716_v13 = vpop.f32.mrb[14].mxu0  ;;  %v732_v14 = vpop.f32.mrb[14].mxu1 }
 0x104   : > { %551 = vst.msk [vmem:[%s866_s5 + $0x70] sm:$0xff] %vm536_vm1, %v466_v7  ;;  %567 = vst.msk [vmem:[%s866_s5 + $0xf0] sm:$0xff] %vm536_vm1, %v530_v8  ;;  %v469_v15 = vadd.f32 %v716_v13, %v861_v20  ;;  %v533_v16 = vadd.f32 %v732_v14, %v861_v20  ;;  %v460_v17 = vpop.f32.mrb[15].mxu0  ;;  %v524_v18 = vpop.f32.mrb[15].mxu1 }
 0x105   : > { %549 = vst.msk [vmem:[%s866_s5 + $0x60] sm:$0xff] %vm536_vm1, %v458_v11  ;;  %565 = vst.msk [vmem:[%s866_s5 + $0xe0] sm:$0xff] %vm536_vm1, %v522_v12  ;;  %v461_v19 = vadd.f32 %v861_v20, %v460_v17  ;;  %v525_v21 = vadd.f32 %v861_v20, %v524_v18 }
 0x106   : > { %552 = vst.msk [vmem:[%s866_s5 + $0x78] sm:$0xff] %vm536_vm1, %v469_v15  ;;  %568 = vst.msk [vmem:[%s866_s5 + $0xf8] sm:$0xff] %vm536_vm1, %v533_v16 }
 0x107   : > { %550 = vst.msk [vmem:[%s866_s5 + $0x68] sm:$0xff] %vm536_vm1, %v461_v19  ;;  %566 = vst.msk [vmem:[%s866_s5 + $0xe8] sm:$0xff] %vm536_vm1, %v525_v21 }
 0x108 PF: > { %s13_s12 = sadd.s32 1, %s775_s12  }
 0x109   : > { %p10_p4 = scmp.ge.s32.totalorder %s13_s12, 4  }
 0x10b   :  { %12 = sbr.rel (!%p10_p4) target bundleno = 1 (0x1), region = 62 }

// kernel: cvae_forward.8
= control target key start
LH: loop header
LB: loop body
LE: loop exit
PB: predicated region body
PF: predicated region fallthrough
CT: control target
= control target key end

     0   :  { %s13964_s0 = inlined_call_operand.vmem [shape: bf16[2,16,128], index: 0, kind: input, shape index: {}]   ;;  %s13965_s1 = inlined_call_operand.vmem [shape: f32[22,1], index: 1, kind: input, shape index: {}]   ;;  %s13966_s2 = inlined_call_operand.vmem [shape: f32[2,16,8], index: 2, kind: input, shape index: {}]   ;;  %s13967_s3 = inlined_call_operand.vmem [shape: bf16[1152,128], index: 3, kind: input, shape index: {}]   ;;  %s13968_s4 = inlined_call_operand.vmem [shape: f32[1,128], index: 4, kind: input, shape index: {}]   ;;  %s13969_s5 = inlined_call_operand.vmem [shape: bf16[1152,128], index: 5, kind: input, shape index: {}]   ;;  %s13970_s6 = inlined_call_operand.vmem [shape: f32[1,128], index: 6, kind: input, shape index: {}]   ;;  %s13971_s7 = inlined_call_operand.vmem [shape: bf16[1152,128], index: 7, kind: input, shape index: {}]   ;;  %s13972_s8 = inlined_call_operand.vmem [shape: f32[1,128], index: 8, kind: input, shape index: {}]   ;;  %s13973_s9 = inlined_call_operand.hbm [shape: bf16[1152,128], index: 9, kind: input, shape index: {}]   ;;  %s13974_s10 = inlined_call_operand.vmem [shape: f32[1,128], index: 10, kind: input, shape index: {}]   ;;  %s13975_s11 = inlined_call_operand.vmem [shape: bf16[128,16], index: 11, kind: input, shape index: {}]   ;;  %s13976_s12 = inlined_call_operand.vmem [shape: f32[1,16], index: 12, kind: input, shape index: {}]   ;;  %s13977_s13 = inlined_call_operand.vmem [shape: bf16[8,128], index: 13, kind: input, shape index: {}]   ;;  %s13978_s14 = inlined_call_operand.vmem [shape: f32[2,1,128], index: 14, kind: input, shape index: {}]   ;;  %s13979_s15 = inlined_call_operand.hbm [shape: bf16[1152,128], index: 15, kind: input, shape index: {}]   ;;  %s13980_s16 = inlined_call_operand.vmem [shape: f32[1,128], index: 16, kind: input, shape index: {}]   ;;  %s13981_s17 = inlined_call_operand.hbm [shape: bf16[1152,128], index: 17, kind: input, shape index: {}]   ;;  %s13982_s18 = inlined_call_operand.vmem [shape: f32[1,128], index: 18, kind: input, shape index: {}]   ;;  %s13983_s19 = inlined_call_operand.hbm [shape: bf16[1152,128], index: 19, kind: input, shape index: {}]   ;;  %s13984_s20 = inlined_call_operand.vmem [shape: f32[1,128], index: 20, kind: input, shape index: {}]   ;;  %s13985_s21 = inlined_call_operand.hbm [shape: bf16[1152,128], index: 21, kind: input, shape index: {}]   ;;  %s13986_s22 = inlined_call_operand.vmem [shape: f32[1,128], index: 22, kind: input, shape index: {}]   ;;  %s13987_s23 = inlined_call_operand.vmem [shape: f32[2,16,16], index: 23, kind: output, shape index: {0}]   ;;  %s13988_s24 = inlined_call_operand.vmem [shape: bf16[2,16,128], index: 24, kind: output, shape index: {1}]  }
   0x1   :  { %13996 = sst [smem:[#allocation16_spill]] %s13964_s0 }
   0x2   :  { %13997 = sst [smem:[#allocation17_spill]] %s13965_s1 }
   0x3   :  { %13998 = sst [smem:[#allocation18_spill]] %s13966_s2 }
   0x4   :  { %13999 = sst [smem:[#allocation19_spill]] %s13967_s3 }
   0x5   :  { %14000 = sst [smem:[#allocation20_spill]] %s13968_s4 }
   0x6   :  { %14001 = sst [smem:[#allocation21_spill]] %s13969_s5 }
   0x7   :  { %14002 = sst [smem:[#allocation22_spill]] %s13970_s6 }
   0x8   :  { %14003 = sst [smem:[#allocation23_spill]] %s13971_s7 }
   0x9   :  { %14004 = sst [smem:[#allocation24_spill]] %s13972_s8 }
   0xa   :  { %14005 = sst [smem:[#allocation25_spill]] %s13982_s18 }
   0xb   :  { %14006 = sst [smem:[#allocation26_spill]] %s13984_s20 }
   0xc   :  { %14007 = sst [smem:[#allocation27_spill]] %s13986_s22 }
   0xd   :  { %14008 = sst [smem:[#allocation28_spill]] %s13988_s24 }
   0xe   :  { %30 = vsyncpa [#allocation5], 0 }
   0xf   :  { %31 = vsyncpa [#allocation7], 0 }
  0x10   :  { %32 = vsyncpa [#allocation10], 0  ;;  %s12504_s5 = smov 0  }
  0x11 LB: > { %14009 = sst [smem:[#allocation15_spill]] %s12366_s5  ;;  %s12510_s26 = sadd.s32 4294967295, %s12366_s5   ;;  %s12366_s5 = sphi %s12504_s5, %s38_s5  }
  0x12   : > { %p9493_p0 = scmp.ge.s32.totalorder %s12366_s5, 1  ;;  %p593_p1 = scmp.lt.s32.totalorder %s12366_s5, 3 }
  0x13   : > { %p13994_p2 = scmp.eq.s32.totalorder %s12510_s26, 0  ;;  %s12368_s28 = smov [#allocation6]  }
  0x14   : > { %p12515_p3 = pnand %p9493_p0, %p593_p1  ;;  %s651_s6 = sshll.u32 %s12368_s28, 4  ;;  %s12519_s6 = int_to_ptr.vmem [resolvable:$true] %s651_s6 }
  0x15   : > { %s12369_s2 = smov [#allocation9]   ;;  %s12370_s7 = smov [#allocation4]  }
  0x16   : > { %s14010_s27 = scalar_select %p12515_p3, 1, 0 }
  0x17   : > { %p11472_p4 = pneg %p12515_p3  ;;  %s683_s29 = sshll.u32 %s12369_s2, 4  ;;  %s12523_s29 = int_to_ptr.vmem [resolvable:$true] %s683_s29 }
  0x18   : > { %s626_s30 = sshll.u32 %s12370_s7, 4  ;;  %s12371_s3 = smov [#allocation8]   ;;  %s12531_s30 = int_to_ptr.vmem [resolvable:$true] %s626_s30 }
  0x19   : > { %p12527_p5 = pnand %p13994_p2, %p11472_p4  ;;  %s12533_s25 = sshll.u32 %s12371_s3, 4  ;;  %s668_s25 = int_to_ptr.vmem [resolvable:$true] %s12533_s25 }
  0x1a   : > { %s12208_s1 = scalar_lea.hbm %s13979_s15, 9216 }
  0x1b   : > { %p12209_p6 = scmp.ne.s32.totalorder %s13979_s15, %s12208_s1  ;;  %p12543_p7 = pneg %p12527_p5 }
  0x1c   : > { %p12215_p10 = scmp.lt.u32.totalorder %s12208_s1, %s13979_s15 }
  0x1d   : > { %p12211_p8 = pnand %p12543_p7, %p12209_p6 }
  0x1f   : > { %p12212_p9 = pneg %p12211_p8 }
  0x21   : > { %p12217_p11 = pnand %p12215_p10, %p12212_p9 }
  0x23   : > { %12220 = shalt.err (!%p12217_p11)
}
  0x24   : > { %s12221_s8 = scalar_lea.vmem %s12519_s6, 9216  ;;  %p12229_p1 = scmp.lt.s32.totalorder %s12519_s6, %s12519_s6 }
  0x25   : > { %p12222_p12 = scmp.ne.s32.totalorder %s12519_s6, %s12221_s8  ;;  %p12230_p4 = scmp.lt.s32.totalorder %s12221_s8, %s12221_s8 }
  0x27   : > { %p12224_p13 = pnand %p12222_p12, %p12543_p7  ;;  %p12231_p6 = por %p12230_p4, %p12229_p1 }
  0x29   : > { %p12225_p0 = pneg %p12224_p13 }
  0x2b   : > { %p12232_p8 = pnand %p12231_p6, %p12225_p0 }
  0x2d   : > { %12235 = shalt.err (!%p12232_p8)
}
  0x2e   : > { %s12372_s4 = smov 64   ;;  %s12373_s1 = smov 4  }
  0x2f   : > { %11478 = dma.hbm_to_vmem [thread:$0]  (!%p12527_p5), %s13979_s15, 9216, %s12519_s6, [#allocation7], %s12372_s4, %s12372_s4, %s12373_s1  }
  0x30   : > { %s12236_s8 = scalar_lea.hbm %s13983_s19, 9216 }
  0x31   : > { %p12237_p9 = scmp.ne.s32.totalorder %s13983_s19, %s12236_s8  ;;  %p12243_p12 = scmp.lt.u32.totalorder %s12236_s8, %s13983_s19 }
  0x33   : > { %p12239_p10 = pnand %p12237_p9, %p12543_p7 }
  0x35   : > { %p12240_p11 = pneg %p12239_p10 }
  0x37   : > { %p12245_p13 = pnand %p12243_p12, %p12240_p11 }
  0x39   : > { %12248 = shalt.err (!%p12245_p13)
}
  0x3a   : > { %s12249_s6 = scalar_lea.vmem %s12523_s29, 9216  ;;  %p12257_p6 = scmp.lt.s32.totalorder %s12523_s29, %s12523_s29 }
  0x3b   : > { %p12250_p0 = scmp.ne.s32.totalorder %s12523_s29, %s12249_s6  ;;  %p12258_p8 = scmp.lt.s32.totalorder %s12249_s6, %s12249_s6 }
  0x3d   : > { %p12252_p1 = pnand %p12250_p0, %p12543_p7  ;;  %p12259_p9 = por %p12258_p8, %p12257_p6 }
  0x3f   : > { %p12253_p4 = pneg %p12252_p1 }
  0x41   : > { %p12260_p10 = pnand %p12259_p9, %p12253_p4 }
  0x43   : > { %12263 = shalt.err (!%p12260_p10)
}
  0x44   : > { %11484 = dma.hbm_to_vmem [thread:$0]  (!%p12527_p5), %s13983_s19, 9216, %s12523_s29, [#allocation10], %s12372_s4, %s12372_s4, %s12373_s1  }
  0x45   : > { %s12264_s28 = scalar_lea.hbm %s13973_s9, 9216 }
  0x46   : > { %p12265_p11 = scmp.ne.s32.totalorder %s13973_s9, %s12264_s28  ;;  %p12271_p0 = scmp.lt.u32.totalorder %s12264_s28, %s13973_s9 }
  0x48   : > { %p12267_p12 = pnand %p12265_p11, %p12543_p7 }
  0x4a   : > { %p12268_p13 = pneg %p12267_p12 }
  0x4c   : > { %p12273_p1 = pnand %p12271_p0, %p12268_p13 }
  0x4e   : > { %12276 = shalt.err (!%p12273_p1)
}
  0x4f   : > { %s12277_s29 = scalar_lea.vmem %s12531_s30, 9216  ;;  %p12285_p9 = scmp.lt.s32.totalorder %s12531_s30, %s12531_s30 }
  0x50   : > { %p12278_p4 = scmp.ne.s32.totalorder %s12531_s30, %s12277_s29  ;;  %p12286_p10 = scmp.lt.s32.totalorder %s12277_s29, %s12277_s29 }
  0x52   : > { %p12280_p6 = pnand %p12278_p4, %p12543_p7  ;;  %p12287_p11 = por %p12286_p10, %p12285_p9 }
  0x54   : > { %p12281_p8 = pneg %p12280_p6 }
  0x56   : > { %p12288_p12 = pnand %p12287_p11, %p12281_p8 }
  0x58   : > { %12291 = shalt.err (!%p12288_p12)
}
  0x59   : > { %11475 = dma.hbm_to_vmem [thread:$0]  (!%p12527_p5), %s13973_s9, 9216, %s12531_s30, [#allocation5], %s12372_s4, %s12372_s4, %s12373_s1  }
  0x5a   : > { %s12292_s24 = scalar_lea.hbm %s13981_s17, 9216 }
  0x5b   : > { %p12293_p13 = scmp.ne.s32.totalorder %s13981_s17, %s12292_s24  ;;  %p12299_p4 = scmp.lt.u32.totalorder %s12292_s24, %s13981_s17 }
  0x5d   : > { %p12295_p0 = pnand %p12293_p13, %p12543_p7 }
  0x5f   : > { %p12296_p1 = pneg %p12295_p0 }
  0x61   : > { %p12301_p6 = pnand %p12299_p4, %p12296_p1 }
  0x63   : > { %12304 = shalt.err (!%p12301_p6)
}
  0x64   : > { %s12305_s8 = scalar_lea.vmem %s668_s25, 9216  ;;  %p12313_p11 = scmp.lt.s32.totalorder %s668_s25, %s668_s25 }
  0x65   : > { %p12306_p8 = scmp.ne.s32.totalorder %s668_s25, %s12305_s8  ;;  %p12314_p12 = scmp.lt.s32.totalorder %s12305_s8, %s12305_s8 }
  0x67   : > { %p12308_p9 = pnand %p12306_p8, %p12543_p7  ;;  %p12315_p2 = por %p12314_p12, %p12313_p11 }
  0x69   : > { %p12309_p10 = pneg %p12308_p9 }
  0x6b   : > { %p12316_p3 = pnand %p12315_p2, %p12309_p10 }
  0x6d   : > { %12319 = shalt.err (!%p12316_p3)
}
  0x6e   : > { %11481 = dma.hbm_to_vmem [thread:$0]  (!%p12527_p5), %s13981_s17, 9216, %s668_s25, [#allocation7], %s12372_s4, %s12372_s4, %s12373_s1  }
  0x6f   : > { %s12374_s6 = smov [#allocation11]   ;;  %s12320_s24 = scalar_lea.hbm %s13985_s21, 9216 }
  0x70   : > { %s699_s18 = sshll.u32 %s12374_s6, 4  ;;  %p12321_p2 = scmp.ne.s32.totalorder %s13985_s21, %s12320_s24  ;;  %s700_s18 = int_to_ptr.vmem [resolvable:$true] %s699_s18 }
  0x71   : > { %p12327_p0 = scmp.lt.u32.totalorder %s12320_s24, %s13985_s21 }
  0x72   : > { %p12323_p3 = pnand %p12321_p2, %p12543_p7 }
  0x74   : > { %p12324_p13 = pneg %p12323_p3 }
  0x76   : > { %p12329_p1 = pnand %p12327_p0, %p12324_p13 }
  0x78   : > { %12332 = shalt.err (!%p12329_p1)
}
  0x79   : > { %s12333_s25 = scalar_lea.vmem %s700_s18, 9216  ;;  %p12341_p9 = scmp.lt.s32.totalorder %s700_s18, %s700_s18 }
  0x7a   : > { %p12334_p4 = scmp.ne.s32.totalorder %s700_s18, %s12333_s25  ;;  %p12342_p10 = scmp.lt.s32.totalorder %s12333_s25, %s12333_s25 }
  0x7c   : > { %p12336_p6 = pnand %p12334_p4, %p12543_p7  ;;  %p12343_p11 = por %p12342_p10, %p12341_p9 }
  0x7e   : > { %p12337_p8 = pneg %p12336_p6 }
  0x80   : > { %p12344_p12 = pnand %p12343_p11, %p12337_p8 }
  0x82   : > { %12347 = shalt.err (!%p12344_p12)
}
  0x83   : > { %11487 = dma.hbm_to_vmem [thread:$0]  (!%p12527_p5), %s13985_s21, 9216, %s700_s18, [#allocation10], %s12372_s4, %s12372_s4, %s12373_s1  }
  0x84   : > { %p14013_p2 = scmp.ne.s32.totalorder %s14010_s27, 0 }
  0x85   : > { %p14014_p7 = scmp.eq.s32.totalorder (!%p14013_p2), %s12510_s26, 0 }
  0x86   : > { %740 = sbr.rel (%p14013_p2) target bundleno = 3268 (0xcc4), region = 112 }
  0x8d   : > { %12353 = dma.done.wait (%p14014_p7), [#allocation5], 9216   ;;  %p14015_p3 = pmov %p14014_p7 }
  0x8f   : > { %12355 = vsyncadd (%p14015_p3), [#allocation5], 4294958080  ;;  %p14016_p13 = pmov %p14015_p3 }
  0x90   : > { %p14017_p0 = pmov %p14015_p3 }
  0x91   : > { %12357 = dma.done.wait (%p14016_p13), [#allocation7], 18432  }
  0x92   : > { %12359 = vsyncadd (%p14017_p0), [#allocation7], 4294948864  ;;  %p14018_p1 = pmov %p14017_p0 }
  0x93   : > { %p14019_p5 = pmov %p14017_p0 }
  0x94   : > { %12361 = dma.done.wait (%p14018_p1), [#allocation10], 18432  }
  0x95   : > { %12363 = vsyncadd (%p14019_p5), [#allocation10], 4294948864  ;;  %v12375_v0 = vmov 0   ;;  %s14020_s0 = sld [smem:[#allocation19_spill]]  ;;  %vm863_vm0 = vsmask.f32 3328 }
  0x96   : > { %874 = vst [vmem:[#allocation2 + $0x10] sm:$0x3] %v12375_v0  ;;  %881 = vst [vmem:[#allocation3 + $0x10] sm:$0x3] %v12375_v0  ;;  %11517 = vset.pattern.permute.xlu0 %v12375_v0  ;;  %11518 = vset.pattern.permute.xlu1 %v12375_v0  ;;  %p835_p4 = scmp.lt.s32.totalorder %s12510_s26, 1  ;;  %vm862_vm1 = vcmask 1043456  }
  0x97   : > { %vm12751_vm2 = vmand %vm862_vm1, %vm863_vm0  ;;  %vm869_vm3 = vsmask.f32 7946  ;;  %vm893_vm4 = vcmask 1041408   ;;  %s14023_s7 = sld [smem:[#allocation16_spill]]  ;;  %vm897_vm5 = vcmask 1042432   ;;  %vm868_vm6 = vcmask 1043458  }
  0x98   : > { %s14045_s26 = smov (!%p835_p4, %s12510_s26), 1  ;;  %vm900_vm7 = vcmask 1044480   ;;  %v865_v34 = vld [vmem:[#allocation2] sm:$0xf]  ;;  %vm952_vm8 = vsmask.f32 7950  ;;  %vm12791_vm10 = vmand %vm868_vm6, %vm869_vm3 }
  0x99   : > { %s10245_s1 = sshll.u32 %s14045_s26, 3  ;;  %v866_v36 = vsel %vm12751_vm2, 0, %v865_v34  ;;  %vm905_vm9 = vcmask 1040384   ;;  %vm902_vm11 = vcmask 1045504   ;;  %vm916_vm12 = vsmask.f32 7440  ;;  %s847_s29 = scalar_lea.vmem %s13978_s14, %s14045_s26 }
  0x9a   : > { %867 = vst [vmem:[#allocation2] sm:$0xf] %v866_v36  ;;  %v871_v45 = vld [vmem:[#allocation2 + $0xc] sm:$0xc]  ;;  %vm951_vm13 = vcmask 1043459   ;;  %vm12822_vm6 = vmor %vm863_vm0, %vm916_vm12  ;;  %s14032_s18 = sld [smem:[#allocation17_spill]] }
  0x9b   : > { %v11519_v1 = vld [vmem:[%s14020_s0 + $0x40] sm:$0xff]   ;;  %v11523_v5 = vld [vmem:[%s14020_s0 + $0x48] sm:$0xff]   ;;  %v11527_v9 = vld [vmem:[%s14020_s0 + $0x50] sm:$0xff]   ;;  %v872_v48 = vsel %vm12791_vm10, 0, %v871_v45  ;;  %vm960_vm14 = vsmask.f32 2304 }
  0x9c   : > { %v11520_v2 = vld [vmem:[%s14020_s0] sm:$0xff]   ;;  %10279 = vmatprep.subr.bf16.mxu0 %v11519_v1  ;;  %v11524_v6 = vld [vmem:[%s14020_s0 + $0x8] sm:$0xff]   ;;  %v11528_v10 = vld [vmem:[%s14020_s0 + $0x10] sm:$0xff]   ;;  %873 = vst [vmem:[#allocation2 + $0xc] sm:$0xc] %v872_v48  ;;  %s14034_s2 = sld [smem:[#allocation20_spill]] }
  0x9d   : > { %v11521_v3 = vld [vmem:[%s14020_s0 + $0xc0] sm:$0xff]   ;;  %10280 = vmatpush3.bf16.msra.mxu0 %v11520_v2  ;;  %v11525_v7 = vld [vmem:[%s14020_s0 + $0xc8] sm:$0xff]   ;;  %v11529_v11 = vld [vmem:[%s14020_s0 + $0xd0] sm:$0xff]   ;;  %s839_s3 = scalar_lea.vmem %s14023_s7, %s10245_s1  ;;  %vm991_vm0 = vsmask.f32 7424  ;;  %s14035_s6 = sld [smem:[#allocation23_spill]] }
  0x9e   : > { %v11522_v4 = vld [vmem:[%s14020_s0 + $0x80] sm:$0xff]   ;;  %10307 = vmatprep.subr.bf16.mxu1 %v11521_v3  ;;  %10281 = vmatprep.subr.bf16.mxu0 %v11523_v5  ;;  %v11526_v8 = vld [vmem:[%s14020_s0 + $0x88] sm:$0xff]   ;;  %v11530_v12 = vld [vmem:[%s14020_s0 + $0x90] sm:$0xff]   ;;  %vm1033_vm12 = vsmask.f32 4352  ;;  %s14036_s28 = sld [smem:[#allocation22_spill]] }
  0x9f   : > { %10308 = vmatpush3.bf16.msra.mxu1 %v11522_v4  ;;  %v11531_v13 = vld [vmem:[%s14020_s0 + $0x58] sm:$0xff]   ;;  %v11535_v17 = vld [vmem:[%s14020_s0 + $0x60] sm:$0xff]   ;;  %v11539_v21 = vld [vmem:[%s14020_s0 + $0x68] sm:$0xff]   ;;  %s10246_s27 = sshll.u32 %s14045_s26, 4  ;;  %s12378_s7 = smov 120  }
  0xa0   : > { %10309 = vmatprep.subr.bf16.mxu1 %v11525_v7  ;;  %v11532_v14 = vld [vmem:[%s14020_s0 + $0x18] sm:$0xff]   ;;  %v11536_v18 = vld [vmem:[%s14020_s0 + $0x20] sm:$0xff]   ;;  %v11540_v22 = vld [vmem:[%s14020_s0 + $0x28] sm:$0xff]   ;;  %s852_s24 = scalar_lea.vmem %s13987_s23, %s10246_s27  ;;  %s14038_s30 = sld [smem:[#allocation18_spill]] }
  0xa1   : > { %10282 = vmatpush3.bf16.msra.mxu0 %v11524_v6  ;;  %v11533_v15 = vld [vmem:[%s14020_s0 + $0xd8] sm:$0xff]   ;;  %v11537_v19 = vld [vmem:[%s14020_s0 + $0xe0] sm:$0xff]   ;;  %v11541_v23 = vld [vmem:[%s14020_s0 + $0xe8] sm:$0xff]   ;;  %s14040_s8 = sld [smem:[#allocation26_spill]]  ;;  %s14042_s20 = sld [smem:[#allocation28_spill]] }
  0xa2   : > { %10283 = vmatprep.subr.bf16.mxu0 %v11527_v9  ;;  %v11534_v16 = vld [vmem:[%s14020_s0 + $0x98] sm:$0xff]   ;;  %v11538_v20 = vld [vmem:[%s14020_s0 + $0xa0] sm:$0xff]   ;;  %v11542_v25 = vld [vmem:[%s14020_s0 + $0xa8] sm:$0xff]  }
  0xa3   : > { %10310 = vmatpush3.bf16.msra.mxu1 %v11526_v8  ;;  %v11543_v26 = vld [vmem:[%s14020_s0 + $0x70] sm:$0xff]   ;;  %v11547_v30 = vld [vmem:[%s14020_s0 + $0x78] sm:$0xff]   ;;  %v882_v35 = vld [vmem:[%s839_s3] sm:$0xf] }
  0xa4   : > { %10311 = vmatprep.subr.bf16.mxu1 %v11529_v11  ;;  %v11544_v27 = vld [vmem:[%s14020_s0 + $0x30] sm:$0xff]   ;;  %v11548_v31 = vld [vmem:[%s14020_s0 + $0x38] sm:$0xff]   ;;  %v9514_v37 = vcombine.low %v882_v35, %v882_v35  ;;  %v11552_v38 = vld [vmem:[%s839_s3 + $0x4] ss:$0 sps:$4 sm:$0xff]   ;;  %v896_v40 = vsel %vm893_vm4, %v882_v35, 0  ;;  %s14033_s3 = sld [smem:[#allocation21_spill]] }
  0xa5   : > { %10284 = vmatpush3.bf16.msra.mxu0 %v11528_v10  ;;  %v11545_v28 = vld [vmem:[%s14020_s0 + $0xf0] sm:$0xff]   ;;  %v11549_v32 = vld [vmem:[%s14020_s0 + $0xf8] sm:$0xff]   ;;  %v11555_v41 = vld [vmem:[%s14020_s0 + $0x140] sm:$0xff]   ;;  %v891_v43 = vrot.slane %v11552_v38, 2  ;;  %v892_v44 = vrot.slane %v11552_v38, 1 }
  0xa6   : > { %10285 = vmatprep.subr.bf16.mxu0 %v11531_v13  ;;  %v11546_v29 = vld [vmem:[%s14020_s0 + $0xb0] sm:$0xff]   ;;  %v11550_v33 = vld [vmem:[%s14020_s0 + $0xb8] sm:$0xff]   ;;  %v887_v42 = vrot.slane %v9514_v37, 7  ;;  %v11558_v49 = vld [vmem:[%s14020_s0 + $0x1c0] sm:$0xff]   ;;  %s844_s5 = scalar_lea.vmem %s14038_s30, %s10246_s27  ;;  %s14041_s27 = sld [smem:[#allocation27_spill]] }
  0xa7   : > { %10312 = vmatpush3.bf16.msra.mxu1 %v11530_v12  ;;  %v907_v47 = vsel %vm905_vm9, 0, %v892_v44  ;;  %vm12809_vm15 = vmand %vm951_vm13, %vm952_vm8  ;;  %v954_v63 = vld [vmem:[#allocation2] sm:$0x8]  ;;  %v962_v10 = vld [vmem:[#allocation2 + $0xc] sm:$0x7]  ;;  %vm5175_vm13 = vcmask 64512   ;;  %s857_s22 = scalar_lea.vmem %s14042_s20, %s10245_s1 }
  0xa8   : > { %10313 = vmatprep.subr.bf16.mxu1 %v11533_v15  ;;  %v899_v46 = vsel %vm897_vm5, %v896_v40, %v887_v42  ;;  %v9518_v51 = vcombine.low %v907_v47, %v907_v47  ;;  %vm12814_vm3 = vmand %vm897_vm5, %vm960_vm14  ;;  %vm1012_vm5 = vcmask 1046528   ;;  %v11563_v42 = vld [vmem:[%s14020_s0 + $0x1c8] sm:$0xff]   ;;  %vm1074_vm8 = vsmask.f32 5376 }
  0xa9   : > { %10286 = vmatpush3.bf16.msra.mxu0 %v11532_v14  ;;  %v901_v50 = vsel %vm900_vm7, %v899_v46, 0  ;;  %v11556_v46 = vld [vmem:[%s14020_s0 + $0x100] sm:$0xff]   ;;  %v11561_v47 = vld [vmem:[%s14020_s0 + $0x148] sm:$0xff]  }
  0xaa   : > { %10287 = vmatprep.subr.bf16.mxu0 %v11535_v17  ;;  %v904_v52 = vsel %vm902_vm11, %v901_v50, %v891_v43  ;;  %v938_v55 = vshll.u32 %v9518_v51, 16  ;;  %v942_v56 = vshrl.u32 %v9518_v51, 16  ;;  %v11564_v50 = vld [vmem:[%s14020_s0 + $0x188] sm:$0xff]   ;;  %v11567_v51 = vld [vmem:[%s14020_s0 + $0x1d0] sm:$0xff]  }
  0xab   : > { %10314 = vmatpush3.bf16.msra.mxu1 %v11534_v16  ;;  %v9516_v53 = vcombine.low %v904_v52, %v904_v52  ;;  %v9517_v54 = vcombine.high %v904_v52, %v904_v52  ;;  %v11562_v52 = vld [vmem:[%s14020_s0 + $0x108] sm:$0xff]   ;;  %v11612_v39 = vld [vmem:[%s14033_s3 + $0x10] sm:$0xff]  }
  0xac   : > { %10315 = vmatprep.subr.bf16.mxu1 %v11537_v19  ;;  %v940_v61 = vrot.slane %v938_v55, 5  ;;  %v944_v0 = vrot.slane %v942_v56, 4  ;;  %v11571_v56 = vld [vmem:[%s14020_s0 + $0x1d8] sm:$0xff]   ;;  %v11608_v24 = vld [vmem:[%s14033_s3 + $0x8] sm:$0xff]  }
  0xad   : > { %10288 = vmatpush3.bf16.msra.mxu0 %v11536_v18  ;;  %v919_v57 = vshll.u32 %v9516_v53, 16  ;;  %v922_v58 = vshrl.u32 %v9516_v53, 16  ;;  %v928_v59 = vshll.u32 %v9517_v54, 16  ;;  %v932_v60 = vshrl.u32 %v9517_v54, 16  ;;  %v11565_v53 = vld [vmem:[%s14020_s0 + $0x150] sm:$0xff]  }
  0xae   : > { %10289 = vmatprep.subr.bf16.mxu0 %v11539_v21  ;;  %v945_v5 = vor.u32 %v944_v0, %v940_v61  ;;  %v11568_v54 = vld [vmem:[%s14020_s0 + $0x190] sm:$0xff]  }
  0xaf   : > { %10316 = vmatpush3.bf16.msra.mxu1 %v11538_v20  ;;  %v921_v1 = vrot.slane %v919_v57, 5  ;;  %v924_v2 = vrot.slane %v922_v58, 4  ;;  %v930_v3 = vrot.slane %v928_v59, 5  ;;  %v934_v4 = vrot.slane %v932_v60, 4  ;;  %v11566_v58 = vld [vmem:[%s14020_s0 + $0x110] sm:$0xff]   ;;  %v11569_v60 = vld [vmem:[%s14020_s0 + $0x158] sm:$0xff]  }
  0xb0   : > { %10317 = vmatprep.subr.bf16.mxu1 %v11541_v23  ;;  %v946_v12 = vrot.slane %v945_v5, 4  ;;  %v976_v0 = vld [vmem:[#allocation2 + $0x10] sm:$0x3]  ;;  %v11570_v5 = vld [vmem:[%s14020_s0 + $0x118] sm:$0xff]  }
  0xb1   : > { %10290 = vmatpush3.bf16.msra.mxu0 %v11540_v22  ;;  %v925_v7 = vor.u32 %v924_v2, %v921_v1  ;;  %v935_v8 = vor.u32 %v934_v4, %v930_v3  ;;  %v955_v9 = vsel %vm12809_vm15, %v921_v1, %v954_v63  ;;  %v11572_v2 = vld [vmem:[%s14020_s0 + $0x198] sm:$0xff]  }
  0xb2   : > { %10291 = vmatprep.subr.bf16.mxu0 %v11543_v26  ;;  %956 = vst [vmem:[#allocation2] sm:$0x8] %v955_v9  ;;  %v963_v15 = vsel %vm12814_vm3, %v946_v12, %v962_v10  ;;  %v11573_v10 = vld [vmem:[%s14020_s0 + $0x160] sm:$0xff]  }
  0xb3   : > { %10318 = vmatpush3.bf16.msra.mxu1 %v11542_v25  ;;  %v926_v13 = vrot.slane %v925_v7, 4  ;;  %v936_v14 = vrot.slane %v935_v8, 4  ;;  %964 = vst [vmem:[#allocation2 + $0xc] sm:$0x7] %v963_v15  ;;  %v11575_v7 = vld [vmem:[%s14020_s0 + $0x1e0] sm:$0xff]  }
  0xb4   : > { %10319 = vmatprep.subr.bf16.mxu1 %v11545_v28  ;;  %v11576_v12 = vld [vmem:[%s14020_s0 + $0x1a0] sm:$0xff]   ;;  %v975_v15 = vld [vmem:[#allocation2 + $0x10] sm:$0x1] }
  0xb5   : > { %10292 = vmatpush3.bf16.msra.mxu0 %v11544_v27  ;;  %v931_v16 = vsel %vm12822_vm6, %v926_v13, %v930_v3  ;;  %v941_v17 = vsel %vm12822_vm6, %v936_v14, %v940_v61 }
  0xb6   : > { %10293 = vmatprep.subr.bf16.mxu0 %v11547_v30  ;;  %957 = vst [vmem:[#allocation2 + $0x4] sm:$0xf] %v931_v16  ;;  %958 = vst [vmem:[#allocation2 + $0x8] sm:$0xf] %v941_v17  ;;  %v11580_v16 = vld [vmem:[%s14020_s0 + $0x1e8] sm:$0xff]  }
  0xb7   : > { %10320 = vmatpush3.bf16.msra.mxu1 %v11546_v29 }
  0xb8   : > { %10321 = vmatprep.subr.bf16.mxu1 %v11549_v32 }
  0xb9   : > { %10294 = vmatpush3.bf16.msra.mxu0 %v11548_v31  ;;  %v965_v18 = vld [vmem:[#allocation2] sm:$0xf] }
  0xba   : > { %10335 = vmatprep.subr.bf16.mxu0 %v11555_v41  ;;  %v970_v19 = vld [vmem:[#allocation2] sm:$0x8]  ;;  %v971_v20 = vld [vmem:[#allocation2 + $0xc] sm:$0x3] }
  0xbb   : > { %10322 = vmatpush3.bf16.msra.mxu1 %v11550_v33  ;;  %v969_v21 = vld [vmem:[#allocation2] sm:$0xe]  ;;  %v12878_v57 = vld [vmem:[#allocation2 + $0xc] sm:$0x7] }
  0xbc   : > { %10363 = vmatprep.subr.bf16.mxu1 %v11558_v49  ;;  %v11560_v41 = vld [vmem:[%s14020_s0 + $0x180] sm:$0xff]   ;;  %v974_v63 = vld [vmem:[#allocation2 + $0xc] sm:$0xf] }
  0xbd   : > { %v12832_v22 = vld [vmem:[#allocation2 + $0x4] sm:$0xf]  ;;  %v12834_v23 = vld [vmem:[#allocation2 + $0x8] sm:$0xf]  ;;  %v12896_v4 = vcombine.low %v974_v63, %v976_v0  ;;  %v9527_v0 = vcombine.low %v12878_v57, %v12878_v57 }
  0xbe   : > { %v9519_v25 = vcombine.low %v965_v18, %v12832_v22  ;;  %v9521_v26 = vcombine.low %v12834_v23, %v12834_v23  ;;  %v12840_v27 = vcombine.low %v970_v19, %v12832_v22  ;;  %v9524_v28 = vcombine.low %v12834_v23, %v971_v20  ;;  %v11579_v55 = vld [vmem:[#allocation2 + $0x8] ss:$0 sps:$4 sm:$0x77]   ;;  %v973_v59 = vld [vmem:[#allocation2 + $0x4] sm:$0xc] }
  0xbf   : > { %v9522_v29 = vcombine.low %v969_v21, %v12832_v22  ;;  %v9526_v61 = vcombine.low %v12832_v22, %v12834_v23  ;;  %v12889_v1 = vcombine.low %v973_v59, %v12834_v23  ;;  %v9525_v3 = vcombine.low %v12834_v23, %v12878_v57 }
  0xc0   : > { %v993_v30 = vshrl.u32 %v9519_v25, 16  ;;  %v995_v31 = vshll.u32 %v9519_v25, 16  ;;  %v1000_v32 = vshll.u32 %v9521_v26, 16  ;;  %v1025_v33 = vrot.slane %v12840_v27, 3 }
  0xc1   : > { %v1026_v34 = vrot.slane %v9524_v28, 3  ;;  %v1013_v35 = vrot.slane %v9522_v29, 1  ;;  %v1014_v36 = vrot.slane %v9521_v26, 1  ;;  %v1004_v37 = vshrl.u32 %v9521_v26, 16  ;;  %v11574_v28 = vld [vmem:[%s14020_s0 + $0x120] sm:$0xff]  }
  0xc2   : > { %v997_v38 = vrot.slane %v995_v31, 1  ;;  %v1002_v40 = vrot.slane %v1000_v32, 1  ;;  %v1076_v8 = vshrl.u32 %v12889_v1, 16  ;;  %v1079_v9 = vshll.u32 %v12889_v1, 16  ;;  %v11577_v31 = vld [vmem:[%s14020_s0 + $0x168] sm:$0xff]  }
  0xc3   : > { %v1027_v43 = vsel %vm900_vm7, %v1025_v33, %v1026_v34  ;;  %v1015_v44 = vsel %vm1012_vm5, %v1013_v35, %v1014_v36  ;;  %v1084_v13 = vshrl.u32 %v12896_v4, 16  ;;  %v1087_v14 = vshll.u32 %v12896_v4, 16  ;;  %v11584_v33 = vld [vmem:[%s14020_s0 + $0x1f0] sm:$0xff]  }
  0xc4   : > { %v998_v45 = vor.u32 %v997_v38, %v993_v30  ;;  %1765 = vmatprep.mubr.bf16.mxu1 %v1027_v43  ;;  %v1006_v48 = vor.u32 %v1004_v37, %v1002_v40  ;;  %v1035_v17 = vshrl.u32 %v12840_v27, 16  ;;  %v1038_v18 = vshll.u32 %v12840_v27, 16  ;;  %v11581_v27 = vld [vmem:[%s14020_s0 + $0x1a8] sm:$0xff]  }
  0xc5   : > { %1766 = vmatmul.mubr.bf16.vlgmr.msra.gmra.mrb[0].mxu1 %v1015_v44  ;;  %v1078_v19 = vrot.slane %v1076_v8, 2  ;;  %v1081_v20 = vrot.slane %v1079_v9, 3  ;;  %v1043_v21 = vshrl.u32 %v9525_v3, 16  ;;  %v1046_v22 = vshll.u32 %v9525_v3, 16  ;;  %v11597_v3 = vld [vmem:[%s14020_s0 + $0x220] sm:$0xff]   ;;  %v11600_v8 = vld [vmem:[%s14020_s0 + $0x238] sm:$0xff]  }
  0xc6   : > { %v1003_v49 = vsel %vm991_vm0, %v998_v45, %v1002_v40  ;;  %10364 = vmatpush3.bf16.msra.mxu1 %v11560_v41  ;;  %1773 = vmatprep.mubr.bf16.mxu1 %v1026_v34  ;;  %v1089_v26 = vrot.slane %v1087_v14, 3  ;;  %v9529_v30 = vcombine.low %v974_v63, %v975_v15  ;;  %v1037_v34 = vrot.slane %v1035_v17, 3  ;;  %v977_v40 = vld [vmem:[#allocation2 + $0x4] sm:$0x8]  ;;  %v11578_v41 = vld [vmem:[%s14020_s0 + $0x128] sm:$0xff]  }
  0xc7   : > { %1717 = vmatprep.mubr.bf16.mxu0 %v1003_v49  ;;  %10365 = vmatprep.subr.bf16.mxu1 %v11563_v42  ;;  %v1082_v29 = vor.u32 %v1081_v20, %v1078_v19  ;;  %v1040_v35 = vrot.slane %v1038_v18, 4  ;;  %v1066_v38 = vrot.slane %v12889_v1, 2  ;;  %v1048_v42 = vrot.slane %v1046_v22, 4  ;;  %v11585_v49 = vld [vmem:[%s14020_s0 + $0x1b0] sm:$0xff]   ;;  %v11601_v9 = vld [vmem:[%s14033_s3 + $0xc0] sm:$0xff]   ;;  %v11605_v15 = vld [vmem:[%s14033_s3 + $0xc8] sm:$0xff]  }
  0xc8   : > { %1718 = vmatmul.mubr.bf16.vlgmr.msra.gmra.mrb[0].mxu0 %v9519_v25  ;;  %v1086_v25 = vrot.slane %v1084_v13, 2  ;;  %v1067_v43 = vrot.slane %v9529_v30, 2  ;;  %v9531_v44 = vcombine.low %v977_v40, %v12834_v23  ;;  %v1098_v45 = vrot.slane %v12896_v4, 3  ;;  %v11588_v23 = vld [vmem:[%s14020_s0 + $0x1f8] sm:$0xff]   ;;  %v11595_v1 = vld [vmem:[%s14020_s0 + $0x210] sm:$0xff]   ;;  %v11604_v4 = vld [vmem:[%s14033_s3] sm:$0xff]  }
  0xc9   : > { %10336 = vmatpush3.bf16.msra.mxu0 %v11556_v46  ;;  %1725 = vmatprep.mubr.bf16.mxu0 %v1006_v48  ;;  %v859_v46 = vld [vmem:[%s14032_s18] sm:$0xff]  ;;  %v11582_v48 = vld [vmem:[%s14020_s0 + $0x170] sm:$0xff]   ;;  %v11607_v17 = vld [vmem:[%s14033_s3 + $0x48] sm:$0xff]  }
  0xca   : > { %10337 = vmatprep.subr.bf16.mxu0 %v11561_v47  ;;  %10366 = vmatpush3.bf16.msra.mxu1 %v11564_v50  ;;  %v1090_v32 = vor.u32 %v1089_v26, %v1086_v25  ;;  %v861_v47 = vld [vmem:[%s14032_s18 + $0x10] sm:$0x3f]  ;;  %v1097_v50 = vrot.slane %v9531_v44, 3  ;;  %v878_v18 = vld [vmem:[#allocation3 + $0xc] sm:$0xc]  ;;  %v11613_v25 = vld [vmem:[%s14033_s3 + $0xd8] sm:$0xff]  }
  0xcb   : > { %10367 = vmatprep.subr.bf16.mxu1 %v11567_v51  ;;  %1930 = vperm.xlu0 %11517, %v859_v46   ;;  %v860_v51 = vld [vmem:[%s14032_s18 + $0x8] sm:$0xff]  ;;  %v875_v13 = vld [vmem:[#allocation3] sm:$0xf]  ;;  %v879_v19 = vsel %vm12791_vm10, 0, %v878_v18  ;;  %v11614_v26 = vld [vmem:[%s14033_s3 + $0x98] sm:$0xff]   ;;  %vm5143_vm10 = vcmask 130048  }
  0xcc   : > { %v1091_v37 = vsel %vm1074_vm8, %v1082_v29, %v1090_v32  ;;  %1940 = vperm.xlu1 %11518, %v861_v47   ;;  %v1099_v57 = vsel %vm900_vm7, %v1097_v50, %v1098_v45  ;;  %v876_v14 = vsel %vm12751_vm2, 0, %v875_v13  ;;  %v11609_v20 = vld [vmem:[%s14033_s3 + $0xd0] sm:$0xff]   ;;  %880 = vst [vmem:[#allocation3 + $0xc] sm:$0xc] %v879_v19  ;;  %v11616_v29 = vld [vmem:[%s14033_s3 + $0x18] sm:$0xff]   ;;  %v11617_v30 = vld [vmem:[%s14033_s3 + $0xe0] sm:$0xff]  }
  0xcd   : > { %10338 = vmatpush3.bf16.msra.mxu0 %v11562_v52  ;;  %1774 = vmatmul.mubr.bf16.gmra.mrb[4].mxu1 %v1014_v36  ;;  %v1045_v36 = vrot.slane %v1043_v21, 3  ;;  %v11583_v52 = vld [vmem:[%s14020_s0 + $0x130] sm:$0xff]   ;;  %877 = vst [vmem:[#allocation3] sm:$0xf] %v876_v14  ;;  %v11630_v44 = vld [vmem:[%s14033_s3 + $0xb8] sm:$0xff]   ;;  %v11635_v46 = vld [vmem:[%s14033_s3 + $0x1c0] sm:$0xff]  }
  0xce   : > { %10339 = vmatprep.subr.bf16.mxu0 %v11565_v53  ;;  %10368 = vmatpush3.bf16.msra.mxu1 %v11568_v54  ;;  %v11586_v53 = vld [vmem:[%s14020_s0 + $0x178] sm:$0xff]   ;;  %v11610_v21 = vld [vmem:[%s14033_s3 + $0x90] sm:$0xff]   ;;  %v11640_v47 = vld [vmem:[%s14033_s3 + $0x140] sm:$0xff]   ;;  %vm12377_vm2 = vmmov 0  }
  0xcf   : > { %10369 = vmatprep.subr.bf16.mxu1 %v11571_v56  ;;  %1861 = vmatprep.mubr.bf16.mxu1 %v1091_v37  ;;  %v11589_v54 = vld [vmem:[%s14020_s0 + $0x1b8] sm:$0xff]   ;;  %v11590_v56 = vld [vmem:[%s14020_s0 + $0x200] sm:$0xff]   ;;  %v1049_v59 = vor.u32 %v1048_v42, %v1045_v36  ;;  %v11611_v22 = vld [vmem:[%s14033_s3 + $0x50] sm:$0xff]  }
  0xd0   : > { %1726 = vmatmul.mubr.bf16.gmra.mrb[4].mxu0 %v11579_v55  ;;  %1935 = vperm.xlu0 %11517, %v860_v51   ;;  %v11587_v55 = vld [vmem:[%s14020_s0 + $0x138] sm:$0xff]   ;;  %v11624_v36 = vld [vmem:[%s14033_s3 + $0x28] sm:$0xff]   ;;  %v11625_v37 = vld [vmem:[%s14033_s3 + $0xf0] sm:$0xff]  }
  0xd1   : > { %10340 = vmatpush3.bf16.msra.mxu0 %v11566_v58  ;;  %1813 = vmatprep.mubr.bf16.mxu0 %v9526_v61  ;;  %v1041_v58 = vor.u32 %v1040_v35, %v1037_v34  ;;  %v11593_v61 = vld [vmem:[%s14020_s0 + $0x208] sm:$0xff]   ;;  %v11626_v40 = vld [vmem:[%s14033_s3 + $0xb0] sm:$0xff]   ;;  %v11629_v42 = vld [vmem:[%s14033_s3 + $0xf8] sm:$0xff]  }
  0xd2   : > { %10341 = vmatprep.subr.bf16.mxu0 %v11569_v60  ;;  %10370 = vmatpush3.bf16.msra.mxu1 %v11572_v2  ;;  %v1068_v60 = vsel %vm902_vm11, %v1066_v38, %v1067_v43  ;;  %v11596_v2 = vld [vmem:[%s14020_s0 + $0x218] sm:$0xff]   ;;  %v11622_v34 = vld [vmem:[%s14033_s3 + $0xa8] sm:$0xff]   ;;  %v11627_v38 = vld [vmem:[%s14033_s3 + $0x70] sm:$0xff]  }
  0xd3   : > { %10371 = vmatprep.subr.bf16.mxu1 %v11575_v7  ;;  %v1050_v63 = vsel %vm1033_vm12, %v1041_v58, %v1049_v59  ;;  %v11599_v7 = vld [vmem:[%s14020_s0 + $0x230] sm:$0xff]   ;;  %v11623_v35 = vld [vmem:[%s14033_s3 + $0x68] sm:$0xff]  }
  0xd5   : > { %10342 = vmatpush3.bf16.msra.mxu0 %v11570_v5  ;;  %v11598_v5 = vld [vmem:[%s14020_s0 + $0x228] sm:$0xff]  }
  0xd6   : > { %10343 = vmatprep.subr.bf16.mxu0 %v11573_v10  ;;  %10372 = vmatpush3.bf16.msra.mxu1 %v11576_v12  ;;  %v11602_v10 = vld [vmem:[%s14033_s3 + $0x80] sm:$0xff]  }
  0xd7   : > { %10373 = vmatprep.subr.bf16.mxu1 %v11580_v16  ;;  %v11603_v12 = vld [vmem:[%s14033_s3 + $0x40] sm:$0xff]   ;;  %v11606_v16 = vld [vmem:[%s14033_s3 + $0x88] sm:$0xff]  }
  0xd9   : > { %10344 = vmatpush3.bf16.msra.mxu0 %v11574_v28  ;;  %v11615_v28 = vld [vmem:[%s14033_s3 + $0x58] sm:$0xff]  }
  0xda   : > { %10345 = vmatprep.subr.bf16.mxu0 %v11577_v31  ;;  %10374 = vmatpush3.bf16.msra.mxu1 %v11581_v27  ;;  %v11618_v31 = vld [vmem:[%s14033_s3 + $0xa0] sm:$0xff]  }
  0xdb   : > { %10375 = vmatprep.subr.bf16.mxu1 %v11584_v33  ;;  %v11619_v27 = vld [vmem:[%s14033_s3 + $0x60] sm:$0xff]   ;;  %v11621_v33 = vld [vmem:[%s14033_s3 + $0xe8] sm:$0xff]  }
  0xdd   : > { %10346 = vmatpush3.bf16.msra.mxu0 %v11578_v41  ;;  %v11628_v41 = vld [vmem:[%s14033_s3 + $0x30] sm:$0xff]  }
  0xde   : > { %10347 = vmatprep.subr.bf16.mxu0 %v11582_v48  ;;  %10376 = vmatpush3.bf16.msra.mxu1 %v11585_v49 }
  0xdf   : > { %10377 = vmatprep.subr.bf16.mxu1 %v11588_v23 }
  0xe1   : > { %10348 = vmatpush3.bf16.msra.mxu0 %v11583_v52  ;;  %v9532_v52 = vld [vmem:[%s14034_s2] ss:$0 sm:$0xff]  ;;  %s14037_s2 = sld [smem:[#allocation24_spill]] }
  0xe2   : > { %10349 = vmatprep.subr.bf16.mxu0 %v11586_v53  ;;  %10378 = vmatpush3.bf16.msra.mxu1 %v11589_v54 }
  0xe3   : > { %10401 = vmatprep.subr.bf16.mxu1 %v11603_v12 }
  0xe5   : > { %10350 = vmatpush3.bf16.msra.mxu0 %v11587_v55  ;;  %1862 = vmatmul.mubr.bf16.vlgmr.msra.gmra.mrb[8].mxu1 %v1068_v60 }
  0xe6   : > { %11266 = vmatprep.subr.bf16.mxu0 %v11590_v56  ;;  %1869 = vmatprep.mubr.bf16.mxu1 %v1090_v32  ;;  %v11620_v32 = vld [vmem:[%s14033_s3 + $0x20] sm:$0xff]  }
  0xe7   : > { %10402 = vmatpush3.bf16.msra.mxu1 %v11604_v4 }
  0xe8   : > { %1814 = vmatmul.mubr.bf16.vlgmr.msra.gmra.mrb[8].mxu0 %v1050_v63  ;;  %10403 = vmatprep.subr.bf16.mxu1 %v11607_v17 }
  0xe9   : > { %11267 = vmatpush3.bf16.msra.mxu0 %v11590_v56  ;;  %1821 = vmatprep.mubr.bf16.mxu0 %v9527_v0 }
  0xea   : > { %11268 = vmatprep.subr.bf16.mxu0 %v11593_v61 }
  0xeb   : > { %10404 = vmatpush3.bf16.msra.mxu1 %v11608_v24 }
  0xec   : > { %10405 = vmatprep.subr.bf16.mxu1 %v11611_v22 }
  0xed   : > { %11269 = vmatpush3.bf16.msra.mxu0 %v11593_v61  ;;  %1870 = vmatmul.mubr.bf16.gmra.mrb[12].mxu1 %v1067_v43  ;;  %v11631_v43 = vld [vmem:[%s14033_s3 + $0x78] sm:$0xff]  }
  0xee   : > { %11270 = vmatprep.subr.bf16.mxu0 %v11595_v1 }
  0xef   : > { %10406 = vmatpush3.bf16.msra.mxu1 %v11612_v39 }
  0xf0   : > { %1822 = vmatmul.mubr.bf16.gmra.mrb[12].mxu0 %v1049_v59  ;;  %10407 = vmatprep.subr.bf16.mxu1 %v11615_v28 }
  0xf1   : > { %11271 = vmatpush3.bf16.msra.mxu0 %v11595_v1  ;;  %11282 = vmatprep.mubr.bf16.mxu0 %v1099_v57 }
  0xf2   : > { %11272 = vmatprep.subr.bf16.mxu0 %v11596_v2 }
  0xf3   : > { %10408 = vmatpush3.bf16.msra.mxu1 %v11616_v29 }
  0xf4   : > { %10409 = vmatprep.subr.bf16.mxu1 %v11619_v27 }
  0xf5   : > { %11273 = vmatpush3.bf16.msra.mxu0 %v11596_v2 }
  0xf6   : > { %11274 = vmatprep.subr.bf16.mxu0 %v11597_v3 }
  0xf7   : > { %10410 = vmatpush3.bf16.msra.mxu1 %v11620_v32 }
  0xf8   : > { %10411 = vmatprep.subr.bf16.mxu1 %v11623_v35 }
  0xf9   : > { %11275 = vmatpush3.bf16.msra.mxu0 %v11597_v3 }
  0xfa   : > { %11276 = vmatprep.subr.bf16.mxu0 %v11598_v5 }
  0xfb   : > { %10412 = vmatpush3.bf16.msra.mxu1 %v11624_v36 }
  0xfc   : > { %10413 = vmatprep.subr.bf16.mxu1 %v11627_v38 }
  0xfd   : > { %11277 = vmatpush3.bf16.msra.mxu0 %v11598_v5 }
  0xfe   : > { %11278 = vmatprep.subr.bf16.mxu0 %v11599_v7 }
  0xff   : > { %10414 = vmatpush3.bf16.msra.mxu1 %v11628_v41 }
 0x100   : > { %10415 = vmatprep.subr.bf16.mxu1 %v11631_v43 }
 0x101   : > { %11279 = vmatpush3.bf16.msra.mxu0 %v11599_v7 }
 0x102   : > { %11280 = vmatprep.subr.bf16.mxu0 %v11600_v8 }
 0x105   : > { %11281 = vmatpush3.bf16.msra.mxu0 %v11600_v8 }
 0x106   : > { %10429 = vmatprep.subr.bf16.mxu0 %v11601_v9 }
 0x108   : > { %11283 = vmatmul.mubr.bf16.vlgmr.msra.gmra.mrb[16].mxu0 %v1098_v45  ;;  %v11632_v45 = vld [vmem:[%s14033_s3 + $0x38] sm:$0xff]  }
 0x109   : > { %10430 = vmatpush3.bf16.msra.mxu0 %v11602_v10  ;;  %10416 = vmatpush3.bf16.msra.mxu1 %v11632_v45 }
 0x10a   : > { %10431 = vmatprep.subr.bf16.mxu0 %v11605_v15  ;;  %10457 = vmatprep.subr.bf16.mxu1 %v11640_v47 }
 0x10d   : > { %10432 = vmatpush3.bf16.msra.mxu0 %v11606_v16 }
 0x10e   : > { %10433 = vmatprep.subr.bf16.mxu0 %v11609_v20 }
 0x111   : > { %10434 = vmatpush3.bf16.msra.mxu0 %v11610_v21 }
 0x112   : > { %10435 = vmatprep.subr.bf16.mxu0 %v11613_v25 }
 0x115   : > { %10436 = vmatpush3.bf16.msra.mxu0 %v11614_v26 }
 0x116   : > { %10437 = vmatprep.subr.bf16.mxu0 %v11617_v30 }
 0x119   : > { %10438 = vmatpush3.bf16.msra.mxu0 %v11618_v31 }
 0x11a   : > { %10439 = vmatprep.subr.bf16.mxu0 %v11621_v33 }
 0x11d   : > { %10440 = vmatpush3.bf16.msra.mxu0 %v11622_v34 }
 0x11e   : > { %10441 = vmatprep.subr.bf16.mxu0 %v11625_v37 }
 0x121   : > { %10442 = vmatpush3.bf16.msra.mxu0 %v11626_v40 }
 0x122   : > { %10443 = vmatprep.subr.bf16.mxu0 %v11629_v42 }
 0x125   : > { %10444 = vmatpush3.bf16.msra.mxu0 %v11630_v44 }
 0x126   : > { %10485 = vmatprep.subr.bf16.mxu0 %v11635_v46 }
 0x14a   : > { %v13110_v45 = vpop.permute.xlu0 %1930 }
 0x198   : > { %v10323_v48 = vpop.f32.mrb[0].mxu1 }
 0x199   : > { %v10324_v49 = vpop.f32.mrb[1].mxu1 }
 0x19a   : > { %v10325_v23 = vadd.f32 %v10324_v49, %v10323_v48  ;;  %v10326_v50 = vpop.f32.mrb[2].mxu1 }
 0x19b   : > { %v10295_v51 = vpop.f32.mrb[0].mxu0  ;;  %v10327_v53 = vpop.f32.mrb[3].mxu1 }
 0x19c   : > { %v10296_v54 = vpop.f32.mrb[1].mxu0  ;;  %v10328_v55 = vadd.f32 %v10327_v53, %v10326_v50 }
 0x19d   : > { %v10297_v56 = vadd.f32 %v10296_v54, %v10295_v51  ;;  %v10298_v58 = vpop.f32.mrb[2].mxu0 }
 0x19e   : > { %v10299_v59 = vpop.f32.mrb[3].mxu0 }
 0x19f   : > { %v1720_v60 = vadd.f32 %v10297_v56, %v9532_v52  ;;  %v10300_v61 = vadd.f32 %v10299_v59, %v10298_v58  ;;  %v13116_v59 = vpop.permute.xlu0 %1935 }
 0x1a0   : > { %v10329_v63 = vpop.f32.mrb[4].mxu1 }
 0x1a1   : > { %v1723_v0 = vadd.f32 %v10300_v61, %v9532_v52  ;;  %v1768_v1 = vadd.f32 %v10325_v23, %v1720_v60  ;;  %v10330_v2 = vpop.f32.mrb[5].mxu1  ;;  %v13112_v23 = vpop.permute.xlu1 %1940 }
 0x1a2   : > { %v10331_v57 = vadd.f32 %v10330_v2, %v10329_v63  ;;  %v10332_v3 = vpop.f32.mrb[6].mxu1  ;;  %v1989_v63 = vld [vmem:[#allocation3] sm:$0x8] }
 0x1a3   : > { %v1771_v5 = vadd.f32 %v10328_v55, %v1723_v0  ;;  %v10301_v7 = vpop.f32.mrb[4].mxu0  ;;  %v10333_v8 = vpop.f32.mrb[7].mxu1 }
 0x1a4   : > { %v10302_v9 = vpop.f32.mrb[5].mxu0 }
 0x1a5   : > { %v10303_v10 = vadd.f32 %v10302_v9, %v10301_v7  ;;  %v10304_v12 = vpop.f32.mrb[6].mxu0 }
 0x1a6   : > { %v10305_v13 = vpop.f32.mrb[7].mxu0 }
 0x1a7   : > { %v1728_v4 = vadd.f32 %v10303_v10, %v9532_v52  ;;  %v1994_v10 = vld [vmem:[#allocation3 + $0xc] sm:$0x7] }
 0x1a9   : > { %v1776_v14 = vadd.f32 %v10331_v57, %v1728_v4 }
 0x1b8   : > { %v10379_v15 = vpop.f32.mrb[8].mxu1 }
 0x1b9   : > { %v10380_v16 = vpop.f32.mrb[9].mxu1 }
 0x1ba   : > { %v10381_v17 = vadd.f32 %v10380_v16, %v10379_v15  ;;  %v10382_v18 = vpop.f32.mrb[10].mxu1 }
 0x1bb   : > { %v10351_v24 = vpop.f32.mrb[8].mxu0  ;;  %v10383_v19 = vpop.f32.mrb[11].mxu1 }
 0x1bc   : > { %v10352_v20 = vpop.f32.mrb[9].mxu0  ;;  %v10384_v21 = vadd.f32 %v10383_v19, %v10382_v18 }
 0x1bd   : > { %v10353_v22 = vadd.f32 %v10352_v20, %v10351_v24  ;;  %v10354_v39 = vpop.f32.mrb[10].mxu0 }
 0x1be   : > { %v10355_v25 = vpop.f32.mrb[11].mxu0 }
 0x1bf   : > { %v1816_v26 = vadd.f32 %v10353_v22, %v1768_v1  ;;  %v10356_v28 = vadd.f32 %v10355_v25, %v10354_v39  ;;  %v2008_v25 = vld [vmem:[#allocation3 + $0x10] sm:$0x3] }
 0x1c0   : > { %v10385_v29 = vpop.f32.mrb[12].mxu1 }
 0x1c1   : > { %v1819_v30 = vadd.f32 %v10356_v28, %v1771_v5  ;;  %v10386_v31 = vpop.f32.mrb[13].mxu1  ;;  %v1864_v27 = vadd.f32 %v10381_v17, %v1816_v26 }
 0x1c2   : > { %v10387_v32 = vadd.f32 %v10386_v31, %v10385_v29  ;;  %v10388_v33 = vpop.f32.mrb[14].mxu1 }
 0x1c3   : > { %v10357_v34 = vpop.f32.mrb[12].mxu0  ;;  %v10389_v35 = vpop.f32.mrb[15].mxu1  ;;  %v1867_v36 = vadd.f32 %v10384_v21, %v1819_v30 }
 0x1c4   : > { %v10358_v37 = vpop.f32.mrb[13].mxu0 }
 0x1c5   : > { %v10359_v38 = vadd.f32 %v10358_v37, %v10357_v34  ;;  %v10360_v40 = vpop.f32.mrb[14].mxu0 }
 0x1c6   : > { %v10361_v41 = vpop.f32.mrb[15].mxu0 }
 0x1c7   : > { %v1824_v42 = vadd.f32 %v10359_v38, %v1776_v14 }
 0x1c9   : > { %v1872_v43 = vadd.f32 %v10387_v32, %v1824_v42  ;;  %v2007_v42 = vld [vmem:[#allocation3 + $0x10] sm:$0x1] }
 0x1db   : > { %v11284_v44 = vpop.f32.mrb[16].mxu0 }
 0x1dc   : > { %v1920_v46 = vadd.f32 %v11284_v44, %v1872_v43  ;;  %v1911_v47 = vpop.f32.mrb[17].mxu0  ;;  %v11638_v44 = vld [vmem:[%s14033_s3 + $0x180] sm:$0xff]  }
 0x1dd   : > { %v1912_v48 = vadd.f32 %v1911_v47, %v1864_v27  ;;  %v11285_v49 = vpop.f32.mrb[18].mxu0 }
 0x1de   : > { %v1927_v50 = vmax.f32 %v1920_v46, 0.0  ;;  %v1914_v51 = vpop.f32.mrb[19].mxu0 }
 0x1df   : > { %v1925_v52 = vmax.f32 %v1912_v48, 0.0  ;;  %v1915_v53 = vadd.f32 %v1914_v51, %v1867_v36 }
 0x1e0   : > { %v1945_v54 = vmul.f32 %v13112_v23, %v1927_v50 }
 0x1e1   : > { %v1943_v55 = vmul.f32 %v13110_v45, %v1925_v52  ;;  %v1926_v56 = vmax.f32 %v1915_v53, 0.0  ;;  %v11642_v53 = vld [vmem:[%s14033_s3 + $0x1c8] sm:$0xff]  }
 0x1e2   : > { %v10251_v58 = vpack.c.bf16 %v1945_v54, %v1945_v54 }
 0x1e3   : > { %v10249_v60 = vpack.c.bf16 %v1943_v55, %v1943_v55  ;;  %v1944_v61 = vmul.f32 %v13116_v59, %v1926_v56 }
 0x1e4   : > { %v1976_v0 = vshll.u32 %v10251_v58, 16  ;;  %v1980_v1 = vshrl.u32 %v10251_v58, 16 }
 0x1e5   : > { %v1957_v2 = vshll.u32 %v10249_v60, 16  ;;  %v1960_v57 = vshrl.u32 %v10249_v60, 16  ;;  %v10250_v3 = vpack.c.bf16 %v1944_v61, %v1944_v61 }
 0x1e6   : > { %v1978_v5 = vrot.slane %v1976_v0, 5  ;;  %v1982_v7 = vrot.slane %v1980_v1, 4  ;;  %v11641_v1 = vld [vmem:[%s14033_s3 + $0x100] sm:$0xff]  }
 0x1e7   : > { %v1959_v8 = vrot.slane %v1957_v2, 5  ;;  %v1962_v9 = vrot.slane %v1960_v57, 4  ;;  %v1966_v12 = vshll.u32 %v10250_v3, 16  ;;  %v1970_v13 = vshrl.u32 %v10250_v3, 16  ;;  %v11643_v3 = vld [vmem:[%s14033_s3 + $0x188] sm:$0xff]  }
 0x1e8   : > { %v1983_v4 = vor.u32 %v1982_v7, %v1978_v5 }
 0x1e9   : > { %v1963_v14 = vor.u32 %v1962_v9, %v1959_v8  ;;  %v1990_v15 = vsel %vm12809_vm15, %v1959_v8, %v1989_v63  ;;  %v1968_v16 = vrot.slane %v1966_v12, 5  ;;  %v1972_v17 = vrot.slane %v1970_v13, 4  ;;  %v11646_v13 = vld [vmem:[%s14033_s3 + $0x1d0] sm:$0xff]  }
 0x1ea   : > { %1991 = vst [vmem:[#allocation3] sm:$0x8] %v1990_v15  ;;  %v1984_v18 = vrot.slane %v1983_v4, 4 }
 0x1eb   : > { %v1964_v24 = vrot.slane %v1963_v14, 4  ;;  %v1973_v19 = vor.u32 %v1972_v17, %v1968_v16 }
 0x1ec   : > { %v1995_v20 = vsel %vm12814_vm3, %v1984_v18, %v1994_v10 }
 0x1ed   : > { %1996 = vst [vmem:[#allocation3 + $0xc] sm:$0x7] %v1995_v20  ;;  %v1969_v21 = vsel %vm12822_vm6, %v1964_v24, %v1968_v16  ;;  %v1974_v22 = vrot.slane %v1973_v19, 4  ;;  %v11645_v24 = vld [vmem:[%s14033_s3 + $0x108] sm:$0xff]  }
 0x1ee   : > { %1992 = vst [vmem:[#allocation3 + $0x4] sm:$0xf] %v1969_v21 }
 0x1ef   : > { %v1979_v39 = vsel %vm12822_vm6, %v1974_v22, %v1978_v5  ;;  %v11644_v5 = vld [vmem:[%s14033_s3 + $0x148] sm:$0xff]   ;;  %v11647_v22 = vld [vmem:[%s14033_s3 + $0x190] sm:$0xff]  }
 0x1f0   : > { %1993 = vst [vmem:[#allocation3 + $0x8] sm:$0xf] %v1979_v39  ;;  %v11648_v39 = vld [vmem:[%s14033_s3 + $0x150] sm:$0xff]  }
 0x1f1   : > { %v2002_v26 = vld [vmem:[#allocation3] sm:$0x8] }
 0x1f2   : > { %v2001_v30 = vld [vmem:[#allocation3] sm:$0xe] }
 0x1f3   : > { %v1997_v31 = vld [vmem:[#allocation3] sm:$0xf] }
 0x1f4   : > { %v13127_v28 = vld [vmem:[#allocation3 + $0xc] sm:$0xf] }
 0x1f5   : > { %v13129_v29 = vld [vmem:[#allocation3 + $0x4] sm:$0xf]  ;;  %v13132_v27 = vcombine.low %v13127_v28, %v2008_v25  ;;  %v2003_v36 = vld [vmem:[#allocation3 + $0xc] sm:$0x3]  ;;  %v9618_v9 = vcombine.low %v13127_v28, %v2007_v42 }
 0x1f6   : > { %v9612_v32 = vcombine.low %v2002_v26, %v13129_v29  ;;  %v9611_v33 = vcombine.low %v2001_v30, %v13129_v29  ;;  %v9608_v34 = vcombine.low %v1997_v31, %v13129_v29  ;;  %v2005_v40 = vld [vmem:[#allocation3 + $0x4] sm:$0xc]  ;;  %v13159_v60 = vld [vmem:[#allocation3 + $0xc] sm:$0x7] }
 0x1f7   : > { %v13137_v35 = vld [vmem:[#allocation3 + $0x8] sm:$0xf]  ;;  %v2110_v41 = vshrl.u32 %v13132_v27, 16  ;;  %v2113_v48 = vshll.u32 %v13132_v27, 16  ;;  %v2009_v10 = vld [vmem:[#allocation3 + $0x4] sm:$0x8] }
 0x1f8   : > { %v9613_v37 = vcombine.low %v13137_v35, %v2003_v36  ;;  %v13142_v38 = vcombine.low %v13137_v35, %v13137_v35  ;;  %v2054_v43 = vrot.slane %v9612_v32, 3  ;;  %v2026_v46 = vshll.u32 %v9608_v34, 16  ;;  %v11654_v31 = vld [vmem:[%s14033_s3 + $0x1d8] sm:$0xff]  }
 0x1f9   : > { %v13149_v47 = vcombine.low %v2005_v40, %v13137_v35  ;;  %v2043_v50 = vrot.slane %v9611_v33, 1  ;;  %v2024_v54 = vshrl.u32 %v9608_v34, 16  ;;  %v2112_v7 = vrot.slane %v2110_v41, 2  ;;  %v11651_v41 = vld [vmem:[#allocation3 + $0x8] ss:$0 sps:$4 sm:$0x77]  }
 0x1fa   : > { %v2055_v49 = vrot.slane %v9613_v37, 3  ;;  %v2044_v51 = vrot.slane %v13142_v38, 1  ;;  %v2031_v52 = vshll.u32 %v13142_v38, 16  ;;  %v2028_v55 = vrot.slane %v2026_v46, 1  ;;  %v11655_v42 = vld [vmem:[%s14033_s3 + $0x198] sm:$0xff]  }
 0x1fb   : > { %v2102_v56 = vshrl.u32 %v13149_v47, 16  ;;  %v2105_v58 = vshll.u32 %v13149_v47, 16  ;;  %v2035_v2 = vshrl.u32 %v13142_v38, 16  ;;  %v2115_v8 = vrot.slane %v2113_v48, 3  ;;  %v11652_v38 = vld [vmem:[%s14033_s3 + $0x110] sm:$0xff]  }
 0x1fc   : > { %v2056_v61 = vsel %vm900_vm7, %v2054_v43, %v2055_v49  ;;  %v2045_v63 = vsel %vm1012_vm5, %v2043_v50, %v2044_v51  ;;  %v2033_v0 = vrot.slane %v2031_v52, 1  ;;  %v2029_v57 = vor.u32 %v2028_v55, %v2024_v54  ;;  %v11656_v43 = vld [vmem:[%s14033_s3 + $0x158] sm:$0xff]   ;;  %v11659_v50 = vld [vmem:[%s14033_s3 + $0x1a0] sm:$0xff]   ;;  %v11663_v52 = vld [vmem:[%s14033_s3 + $0x1a8] sm:$0xff]  }
 0x1fd   : > { %2791 = vmatprep.mubr.bf16.mxu0 %v2056_v61  ;;  %v2104_v4 = vrot.slane %v2102_v56, 2  ;;  %v2107_v14 = vrot.slane %v2105_v58, 3  ;;  %v9614_v15 = vcombine.low %v13137_v35, %v13159_v60  ;;  %v2063_v17 = vshrl.u32 %v9612_v32, 16  ;;  %v11666_v54 = vld [vmem:[%s14033_s3 + $0x1f0] sm:$0xff]   ;;  %v11665_v55 = vld [vmem:[%s14033_s3 + $0x128] sm:$0xff]   ;;  %v11670_v61 = vld [vmem:[%s14033_s3 + $0x1f8] sm:$0xff]  }
 0x1fe   : > { %2792 = vmatmul.mubr.bf16.vlgmr.msra.gmra.mrb[20].mxu0 %v2045_v63  ;;  %v2037_v12 = vor.u32 %v2035_v2, %v2033_v0  ;;  %v2034_v16 = vsel %vm991_vm0, %v2029_v57, %v2033_v0  ;;  %v2066_v18 = vshll.u32 %v9612_v32, 16  ;;  %v9620_v21 = vcombine.low %v2009_v10, %v13137_v35  ;;  %v11667_v56 = vld [vmem:[%s14033_s3 + $0x1b0] sm:$0xff]   ;;  %v11671_v0 = vld [vmem:[%s14033_s3 + $0x1b8] sm:$0xff]   ;;  %v11676_v57 = vld [vmem:[%s14033_s3 + $0x200] sm:$0xff]  }
 0x1ff   : > { %10486 = vmatpush3.bf16.msra.mxu0 %v11638_v44  ;;  %2799 = vmatprep.mubr.bf16.mxu0 %v2055_v49  ;;  %v2071_v19 = vshrl.u32 %v9614_v15, 16  ;;  %v2074_v20 = vshll.u32 %v9614_v15, 16  ;;  %v2093_v25 = vrot.slane %v13149_v47, 2  ;;  %v13191_v26 = vrot.slane %v9618_v9, 2  ;;  %v11658_v44 = vld [vmem:[%s14033_s3 + $0x1e0] sm:$0xff]   ;;  %v11657_v49 = vld [vmem:[%s14033_s3 + $0x118] sm:$0xff]  }
 0x200   : > { %2743 = vmatprep.mubr.bf16.mxu1 %v2034_v16  ;;  %10487 = vmatprep.subr.bf16.mxu0 %v11642_v53  ;;  %v13193_v28 = vrot.slane %v2063_v17, 3  ;;  %v13195_v30 = vrot.slane %v2066_v18, 4  ;;  %v2124_v36 = vrot.slane %v13132_v27, 3  ;;  %v2108_v37 = vor.u32 %v2107_v14, %v2104_v4  ;;  %v11664_v53 = vld [vmem:[%s14033_s3 + $0x168] sm:$0xff]   ;;  %v11668_v58 = vld [vmem:[%s14033_s3 + $0x170] sm:$0xff]   ;;  %v11673_v2 = vld [vmem:[%s14033_s3 + $0x138] sm:$0xff]  }
 0x201   : > { %2744 = vmatmul.mubr.bf16.vlgmr.msra.gmra.mrb[16].mxu1 %v9608_v34  ;;  %v2073_v32 = vrot.slane %v2071_v19, 3  ;;  %v2076_v33 = vrot.slane %v2074_v20, 4  ;;  %v13200_v34 = vrot.slane %v9620_v21, 3  ;;  %v2116_v40 = vor.u32 %v2115_v8, %v2112_v7  ;;  %v11669_v63 = vld [vmem:[%s14033_s3 + $0x130] sm:$0xff]   ;;  %v11678_v7 = vld [vmem:[%s14033_s3 + $0x208] sm:$0xff]   ;;  %v11685_v15 = vld [vmem:[%s14033_s3 + $0x238] sm:$0xff]  }
 0x202   : > { %10458 = vmatpush3.bf16.msra.mxu1 %v11641_v1  ;;  %2751 = vmatprep.mubr.bf16.mxu1 %v2037_v12  ;;  %v9615_v48 = vcombine.low %v13129_v29, %v13137_v35  ;;  %v11662_v29 = vld [vmem:[%s14033_s3 + $0x1e8] sm:$0xff]   ;;  %v11661_v35 = vld [vmem:[%s14033_s3 + $0x120] sm:$0xff]   ;;  %v11672_v1 = vld [vmem:[%s14033_s3 + $0x178] sm:$0xff]   ;;  %v2069_v8 = vor.u32 %v13195_v30, %v13193_v28  ;;  %v9616_v10 = vcombine.low %v13159_v60, %v13159_v60 }
 0x203   : > { %10488 = vmatpush3.bf16.msra.mxu0 %v11643_v3  ;;  %10459 = vmatprep.subr.bf16.mxu1 %v11644_v5  ;;  %v2117_v46 = vsel %vm1074_vm8, %v2108_v37, %v2116_v40  ;;  %v2077_v3 = vor.u32 %v2076_v33, %v2073_v32  ;;  %v2095_v5 = vsel %vm902_vm11, %v2093_v25, %v13191_v26  ;;  %v11679_v47 = vld [vmem:[%s14033_s3 + $0x210] sm:$0xff]   ;;  %v11681_v12 = vld [vmem:[%s14033_s3 + $0x218] sm:$0xff]   ;;  %v11683_v4 = vld [vmem:[%s14033_s3 + $0x228] sm:$0xff]  }
 0x204   : > { %10489 = vmatprep.subr.bf16.mxu0 %v11646_v13  ;;  %v2125_v60 = vsel %vm900_vm7, %v13200_v34, %v2124_v36  ;;  %v11682_v13 = vld [vmem:[%s14033_s3 + $0x220] sm:$0xff]   ;;  %v11684_v14 = vld [vmem:[%s14033_s3 + $0x230] sm:$0xff]   ;;  %v11691_v19 = vld [vmem:[%s14035_s6 + $0x88] sm:$0xff]  }
 0x205   : > { %v2078_v9 = vsel %vm1033_vm12, %v2069_v8, %v2077_v3  ;;  %v11686_v16 = vld [vmem:[%s14035_s6 + $0xc0] sm:$0xff]   ;;  %v11692_v20 = vld [vmem:[%s14035_s6 + $0x48] sm:$0xff]   ;;  %v11693_v21 = vld [vmem:[%s14035_s6 + $0xd0] sm:$0xff]  }
 0x206   : > { %10460 = vmatpush3.bf16.msra.mxu1 %v11645_v24  ;;  %2800 = vmatmul.mubr.bf16.gmra.mrb[24].mxu0 %v2044_v51  ;;  %v11660_v51 = vld [vmem:[%s14033_s3 + $0x160] sm:$0xff]   ;;  %v11689_v24 = vld [vmem:[%s14035_s6 + $0xc8] sm:$0xff]   ;;  %v11696_v25 = vld [vmem:[%s14035_s6 + $0x50] sm:$0xff]  }
 0x207   : > { %10490 = vmatpush3.bf16.msra.mxu0 %v11647_v22  ;;  %10461 = vmatprep.subr.bf16.mxu1 %v11648_v39  ;;  %v11687_v17 = vld [vmem:[%s14035_s6 + $0x80] sm:$0xff]   ;;  %v11694_v22 = vld [vmem:[%s14035_s6 + $0x8] sm:$0xff]   ;;  %v11695_v39 = vld [vmem:[%s14035_s6 + $0x90] sm:$0xff]  }
 0x208   : > { %2887 = vmatprep.mubr.bf16.mxu0 %v2117_v46  ;;  %10491 = vmatprep.subr.bf16.mxu0 %v11654_v31  ;;  %v11688_v18 = vld [vmem:[%s14035_s6 + $0x40] sm:$0xff]   ;;  %v11698_v28 = vld [vmem:[%s14035_s6 + $0x10] sm:$0xff]   ;;  %v11699_v30 = vld [vmem:[%s14035_s6 + $0x98] sm:$0xff]  }
 0x209   : > { %2752 = vmatmul.mubr.bf16.gmra.mrb[20].mxu1 %v11651_v41  ;;  %v11690_v27 = vld [vmem:[%s14035_s6] sm:$0xff]   ;;  %v11700_v31 = vld [vmem:[%s14035_s6 + $0x58] sm:$0xff]   ;;  %v11705_v37 = vld [vmem:[%s14035_s6 + $0xe8] sm:$0xff]  }
 0x20a   : > { %10462 = vmatpush3.bf16.msra.mxu1 %v11652_v38  ;;  %2839 = vmatprep.mubr.bf16.mxu1 %v9615_v48  ;;  %v11701_v32 = vld [vmem:[%s14035_s6 + $0xe0] sm:$0xff]   ;;  %v11702_v33 = vld [vmem:[%s14035_s6 + $0x18] sm:$0xff]   ;;  %v11708_v41 = vld [vmem:[%s14035_s6 + $0x68] sm:$0xff]  }
 0x20b   : > { %10492 = vmatpush3.bf16.msra.mxu0 %v11655_v42  ;;  %10463 = vmatprep.subr.bf16.mxu1 %v11656_v43  ;;  %v11703_v34 = vld [vmem:[%s14035_s6 + $0xa0] sm:$0xff]   ;;  %v11709_v42 = vld [vmem:[%s14035_s6 + $0xf0] sm:$0xff]   ;;  %v11710_v43 = vld [vmem:[%s14035_s6 + $0x28] sm:$0xff]  }
 0x20c   : > { %10493 = vmatprep.subr.bf16.mxu0 %v11658_v44  ;;  %v11706_v38 = vld [vmem:[%s14035_s6 + $0x20] sm:$0xff]   ;;  %v11711_v44 = vld [vmem:[%s14035_s6 + $0xb0] sm:$0xff]   ;;  %v11713_v48 = vld [vmem:[%s14035_s6 + $0xf8] sm:$0xff]  }
 0x20d   : > { %v11712_v46 = vld [vmem:[%s14035_s6 + $0x70] sm:$0xff]  }
 0x20e   : > { %10464 = vmatpush3.bf16.msra.mxu1 %v11657_v49  ;;  %v11714_v49 = vld [vmem:[%s14035_s6 + $0x30] sm:$0xff]  }
 0x20f   : > { %10494 = vmatpush3.bf16.msra.mxu0 %v11659_v50  ;;  %10465 = vmatprep.subr.bf16.mxu1 %v11660_v51  ;;  %v11715_v50 = vld [vmem:[%s14035_s6 + $0xb8] sm:$0xff]  }
 0x210   : > { %10495 = vmatprep.subr.bf16.mxu0 %v11662_v29  ;;  %v11716_v51 = vld [vmem:[%s14035_s6 + $0x78] sm:$0xff]   ;;  %v11719_v29 = vld [vmem:[%s14035_s6 + $0x1c0] sm:$0xff]  }
 0x212   : > { %10466 = vmatpush3.bf16.msra.mxu1 %v11661_v35  ;;  %v11720_v35 = vld [vmem:[%s14035_s6 + $0x38] sm:$0xff]  }
 0x213   : > { %10496 = vmatpush3.bf16.msra.mxu0 %v11663_v52  ;;  %10467 = vmatprep.subr.bf16.mxu1 %v11664_v53  ;;  %v11725_v52 = vld [vmem:[%s14035_s6 + $0x140] sm:$0xff]  }
 0x214   : > { %10497 = vmatprep.subr.bf16.mxu0 %v11666_v54 }
 0x216   : > { %10468 = vmatpush3.bf16.msra.mxu1 %v11665_v55 }
 0x217   : > { %10498 = vmatpush3.bf16.msra.mxu0 %v11667_v56  ;;  %10469 = vmatprep.subr.bf16.mxu1 %v11668_v58 }
 0x218   : > { %10499 = vmatprep.subr.bf16.mxu0 %v11670_v61 }
 0x21a   : > { %10470 = vmatpush3.bf16.msra.mxu1 %v11669_v63  ;;  %v9621_v63 = vld [vmem:[%s14036_s28] ss:$0 sm:$0xff] }
 0x21b   : > { %10500 = vmatpush3.bf16.msra.mxu0 %v11671_v0  ;;  %10471 = vmatprep.subr.bf16.mxu1 %v11672_v1 }
 0x21c   : > { %10523 = vmatprep.subr.bf16.mxu0 %v11688_v18 }
 0x21e   : > { %10472 = vmatpush3.bf16.msra.mxu1 %v11673_v2  ;;  %2888 = vmatmul.mubr.bf16.vlgmr.msra.gmra.mrb[28].mxu0 %v2095_v5 }
 0x21f   : > { %2895 = vmatprep.mubr.bf16.mxu0 %v2116_v40  ;;  %11286 = vmatprep.subr.bf16.mxu1 %v11676_v57  ;;  %v11707_v40 = vld [vmem:[%s14035_s6 + $0xa8] sm:$0xff]  }
 0x220   : > { %10524 = vmatpush3.bf16.msra.mxu0 %v11690_v27 }
 0x221   : > { %2840 = vmatmul.mubr.bf16.vlgmr.msra.gmra.mrb[24].mxu1 %v2078_v9  ;;  %10525 = vmatprep.subr.bf16.mxu0 %v11692_v20 }
 0x222   : > { %2847 = vmatprep.mubr.bf16.mxu1 %v9616_v10  ;;  %11287 = vmatpush3.bf16.msra.mxu1 %v11676_v57 }
 0x223   : > { %11288 = vmatprep.subr.bf16.mxu1 %v11678_v7 }
 0x224   : > { %10526 = vmatpush3.bf16.msra.mxu0 %v11694_v22 }
 0x225   : > { %10527 = vmatprep.subr.bf16.mxu0 %v11696_v25 }
 0x226   : > { %11289 = vmatpush3.bf16.msra.mxu1 %v11678_v7  ;;  %2896 = vmatmul.mubr.bf16.gmra.mrb[32].mxu0 %v13191_v26  ;;  %v11697_v26 = vld [vmem:[%s14035_s6 + $0xd8] sm:$0xff]  }
 0x227   : > { %11290 = vmatprep.subr.bf16.mxu1 %v11679_v47 }
 0x228   : > { %10528 = vmatpush3.bf16.msra.mxu0 %v11698_v28 }
 0x229   : > { %2848 = vmatmul.mubr.bf16.gmra.mrb[28].mxu1 %v2077_v3  ;;  %10529 = vmatprep.subr.bf16.mxu0 %v11700_v31 }
 0x22a   : > { %11291 = vmatpush3.bf16.msra.mxu1 %v11679_v47  ;;  %11302 = vmatprep.mubr.bf16.mxu1 %v2125_v60 }
 0x22b   : > { %11292 = vmatprep.subr.bf16.mxu1 %v11681_v12 }
 0x22c   : > { %10530 = vmatpush3.bf16.msra.mxu0 %v11702_v33 }
 0x22e   : > { %11293 = vmatpush3.bf16.msra.mxu1 %v11681_v12 }
 0x22f   : > { %11294 = vmatprep.subr.bf16.mxu1 %v11682_v13 }
 0x232   : > { %11295 = vmatpush3.bf16.msra.mxu1 %v11682_v13 }
 0x233   : > { %11296 = vmatprep.subr.bf16.mxu1 %v11683_v4 }
 0x236   : > { %11297 = vmatpush3.bf16.msra.mxu1 %v11683_v4 }
 0x237   : > { %11298 = vmatprep.subr.bf16.mxu1 %v11684_v14 }
 0x23a   : > { %11299 = vmatpush3.bf16.msra.mxu1 %v11684_v14 }
 0x23b   : > { %11300 = vmatprep.subr.bf16.mxu1 %v11685_v15 }
 0x23e   : > { %11301 = vmatpush3.bf16.msra.mxu1 %v11685_v15 }
 0x23f   : > { %10551 = vmatprep.subr.bf16.mxu1 %v11686_v16 }
 0x241   : > { %11303 = vmatmul.mubr.bf16.vlgmr.msra.gmra.mrb[32].mxu1 %v2124_v36  ;;  %v11704_v36 = vld [vmem:[%s14035_s6 + $0x60] sm:$0xff]  }
 0x242   : > { %10552 = vmatpush3.bf16.msra.mxu1 %v11687_v17  ;;  %10531 = vmatprep.subr.bf16.mxu0 %v11704_v36 }
 0x243   : > { %10553 = vmatprep.subr.bf16.mxu1 %v11689_v24  ;;  %10532 = vmatpush3.bf16.msra.mxu0 %v11706_v38 }
 0x244   : > { %10533 = vmatprep.subr.bf16.mxu0 %v11708_v41 }
 0x246   : > { %10554 = vmatpush3.bf16.msra.mxu1 %v11691_v19 }
 0x247   : > { %10555 = vmatprep.subr.bf16.mxu1 %v11693_v21  ;;  %10534 = vmatpush3.bf16.msra.mxu0 %v11710_v43 }
 0x248   : > { %10535 = vmatprep.subr.bf16.mxu0 %v11712_v46 }
 0x24a   : > { %10556 = vmatpush3.bf16.msra.mxu1 %v11695_v39 }
 0x24b   : > { %10557 = vmatprep.subr.bf16.mxu1 %v11697_v26  ;;  %10536 = vmatpush3.bf16.msra.mxu0 %v11714_v49 }
 0x24c   : > { %10537 = vmatprep.subr.bf16.mxu0 %v11716_v51 }
 0x24e   : > { %10558 = vmatpush3.bf16.msra.mxu1 %v11699_v30 }
 0x24f   : > { %10559 = vmatprep.subr.bf16.mxu1 %v11701_v32  ;;  %10538 = vmatpush3.bf16.msra.mxu0 %v11720_v35 }
 0x250   : > { %10579 = vmatprep.subr.bf16.mxu0 %v11725_v52 }
 0x252   : > { %10560 = vmatpush3.bf16.msra.mxu1 %v11703_v34 }
 0x253   : > { %10561 = vmatprep.subr.bf16.mxu1 %v11705_v37 }
 0x256   : > { %10562 = vmatpush3.bf16.msra.mxu1 %v11707_v40 }
 0x257   : > { %10563 = vmatprep.subr.bf16.mxu1 %v11709_v42 }
 0x25a   : > { %10564 = vmatpush3.bf16.msra.mxu1 %v11711_v44 }
 0x25b   : > { %10565 = vmatprep.subr.bf16.mxu1 %v11713_v48 }
 0x25e   : > { %10566 = vmatpush3.bf16.msra.mxu1 %v11715_v50 }
 0x25f   : > { %10607 = vmatprep.subr.bf16.mxu1 %v11719_v29 }
 0x2d1   : > { %v10445_v53 = vpop.f32.mrb[20].mxu0 }
 0x2d2   : > { %v10446_v54 = vpop.f32.mrb[21].mxu0 }
 0x2d3   : > { %v10447_v55 = vadd.f32 %v10446_v54, %v10445_v53  ;;  %v10448_v56 = vpop.f32.mrb[22].mxu0  ;;  %v2957_v53 = vld [vmem:[#allocation2 + $0xc] sm:$0x7] }
 0x2d4   : > { %v10417_v58 = vpop.f32.mrb[16].mxu1  ;;  %v10449_v61 = vpop.f32.mrb[23].mxu0 }
 0x2d5   : > { %v10418_v0 = vpop.f32.mrb[17].mxu1  ;;  %v10450_v1 = vadd.f32 %v10449_v61, %v10448_v56  ;;  %v2954_v56 = vld [vmem:[#allocation2] sm:$0x8] }
 0x2d6   : > { %v10419_v2 = vadd.f32 %v10418_v0, %v10417_v58  ;;  %v10420_v57 = vpop.f32.mrb[18].mxu1  ;;  %v2961_v0 = vunpack.c.l.bf16 %v2957_v53 }
 0x2d7   : > { %v10421_v3 = vpop.f32.mrb[19].mxu1 }
 0x2d8   : > { %v2746_v5 = vadd.f32 %v10419_v2, %v9621_v63  ;;  %v10422_v7 = vadd.f32 %v10421_v3, %v10420_v57  ;;  %v2958_v57 = vunpack.c.l.bf16 %v2954_v56 }
 0x2d9   : > { %v10451_v8 = vpop.f32.mrb[24].mxu0 }
 0x2da   : > { %v2749_v9 = vadd.f32 %v10422_v7, %v9621_v63  ;;  %v10452_v10 = vpop.f32.mrb[25].mxu0  ;;  %v2794_v47 = vadd.f32 %v10447_v55, %v2746_v5  ;;  %v2955_v5 = vld [vmem:[#allocation2 + $0x4] sm:$0xff]  }
 0x2db   : > { %v10453_v12 = vadd.f32 %v10452_v10, %v10451_v8  ;;  %v10454_v60 = vpop.f32.mrb[26].mxu0  ;;  %v13412_v10 = vrot.slane %v13112_v23, 1 }
 0x2dc   : > { %v10423_v13 = vpop.f32.mrb[20].mxu1  ;;  %v10455_v4 = vpop.f32.mrb[27].mxu0  ;;  %v2797_v14 = vadd.f32 %v10450_v1, %v2749_v9  ;;  %v2960_v60 = vunpack.c.h.bf16 %v2955_v5 }
 0x2dd   : > { %v10424_v15 = vpop.f32.mrb[21].mxu1  ;;  %v2980_v4 = vrot.slane %v13116_v59, 1 }
 0x2de   : > { %v10425_v16 = vadd.f32 %v10424_v15, %v10423_v13  ;;  %v10426_v17 = vpop.f32.mrb[22].mxu1  ;;  %v13415_v13 = vrot.slane %v13110_v45, 1 }
 0x2df   : > { %v10427_v18 = vpop.f32.mrb[23].mxu1  ;;  %v3012_v17 = vld [vmem:[#allocation2 + $0xc] sm:$0x7] }
 0x2e0   : > { %v2754_v24 = vadd.f32 %v10425_v16, %v9621_v63 }
 0x2e2   : > { %v2802_v27 = vadd.f32 %v10453_v12, %v2754_v24  ;;  %v2959_v12 = vunpack.c.l.bf16 %v2955_v5 }
 0x2f1   : > { %v10501_v19 = vpop.f32.mrb[28].mxu0 }
 0x2f2   : > { %v10502_v20 = vpop.f32.mrb[29].mxu0 }
 0x2f3   : > { %v10503_v21 = vadd.f32 %v10502_v20, %v10501_v19  ;;  %v10504_v22 = vpop.f32.mrb[30].mxu0 }
 0x2f4   : > { %v10473_v39 = vpop.f32.mrb[24].mxu1  ;;  %v10505_v25 = vpop.f32.mrb[31].mxu0 }
 0x2f5   : > { %v10474_v26 = vpop.f32.mrb[25].mxu1  ;;  %v10506_v28 = vadd.f32 %v10505_v25, %v10504_v22  ;;  %v13428_v25 = vsel %vm1012_vm5, %v2980_v4, %v13412_v10 }
 0x2f6   : > { %v10475_v30 = vadd.f32 %v10474_v26, %v10473_v39  ;;  %v10476_v31 = vpop.f32.mrb[26].mxu1  ;;  %v13424_v39 = vsel %vm1012_vm5, %v13415_v13, %v2980_v4  ;;  %v11728_v4 = vld [vmem:[%s14035_s6 + $0x188] sm:$0xff]  }
 0x2f7   : > { %v10477_v32 = vpop.f32.mrb[27].mxu1 }
 0x2f8   : > { %v2842_v33 = vadd.f32 %v10475_v30, %v2794_v47  ;;  %v10478_v34 = vadd.f32 %v10477_v32, %v10476_v31 }
 0x2f9   : > { %v10507_v36 = vpop.f32.mrb[32].mxu0 }
 0x2fa   : > { %v2845_v37 = vadd.f32 %v10478_v34, %v2797_v14  ;;  %v10508_v38 = vpop.f32.mrb[33].mxu0  ;;  %v2890_v40 = vadd.f32 %v10503_v21, %v2842_v33 }
 0x2fb   : > { %v10509_v41 = vadd.f32 %v10508_v38, %v10507_v36  ;;  %v10510_v42 = vpop.f32.mrb[34].mxu0  ;;  %v3026_v36 = vld [vmem:[#allocation2 + $0x10] sm:$0x3] }
 0x2fc   : > { %v10479_v43 = vpop.f32.mrb[28].mxu1  ;;  %v10511_v44 = vpop.f32.mrb[35].mxu0  ;;  %v2893_v46 = vadd.f32 %v10506_v28, %v2845_v37 }
 0x2fd   : > { %v10480_v48 = vpop.f32.mrb[29].mxu1 }
 0x2fe   : > { %v10481_v49 = vadd.f32 %v10480_v48, %v10479_v43  ;;  %v10482_v50 = vpop.f32.mrb[30].mxu1 }
 0x2ff   : > { %v10483_v51 = vpop.f32.mrb[31].mxu1 }
 0x300   : > { %v2850_v29 = vadd.f32 %v10481_v49, %v2802_v27 }
 0x302   : > { %v2898_v35 = vadd.f32 %v10509_v41, %v2850_v29 }
 0x314   : > { %v11304_v52 = vpop.f32.mrb[32].mxu1 }
 0x315   : > { %v2946_v54 = vadd.f32 %v11304_v52, %v2898_v35  ;;  %v2937_v55 = vpop.f32.mrb[33].mxu1 }
 0x316   : > { %v2938_v58 = vadd.f32 %v2937_v55, %v2890_v40  ;;  %v11305_v61 = vpop.f32.mrb[34].mxu1 }
 0x317   : > { %v2953_v63 = vmax.f32 %v2946_v54, 0.0  ;;  %v2940_v1 = vpop.f32.mrb[35].mxu1 }
 0x318   : > { %v2951_v2 = vmax.f32 %v2938_v58, 0.0  ;;  %v2941_v3 = vadd.f32 %v2940_v1, %v2893_v46 }
 0x319   : > { %v2969_v7 = vrot.slane %v2953_v63, 1 }
 0x31a   : > { %v2966_v8 = vrot.slane %v2951_v2, 1  ;;  %v2952_v9 = vmax.f32 %v2941_v3, 0.0 }
 0x31b   : > { %v2978_v47 = vadd.f32 %v2969_v7, %v2961_v0 }
 0x31c   : > { %v2975_v14 = vadd.f32 %v2966_v8, %v2958_v57  ;;  %v2967_v15 = vrot.slane %v2952_v9, 1  ;;  %v11726_v57 = vld [vmem:[%s14035_s6 + $0x1c8] sm:$0xff]  }
 0x31d   : > { %v2991_v16 = vmul.f32 %v13412_v10, %v2978_v47 }
 0x31e   : > { %v2988_v18 = vmul.f32 %v13415_v13, %v2975_v14  ;;  %v2968_v24 = vsel %vm1012_vm5, %v2966_v8, %v2967_v15  ;;  %v2970_v27 = vsel %vm1012_vm5, %v2967_v15, %v2969_v7  ;;  %v11727_v14 = vld [vmem:[%s14035_s6 + $0x100] sm:$0xff]  }
 0x31f   : > { %v10255_v19 = vpack.c.bf16 %v2991_v16, %v2991_v16  ;;  %v2976_v20 = vadd.f32 %v2968_v24, %v2959_v12  ;;  %v2977_v21 = vadd.f32 %v2970_v27, %v2960_v60  ;;  %v11729_v24 = vld [vmem:[%s14035_s6 + $0x148] sm:$0xff]   ;;  %v11730_v27 = vld [vmem:[%s14035_s6 + $0x1d0] sm:$0xff]  }
 0x320   : > { %v10252_v22 = vpack.c.bf16 %v2988_v18, %v2988_v18 }
 0x321   : > { %v3013_v26 = vsel %vm12814_vm3, %v10255_v19, %v3012_v17  ;;  %v2989_v28 = vmul.f32 %v13424_v39, %v2976_v20  ;;  %v2990_v30 = vmul.f32 %v13428_v25, %v2977_v21  ;;  %v11732_v21 = vld [vmem:[%s14035_s6 + $0x190] sm:$0xff]  }
 0x322   : > { %3014 = vst [vmem:[#allocation2 + $0xc] sm:$0x7] %v3013_v26  ;;  %v3008_v31 = vsel %vm12809_vm15, %v10252_v22, %v2954_v56  ;;  %v11723_v56 = vld [vmem:[%s14035_s6 + $0x180] sm:$0xff]   ;;  %v11731_v22 = vld [vmem:[%s14035_s6 + $0x108] sm:$0xff]  }
 0x323   : > { %3009 = vst [vmem:[#allocation2] sm:$0x8] %v3008_v31  ;;  %v10253_v32 = vpack.c.bf16 %v2989_v28, %v2989_v28  ;;  %v10254_v33 = vpack.c.bf16 %v2990_v30, %v2990_v30  ;;  %v11736_v28 = vld [vmem:[%s14035_s6 + $0x1d8] sm:$0xff]   ;;  %v11735_v30 = vld [vmem:[%s14035_s6 + $0x150] sm:$0xff]  }
 0x325   : > { %3010 = vst [vmem:[#allocation2 + $0x4] sm:$0xf] %v10253_v32  ;;  %3011 = vst [vmem:[#allocation2 + $0x8] sm:$0xf] %v10254_v33  ;;  %v11739_v32 = vld [vmem:[%s14035_s6 + $0x198] sm:$0xff]   ;;  %v11738_v33 = vld [vmem:[%s14035_s6 + $0x110] sm:$0xff]  }
 0x329   : > { %v13436_v34 = vld [vmem:[#allocation2 + $0xc] sm:$0xf] }
 0x32a   : > { %v3020_v37 = vld [vmem:[#allocation2] sm:$0x8]  ;;  %v3021_v38 = vld [vmem:[#allocation2 + $0xc] sm:$0x3]  ;;  %v13443_v44 = vcombine.low %v13436_v34, %v3026_v36 }
 0x32b   : > { %v3019_v40 = vld [vmem:[#allocation2] sm:$0xe] }
 0x32c   : > { %v13438_v41 = vld [vmem:[#allocation2 + $0x4] sm:$0xf]  ;;  %v13440_v42 = vld [vmem:[#allocation2 + $0x8] sm:$0xf]  ;;  %v3015_v51 = vld [vmem:[#allocation2] sm:$0xf] }
 0x32d   : > { %v3023_v43 = vld [vmem:[#allocation2 + $0x4] sm:$0xc]  ;;  %v13446_v46 = vcombine.low %v3020_v37, %v13438_v41  ;;  %v9703_v48 = vcombine.low %v13440_v42, %v3021_v38  ;;  %v9700_v49 = vcombine.low %v13440_v42, %v13440_v42  ;;  %v9701_v50 = vcombine.low %v3019_v40, %v13438_v41  ;;  %v11737_v36 = vld [vmem:[#allocation2 + $0x8] ss:$0 sps:$4 sm:$0x77]   ;;  %v11741_v37 = vld [vmem:[%s14035_s6 + $0x158] sm:$0xff]  }
 0x32e   : > { %v9698_v29 = vcombine.low %v3015_v51, %v13438_v41  ;;  %v13454_v35 = vcombine.low %v3023_v43, %v13440_v42  ;;  %v3128_v63 = vshrl.u32 %v13443_v44, 16  ;;  %v3131_v0 = vshll.u32 %v13443_v44, 16  ;;  %v11742_v38 = vld [vmem:[%s14035_s6 + $0x1e0] sm:$0xff]  }
 0x32f   : > { %v3072_v52 = vrot.slane %v13446_v46, 3  ;;  %v3073_v53 = vrot.slane %v9703_v48, 3  ;;  %v3061_v54 = vrot.slane %v9701_v50, 1  ;;  %v3062_v55 = vrot.slane %v9700_v49, 1  ;;  %v11744_v43 = vld [vmem:[%s14035_s6 + $0x1a0] sm:$0xff]   ;;  %v11743_v48 = vld [vmem:[%s14035_s6 + $0x118] sm:$0xff]  }
 0x330   : > { %v3044_v58 = vshll.u32 %v9698_v29, 16  ;;  %v3049_v61 = vshll.u32 %v9700_v49, 16  ;;  %v3120_v3 = vshrl.u32 %v13454_v35, 16  ;;  %v3123_v5 = vshll.u32 %v13454_v35, 16  ;;  %v11748_v50 = vld [vmem:[%s14035_s6 + $0x1a8] sm:$0xff]   ;;  %v11747_v51 = vld [vmem:[%s14035_s6 + $0x120] sm:$0xff]  }
 0x331   : > { %v3074_v1 = vsel %vm900_vm7, %v3072_v52, %v3073_v53  ;;  %v3063_v2 = vsel %vm1012_vm5, %v3061_v54, %v3062_v55  ;;  %v3042_v7 = vshrl.u32 %v9698_v29, 16  ;;  %v3053_v15 = vshrl.u32 %v9700_v49, 16  ;;  %v11746_v49 = vld [vmem:[%s14035_s6 + $0x1e8] sm:$0xff]  }
 0x332   : > { %3809 = vmatprep.mubr.bf16.mxu1 %v3074_v1  ;;  %v3046_v8 = vrot.slane %v3044_v58, 1  ;;  %v3051_v9 = vrot.slane %v3049_v61, 1  ;;  %v3122_v47 = vrot.slane %v3120_v3, 2  ;;  %v3125_v12 = vrot.slane %v3123_v5, 3  ;;  %v11749_v52 = vld [vmem:[%s14035_s6 + $0x168] sm:$0xff]   ;;  %v11754_v58 = vld [vmem:[%s14035_s6 + $0x1f8] sm:$0xff]  }
 0x333   : > { %3810 = vmatmul.mubr.bf16.vlgmr.msra.gmra.mrb[36].mxu1 %v3063_v2  ;;  %v3130_v16 = vrot.slane %v3128_v63, 2  ;;  %v3133_v17 = vrot.slane %v3131_v0, 3  ;;  %v9705_v40 = vcombine.low %v13438_v41, %v13440_v42  ;;  %v11745_v41 = vld [vmem:[%s14035_s6 + $0x160] sm:$0xff]   ;;  %v3025_v61 = vld [vmem:[#allocation2 + $0x10] sm:$0x1]  ;;  %v3081_v0 = vshrl.u32 %v13446_v46, 16 }
 0x334   : > { %10608 = vmatpush3.bf16.msra.mxu1 %v11723_v56  ;;  %3817 = vmatprep.mubr.bf16.mxu1 %v3073_v53  ;;  %v3047_v60 = vor.u32 %v3046_v8, %v3042_v7  ;;  %v3055_v19 = vor.u32 %v3053_v15, %v3051_v9  ;;  %v3126_v20 = vor.u32 %v3125_v12, %v3122_v47  ;;  %v3022_v53 = vld [vmem:[#allocation2 + $0xc] sm:$0x7]  ;;  %v11753_v63 = vld [vmem:[%s14035_s6 + $0x170] sm:$0xff]   ;;  %v3084_v1 = vshll.u32 %v13446_v46, 16  ;;  %v11756_v3 = vld [vmem:[%s14035_s6 + $0x1b8] sm:$0xff]  }
 0x335   : > { %10609 = vmatprep.subr.bf16.mxu1 %v11726_v57  ;;  %v13488_v26 = vor.u32 %v3133_v17, %v3130_v16  ;;  %v9704_v54 = vcombine.low %v13440_v42, %v3022_v53  ;;  %v11751_v56 = vld [vmem:[%s14035_s6 + $0x128] sm:$0xff]   ;;  %v9708_v5 = vcombine.low %v13436_v34, %v3025_v61  ;;  %v11755_v7 = vld [vmem:[%s14035_s6 + $0x130] sm:$0xff]   ;;  %v11757_v46 = vld [vmem:[%s14035_s6 + $0x178] sm:$0xff]   ;;  %v3111_v8 = vrot.slane %v13454_v35, 2 }
 0x336   : > { %v3052_v18 = vsel %vm991_vm0, %v3047_v60, %v3051_v9  ;;  %v3083_v9 = vrot.slane %v3081_v0, 3  ;;  %v3086_v47 = vrot.slane %v3084_v1, 4  ;;  %v11759_v34 = vld [vmem:[%s14035_s6 + $0x138] sm:$0xff]   ;;  %v11761_v15 = vld [vmem:[%s14035_s6 + $0x200] sm:$0xff]   ;;  %v11791_v61 = vld [vmem:[#allocation4 + $0xe8] sm:$0xff]  }
 0x337   : > { %3761 = vmatprep.mubr.bf16.mxu0 %v3052_v18  ;;  %v3135_v31 = vsel %vm1074_vm8, %v3126_v20, %v13488_v26  ;;  %v3089_v2 = vshrl.u32 %v9704_v54, 16  ;;  %v3092_v57 = vshll.u32 %v9704_v54, 16  ;;  %v3027_v17 = vld [vmem:[#allocation2 + $0x4] sm:$0x8]  ;;  %v11763_v18 = vld [vmem:[%s14035_s6 + $0x208] sm:$0xff]   ;;  %v11764_v20 = vld [vmem:[%s14035_s6 + $0x210] sm:$0xff]  }
 0x338   : > { %3762 = vmatmul.mubr.bf16.vlgmr.msra.gmra.mrb[36].mxu0 %v9698_v29  ;;  %10610 = vmatpush3.bf16.msra.mxu1 %v11728_v4  ;;  %v11750_v29 = vld [vmem:[%s14035_s6 + $0x1f0] sm:$0xff]   ;;  %v3112_v4 = vrot.slane %v9708_v5, 2  ;;  %v3087_v35 = vor.u32 %v3086_v47, %v3083_v9  ;;  %v11786_v54 = vld [vmem:[#allocation4 + $0x18] sm:$0xff]   ;;  %v11796_v5 = vld [vmem:[#allocation4 + $0xb0] sm:$0xff]  }
 0x339   : > { %10580 = vmatpush3.bf16.msra.mxu0 %v11727_v14  ;;  %3769 = vmatprep.mubr.bf16.mxu0 %v3055_v19  ;;  %v3091_v12 = vrot.slane %v3089_v2, 3  ;;  %v3094_v60 = vrot.slane %v3092_v57, 4  ;;  %v9710_v19 = vcombine.low %v3027_v17, %v13440_v42  ;;  %v11793_v0 = vld [vmem:[#allocation4 + $0x68] sm:$0xff]   ;;  %v11795_v2 = vld [vmem:[#allocation4 + $0xf0] sm:$0xff]   ;;  %v11800_v9 = vld [vmem:[#allocation4 + $0xb8] sm:$0xff]  }
 0x33a   : > { %10581 = vmatprep.subr.bf16.mxu0 %v11729_v24  ;;  %10611 = vmatprep.subr.bf16.mxu1 %v11730_v27  ;;  %v3113_v14 = vsel %vm902_vm11, %v3111_v8, %v3112_v4  ;;  %v9706_v27 = vcombine.low %v3022_v53, %v3022_v53  ;;  %v11785_v53 = vld [vmem:[#allocation4 + $0x58] sm:$0xff]   ;;  %v11792_v1 = vld [vmem:[#allocation4 + $0xa8] sm:$0xff]   ;;  %v11805_v47 = vld [vmem:[#allocation4 + $0x1c0] sm:$0xff]  }
 0x33b   : > { %3818 = vmatmul.mubr.bf16.gmra.mrb[40].mxu1 %v3062_v55  ;;  %v11752_v55 = vld [vmem:[%s14035_s6 + $0x1b0] sm:$0xff]   ;;  %v3095_v16 = vor.u32 %v3094_v60, %v3091_v12  ;;  %v11801_v8 = vld [vmem:[#allocation4 + $0x78] sm:$0xff]   ;;  %v11810_v60 = vld [vmem:[#allocation4 + $0x140] sm:$0xff]  }
 0x33c   : > { %10612 = vmatpush3.bf16.msra.mxu1 %v11732_v21  ;;  %3905 = vmatprep.mubr.bf16.mxu1 %v3135_v31  ;;  %v3141_v21 = vrot.slane %v9710_v19, 3  ;;  %v11770_v31 = vld [vmem:[%s14035_s6 + $0x238] sm:$0xff]   ;;  %v11794_v57 = vld [vmem:[#allocation4 + $0x28] sm:$0xff]   ;;  %v11802_v12 = vld [vmem:[#allocation4 + $0x38] sm:$0xff]  }
 0x33d   : > { %10582 = vmatpush3.bf16.msra.mxu0 %v11731_v22  ;;  %10613 = vmatprep.subr.bf16.mxu1 %v11736_v28  ;;  %v3096_v24 = vsel %vm1033_vm12, %v3087_v35, %v3095_v16  ;;  %v3142_v22 = vrot.slane %v13443_v44, 3  ;;  %v11767_v28 = vld [vmem:[%s14035_s6 + $0x220] sm:$0xff]   ;;  %v11768_v44 = vld [vmem:[%s14035_s6 + $0x228] sm:$0xff]  }
 0x33e   : > { %10583 = vmatprep.subr.bf16.mxu0 %v11735_v30  ;;  %v11769_v30 = vld [vmem:[%s14035_s6 + $0x230] sm:$0xff]  }
 0x33f   : > { %v3143_v42 = vsel %vm900_vm7, %v3141_v21, %v3142_v22 }
 0x340   : > { %3770 = vmatmul.mubr.bf16.gmra.mrb[40].mxu0 %v11737_v36  ;;  %10614 = vmatpush3.bf16.msra.mxu1 %v11739_v32  ;;  %v11771_v32 = vld [vmem:[#allocation4 + $0xc0] sm:$0xff]  }
 0x341   : > { %10584 = vmatpush3.bf16.msra.mxu0 %v11738_v33  ;;  %3857 = vmatprep.mubr.bf16.mxu0 %v9705_v40  ;;  %v11772_v33 = vld [vmem:[#allocation4 + $0x80] sm:$0xff]   ;;  %v11776_v40 = vld [vmem:[#allocation4 + $0x88] sm:$0xff]  }
 0x342   : > { %10585 = vmatprep.subr.bf16.mxu0 %v11741_v37  ;;  %10615 = vmatprep.subr.bf16.mxu1 %v11742_v38  ;;  %v11773_v36 = vld [vmem:[#allocation4 + $0x40] sm:$0xff]   ;;  %v11775_v38 = vld [vmem:[#allocation4 + $0xc8] sm:$0xff]  }
 0x343   : > { %v11774_v37 = vld [vmem:[#allocation4] sm:$0xff]  }
 0x344   : > { %10616 = vmatpush3.bf16.msra.mxu1 %v11744_v43  ;;  %v11777_v43 = vld [vmem:[#allocation4 + $0x48] sm:$0xff]  }
 0x345   : > { %10586 = vmatpush3.bf16.msra.mxu0 %v11743_v48  ;;  %10617 = vmatprep.subr.bf16.mxu1 %v11746_v49  ;;  %v11778_v48 = vld [vmem:[#allocation4 + $0x8] sm:$0xff]   ;;  %v11779_v49 = vld [vmem:[#allocation4 + $0xd0] sm:$0xff]  }
 0x346   : > { %10587 = vmatprep.subr.bf16.mxu0 %v11745_v41  ;;  %v11780_v41 = vld [vmem:[#allocation4 + $0x90] sm:$0xff]  }
 0x348   : > { %10618 = vmatpush3.bf16.msra.mxu1 %v11748_v50  ;;  %v11781_v50 = vld [vmem:[#allocation4 + $0x50] sm:$0xff]  }
 0x349   : > { %10588 = vmatpush3.bf16.msra.mxu0 %v11747_v51  ;;  %10619 = vmatprep.subr.bf16.mxu1 %v11750_v29  ;;  %v11782_v51 = vld [vmem:[#allocation4 + $0x10] sm:$0xff]   ;;  %v11783_v29 = vld [vmem:[#allocation4 + $0xd8] sm:$0xff]  }
 0x34a   : > { %10589 = vmatprep.subr.bf16.mxu0 %v11749_v52  ;;  %v11784_v52 = vld [vmem:[#allocation4 + $0x98] sm:$0xff]  }
 0x34c   : > { %10620 = vmatpush3.bf16.msra.mxu1 %v11752_v55  ;;  %v11787_v55 = vld [vmem:[#allocation4 + $0xe0] sm:$0xff]  }
 0x34d   : > { %10590 = vmatpush3.bf16.msra.mxu0 %v11751_v56  ;;  %10621 = vmatprep.subr.bf16.mxu1 %v11754_v58  ;;  %v11789_v56 = vld [vmem:[#allocation4 + $0x60] sm:$0xff]  }
 0x34e   : > { %10591 = vmatprep.subr.bf16.mxu0 %v11753_v63  ;;  %v11788_v58 = vld [vmem:[#allocation4 + $0xa0] sm:$0xff]  }
 0x34f   : > { %v11790_v63 = vld [vmem:[#allocation4 + $0x20] sm:$0xff]  }
 0x350   : > { %10622 = vmatpush3.bf16.msra.mxu1 %v11756_v3  ;;  %v11797_v3 = vld [vmem:[#allocation4 + $0x70] sm:$0xff]  }
 0x351   : > { %10592 = vmatpush3.bf16.msra.mxu0 %v11755_v7  ;;  %10645 = vmatprep.subr.bf16.mxu1 %v11773_v36  ;;  %v11799_v7 = vld [vmem:[#allocation4 + $0xf8] sm:$0xff]  }
 0x352   : > { %10593 = vmatprep.subr.bf16.mxu0 %v11757_v46  ;;  %v11798_v46 = vld [vmem:[#allocation4 + $0x30] sm:$0xff]  }
 0x353   : > { %3906 = vmatmul.mubr.bf16.vlgmr.msra.gmra.mrb[44].mxu1 %v3113_v14 }
 0x354   : > { %3913 = vmatprep.mubr.bf16.mxu1 %v13488_v26  ;;  %v11766_v26 = vld [vmem:[%s14035_s6 + $0x218] sm:$0xff]   ;;  %10646 = vmatpush3.bf16.msra.mxu1 %v11774_v37 }
 0x355   : > { %10594 = vmatpush3.bf16.msra.mxu0 %v11759_v34  ;;  %10647 = vmatprep.subr.bf16.mxu1 %v11777_v43 }
 0x356   : > { %11306 = vmatprep.subr.bf16.mxu0 %v11761_v15 }
 0x358   : > { %3858 = vmatmul.mubr.bf16.vlgmr.msra.gmra.mrb[44].mxu0 %v3096_v24  ;;  %10648 = vmatpush3.bf16.msra.mxu1 %v11778_v48 }
 0x359   : > { %3865 = vmatprep.mubr.bf16.mxu0 %v9706_v27  ;;  %11307 = vmatpush3.bf16.msra.mxu0 %v11761_v15 }
 0x35a   : > { %11308 = vmatprep.subr.bf16.mxu0 %v11763_v18  ;;  %10649 = vmatprep.subr.bf16.mxu1 %v11781_v50 }
 0x35b   : > { %3914 = vmatmul.mubr.bf16.gmra.mrb[48].mxu1 %v3112_v4 }
 0x35c   : > { %10650 = vmatpush3.bf16.msra.mxu1 %v11782_v51 }
 0x35d   : > { %11309 = vmatpush3.bf16.msra.mxu0 %v11763_v18  ;;  %10651 = vmatprep.subr.bf16.mxu1 %v11785_v53  ;;  %v9711_v18 = vld [vmem:[%s14037_s2] ss:$0 sm:$0xff]  ;;  %s14039_s2 = sld [smem:[#allocation25_spill]] }
 0x35e   : > { %11310 = vmatprep.subr.bf16.mxu0 %v11764_v20 }
 0x360   : > { %3866 = vmatmul.mubr.bf16.gmra.mrb[48].mxu0 %v3095_v16  ;;  %10652 = vmatpush3.bf16.msra.mxu1 %v11786_v54 }
 0x361   : > { %11311 = vmatpush3.bf16.msra.mxu0 %v11764_v20  ;;  %11322 = vmatprep.mubr.bf16.mxu0 %v3143_v42 }
 0x362   : > { %11312 = vmatprep.subr.bf16.mxu0 %v11766_v26  ;;  %10653 = vmatprep.subr.bf16.mxu1 %v11789_v56 }
 0x364   : > { %10654 = vmatpush3.bf16.msra.mxu1 %v11790_v63 }
 0x365   : > { %11313 = vmatpush3.bf16.msra.mxu0 %v11766_v26  ;;  %10655 = vmatprep.subr.bf16.mxu1 %v11793_v0 }
 0x366   : > { %11314 = vmatprep.subr.bf16.mxu0 %v11767_v28 }
 0x368   : > { %10656 = vmatpush3.bf16.msra.mxu1 %v11794_v57 }
 0x369   : > { %11315 = vmatpush3.bf16.msra.mxu0 %v11767_v28  ;;  %10657 = vmatprep.subr.bf16.mxu1 %v11797_v3 }
 0x36a   : > { %11316 = vmatprep.subr.bf16.mxu0 %v11768_v44 }
 0x36c   : > { %10658 = vmatpush3.bf16.msra.mxu1 %v11798_v46 }
 0x36d   : > { %11317 = vmatpush3.bf16.msra.mxu0 %v11768_v44  ;;  %10659 = vmatprep.subr.bf16.mxu1 %v11801_v8 }
 0x36e   : > { %11318 = vmatprep.subr.bf16.mxu0 %v11769_v30 }
 0x370   : > { %10660 = vmatpush3.bf16.msra.mxu1 %v11802_v12 }
 0x371   : > { %11319 = vmatpush3.bf16.msra.mxu0 %v11769_v30  ;;  %10701 = vmatprep.subr.bf16.mxu1 %v11810_v60 }
 0x372   : > { %11320 = vmatprep.subr.bf16.mxu0 %v11770_v31 }
 0x375   : > { %11321 = vmatpush3.bf16.msra.mxu0 %v11770_v31 }
 0x376   : > { %10673 = vmatprep.subr.bf16.mxu0 %v11771_v32 }
 0x378   : > { %11323 = vmatmul.mubr.bf16.vlgmr.msra.gmra.mrb[52].mxu0 %v3142_v22 }
 0x379   : > { %10674 = vmatpush3.bf16.msra.mxu0 %v11772_v33 }
 0x37a   : > { %10675 = vmatprep.subr.bf16.mxu0 %v11775_v38 }
 0x37d   : > { %10676 = vmatpush3.bf16.msra.mxu0 %v11776_v40 }
 0x37e   : > { %10677 = vmatprep.subr.bf16.mxu0 %v11779_v49 }
 0x381   : > { %10678 = vmatpush3.bf16.msra.mxu0 %v11780_v41 }
 0x382   : > { %10679 = vmatprep.subr.bf16.mxu0 %v11783_v29 }
 0x385   : > { %10680 = vmatpush3.bf16.msra.mxu0 %v11784_v52 }
 0x386   : > { %10681 = vmatprep.subr.bf16.mxu0 %v11787_v55 }
 0x389   : > { %10682 = vmatpush3.bf16.msra.mxu0 %v11788_v58 }
 0x38a   : > { %10683 = vmatprep.subr.bf16.mxu0 %v11791_v61 }
 0x38d   : > { %10684 = vmatpush3.bf16.msra.mxu0 %v11792_v1 }
 0x38e   : > { %10685 = vmatprep.subr.bf16.mxu0 %v11795_v2 }
 0x391   : > { %10686 = vmatpush3.bf16.msra.mxu0 %v11796_v5 }
 0x392   : > { %10687 = vmatprep.subr.bf16.mxu0 %v11799_v7 }
 0x395   : > { %10688 = vmatpush3.bf16.msra.mxu0 %v11800_v9 }
 0x396   : > { %10729 = vmatprep.subr.bf16.mxu0 %v11805_v47 }
 0x406   : > { %v10567_v4 = vpop.f32.mrb[36].mxu1 }
 0x407   : > { %v10568_v34 = vpop.f32.mrb[37].mxu1 }
 0x408   : > { %v10569_v14 = vadd.f32 %v10568_v34, %v10567_v4  ;;  %v10570_v15 = vpop.f32.mrb[38].mxu1 }
 0x409   : > { %v10571_v35 = vpop.f32.mrb[39].mxu1 }
 0x40a   : > { %v10572_v16 = vadd.f32 %v10571_v35, %v10570_v15 }
 0x40b   : > { %v10539_v17 = vpop.f32.mrb[36].mxu0 }
 0x40c   : > { %v10540_v24 = vpop.f32.mrb[37].mxu0 }
 0x40d   : > { %v10541_v27 = vadd.f32 %v10540_v24, %v10539_v17  ;;  %v10542_v19 = vpop.f32.mrb[38].mxu0 }
 0x40e   : > { %v10543_v20 = vpop.f32.mrb[39].mxu0  ;;  %v10573_v21 = vpop.f32.mrb[40].mxu1 }
 0x40f   : > { %v3764_v22 = vadd.f32 %v10541_v27, %v9711_v18  ;;  %v10544_v26 = vadd.f32 %v10543_v20, %v10542_v19  ;;  %v10574_v42 = vpop.f32.mrb[41].mxu1 }
 0x410   : > { %v10575_v28 = vadd.f32 %v10574_v42, %v10573_v21  ;;  %v10576_v44 = vpop.f32.mrb[42].mxu1 }
 0x411   : > { %v3767_v30 = vadd.f32 %v10544_v26, %v9711_v18  ;;  %v10577_v31 = vpop.f32.mrb[43].mxu1  ;;  %v3812_v32 = vadd.f32 %v10569_v14, %v3764_v22 }
 0x413   : > { %v10545_v33 = vpop.f32.mrb[40].mxu0  ;;  %v3815_v36 = vadd.f32 %v10572_v16, %v3767_v30 }
 0x414   : > { %v10546_v37 = vpop.f32.mrb[41].mxu0 }
 0x415   : > { %v10547_v38 = vadd.f32 %v10546_v37, %v10545_v33  ;;  %v10548_v40 = vpop.f32.mrb[42].mxu0 }
 0x416   : > { %v10549_v43 = vpop.f32.mrb[43].mxu0 }
 0x417   : > { %v3772_v48 = vadd.f32 %v10547_v38, %v9711_v18 }
 0x419   : > { %v3820_v49 = vadd.f32 %v10575_v28, %v3772_v48 }
 0x426   : > { %v10623_v41 = vpop.f32.mrb[44].mxu1 }
 0x427   : > { %v10624_v50 = vpop.f32.mrb[45].mxu1 }
 0x428   : > { %v10625_v51 = vadd.f32 %v10624_v50, %v10623_v41  ;;  %v10626_v29 = vpop.f32.mrb[46].mxu1  ;;  %v4018_v50 = vld [vmem:[#allocation3] sm:$0x8] }
 0x429   : > { %v10627_v52 = vpop.f32.mrb[47].mxu1 }
 0x42a   : > { %v10628_v53 = vadd.f32 %v10627_v52, %v10626_v29 }
 0x42b   : > { %v10595_v54 = vpop.f32.mrb[44].mxu0 }
 0x42c   : > { %v10596_v55 = vpop.f32.mrb[45].mxu0 }
 0x42d   : > { %v10597_v56 = vadd.f32 %v10596_v55, %v10595_v54  ;;  %v10598_v58 = vpop.f32.mrb[46].mxu0  ;;  %v4023_v55 = vld [vmem:[#allocation3 + $0xc] sm:$0x7] }
 0x42e   : > { %v10599_v61 = vpop.f32.mrb[47].mxu0  ;;  %v10629_v63 = vpop.f32.mrb[48].mxu1 }
 0x42f   : > { %v3860_v0 = vadd.f32 %v10597_v56, %v3812_v32  ;;  %v10600_v1 = vadd.f32 %v10599_v61, %v10598_v58  ;;  %v10630_v2 = vpop.f32.mrb[49].mxu1 }
 0x430   : > { %v10631_v57 = vadd.f32 %v10630_v2, %v10629_v63  ;;  %v10632_v3 = vpop.f32.mrb[50].mxu1 }
 0x431   : > { %v3863_v5 = vadd.f32 %v10600_v1, %v3815_v36  ;;  %v10633_v7 = vpop.f32.mrb[51].mxu1  ;;  %v3908_v46 = vadd.f32 %v10625_v51, %v3860_v0 }
 0x433   : > { %v10601_v8 = vpop.f32.mrb[48].mxu0  ;;  %v3911_v9 = vadd.f32 %v10628_v53, %v3863_v5 }
 0x434   : > { %v10602_v47 = vpop.f32.mrb[49].mxu0 }
 0x435   : > { %v10603_v12 = vadd.f32 %v10602_v47, %v10601_v8  ;;  %v10604_v60 = vpop.f32.mrb[50].mxu0  ;;  %v4037_v47 = vld [vmem:[#allocation3 + $0x10] sm:$0x3] }
 0x436   : > { %v10605_v4 = vpop.f32.mrb[51].mxu0 }
 0x437   : > { %v3868_v34 = vadd.f32 %v10603_v12, %v3820_v49 }
 0x439   : > { %v3916_v14 = vadd.f32 %v10631_v57, %v3868_v34 }
 0x44b   : > { %v11324_v15 = vpop.f32.mrb[52].mxu0 }
 0x44c   : > { %v3964_v35 = vadd.f32 %v11324_v15, %v3916_v14  ;;  %v3955_v16 = vpop.f32.mrb[53].mxu0 }
 0x44d   : > { %v3956_v17 = vadd.f32 %v3955_v16, %v3908_v46  ;;  %v11325_v18 = vpop.f32.mrb[54].mxu0 }
 0x44e   : > { %v3971_v24 = vmax.f32 %v3964_v35, 0.0  ;;  %v3958_v27 = vpop.f32.mrb[55].mxu0 }
 0x44f   : > { %v3969_v19 = vmax.f32 %v3956_v17, 0.0  ;;  %v3959_v20 = vadd.f32 %v3958_v27, %v3911_v9 }
 0x450   : > { %v3974_v21 = vmul.f32 %v3971_v24, %v13112_v23 }
 0x451   : > { %v3972_v22 = vmul.f32 %v3969_v19, %v13110_v45  ;;  %v3970_v26 = vmax.f32 %v3959_v20, 0.0  ;;  %v11808_v20 = vld [vmem:[#allocation4 + $0x180] sm:$0xff]  }
 0x452   : > { %v10258_v42 = vpack.c.bf16 %v3974_v21, %v3974_v21 }
 0x453   : > { %v10256_v28 = vpack.c.bf16 %v3972_v22, %v3972_v22  ;;  %v3973_v44 = vmul.f32 %v3970_v26, %v13116_v59 }
 0x454   : > { %v4005_v30 = vshll.u32 %v10258_v42, 16  ;;  %v4009_v31 = vshrl.u32 %v10258_v42, 16 }
 0x455   : > { %v3986_v32 = vshll.u32 %v10256_v28, 16  ;;  %v3989_v33 = vshrl.u32 %v10256_v28, 16  ;;  %v10257_v36 = vpack.c.bf16 %v3973_v44, %v3973_v44 }
 0x456   : > { %v4007_v37 = vrot.slane %v4005_v30, 5  ;;  %v4011_v38 = vrot.slane %v4009_v31, 4 }
 0x457   : > { %v3988_v40 = vrot.slane %v3986_v32, 5  ;;  %v3991_v43 = vrot.slane %v3989_v33, 4  ;;  %v3995_v48 = vshll.u32 %v10257_v36, 16  ;;  %v3999_v49 = vshrl.u32 %v10257_v36, 16  ;;  %v11812_v32 = vld [vmem:[#allocation4 + $0x1c8] sm:$0xff]  }
 0x458   : > { %v4012_v41 = vor.u32 %v4011_v38, %v4007_v37  ;;  %v11811_v38 = vld [vmem:[#allocation4 + $0x100] sm:$0xff]  }
 0x459   : > { %v3992_v51 = vor.u32 %v3991_v43, %v3988_v40  ;;  %v4019_v29 = vsel %vm12809_vm15, %v3988_v40, %v4018_v50  ;;  %v3997_v52 = vrot.slane %v3995_v48, 5  ;;  %v4001_v53 = vrot.slane %v3999_v49, 4  ;;  %v11813_v48 = vld [vmem:[#allocation4 + $0x188] sm:$0xff]  }
 0x45a   : > { %v4013_v54 = vrot.slane %v4012_v41, 4  ;;  %4020 = vst [vmem:[#allocation3] sm:$0x8] %v4019_v29  ;;  %v11814_v49 = vld [vmem:[#allocation4 + $0x148] sm:$0xff]  }
 0x45b   : > { %v3993_v56 = vrot.slane %v3992_v51, 4  ;;  %v4002_v58 = vor.u32 %v4001_v53, %v3997_v52  ;;  %v11816_v51 = vld [vmem:[#allocation4 + $0x1d0] sm:$0xff]   ;;  %v11815_v53 = vld [vmem:[#allocation4 + $0x108] sm:$0xff]  }
 0x45c   : > { %v4024_v61 = vsel %vm12814_vm3, %v4013_v54, %v4023_v55  ;;  %v11817_v54 = vld [vmem:[#allocation4 + $0x190] sm:$0xff]  }
 0x45d   : > { %4025 = vst [vmem:[#allocation3 + $0xc] sm:$0x7] %v4024_v61  ;;  %v3998_v63 = vsel %vm12822_vm6, %v3993_v56, %v3997_v52  ;;  %v4003_v0 = vrot.slane %v4002_v58, 4  ;;  %v11818_v55 = vld [vmem:[#allocation4 + $0x150] sm:$0xff]   ;;  %v11824_v58 = vld [vmem:[#allocation4 + $0x1d8] sm:$0xff]  }
 0x45e   : > { %4021 = vst [vmem:[#allocation3 + $0x4] sm:$0xf] %v3998_v63  ;;  %v11822_v63 = vld [vmem:[#allocation4 + $0x110] sm:$0xff]  }
 0x45f   : > { %v4008_v1 = vsel %vm12822_vm6, %v4003_v0, %v4007_v37 }
 0x460   : > { %4022 = vst [vmem:[#allocation3 + $0x8] sm:$0xf] %v4008_v1 }
 0x461   : > { %v4031_v2 = vld [vmem:[#allocation3] sm:$0x8] }
 0x462   : > { %v4030_v3 = vld [vmem:[#allocation3] sm:$0xe] }
 0x463   : > { %v4026_v5 = vld [vmem:[#allocation3] sm:$0xf] }
 0x464   : > { %v13616_v9 = vld [vmem:[#allocation3 + $0xc] sm:$0xf] }
 0x465   : > { %v13609_v57 = vld [vmem:[#allocation3 + $0x4] sm:$0xf]  ;;  %v4032_v60 = vld [vmem:[#allocation3 + $0xc] sm:$0x3]  ;;  %v13628_v17 = vcombine.low %v13616_v9, %v4037_v47  ;;  %v11829_v47 = vld [vmem:[#allocation4 + $0x1a0] sm:$0xff]  }
 0x466   : > { %v13612_v7 = vcombine.low %v4031_v2, %v13609_v57  ;;  %v9790_v46 = vcombine.low %v4030_v3, %v13609_v57  ;;  %v9787_v8 = vcombine.low %v4026_v5, %v13609_v57  ;;  %v4034_v14 = vld [vmem:[#allocation3 + $0x4] sm:$0xc]  ;;  %v11825_v2 = vld [vmem:[#allocation4 + $0x198] sm:$0xff]  }
 0x467   : > { %v13618_v12 = vld [vmem:[#allocation3 + $0x8] sm:$0xf]  ;;  %v4139_v36 = vshrl.u32 %v13628_v17, 16  ;;  %v4142_v37 = vshll.u32 %v13628_v17, 16  ;;  %v11826_v3 = vld [vmem:[#allocation4 + $0x158] sm:$0xff]  }
 0x468   : > { %v9792_v4 = vcombine.low %v13618_v12, %v4032_v60  ;;  %v9789_v34 = vcombine.low %v13618_v12, %v13618_v12  ;;  %v4083_v15 = vrot.slane %v13612_v7, 3  ;;  %v4055_v35 = vshll.u32 %v9787_v8, 16  ;;  %v11821_v1 = vld [vmem:[#allocation3 + $0x8] ss:$0 sps:$4 sm:$0x77]   ;;  %v11830_v60 = vld [vmem:[#allocation4 + $0x160] sm:$0xff]  }
 0x469   : > { %v13625_v16 = vcombine.low %v4034_v14, %v13618_v12  ;;  %v4072_v24 = vrot.slane %v9790_v46, 1  ;;  %v4053_v21 = vshrl.u32 %v9787_v8, 16  ;;  %v4141_v29 = vrot.slane %v4139_v36, 2  ;;  %v11828_v46 = vld [vmem:[#allocation4 + $0x1e0] sm:$0xff]   ;;  %v11833_v14 = vld [vmem:[#allocation4 + $0x1a8] sm:$0xff]  }
 0x46a   : > { %v4084_v18 = vrot.slane %v9792_v4, 3  ;;  %v4073_v27 = vrot.slane %v9789_v34, 1  ;;  %v4060_v19 = vshll.u32 %v9789_v34, 16  ;;  %v4057_v22 = vrot.slane %v4055_v35, 1  ;;  %v11832_v4 = vld [vmem:[#allocation4 + $0x1e8] sm:$0xff]  }
 0x46b   : > { %v4131_v26 = vshrl.u32 %v13625_v16, 16  ;;  %v4134_v42 = vshll.u32 %v13625_v16, 16  ;;  %v4064_v31 = vshrl.u32 %v9789_v34, 16  ;;  %v4144_v52 = vrot.slane %v4142_v37, 3  ;;  %v11831_v34 = vld [vmem:[#allocation4 + $0x120] sm:$0xff]  }
 0x46c   : > { %v4085_v28 = vsel %vm900_vm7, %v4083_v15, %v4084_v18  ;;  %v4074_v44 = vsel %vm1012_vm5, %v4072_v24, %v4073_v27  ;;  %v4062_v30 = vrot.slane %v4060_v19, 1  ;;  %v4058_v33 = vor.u32 %v4057_v22, %v4053_v21  ;;  %v11834_v15 = vld [vmem:[#allocation4 + $0x168] sm:$0xff]   ;;  %v4033_v35 = vld [vmem:[#allocation3 + $0xc] sm:$0x7]  ;;  %v11838_v19 = vld [vmem:[#allocation4 + $0x170] sm:$0xff]  }
 0x46d   : > { %4820 = vmatprep.mubr.bf16.mxu0 %v4085_v28  ;;  %v4133_v41 = vrot.slane %v4131_v26, 2  ;;  %v4136_v50 = vrot.slane %v4134_v42, 3  ;;  %v13637_v61 = vor.u32 %v4144_v52, %v4141_v29  ;;  %v9794_v5 = vcombine.low %v13609_v57, %v13618_v12  ;;  %v11836_v57 = vld [vmem:[#allocation4 + $0x1f0] sm:$0xff]   ;;  %v11835_v24 = vld [vmem:[#allocation4 + $0x128] sm:$0xff]   ;;  %v4036_v21 = vld [vmem:[#allocation3 + $0x10] sm:$0x1] }
 0x46e   : > { %4821 = vmatmul.mubr.bf16.vlgmr.msra.gmra.mrb[56].mxu0 %v4074_v44  ;;  %v4066_v40 = vor.u32 %v4064_v31, %v4062_v30  ;;  %v4063_v43 = vsel %vm991_vm0, %v4058_v33, %v4062_v30  ;;  %v11839_v42 = vld [vmem:[#allocation4 + $0x130] sm:$0xff]   ;;  %v4092_v28 = vshrl.u32 %v13612_v7, 16  ;;  %v4095_v44 = vshll.u32 %v13612_v7, 16  ;;  %v11841_v30 = vld [vmem:[#allocation4 + $0x1b8] sm:$0xff]  }
 0x46f   : > { %10730 = vmatpush3.bf16.msra.mxu0 %v11808_v20  ;;  %4828 = vmatprep.mubr.bf16.mxu0 %v4084_v18  ;;  %v4137_v56 = vor.u32 %v4136_v50, %v4133_v41  ;;  %v9793_v18 = vcombine.low %v13618_v12, %v4033_v35  ;;  %v11840_v20 = vld [vmem:[#allocation4 + $0x1f8] sm:$0xff]   ;;  %v4122_v37 = vrot.slane %v13625_v16, 2  ;;  %v4038_v29 = vld [vmem:[#allocation3 + $0x4] sm:$0x8] }
 0x470   : > { %4772 = vmatprep.mubr.bf16.mxu1 %v4063_v43  ;;  %10731 = vmatprep.subr.bf16.mxu0 %v11812_v32  ;;  %v11842_v31 = vld [vmem:[#allocation4 + $0x178] sm:$0xff]   ;;  %v9797_v32 = vcombine.low %v13616_v9, %v4036_v21  ;;  %v4097_v43 = vrot.slane %v4095_v44, 4  ;;  %v11848_v9 = vld [vmem:[#allocation4 + $0x208] sm:$0xff]   ;;  %v9799_v52 = vcombine.low %v4038_v29, %v13618_v12 }
 0x471   : > { %4773 = vmatmul.mubr.bf16.vlgmr.msra.gmra.mrb[52].mxu1 %v9787_v8  ;;  %v4146_v0 = vsel %vm1074_vm8, %v4137_v56, %v13637_v61  ;;  %v11827_v8 = vld [vmem:[#allocation4 + $0x118] sm:$0xff]   ;;  %v4100_v22 = vshrl.u32 %v9793_v18, 16  ;;  %v4103_v26 = vshll.u32 %v9793_v18, 16  ;;  %v11853_v12 = vld [vmem:[#allocation4 + $0x228] sm:$0xff]  }
 0x472   : > { %10702 = vmatpush3.bf16.msra.mxu1 %v11811_v38  ;;  %4780 = vmatprep.mubr.bf16.mxu1 %v4066_v40  ;;  %v11843_v38 = vld [vmem:[#allocation4 + $0x138] sm:$0xff]   ;;  %v4094_v40 = vrot.slane %v4092_v28, 3 }
 0x473   : > { %10732 = vmatpush3.bf16.msra.mxu0 %v11813_v48  ;;  %10703 = vmatprep.subr.bf16.mxu1 %v11814_v49  ;;  %v4102_v33 = vrot.slane %v4100_v22, 3  ;;  %v4105_v36 = vrot.slane %v4103_v26, 4  ;;  %v4123_v48 = vrot.slane %v9797_v32, 2  ;;  %v11846_v49 = vld [vmem:[#allocation4 + $0x200] sm:$0xff]   ;;  %v11851_v56 = vld [vmem:[#allocation4 + $0x218] sm:$0xff]  }
 0x474   : > { %10733 = vmatprep.subr.bf16.mxu0 %v11816_v51  ;;  %v4098_v50 = vor.u32 %v4097_v43, %v4094_v40  ;;  %v9795_v51 = vcombine.low %v4033_v35, %v4033_v35  ;;  %v9800_v18 = vld [vmem:[%s13974_s10] ss:$0 sm:$0xff] }
 0x475   : > { %v4106_v7 = vor.u32 %v4105_v36, %v4102_v33  ;;  %v4124_v41 = vsel %vm902_vm11, %v4122_v37, %v4123_v48 }
 0x476   : > { %10704 = vmatpush3.bf16.msra.mxu1 %v11815_v53  ;;  %4829 = vmatmul.mubr.bf16.gmra.mrb[60].mxu0 %v4073_v27  ;;  %v11837_v27 = vld [vmem:[#allocation4 + $0x1b0] sm:$0xff]  }
 0x477   : > { %10734 = vmatpush3.bf16.msra.mxu0 %v11817_v54  ;;  %10705 = vmatprep.subr.bf16.mxu1 %v11818_v55  ;;  %v4107_v16 = vsel %vm1033_vm12, %v4098_v50, %v4106_v7  ;;  %v11849_v53 = vld [vmem:[#allocation4 + $0x210] sm:$0xff]   ;;  %v4152_v54 = vrot.slane %v9799_v52, 3  ;;  %v4153_v55 = vrot.slane %v13628_v17, 3  ;;  %v11856_v17 = vld [vmem:[%s13975_s11] sm:$0xff]  }
 0x478   : > { %4916 = vmatprep.mubr.bf16.mxu0 %v4146_v0  ;;  %10735 = vmatprep.subr.bf16.mxu0 %v11824_v58  ;;  %v11855_v0 = vld [vmem:[#allocation4 + $0x238] sm:$0xff]  }
 0x479   : > { %4781 = vmatmul.mubr.bf16.gmra.mrb[56].mxu1 %v11821_v1  ;;  %v4154_v58 = vsel %vm900_vm7, %v4152_v54, %v4153_v55  ;;  %v12376_v1 = vmov 0.0  }
 0x47a   : > { %10706 = vmatpush3.bf16.msra.mxu1 %v11822_v63  ;;  %4868 = vmatprep.mubr.bf16.mxu1 %v9794_v5  ;;  %v11854_v63 = vld [vmem:[#allocation4 + $0x230] sm:$0xff]  }
 0x47b   : > { %10736 = vmatpush3.bf16.msra.mxu0 %v11825_v2  ;;  %10707 = vmatprep.subr.bf16.mxu1 %v11826_v3  ;;  %v11857_v2 = vld [vmem:[%s13975_s11 + $0x8] sm:$0xff]   ;;  %v11858_v3 = vld [vmem:[%s13975_s11 + $0x10] sm:$0xff]   ;;  %v11859_v5 = vld [vmem:[%s13975_s11 + $0x18] sm:$0xff]  }
 0x47c   : > { %10737 = vmatprep.subr.bf16.mxu0 %v11828_v46  ;;  %v11860_v46 = vld [vmem:[%s13975_s11 + $0x20] sm:$0xff]  }
 0x47e   : > { %10708 = vmatpush3.bf16.msra.mxu1 %v11827_v8  ;;  %v11861_v8 = vld [vmem:[%s13975_s11 + $0x28] sm:$0xff]  }
 0x47f   : > { %10738 = vmatpush3.bf16.msra.mxu0 %v11829_v47  ;;  %10709 = vmatprep.subr.bf16.mxu1 %v11830_v60  ;;  %v11862_v47 = vld [vmem:[%s13975_s11 + $0x30] sm:$0xff]   ;;  %v11863_v60 = vld [vmem:[%s13975_s11 + $0x38] sm:$0xff]  }
 0x480   : > { %10739 = vmatprep.subr.bf16.mxu0 %v11832_v4 }
 0x482   : > { %10710 = vmatpush3.bf16.msra.mxu1 %v11831_v34 }
 0x483   : > { %10740 = vmatpush3.bf16.msra.mxu0 %v11833_v14  ;;  %10711 = vmatprep.subr.bf16.mxu1 %v11834_v15 }
 0x484   : > { %10741 = vmatprep.subr.bf16.mxu0 %v11836_v57 }
 0x486   : > { %10712 = vmatpush3.bf16.msra.mxu1 %v11835_v24 }
 0x487   : > { %10742 = vmatpush3.bf16.msra.mxu0 %v11837_v27  ;;  %10713 = vmatprep.subr.bf16.mxu1 %v11838_v19 }
 0x488   : > { %10743 = vmatprep.subr.bf16.mxu0 %v11840_v20 }
 0x48a   : > { %10714 = vmatpush3.bf16.msra.mxu1 %v11839_v42 }
 0x48b   : > { %10744 = vmatpush3.bf16.msra.mxu0 %v11841_v30  ;;  %10715 = vmatprep.subr.bf16.mxu1 %v11842_v31 }
 0x48c   : > { %11346 = vmatprep.subr.bf16.mxu0 %v12376_v1 }
 0x48e   : > { %10716 = vmatpush3.bf16.msra.mxu1 %v11843_v38  ;;  %4917 = vmatmul.mubr.bf16.vlgmr.msra.gmra.mrb[64].mxu0 %v4124_v41 }
 0x48f   : > { %4924 = vmatprep.mubr.bf16.mxu0 %v13637_v61  ;;  %11326 = vmatprep.subr.bf16.mxu1 %v11846_v49  ;;  %v11852_v61 = vld [vmem:[#allocation4 + $0x220] sm:$0xff]  }
 0x490   : > { %11347 = vmatpush3.bf16.msra.mxu0 %v11856_v17 }
 0x491   : > { %4869 = vmatmul.mubr.bf16.vlgmr.msra.gmra.mrb[60].mxu1 %v4107_v16  ;;  %11348 = vmatprep.subr.bf16.mxu0 %v12376_v1 }
 0x492   : > { %4876 = vmatprep.mubr.bf16.mxu1 %v9795_v51  ;;  %11327 = vmatpush3.bf16.msra.mxu1 %v11846_v49 }
 0x493   : > { %11328 = vmatprep.subr.bf16.mxu1 %v11848_v9 }
 0x494   : > { %11349 = vmatpush3.bf16.msra.mxu0 %v11857_v2 }
 0x495   : > { %11350 = vmatprep.subr.bf16.mxu0 %v12376_v1 }
 0x496   : > { %11329 = vmatpush3.bf16.msra.mxu1 %v11848_v9  ;;  %4925 = vmatmul.mubr.bf16.gmra.mrb[68].mxu0 %v4123_v48 }
 0x497   : > { %11330 = vmatprep.subr.bf16.mxu1 %v11849_v53  ;;  %11362 = vmatprep.mubr.msk.bf16.mxu0 %vm12377_vm2, %v12376_v1 }
 0x498   : > { %11351 = vmatpush3.bf16.msra.mxu0 %v11858_v3 }
 0x499   : > { %4877 = vmatmul.mubr.bf16.gmra.mrb[64].mxu1 %v4106_v7  ;;  %11352 = vmatprep.subr.bf16.mxu0 %v12376_v1 }
 0x49a   : > { %11331 = vmatpush3.bf16.msra.mxu1 %v11849_v53  ;;  %11342 = vmatprep.mubr.bf16.mxu1 %v4154_v58 }
 0x49b   : > { %11332 = vmatprep.subr.bf16.mxu1 %v11851_v56 }
 0x49c   : > { %11353 = vmatpush3.bf16.msra.mxu0 %v11859_v5 }
 0x49d   : > { %11354 = vmatprep.subr.bf16.mxu0 %v12376_v1 }
 0x49e   : > { %11333 = vmatpush3.bf16.msra.mxu1 %v11851_v56 }
 0x49f   : > { %11334 = vmatprep.subr.bf16.mxu1 %v11852_v61 }
 0x4a0   : > { %11355 = vmatpush3.bf16.msra.mxu0 %v11860_v46 }
 0x4a1   : > { %11356 = vmatprep.subr.bf16.mxu0 %v12376_v1 }
 0x4a2   : > { %11335 = vmatpush3.bf16.msra.mxu1 %v11852_v61 }
 0x4a3   : > { %11336 = vmatprep.subr.bf16.mxu1 %v11853_v12 }
 0x4a4   : > { %11357 = vmatpush3.bf16.msra.mxu0 %v11861_v8 }
 0x4a5   : > { %11358 = vmatprep.subr.bf16.mxu0 %v12376_v1 }
 0x4a6   : > { %11337 = vmatpush3.bf16.msra.mxu1 %v11853_v12 }
 0x4a7   : > { %11338 = vmatprep.subr.bf16.mxu1 %v11854_v63 }
 0x4a8   : > { %11359 = vmatpush3.bf16.msra.mxu0 %v11862_v47 }
 0x4a9   : > { %11360 = vmatprep.subr.bf16.mxu0 %v12376_v1 }
 0x4aa   : > { %11339 = vmatpush3.bf16.msra.mxu1 %v11854_v63 }
 0x4ab   : > { %11340 = vmatprep.subr.bf16.mxu1 %v11855_v0 }
 0x4ac   : > { %11361 = vmatpush3.bf16.msra.mxu0 %v11863_v60 }
 0x4ae   : > { %11341 = vmatpush3.bf16.msra.mxu1 %v11855_v0 }
 0x4af   : > { %11366 = vmatprep.subr.bf16.mxu1 %v12376_v1 }
 0x4b1   : > { %11343 = vmatmul.mubr.bf16.vlgmr.msra.gmra.mrb[68].mxu1 %v4153_v55 }
 0x4b2   : > { %11368 = vmatprep.mubr.msk.bf16.mxu1 %vm12377_vm2, %v12376_v1 }
 0x541   : > { %v10689_v4 = vpop.f32.mrb[56].mxu0 }
 0x542   : > { %v10690_v34 = vpop.f32.mrb[57].mxu0 }
 0x543   : > { %v10691_v14 = vadd.f32 %v10690_v34, %v10689_v4  ;;  %v10692_v15 = vpop.f32.mrb[58].mxu0 }
 0x544   : > { %v10661_v35 = vpop.f32.mrb[52].mxu1  ;;  %v10693_v57 = vpop.f32.mrb[59].mxu0 }
 0x545   : > { %v10662_v24 = vpop.f32.mrb[53].mxu1  ;;  %v10694_v27 = vadd.f32 %v10693_v57, %v10692_v15 }
 0x546   : > { %v10663_v19 = vadd.f32 %v10662_v24, %v10661_v35  ;;  %v10664_v20 = vpop.f32.mrb[54].mxu1 }
 0x547   : > { %v10665_v21 = vpop.f32.mrb[55].mxu1 }
 0x548   : > { %v4775_v22 = vadd.f32 %v10663_v19, %v9800_v18  ;;  %v10666_v26 = vadd.f32 %v10665_v21, %v10664_v20  ;;  %v4983_v20 = vld [vmem:[#allocation2] sm:$0x8] }
 0x549   : > { %v10695_v42 = vpop.f32.mrb[60].mxu0 }
 0x54a   : > { %v4778_v28 = vadd.f32 %v10666_v26, %v9800_v18  ;;  %v10696_v44 = vpop.f32.mrb[61].mxu0  ;;  %v4823_v30 = vadd.f32 %v10691_v14, %v4775_v22 }
 0x54b   : > { %v10697_v31 = vadd.f32 %v10696_v44, %v10695_v42  ;;  %v10698_v32 = vpop.f32.mrb[62].mxu0  ;;  %v4987_v44 = vunpack.c.l.bf16 %v4983_v20 }
 0x54c   : > { %v10667_v33 = vpop.f32.mrb[56].mxu1  ;;  %v10699_v36 = vpop.f32.mrb[63].mxu0  ;;  %v4826_v37 = vadd.f32 %v10694_v27, %v4778_v28  ;;  %v4984_v32 = vld [vmem:[#allocation2 + $0x4] sm:$0xff]  }
 0x54d   : > { %v10668_v38 = vpop.f32.mrb[57].mxu1 }
 0x54e   : > { %v10669_v40 = vadd.f32 %v10668_v38, %v10667_v33  ;;  %v10670_v43 = vpop.f32.mrb[58].mxu1  ;;  %v4988_v38 = vunpack.c.l.bf16 %v4984_v32 }
 0x54f   : > { %v10671_v48 = vpop.f32.mrb[59].mxu1 }
 0x550   : > { %v4783_v49 = vadd.f32 %v10669_v40, %v9800_v18  ;;  %v4986_v18 = vld [vmem:[#allocation2 + $0xc] sm:$0x7]  ;;  %v4989_v40 = vunpack.c.h.bf16 %v4984_v32  ;;  %v11869_v32 = vld [vmem:[#allocation6 + $0x88] sm:$0xff]  }
 0x551   : > { %v4990_v42 = vunpack.c.l.bf16 %v4986_v18 }
 0x552   : > { %v4831_v7 = vadd.f32 %v10697_v31, %v4783_v49 }
 0x561   : > { %v10745_v41 = vpop.f32.mrb[64].mxu0 }
 0x562   : > { %v10746_v50 = vpop.f32.mrb[65].mxu0 }
 0x563   : > { %v10747_v9 = vadd.f32 %v10746_v50, %v10745_v41  ;;  %v10748_v16 = vpop.f32.mrb[66].mxu0 }
 0x564   : > { %v10717_v51 = vpop.f32.mrb[60].mxu1  ;;  %v10749_v29 = vpop.f32.mrb[67].mxu0 }
 0x565   : > { %v10718_v52 = vpop.f32.mrb[61].mxu1  ;;  %v10750_v53 = vadd.f32 %v10749_v29, %v10748_v16 }
 0x566   : > { %v10719_v54 = vadd.f32 %v10718_v52, %v10717_v51  ;;  %v10720_v55 = vpop.f32.mrb[62].mxu1 }
 0x567   : > { %v10721_v56 = vpop.f32.mrb[63].mxu1 }
 0x568   : > { %v4871_v58 = vadd.f32 %v10719_v54, %v4823_v30  ;;  %v10722_v61 = vadd.f32 %v10721_v56, %v10720_v55 }
 0x569   : > { %v10751_v12 = vpop.f32.mrb[68].mxu0 }
 0x56a   : > { %v4874_v63 = vadd.f32 %v10722_v61, %v4826_v37  ;;  %v10752_v0 = vpop.f32.mrb[69].mxu0  ;;  %v4919_v17 = vadd.f32 %v10747_v9, %v4871_v58 }
 0x56b   : > { %v10753_v1 = vadd.f32 %v10752_v0, %v10751_v12  ;;  %v10754_v2 = vpop.f32.mrb[70].mxu0  ;;  %v9873_v0 = vld [vmem:[%s13976_s12] ss:$0 sm:$0xff] }
 0x56c   : > { %v10723_v3 = vpop.f32.mrb[64].mxu1  ;;  %v10755_v5 = vpop.f32.mrb[71].mxu0  ;;  %v4922_v46 = vadd.f32 %v10750_v53, %v4874_v63 }
 0x56d   : > { %v10724_v8 = vpop.f32.mrb[65].mxu1 }
 0x56e   : > { %v10725_v47 = vadd.f32 %v10724_v8, %v10723_v3  ;;  %v10726_v60 = vpop.f32.mrb[66].mxu1 }
 0x56f   : > { %v10727_v4 = vpop.f32.mrb[67].mxu1 }
 0x570   : > { %v4879_v34 = vadd.f32 %v10725_v47, %v4831_v7 }
 0x572   : > { %v4927_v14 = vadd.f32 %v10753_v1, %v4879_v34  ;;  %v5167_v34 = vld [vmem:[%s13977_s13] sm:$0xf] }
 0x584   : > { %v11344_v15 = vpop.f32.mrb[68].mxu1 }
 0x585   : > { %v4975_v35 = vadd.f32 %v11344_v15, %v4927_v14  ;;  %v4966_v57 = vpop.f32.mrb[69].mxu1  ;;  %v5180_v14 = vsel %vm862_vm1, %v5167_v34, 0 }
 0x586   : > { %v4967_v24 = vadd.f32 %v4966_v57, %v4919_v17  ;;  %v11345_v27 = vpop.f32.mrb[70].mxu1  ;;  %11367 = vmatpush3.bf16.msra.mxu1 %v5180_v14  ;;  %v5146_v57 = vld [vmem:[%s844_s5] sm:$0xff] }
 0x587   : > { %v4982_v19 = vmax.f32 %v4975_v35, 0.0  ;;  %v4969_v21 = vpop.f32.mrb[71].mxu1 }
 0x588   : > { %v4980_v22 = vmax.f32 %v4967_v24, 0.0  ;;  %v4970_v26 = vadd.f32 %v4969_v21, %v4922_v46  ;;  %v5147_v24 = vld [vmem:[%s844_s5 + $0x8] sm:$0xff] }
 0x589   : > { %v4997_v28 = vrot.slane %v4982_v19, 1 }
 0x58a   : > { %v4994_v30 = vrot.slane %v4980_v22, 1  ;;  %v4981_v31 = vmax.f32 %v4970_v26, 0.0 }
 0x58b   : > { %v5006_v33 = vadd.f32 %v4997_v28, %v4990_v42  ;;  %v11864_v42 = vld [vmem:[#allocation6 + $0xc0] sm:$0xff]  }
 0x58c   : > { %v5003_v36 = vadd.f32 %v4994_v30, %v4987_v44  ;;  %v4995_v37 = vrot.slane %v4981_v31, 1  ;;  %10806 = vmatprep.subr.bf16.mxu0 %v11864_v42  ;;  %v11866_v44 = vld [vmem:[#allocation6 + $0x40] sm:$0xff]   ;;  %v11868_v31 = vld [vmem:[#allocation6 + $0xc8] sm:$0xff]  }
 0x58d   : > { %v5010_v43 = vmul.f32 %v5006_v33, %v13412_v10  ;;  %10778 = vmatprep.subr.bf16.mxu1 %v11866_v44  ;;  %v11870_v33 = vld [vmem:[#allocation6 + $0x48] sm:$0xff]  }
 0x58e   : > { %v5007_v48 = vmul.f32 %v5003_v36, %v13415_v13  ;;  %v4996_v49 = vsel %vm1012_vm5, %v4994_v30, %v4995_v37  ;;  %v4998_v7 = vsel %vm1012_vm5, %v4995_v37, %v4997_v28  ;;  %v11865_v28 = vld [vmem:[#allocation6 + $0x80] sm:$0xff]   ;;  %v11871_v36 = vld [vmem:[#allocation6 + $0x8] sm:$0xff]   ;;  %v11872_v37 = vld [vmem:[#allocation6 + $0xd0] sm:$0xff]  }
 0x58f   : > { %v5004_v41 = vadd.f32 %v4996_v49, %v4988_v38  ;;  %v5005_v50 = vadd.f32 %v4998_v7, %v4989_v40  ;;  %v5025_v51 = vrot.slane %v5010_v43, 5  ;;  %v11867_v30 = vld [vmem:[#allocation6] sm:$0xff]   ;;  %v11873_v38 = vld [vmem:[#allocation6 + $0x90] sm:$0xff]   ;;  %v11877_v49 = vld [vmem:[#allocation6 + $0x98] sm:$0xff]  }
 0x590   : > { %v5013_v29 = vrot.slane %v5007_v48, 7  ;;  %v11874_v40 = vld [vmem:[#allocation6 + $0x50] sm:$0xff]   ;;  %v11876_v48 = vld [vmem:[#allocation6 + $0xd8] sm:$0xff]  }
 0x591   : > { %v5008_v9 = vmul.f32 %v5004_v41, %v13424_v39  ;;  %v5009_v16 = vmul.f32 %v5005_v50, %v13428_v25  ;;  %v11875_v43 = vld [vmem:[#allocation6 + $0x10] sm:$0xff]   ;;  %v11878_v7 = vld [vmem:[#allocation6 + $0x58] sm:$0xff]   ;;  %v11880_v50 = vld [vmem:[#allocation6 + $0xe0] sm:$0xff]  }
 0x592   : > { %v11879_v41 = vld [vmem:[#allocation6 + $0x18] sm:$0xff]  }
 0x593   : > { %v5014_v52 = vrot.slane %v5008_v9, 7  ;;  %v5018_v53 = vrot.slane %v5008_v9, 1  ;;  %v5019_v54 = vrot.slane %v5009_v16, 1  ;;  %v5022_v55 = vrot.slane %v5009_v16, 3  ;;  %v11881_v9 = vld [vmem:[#allocation6 + $0xa0] sm:$0xff]  }
 0x594   : > { %v11882_v16 = vld [vmem:[#allocation6 + $0x60] sm:$0xff]  }
 0x595   : > { %v5015_v56 = vsel %vm905_vm9, %v5013_v29, %v5014_v52  ;;  %v5020_v58 = vsel %vm1012_vm5, %v5018_v53, %v5019_v54  ;;  %v5029_v61 = vsel %vm862_vm1, %v5022_v55, %v5025_v51  ;;  %v11884_v51 = vld [vmem:[#allocation6 + $0xe8] sm:$0xff]   ;;  %v11883_v29 = vld [vmem:[#allocation6 + $0x20] sm:$0xff]   ;;  %v11888_v54 = vld [vmem:[#allocation6 + $0xf0] sm:$0xff]  }
 0x596   : > { %v5028_v12 = vsel %vm862_vm1, %v5015_v56, %v5020_v58  ;;  %v11886_v52 = vld [vmem:[#allocation6 + $0x68] sm:$0xff]   ;;  %v11890_v56 = vld [vmem:[#allocation6 + $0x70] sm:$0xff]  }
 0x597   : > { %v5030_v63 = vpack.c.bf16 %v5029_v61, %v5028_v12  ;;  %v11885_v53 = vld [vmem:[#allocation6 + $0xa8] sm:$0xff]   ;;  %v11889_v58 = vld [vmem:[#allocation6 + $0xb0] sm:$0xff]   ;;  %v11892_v61 = vld [vmem:[#allocation6 + $0xf8] sm:$0xff]  }
 0x598   : > { %v11887_v55 = vld [vmem:[#allocation6 + $0x28] sm:$0xff]   ;;  %v11891_v12 = vld [vmem:[#allocation6 + $0x30] sm:$0xff]  }
 0x599   : > { %11363 = vmatmul.mubr.bf16.vlgmr.msra.gmra.mrb[72].mxu0 %v5030_v63  ;;  %v11894_v63 = vld [vmem:[#allocation6 + $0x78] sm:$0xff]  }
 0x59a   : > { %10807 = vmatpush3.bf16.msra.mxu0 %v11865_v28 }
 0x59b   : > { %10808 = vmatprep.subr.bf16.mxu0 %v11868_v31 }
 0x59e   : > { %10809 = vmatpush3.bf16.msra.mxu0 %v11869_v32 }
 0x59f   : > { %10810 = vmatprep.subr.bf16.mxu0 %v11872_v37 }
 0x5a2   : > { %10811 = vmatpush3.bf16.msra.mxu0 %v11873_v38 }
 0x5a3   : > { %10812 = vmatprep.subr.bf16.mxu0 %v11876_v48 }
 0x5a6   : > { %10813 = vmatpush3.bf16.msra.mxu0 %v11877_v49 }
 0x5a7   : > { %10814 = vmatprep.subr.bf16.mxu0 %v11880_v50 }
 0x5aa   : > { %10815 = vmatpush3.bf16.msra.mxu0 %v11881_v9 }
 0x5ab   : > { %10816 = vmatprep.subr.bf16.mxu0 %v11884_v51 }
 0x5ae   : > { %10817 = vmatpush3.bf16.msra.mxu0 %v11885_v53  ;;  %v5286_v53 = vld [vmem:[#allocation2 + $0xc] sm:$0x7] }
 0x5af   : > { %10818 = vmatprep.subr.bf16.mxu0 %v11888_v54 }
 0x5b2   : > { %10819 = vmatpush3.bf16.msra.mxu0 %v11889_v58 }
 0x5b3   : > { %10820 = vmatprep.subr.bf16.mxu0 %v11892_v61 }
 0x66c   : > { %v5136_v17 = vpop.f32.mrb[72].mxu0 }
 0x66d   : > { %v5137_v1 = vadd.f32 %v9873_v0, %v5136_v17  ;;  %v11364_v2 = vpop.f32.mrb[73].mxu0  ;;  %v11898_v17 = vld [vmem:[#allocation6 + $0x1c0] sm:$0xff]  }
 0x66e   : > { %v5139_v3 = vpop.f32.mrb[74].mxu0  ;;  %v11903_v2 = vld [vmem:[#allocation6 + $0x140] sm:$0xff]  }
 0x66f   : > { %v5148_v5 = vmul.f32 0.5, %v5137_v1  ;;  %v5140_v46 = vadd.f32 %v9873_v0, %v5139_v3  ;;  %v11365_v8 = vpop.f32.mrb[75].mxu0  ;;  %5144 = vst.msk [vmem:[%s852_s24] sm:$0xff] %vm5143_vm10, %v5137_v1  ;;  %v11893_v0 = vld [vmem:[#allocation6 + $0xb8] sm:$0xff]  }
 0x670   : > { %10821 = vmatpush3.bf16.msra.mxu0 %v11893_v0  ;;  %v9882_v3 = vld [vmem:[%s847_s29] ss:$0 sm:$0xff] }
 0x671   : > { %v5150_v47 = vmul.f32 1.442695, %v5148_v5  ;;  %v5149_v60 = vmul.f32 0.5, %v5140_v46  ;;  %5145 = vst.msk [vmem:[%s852_s24 + $0x8] sm:$0xff] %vm5143_vm10, %v5140_v46  ;;  %10862 = vmatprep.subr.bf16.mxu0 %v11898_v17 }
 0x673   : > { %12204 = vpow2.f32 %v5150_v47  ;;  %v5152_v4 = vmul.f32 1.442695, %v5149_v60 }
 0x675   : > { %12206 = vpow2.f32 %v5152_v4 }
 0x67d   : > { %v12205_v15 = vpop.eup %12204 }
 0x67e   : > { %5156 = vrot.lane.b32.xlu1 %v12205_v15, %s12378_s7 }
 0x67f   : > { %v12207_v35 = vpop.eup %12206 }
 0x680   : > { %5158 = vrot.lane.b32.xlu0 %v12207_v35, %s12378_s7 }
 0x6f0   : > { %v5157_v18 = vpop.permute.xlu1 %5156 }
 0x6f1   : > { %v5162_v27 = vmul.f32 %v5157_v18, %v5146_v57 }
 0x6f2   : > { %v5159_v19 = vpop.permute.xlu0 %5158 }
 0x6f3   : > { %v5163_v20 = vmul.f32 %v5159_v19, %v5147_v24  ;;  %v5164_v21 = vadd.f32 %v5162_v27, %v5137_v1  ;;  %v11895_v1 = vld [vmem:[#allocation6 + $0x38] sm:$0xff]  }
 0x6f5   : > { %v5165_v22 = vadd.f32 %v5163_v20, %v5140_v46 }
 0x6f7   : > { %v5166_v26 = vpack.c.bf16 %v5165_v22, %v5164_v21 }
 0x6f9   : > { %11369 = vmatmul.mubr.msk.bf16.vlgmr.msra.gmra.mrb[72].mxu1 %vm5175_vm13, %v5166_v26 }
 0x6fa   : > { %10779 = vmatpush3.bf16.msra.mxu1 %v11867_v30 }
 0x6fb   : > { %10780 = vmatprep.subr.bf16.mxu1 %v11870_v33  ;;  %v5281_v33 = vld [vmem:[#allocation2] sm:$0x8] }
 0x6fe   : > { %10781 = vmatpush3.bf16.msra.mxu1 %v11871_v36 }
 0x6ff   : > { %10782 = vmatprep.subr.bf16.mxu1 %v11874_v40 }
 0x702   : > { %10783 = vmatpush3.bf16.msra.mxu1 %v11875_v43 }
 0x703   : > { %10784 = vmatprep.subr.bf16.mxu1 %v11878_v7 }
 0x706   : > { %10785 = vmatpush3.bf16.msra.mxu1 %v11879_v41 }
 0x707   : > { %10786 = vmatprep.subr.bf16.mxu1 %v11882_v16 }
 0x70a   : > { %10787 = vmatpush3.bf16.msra.mxu1 %v11883_v29 }
 0x70b   : > { %10788 = vmatprep.subr.bf16.mxu1 %v11886_v52 }
 0x70e   : > { %10789 = vmatpush3.bf16.msra.mxu1 %v11887_v55 }
 0x70f   : > { %10790 = vmatprep.subr.bf16.mxu1 %v11890_v56 }
 0x712   : > { %10791 = vmatpush3.bf16.msra.mxu1 %v11891_v12 }
 0x713   : > { %10792 = vmatprep.subr.bf16.mxu1 %v11894_v63 }
 0x716   : > { %10793 = vmatpush3.bf16.msra.mxu1 %v11895_v1  ;;  %v5300_v1 = vld [vmem:[#allocation2 + $0x10] sm:$0x3] }
 0x717   : > { %10834 = vmatprep.subr.bf16.mxu1 %v11903_v2 }
 0x7cc   : > { %v5216_v5 = vpop.f32.mrb[72].mxu1 }
 0x7cd   : > { %v5217_v46 = vadd.f32 %v9882_v3, %v5216_v5  ;;  %v11370_v8 = vpop.f32.mrb[73].mxu1 }
 0x7ce   : > { %v5219_v47 = vpop.f32.mrb[74].mxu1 }
 0x7cf   : > { %v5223_v60 = vmax.f32 %v5217_v46, 0.0  ;;  %v5220_v4 = vadd.f32 %v9882_v3, %v5219_v47  ;;  %v11371_v34 = vpop.f32.mrb[75].mxu1 }
 0x7d1   : > { %v5226_v14 = vrot.slane %v5223_v60, 6  ;;  %v5233_v15 = vsel %vm862_vm1, %v5223_v60, 0.0  ;;  %v5224_v35 = vmax.f32 %v5220_v4, 0.0 }
 0x7d3   : > { %v5234_v57 = vsel %vm902_vm11, %v5233_v15, %v5226_v14  ;;  %v5235_v18 = vsel %vm893_vm4, %v5226_v14, 0.0  ;;  %v5229_v24 = vrot.slane %v5224_v35, 4  ;;  %v5231_v27 = vrot.slane %v5224_v35, 2 }
 0x7d4   : > { %v10259_v19 = vpack.c.bf16 %v5234_v57, %v5234_v57 }
 0x7d5   : > { %v5236_v20 = vsel %vm862_vm1, %v5235_v18, %v5229_v24  ;;  %v5237_v21 = vsel %vm893_vm4, 0.0, %v5231_v27 }
 0x7d6   : > { %v5249_v22 = vshll.u32 %v10259_v19, 16  ;;  %v5252_v26 = vshrl.u32 %v10259_v19, 16  ;;  %v10260_v42 = vpack.c.bf16 %v5236_v20, %v5236_v20  ;;  %v10261_v28 = vpack.c.bf16 %v5237_v21, %v5237_v21 }
 0x7d8   : > { %v5251_v44 = vrot.slane %v5249_v22, 5  ;;  %v5254_v30 = vrot.slane %v5252_v26, 4  ;;  %v5258_v31 = vshll.u32 %v10260_v42, 16  ;;  %v5262_v32 = vshrl.u32 %v10260_v42, 16  ;;  %v11901_v22 = vld [vmem:[#allocation6 + $0x180] sm:$0xff]  }
 0x7d9   : > { %v5268_v36 = vshll.u32 %v10261_v28, 16  ;;  %v5272_v37 = vshrl.u32 %v10261_v28, 16 }
 0x7da   : > { %v5255_v38 = vor.u32 %v5254_v30, %v5251_v44  ;;  %v5282_v40 = vsel %vm12809_vm15, %v5251_v44, %v5281_v33  ;;  %v5260_v43 = vrot.slane %v5258_v31, 5  ;;  %v5264_v48 = vrot.slane %v5262_v32, 4  ;;  %v11904_v31 = vld [vmem:[#allocation6 + $0x100] sm:$0xff]  }
 0x7db   : > { %5283 = vst [vmem:[#allocation2] sm:$0x8] %v5282_v40  ;;  %v5270_v49 = vrot.slane %v5268_v36, 5  ;;  %v5274_v7 = vrot.slane %v5272_v37, 4  ;;  %v11905_v37 = vld [vmem:[#allocation6 + $0x1c8] sm:$0xff]  }
 0x7dc   : > { %v5256_v41 = vrot.slane %v5255_v38, 4  ;;  %v5265_v50 = vor.u32 %v5264_v48, %v5260_v43  ;;  %v11907_v38 = vld [vmem:[#allocation6 + $0x148] sm:$0xff]  }
 0x7dd   : > { %v5275_v9 = vor.u32 %v5274_v7, %v5270_v49  ;;  %v11909_v7 = vld [vmem:[#allocation6 + $0x1d0] sm:$0xff]  }
 0x7de   : > { %v5261_v16 = vsel %vm12822_vm6, %v5256_v41, %v5260_v43  ;;  %v5266_v51 = vrot.slane %v5265_v50, 4  ;;  %v11908_v41 = vld [vmem:[#allocation6 + $0x108] sm:$0xff]   ;;  %v11911_v50 = vld [vmem:[#allocation6 + $0x150] sm:$0xff]  }
 0x7df   : > { %v5276_v29 = vrot.slane %v5275_v9, 4  ;;  %5284 = vst [vmem:[#allocation2 + $0x4] sm:$0xf] %v5261_v16 }
 0x7e0   : > { %v5271_v52 = vsel %vm12822_vm6, %v5266_v51, %v5270_v49  ;;  %v11906_v49 = vld [vmem:[#allocation6 + $0x188] sm:$0xff]   ;;  %v11910_v51 = vld [vmem:[#allocation6 + $0x190] sm:$0xff]  }
 0x7e1   : > { %5285 = vst [vmem:[#allocation2 + $0x8] sm:$0xf] %v5271_v52  ;;  %v5287_v54 = vsel %vm12814_vm3, %v5276_v29, %v5286_v53  ;;  %v11917_v29 = vld [vmem:[#allocation6 + $0x1d8] sm:$0xff]   ;;  %v11915_v52 = vld [vmem:[#allocation6 + $0x110] sm:$0xff]  }
 0x7e2   : > { %5288 = vst [vmem:[#allocation2 + $0xc] sm:$0x7] %v5287_v54  ;;  %v5294_v55 = vld [vmem:[#allocation2] sm:$0x8] }
 0x7e3   : > { %v5293_v58 = vld [vmem:[#allocation2] sm:$0xe] }
 0x7e4   : > { %v5289_v61 = vld [vmem:[#allocation2] sm:$0xf] }
 0x7e6   : > { %v13722_v56 = vld [vmem:[#allocation2 + $0x4] sm:$0xf] }
 0x7e7   : > { %v13725_v12 = vcombine.low %v5294_v55, %v13722_v56  ;;  %v9890_v63 = vcombine.low %v5293_v58, %v13722_v56  ;;  %v9887_v0 = vcombine.low %v5289_v61, %v13722_v56  ;;  %v5297_v8 = vld [vmem:[#allocation2 + $0x4] sm:$0xc] }
 0x7e8   : > { %v13729_v17 = vld [vmem:[#allocation2 + $0x8] sm:$0xf]  ;;  %v11919_v55 = vld [vmem:[#allocation6 + $0x158] sm:$0xff]  }
 0x7e9   : > { %v5295_v2 = vld [vmem:[#allocation2 + $0xc] sm:$0x3]  ;;  %v5346_v3 = vrot.slane %v13725_v12, 3  ;;  %v9889_v5 = vcombine.low %v13729_v17, %v13729_v17  ;;  %v5335_v46 = vrot.slane %v9890_v63, 1  ;;  %v5316_v60 = vshrl.u32 %v9887_v0, 16  ;;  %v11918_v61 = vld [vmem:[#allocation6 + $0x198] sm:$0xff]  }
 0x7ea   : > { %v9892_v47 = vcombine.low %v13729_v17, %v5295_v2  ;;  %v5318_v4 = vshll.u32 %v9887_v0, 16  ;;  %v13735_v34 = vld [vmem:[#allocation2 + $0xc] sm:$0xf]  ;;  %v13738_v14 = vcombine.low %v5297_v8, %v13729_v17  ;;  %v11914_v54 = vld [vmem:[#allocation2 + $0x8] ss:$0 sps:$4 sm:$0x77]   ;;  %v9894_v58 = vcombine.low %v13722_v56, %v13729_v17 }
 0x7eb   : > { %v5336_v15 = vrot.slane %v9889_v5, 1  ;;  %v5323_v35 = vshll.u32 %v9889_v5, 16  ;;  %v5327_v57 = vshrl.u32 %v9889_v5, 16  ;;  %v13741_v18 = vcombine.low %v13735_v34, %v5300_v1  ;;  %v11921_v63 = vld [vmem:[#allocation6 + $0x1e0] sm:$0xff]   ;;  %v11927_v8 = vld [vmem:[#allocation6 + $0x168] sm:$0xff]  }
 0x7ec   : > { %v5347_v24 = vrot.slane %v9892_v47, 3  ;;  %v5320_v27 = vrot.slane %v5318_v4, 1  ;;  %v5394_v19 = vshrl.u32 %v13738_v14, 16  ;;  %v5397_v20 = vshll.u32 %v13738_v14, 16  ;;  %v11923_v1 = vld [vmem:[#allocation6 + $0x160] sm:$0xff]   ;;  %v11926_v56 = vld [vmem:[#allocation6 + $0x1a8] sm:$0xff]  }
 0x7ed   : > { %v5337_v21 = vsel %vm1012_vm5, %v5335_v46, %v5336_v15  ;;  %v5325_v26 = vrot.slane %v5323_v35, 1  ;;  %v5402_v42 = vshrl.u32 %v13741_v18, 16  ;;  %v5405_v28 = vshll.u32 %v13741_v18, 16  ;;  %v11922_v2 = vld [vmem:[#allocation6 + $0x1a0] sm:$0xff]   ;;  %v11928_v4 = vld [vmem:[#allocation6 + $0x128] sm:$0xff]  }
 0x7ee   : > { %v5348_v44 = vsel %vm900_vm7, %v5346_v3, %v5347_v24  ;;  %v5321_v30 = vor.u32 %v5320_v27, %v5316_v60  ;;  %v5396_v33 = vrot.slane %v5394_v19, 2  ;;  %v5399_v40 = vrot.slane %v5397_v20, 3  ;;  %v11925_v3 = vld [vmem:[#allocation6 + $0x1e8] sm:$0xff]   ;;  %v5296_v5 = vld [vmem:[#allocation2 + $0xc] sm:$0x7]  ;;  %v11929_v60 = vld [vmem:[#allocation6 + $0x1f0] sm:$0xff]  }
 0x7ef   : > { %6083 = vmatprep.mubr.bf16.mxu0 %v5348_v44  ;;  %v5329_v32 = vor.u32 %v5327_v57, %v5325_v26  ;;  %v5404_v43 = vrot.slane %v5402_v42, 2  ;;  %v5407_v48 = vrot.slane %v5405_v28, 3  ;;  %v11924_v46 = vld [vmem:[#allocation6 + $0x120] sm:$0xff]   ;;  %v9893_v47 = vcombine.low %v13729_v17, %v5296_v5  ;;  %v5299_v35 = vld [vmem:[#allocation2 + $0x10] sm:$0x1]  ;;  %v11930_v57 = vld [vmem:[#allocation6 + $0x1b0] sm:$0xff]  }
 0x7f0   : > { %6084 = vmatmul.mubr.bf16.vlgmr.msra.gmra.mrb[76].mxu0 %v5337_v21  ;;  %v5326_v36 = vsel %vm991_vm0, %v5321_v30, %v5325_v26  ;;  %v5400_v9 = vor.u32 %v5399_v40, %v5396_v33  ;;  %v11933_v19 = vld [vmem:[#allocation6 + $0x1f8] sm:$0xff]   ;;  %v11932_v20 = vld [vmem:[#allocation6 + $0x130] sm:$0xff]   ;;  %v9897_v21 = vcombine.low %v13735_v34, %v5299_v35  ;;  %v5358_v26 = vshll.u32 %v13725_v12, 16  ;;  %v11939_v34 = vld [vmem:[#allocation6 + $0x200] sm:$0xff]  }
 0x7f1   : > { %10863 = vmatpush3.bf16.msra.mxu0 %v11901_v22  ;;  %6035 = vmatprep.mubr.bf16.mxu1 %v5326_v36  ;;  %v13750_v16 = vor.u32 %v5407_v48, %v5404_v43  ;;  %v5366_v27 = vshll.u32 %v9893_v47, 16  ;;  %v5355_v22 = vshrl.u32 %v13725_v12, 16  ;;  %v11935_v42 = vld [vmem:[#allocation6 + $0x178] sm:$0xff]   ;;  %v11941_v43 = vld [vmem:[#allocation6 + $0x208] sm:$0xff]   ;;  %v11967_v35 = vld [vmem:[#allocation8 + $0x60] sm:$0xff]  }
 0x7f2   : > { %6091 = vmatprep.mubr.bf16.mxu0 %v5347_v24  ;;  %6036 = vmatmul.mubr.bf16.vlgmr.msra.gmra.mrb[76].mxu1 %v9887_v0  ;;  %v11920_v0 = vld [vmem:[#allocation6 + $0x118] sm:$0xff]   ;;  %v5363_v24 = vshrl.u32 %v9893_v47, 16  ;;  %v5386_v33 = vrot.slane %v9897_v21, 2  ;;  %v11972_v21 = vld [vmem:[#allocation8 + $0x28] sm:$0xff]  }
 0x7f3   : > { %10835 = vmatpush3.bf16.msra.mxu1 %v11904_v31  ;;  %6043 = vmatprep.mubr.bf16.mxu1 %v5329_v32  ;;  %v5409_v53 = vsel %vm1074_vm8, %v5400_v9, %v13750_v16  ;;  %v11934_v28 = vld [vmem:[#allocation6 + $0x1b8] sm:$0xff]   ;;  %v5368_v30 = vrot.slane %v5366_v27, 4  ;;  %v5385_v32 = vrot.slane %v13738_v14, 2  ;;  %v5357_v36 = vrot.slane %v5355_v22, 3  ;;  %v11971_v27 = vld [vmem:[#allocation8 + $0x68] sm:$0xff]   ;;  %v11975_v22 = vld [vmem:[#allocation8 + $0x70] sm:$0xff]  }
 0x7f4   : > { %10864 = vmatprep.subr.bf16.mxu0 %v11905_v37  ;;  %10836 = vmatprep.subr.bf16.mxu1 %v11907_v38  ;;  %v5365_v44 = vrot.slane %v5363_v24, 3  ;;  %v11936_v31 = vld [vmem:[#allocation6 + $0x138] sm:$0xff]   ;;  %v5360_v37 = vrot.slane %v5358_v26, 4  ;;  %v5416_v9 = vrot.slane %v13741_v18, 3  ;;  %v11968_v24 = vld [vmem:[#allocation8 + $0x20] sm:$0xff]   ;;  %v11974_v26 = vld [vmem:[#allocation8 + $0xb0] sm:$0xff]  }
 0x7f5   : > { %10865 = vmatpush3.bf16.msra.mxu0 %v11906_v49  ;;  %v5387_v12 = vsel %vm902_vm11, %v5385_v32, %v5386_v33  ;;  %v9895_v49 = vcombine.low %v5296_v5, %v5296_v5  ;;  %v5301_v14 = vld [vmem:[#allocation2 + $0x4] sm:$0x8]  ;;  %v11959_v5 = vld [vmem:[#allocation8 + $0x50] sm:$0xff]  }
 0x7f6   : > { %10866 = vmatprep.subr.bf16.mxu0 %v11909_v7  ;;  %v5369_v38 = vor.u32 %v5368_v30, %v5365_v44  ;;  %v5361_v40 = vor.u32 %v5360_v37, %v5357_v36  ;;  %v9899_v7 = vcombine.low %v5301_v14, %v13729_v17  ;;  %v11946_v17 = vld [vmem:[#allocation6 + $0x228] sm:$0xff]   ;;  %v11948_v18 = vld [vmem:[#allocation6 + $0x238] sm:$0xff]  }
 0x7f7   : > { %10837 = vmatpush3.bf16.msra.mxu1 %v11908_v41  ;;  %v11942_v41 = vld [vmem:[#allocation6 + $0x210] sm:$0xff]   ;;  %v11963_v47 = vld [vmem:[#allocation8 + $0x58] sm:$0xff]  }
 0x7f8   : > { %6092 = vmatmul.mubr.bf16.gmra.mrb[80].mxu0 %v5336_v15  ;;  %10838 = vmatprep.subr.bf16.mxu1 %v11911_v50  ;;  %v11931_v15 = vld [vmem:[#allocation6 + $0x170] sm:$0xff]   ;;  %v5370_v48 = vsel %vm1033_vm12, %v5361_v40, %v5369_v38  ;;  %v5415_v50 = vrot.slane %v9899_v7, 3  ;;  %v11979_v44 = vld [vmem:[#allocation8 + $0x78] sm:$0xff]  }
 0x7f9   : > { %10867 = vmatpush3.bf16.msra.mxu0 %v11910_v51  ;;  %6179 = vmatprep.mubr.bf16.mxu0 %v5409_v53  ;;  %v11944_v51 = vld [vmem:[#allocation6 + $0x218] sm:$0xff]   ;;  %v11949_v53 = vld [vmem:[#allocation8 + $0xc0] sm:$0xff]  }
 0x7fa   : > { %6044 = vmatmul.mubr.bf16.gmra.mrb[80].mxu1 %v11914_v54  ;;  %10868 = vmatprep.subr.bf16.mxu0 %v11917_v29  ;;  %v11945_v29 = vld [vmem:[#allocation6 + $0x220] sm:$0xff]   ;;  %v11978_v30 = vld [vmem:[#allocation8 + $0xb8] sm:$0xff]  }
 0x7fb   : > { %10839 = vmatpush3.bf16.msra.mxu1 %v11915_v52  ;;  %6131 = vmatprep.mubr.bf16.mxu1 %v9894_v58  ;;  %v11947_v52 = vld [vmem:[#allocation6 + $0x230] sm:$0xff]   ;;  %v11950_v54 = vld [vmem:[#allocation8 + $0x80] sm:$0xff]   ;;  %v11980_v32 = vld [vmem:[#allocation8 + $0x38] sm:$0xff]  }
 0x7fc   : > { %10840 = vmatprep.subr.bf16.mxu1 %v11919_v55  ;;  %v11951_v55 = vld [vmem:[#allocation8 + $0x40] sm:$0xff]   ;;  %v9900_v40 = vld [vmem:[%s13980_s16] ss:$0 sm:$0xff] }
 0x7fd   : > { %10869 = vmatpush3.bf16.msra.mxu0 %v11918_v61  ;;  %v11952_v58 = vld [vmem:[#allocation8] sm:$0xff]   ;;  %v11953_v61 = vld [vmem:[#allocation8 + $0xc8] sm:$0xff]  }
 0x7fe   : > { %10870 = vmatprep.subr.bf16.mxu0 %v11921_v63  ;;  %v11954_v63 = vld [vmem:[#allocation8 + $0x88] sm:$0xff]  }
 0x7ff   : > { %10841 = vmatpush3.bf16.msra.mxu1 %v11920_v0  ;;  %v11955_v0 = vld [vmem:[#allocation8 + $0x48] sm:$0xff]  }
 0x800   : > { %10842 = vmatprep.subr.bf16.mxu1 %v11923_v1  ;;  %v11956_v1 = vld [vmem:[#allocation8 + $0x8] sm:$0xff]  }
 0x801   : > { %10871 = vmatpush3.bf16.msra.mxu0 %v11922_v2  ;;  %v11957_v2 = vld [vmem:[#allocation8 + $0xd0] sm:$0xff]  }
 0x802   : > { %10872 = vmatprep.subr.bf16.mxu0 %v11925_v3  ;;  %v11958_v3 = vld [vmem:[#allocation8 + $0x90] sm:$0xff]  }
 0x803   : > { %10843 = vmatpush3.bf16.msra.mxu1 %v11924_v46  ;;  %v11960_v46 = vld [vmem:[#allocation8 + $0x10] sm:$0xff]  }
 0x804   : > { %10844 = vmatprep.subr.bf16.mxu1 %v11927_v8  ;;  %v11961_v8 = vld [vmem:[#allocation8 + $0xd8] sm:$0xff]  }
 0x805   : > { %10873 = vmatpush3.bf16.msra.mxu0 %v11926_v56  ;;  %v11962_v56 = vld [vmem:[#allocation8 + $0x98] sm:$0xff]  }
 0x806   : > { %10874 = vmatprep.subr.bf16.mxu0 %v11929_v60  ;;  %v11964_v60 = vld [vmem:[#allocation8 + $0x18] sm:$0xff]  }
 0x807   : > { %10845 = vmatpush3.bf16.msra.mxu1 %v11928_v4  ;;  %v11965_v4 = vld [vmem:[#allocation8 + $0xe0] sm:$0xff]  }
 0x808   : > { %10846 = vmatprep.subr.bf16.mxu1 %v11931_v15  ;;  %v11966_v15 = vld [vmem:[#allocation8 + $0xa0] sm:$0xff]  }
 0x809   : > { %10875 = vmatpush3.bf16.msra.mxu0 %v11930_v57  ;;  %v11969_v57 = vld [vmem:[#allocation8 + $0xe8] sm:$0xff]  }
 0x80a   : > { %10876 = vmatprep.subr.bf16.mxu0 %v11933_v19  ;;  %v11970_v19 = vld [vmem:[#allocation8 + $0xa8] sm:$0xff]  }
 0x80b   : > { %10847 = vmatpush3.bf16.msra.mxu1 %v11932_v20  ;;  %v11973_v20 = vld [vmem:[#allocation8 + $0xf0] sm:$0xff]  }
 0x80c   : > { %10848 = vmatprep.subr.bf16.mxu1 %v11935_v42  ;;  %v11977_v42 = vld [vmem:[#allocation8 + $0xf8] sm:$0xff]  }
 0x80d   : > { %10877 = vmatpush3.bf16.msra.mxu0 %v11934_v28  ;;  %v11976_v28 = vld [vmem:[#allocation8 + $0x30] sm:$0xff]  }
 0x80e   : > { %10900 = vmatprep.subr.bf16.mxu0 %v11951_v55 }
 0x80f   : > { %10849 = vmatpush3.bf16.msra.mxu1 %v11936_v31  ;;  %v11983_v31 = vld [vmem:[#allocation8 + $0x1c0] sm:$0xff]  }
 0x810   : > { %6180 = vmatmul.mubr.bf16.vlgmr.msra.gmra.mrb[84].mxu0 %v5387_v12  ;;  %11372 = vmatprep.subr.bf16.mxu1 %v11939_v34 }
 0x811   : > { %6187 = vmatprep.mubr.bf16.mxu0 %v13750_v16  ;;  %v5417_v16 = vsel %vm900_vm7, %v5415_v50, %v5416_v9  ;;  %10901 = vmatpush3.bf16.msra.mxu0 %v11952_v58 }
 0x812   : > { %6132 = vmatmul.mubr.bf16.vlgmr.msra.gmra.mrb[84].mxu1 %v5370_v48  ;;  %10902 = vmatprep.subr.bf16.mxu0 %v11955_v0 }
 0x813   : > { %6139 = vmatprep.mubr.bf16.mxu1 %v9895_v49  ;;  %11373 = vmatpush3.bf16.msra.mxu1 %v11939_v34 }
 0x814   : > { %11374 = vmatprep.subr.bf16.mxu1 %v11941_v43 }
 0x815   : > { %10903 = vmatpush3.bf16.msra.mxu0 %v11956_v1 }
 0x816   : > { %10904 = vmatprep.subr.bf16.mxu0 %v11959_v5 }
 0x817   : > { %11375 = vmatpush3.bf16.msra.mxu1 %v11941_v43 }
 0x818   : > { %6188 = vmatmul.mubr.bf16.gmra.mrb[88].mxu0 %v5386_v33  ;;  %11376 = vmatprep.subr.bf16.mxu1 %v11942_v41  ;;  %v11988_v33 = vld [vmem:[#allocation8 + $0x140] sm:$0xff]  }
 0x819   : > { %10905 = vmatpush3.bf16.msra.mxu0 %v11960_v46 }
 0x81a   : > { %6140 = vmatmul.mubr.bf16.gmra.mrb[88].mxu1 %v5369_v38  ;;  %10906 = vmatprep.subr.bf16.mxu0 %v11963_v47 }
 0x81b   : > { %11377 = vmatpush3.bf16.msra.mxu1 %v11942_v41  ;;  %11388 = vmatprep.mubr.bf16.mxu1 %v5417_v16 }
 0x81c   : > { %11378 = vmatprep.subr.bf16.mxu1 %v11944_v51 }
 0x81d   : > { %10907 = vmatpush3.bf16.msra.mxu0 %v11964_v60 }
 0x81e   : > { %10908 = vmatprep.subr.bf16.mxu0 %v11967_v35 }
 0x81f   : > { %11379 = vmatpush3.bf16.msra.mxu1 %v11944_v51 }
 0x820   : > { %11380 = vmatprep.subr.bf16.mxu1 %v11945_v29 }
 0x821   : > { %10909 = vmatpush3.bf16.msra.mxu0 %v11968_v24 }
 0x822   : > { %10910 = vmatprep.subr.bf16.mxu0 %v11971_v27 }
 0x823   : > { %11381 = vmatpush3.bf16.msra.mxu1 %v11945_v29 }
 0x824   : > { %11382 = vmatprep.subr.bf16.mxu1 %v11946_v17 }
 0x825   : > { %10911 = vmatpush3.bf16.msra.mxu0 %v11972_v21 }
 0x826   : > { %10912 = vmatprep.subr.bf16.mxu0 %v11975_v22 }
 0x827   : > { %11383 = vmatpush3.bf16.msra.mxu1 %v11946_v17 }
 0x828   : > { %11384 = vmatprep.subr.bf16.mxu1 %v11947_v52 }
 0x829   : > { %10913 = vmatpush3.bf16.msra.mxu0 %v11976_v28 }
 0x82a   : > { %10914 = vmatprep.subr.bf16.mxu0 %v11979_v44 }
 0x82b   : > { %11385 = vmatpush3.bf16.msra.mxu1 %v11947_v52 }
 0x82c   : > { %11386 = vmatprep.subr.bf16.mxu1 %v11948_v18 }
 0x82d   : > { %10915 = vmatpush3.bf16.msra.mxu0 %v11980_v32 }
 0x82e   : > { %10956 = vmatprep.subr.bf16.mxu0 %v11988_v33 }
 0x82f   : > { %11387 = vmatpush3.bf16.msra.mxu1 %v11948_v18 }
 0x830   : > { %10928 = vmatprep.subr.bf16.mxu1 %v11949_v53 }
 0x832   : > { %11389 = vmatmul.mubr.bf16.vlgmr.msra.gmra.mrb[92].mxu1 %v5416_v9 }
 0x833   : > { %10929 = vmatpush3.bf16.msra.mxu1 %v11950_v54 }
 0x834   : > { %10930 = vmatprep.subr.bf16.mxu1 %v11953_v61 }
 0x837   : > { %10931 = vmatpush3.bf16.msra.mxu1 %v11954_v63 }
 0x838   : > { %10932 = vmatprep.subr.bf16.mxu1 %v11957_v2 }
 0x83b   : > { %10933 = vmatpush3.bf16.msra.mxu1 %v11958_v3 }
 0x83c   : > { %10934 = vmatprep.subr.bf16.mxu1 %v11961_v8 }
 0x83f   : > { %10935 = vmatpush3.bf16.msra.mxu1 %v11962_v56 }
 0x840   : > { %10936 = vmatprep.subr.bf16.mxu1 %v11965_v4 }
 0x843   : > { %10937 = vmatpush3.bf16.msra.mxu1 %v11966_v15 }
 0x844   : > { %10938 = vmatprep.subr.bf16.mxu1 %v11969_v57 }
 0x847   : > { %10939 = vmatpush3.bf16.msra.mxu1 %v11970_v19 }
 0x848   : > { %10940 = vmatprep.subr.bf16.mxu1 %v11973_v20 }
 0x84b   : > { %10941 = vmatpush3.bf16.msra.mxu1 %v11974_v26 }
 0x84c   : > { %10942 = vmatprep.subr.bf16.mxu1 %v11977_v42 }
 0x84f   : > { %10943 = vmatpush3.bf16.msra.mxu1 %v11978_v30 }
 0x850   : > { %10984 = vmatprep.subr.bf16.mxu1 %v11983_v31 }
 0x8c3   : > { %v10822_v36 = vpop.f32.mrb[76].mxu0 }
 0x8c4   : > { %v10823_v37 = vpop.f32.mrb[77].mxu0 }
 0x8c5   : > { %v10824_v34 = vadd.f32 %v10823_v37, %v10822_v36  ;;  %v10794_v38 = vpop.f32.mrb[76].mxu1  ;;  %v10825_v12 = vpop.f32.mrb[78].mxu0 }
 0x8c6   : > { %v10795_v43 = vpop.f32.mrb[77].mxu1  ;;  %v10826_v48 = vpop.f32.mrb[79].mxu0 }
 0x8c7   : > { %v10796_v49 = vadd.f32 %v10795_v43, %v10794_v38  ;;  %v10827_v14 = vadd.f32 %v10826_v48, %v10825_v12  ;;  %v10797_v7 = vpop.f32.mrb[78].mxu1 }
 0x8c8   : > { %v10798_v41 = vpop.f32.mrb[79].mxu1 }
 0x8c9   : > { %v6038_v50 = vadd.f32 %v10796_v49, %v9900_v40  ;;  %v10799_v9 = vadd.f32 %v10798_v41, %v10797_v7 }
 0x8cb   : > { %v6041_v51 = vadd.f32 %v10799_v9, %v9900_v40  ;;  %v10828_v16 = vpop.f32.mrb[80].mxu0  ;;  %v6086_v29 = vadd.f32 %v10824_v34, %v6038_v50 }
 0x8cc   : > { %v10829_v17 = vpop.f32.mrb[81].mxu0 }
 0x8cd   : > { %v10830_v52 = vadd.f32 %v10829_v17, %v10828_v16  ;;  %v10800_v18 = vpop.f32.mrb[80].mxu1  ;;  %v10831_v53 = vpop.f32.mrb[82].mxu0  ;;  %v6089_v54 = vadd.f32 %v10827_v14, %v6041_v51 }
 0x8ce   : > { %v10801_v55 = vpop.f32.mrb[81].mxu1  ;;  %v10832_v58 = vpop.f32.mrb[83].mxu0 }
 0x8cf   : > { %v10802_v61 = vadd.f32 %v10801_v55, %v10800_v18  ;;  %v10803_v63 = vpop.f32.mrb[82].mxu1 }
 0x8d0   : > { %v10804_v0 = vpop.f32.mrb[83].mxu1 }
 0x8d1   : > { %v6046_v1 = vadd.f32 %v10802_v61, %v9900_v40 }
 0x8d3   : > { %v6094_v2 = vadd.f32 %v10830_v52, %v6046_v1 }
 0x8e3   : > { %v10878_v3 = vpop.f32.mrb[84].mxu0 }
 0x8e4   : > { %v10879_v5 = vpop.f32.mrb[85].mxu0 }
 0x8e5   : > { %v10880_v46 = vadd.f32 %v10879_v5, %v10878_v3  ;;  %v10850_v8 = vpop.f32.mrb[84].mxu1  ;;  %v10881_v56 = vpop.f32.mrb[86].mxu0  ;;  %v6292_v5 = vld [vmem:[#allocation3] sm:$0x8] }
 0x8e6   : > { %v10851_v47 = vpop.f32.mrb[85].mxu1  ;;  %v10882_v60 = vpop.f32.mrb[87].mxu0 }
 0x8e7   : > { %v10852_v4 = vadd.f32 %v10851_v47, %v10850_v8  ;;  %v10883_v15 = vadd.f32 %v10882_v60, %v10881_v56  ;;  %v10853_v35 = vpop.f32.mrb[86].mxu1 }
 0x8e8   : > { %v10854_v57 = vpop.f32.mrb[87].mxu1 }
 0x8e9   : > { %v6134_v24 = vadd.f32 %v10852_v4, %v6086_v29  ;;  %v10855_v27 = vadd.f32 %v10854_v57, %v10853_v35  ;;  %v6297_v4 = vld [vmem:[#allocation3 + $0xc] sm:$0x7] }
 0x8eb   : > { %v6137_v19 = vadd.f32 %v10855_v27, %v6089_v54  ;;  %v10884_v20 = vpop.f32.mrb[88].mxu0  ;;  %v6182_v21 = vadd.f32 %v10880_v46, %v6134_v24 }
 0x8ec   : > { %v10885_v22 = vpop.f32.mrb[89].mxu0 }
 0x8ed   : > { %v10886_v26 = vadd.f32 %v10885_v22, %v10884_v20  ;;  %v10856_v42 = vpop.f32.mrb[88].mxu1  ;;  %v10887_v28 = vpop.f32.mrb[90].mxu0  ;;  %v6185_v44 = vadd.f32 %v10883_v15, %v6137_v19 }
 0x8ee   : > { %v10857_v30 = vpop.f32.mrb[89].mxu1  ;;  %v10888_v31 = vpop.f32.mrb[91].mxu0 }
 0x8ef   : > { %v10858_v32 = vadd.f32 %v10857_v30, %v10856_v42  ;;  %v10859_v33 = vpop.f32.mrb[90].mxu1  ;;  %v6311_v31 = vld [vmem:[#allocation3 + $0x10] sm:$0x3] }
 0x8f0   : > { %v10860_v36 = vpop.f32.mrb[91].mxu1 }
 0x8f1   : > { %v6142_v37 = vadd.f32 %v10858_v32, %v6094_v2 }
 0x8f3   : > { %v6190_v34 = vadd.f32 %v10886_v26, %v6142_v37 }
 0x905   : > { %v11390_v38 = vpop.f32.mrb[92].mxu1 }
 0x906   : > { %v6238_v12 = vadd.f32 %v11390_v38, %v6190_v34  ;;  %v6229_v40 = vpop.f32.mrb[93].mxu1 }
 0x907   : > { %v6230_v43 = vadd.f32 %v6229_v40, %v6182_v21  ;;  %v11391_v48 = vpop.f32.mrb[94].mxu1 }
 0x908   : > { %v6245_v49 = vmax.f32 %v6238_v12, 0.0  ;;  %v6232_v14 = vpop.f32.mrb[95].mxu1 }
 0x909   : > { %v6243_v7 = vmax.f32 %v6230_v43, 0.0  ;;  %v6233_v41 = vadd.f32 %v6232_v14, %v6185_v44 }
 0x90a   : > { %v6248_v50 = vmul.f32 %v6245_v49, %v13112_v23 }
 0x90b   : > { %v6246_v9 = vmul.f32 %v6243_v7, %v13110_v45  ;;  %v6244_v51 = vmax.f32 %v6233_v41, 0.0  ;;  %v11986_v41 = vld [vmem:[#allocation8 + $0x180] sm:$0xff]  }
 0x90c   : > { %v10264_v16 = vpack.c.bf16 %v6248_v50, %v6248_v50 }
 0x90d   : > { %v10262_v29 = vpack.c.bf16 %v6246_v9, %v6246_v9  ;;  %v6247_v17 = vmul.f32 %v6244_v51, %v13116_v59 }
 0x90e   : > { %v6279_v52 = vshll.u32 %v10264_v16, 16  ;;  %v6283_v18 = vshrl.u32 %v10264_v16, 16 }
 0x90f   : > { %v6260_v53 = vshll.u32 %v10262_v29, 16  ;;  %v6263_v54 = vshrl.u32 %v10262_v29, 16  ;;  %v10263_v55 = vpack.c.bf16 %v6247_v17, %v6247_v17 }
 0x910   : > { %v6281_v58 = vrot.slane %v6279_v52, 5  ;;  %v6285_v61 = vrot.slane %v6283_v18, 4 }
 0x911   : > { %v6262_v63 = vrot.slane %v6260_v53, 5  ;;  %v6265_v0 = vrot.slane %v6263_v54, 4  ;;  %v6269_v1 = vshll.u32 %v10263_v55, 16  ;;  %v6273_v2 = vshrl.u32 %v10263_v55, 16  ;;  %v11990_v53 = vld [vmem:[#allocation8 + $0x1c8] sm:$0xff]  }
 0x912   : > { %v6286_v3 = vor.u32 %v6285_v61, %v6281_v58  ;;  %v11989_v61 = vld [vmem:[#allocation8 + $0x100] sm:$0xff]  }
 0x913   : > { %v6266_v46 = vor.u32 %v6265_v0, %v6262_v63  ;;  %v6293_v8 = vsel %vm12809_vm15, %v6262_v63, %v6292_v5  ;;  %v6271_v56 = vrot.slane %v6269_v1, 5  ;;  %v6275_v47 = vrot.slane %v6273_v2, 4  ;;  %v11991_v1 = vld [vmem:[#allocation8 + $0x188] sm:$0xff]  }
 0x914   : > { %v6287_v60 = vrot.slane %v6286_v3, 4  ;;  %6294 = vst [vmem:[#allocation3] sm:$0x8] %v6293_v8  ;;  %v11992_v2 = vld [vmem:[#allocation8 + $0x148] sm:$0xff]  }
 0x915   : > { %v6267_v15 = vrot.slane %v6266_v46, 4  ;;  %v6276_v35 = vor.u32 %v6275_v47, %v6271_v56  ;;  %v11994_v46 = vld [vmem:[#allocation8 + $0x1d0] sm:$0xff]   ;;  %v11993_v47 = vld [vmem:[#allocation8 + $0x108] sm:$0xff]  }
 0x916   : > { %v6298_v57 = vsel %vm12814_vm3, %v6287_v60, %v6297_v4  ;;  %v11995_v60 = vld [vmem:[#allocation8 + $0x190] sm:$0xff]  }
 0x917   : > { %6299 = vst [vmem:[#allocation3 + $0xc] sm:$0x7] %v6298_v57  ;;  %v6272_v24 = vsel %vm12822_vm6, %v6267_v15, %v6271_v56  ;;  %v6277_v27 = vrot.slane %v6276_v35, 4  ;;  %v11996_v4 = vld [vmem:[#allocation8 + $0x150] sm:$0xff]   ;;  %v12002_v35 = vld [vmem:[#allocation8 + $0x1d8] sm:$0xff]  }
 0x918   : > { %6295 = vst [vmem:[#allocation3 + $0x4] sm:$0xf] %v6272_v24  ;;  %v12000_v24 = vld [vmem:[#allocation8 + $0x110] sm:$0xff]  }
 0x919   : > { %v6282_v19 = vsel %vm12822_vm6, %v6277_v27, %v6281_v58 }
 0x91a   : > { %6296 = vst [vmem:[#allocation3 + $0x8] sm:$0xf] %v6282_v19 }
 0x91b   : > { %v6305_v20 = vld [vmem:[#allocation3] sm:$0x8] }
 0x91c   : > { %v6304_v22 = vld [vmem:[#allocation3] sm:$0xe] }
 0x91d   : > { %v6300_v26 = vld [vmem:[#allocation3] sm:$0xf] }
 0x91e   : > { %v13788_v30 = vld [vmem:[#allocation3 + $0xc] sm:$0xf] }
 0x91f   : > { %v13781_v21 = vld [vmem:[#allocation3 + $0x4] sm:$0xf]  ;;  %v6306_v33 = vld [vmem:[#allocation3 + $0xc] sm:$0x3]  ;;  %v13800_v43 = vcombine.low %v13788_v30, %v6311_v31  ;;  %v12007_v31 = vld [vmem:[#allocation8 + $0x1a0] sm:$0xff]  }
 0x920   : > { %v13784_v42 = vcombine.low %v6305_v20, %v13781_v21  ;;  %v9979_v28 = vcombine.low %v6304_v22, %v13781_v21  ;;  %v9976_v44 = vcombine.low %v6300_v26, %v13781_v21  ;;  %v6308_v34 = vld [vmem:[#allocation3 + $0x4] sm:$0xc]  ;;  %v12003_v20 = vld [vmem:[#allocation8 + $0x198] sm:$0xff]  }
 0x921   : > { %v13790_v32 = vld [vmem:[#allocation3 + $0x8] sm:$0xf]  ;;  %v6413_v55 = vshrl.u32 %v13800_v43, 16  ;;  %v6416_v58 = vshll.u32 %v13800_v43, 16  ;;  %v12004_v22 = vld [vmem:[#allocation8 + $0x158] sm:$0xff]  }
 0x922   : > { %v9981_v36 = vcombine.low %v13790_v32, %v6306_v33  ;;  %v9978_v37 = vcombine.low %v13790_v32, %v13790_v32  ;;  %v6357_v38 = vrot.slane %v13784_v42, 3  ;;  %v6329_v12 = vshll.u32 %v9976_v44, 16  ;;  %v11999_v19 = vld [vmem:[#allocation3 + $0x8] ss:$0 sps:$4 sm:$0x77]   ;;  %v12008_v33 = vld [vmem:[#allocation8 + $0x160] sm:$0xff]  }
 0x923   : > { %v13797_v40 = vcombine.low %v6308_v34, %v13790_v32  ;;  %v6346_v49 = vrot.slane %v9979_v28, 1  ;;  %v6327_v50 = vshrl.u32 %v9976_v44, 16  ;;  %v6415_v8 = vrot.slane %v6413_v55, 2  ;;  %v12006_v28 = vld [vmem:[#allocation8 + $0x1e0] sm:$0xff]   ;;  %v12011_v34 = vld [vmem:[#allocation8 + $0x1a8] sm:$0xff]  }
 0x924   : > { %v6358_v48 = vrot.slane %v9981_v36, 3  ;;  %v6347_v14 = vrot.slane %v9978_v37, 1  ;;  %v6334_v7 = vshll.u32 %v9978_v37, 16  ;;  %v6331_v9 = vrot.slane %v6329_v12, 1  ;;  %v12010_v36 = vld [vmem:[#allocation8 + $0x1e8] sm:$0xff]  }
 0x925   : > { %v6405_v51 = vshrl.u32 %v13797_v40, 16  ;;  %v6408_v16 = vshll.u32 %v13797_v40, 16  ;;  %v6338_v18 = vshrl.u32 %v9978_v37, 16  ;;  %v6418_v56 = vrot.slane %v6416_v58, 3  ;;  %v12009_v37 = vld [vmem:[#allocation8 + $0x120] sm:$0xff]  }
 0x926   : > { %v6359_v29 = vsel %vm900_vm7, %v6357_v38, %v6358_v48  ;;  %v6348_v17 = vsel %vm1012_vm5, %v6346_v49, %v6347_v14  ;;  %v6336_v52 = vrot.slane %v6334_v7, 1  ;;  %v6332_v54 = vor.u32 %v6331_v9, %v6327_v50  ;;  %v12012_v38 = vld [vmem:[#allocation8 + $0x168] sm:$0xff]   ;;  %v6307_v12 = vld [vmem:[#allocation3 + $0xc] sm:$0x7]  ;;  %v12016_v7 = vld [vmem:[#allocation8 + $0x170] sm:$0xff]  }
 0x927   : > { %7094 = vmatprep.mubr.bf16.mxu1 %v6359_v29  ;;  %v6407_v3 = vrot.slane %v6405_v51, 2  ;;  %v6410_v5 = vrot.slane %v6408_v16, 3  ;;  %v13809_v57 = vor.u32 %v6418_v56, %v6415_v8  ;;  %v9983_v26 = vcombine.low %v13781_v21, %v13790_v32  ;;  %v12014_v21 = vld [vmem:[#allocation8 + $0x1f0] sm:$0xff]   ;;  %v12013_v49 = vld [vmem:[#allocation8 + $0x128] sm:$0xff]   ;;  %v6310_v50 = vld [vmem:[#allocation3 + $0x10] sm:$0x1] }
 0x928   : > { %7095 = vmatmul.mubr.bf16.vlgmr.msra.gmra.mrb[96].mxu1 %v6348_v17  ;;  %v6340_v63 = vor.u32 %v6338_v18, %v6336_v52  ;;  %v6337_v0 = vsel %vm991_vm0, %v6332_v54, %v6336_v52  ;;  %v12017_v16 = vld [vmem:[#allocation8 + $0x130] sm:$0xff]   ;;  %v6366_v29 = vshrl.u32 %v13784_v42, 16  ;;  %v6369_v17 = vshll.u32 %v13784_v42, 16  ;;  %v12019_v52 = vld [vmem:[#allocation8 + $0x1b8] sm:$0xff]  }
 0x929   : > { %10985 = vmatpush3.bf16.msra.mxu1 %v11986_v41  ;;  %7102 = vmatprep.mubr.bf16.mxu1 %v6358_v48  ;;  %v6411_v15 = vor.u32 %v6410_v5, %v6407_v3  ;;  %v9982_v48 = vcombine.low %v13790_v32, %v6307_v12  ;;  %v12018_v41 = vld [vmem:[#allocation8 + $0x1f8] sm:$0xff]   ;;  %v6396_v58 = vrot.slane %v13797_v40, 2  ;;  %v6312_v8 = vld [vmem:[#allocation3 + $0x4] sm:$0x8] }
 0x92a   : > { %7046 = vmatprep.mubr.bf16.mxu0 %v6337_v0  ;;  %10986 = vmatprep.subr.bf16.mxu1 %v11990_v53  ;;  %v12020_v18 = vld [vmem:[#allocation8 + $0x178] sm:$0xff]   ;;  %v9986_v53 = vcombine.low %v13788_v30, %v6310_v50  ;;  %v6371_v0 = vrot.slane %v6369_v17, 4  ;;  %v12026_v30 = vld [vmem:[#allocation8 + $0x208] sm:$0xff]   ;;  %v9988_v56 = vcombine.low %v6312_v8, %v13790_v32  ;;  %v12054_v50 = vld [vmem:[#allocation9 + $0x20] sm:$0xff]  }
 0x92b   : > { %7047 = vmatmul.mubr.bf16.vlgmr.msra.gmra.mrb[92].mxu0 %v9976_v44  ;;  %v6420_v27 = vsel %vm1074_vm8, %v6411_v15, %v13809_v57  ;;  %v12005_v44 = vld [vmem:[#allocation8 + $0x118] sm:$0xff]   ;;  %v6374_v9 = vshrl.u32 %v9982_v48, 16  ;;  %v6377_v51 = vshll.u32 %v9982_v48, 16  ;;  %v12031_v32 = vld [vmem:[#allocation8 + $0x228] sm:$0xff]   ;;  %v12049_v48 = vld [vmem:[#allocation9 + $0xe0] sm:$0xff]  }
 0x92c   : > { %10957 = vmatpush3.bf16.msra.mxu0 %v11989_v61  ;;  %7054 = vmatprep.mubr.bf16.mxu0 %v6340_v63  ;;  %v12021_v61 = vld [vmem:[#allocation8 + $0x138] sm:$0xff]   ;;  %v6368_v63 = vrot.slane %v6366_v29, 3  ;;  %v12058_v29 = vld [vmem:[#allocation9 + $0x28] sm:$0xff]   ;;  %v12059_v17 = vld [vmem:[#allocation9 + $0xb0] sm:$0xff]  }
 0x92d   : > { %10987 = vmatpush3.bf16.msra.mxu1 %v11991_v1  ;;  %10958 = vmatprep.subr.bf16.mxu0 %v11992_v2  ;;  %v6376_v54 = vrot.slane %v6374_v9, 3  ;;  %v6379_v55 = vrot.slane %v6377_v51, 4  ;;  %v6397_v1 = vrot.slane %v9986_v53, 2  ;;  %v12024_v2 = vld [vmem:[#allocation8 + $0x200] sm:$0xff]   ;;  %v12029_v15 = vld [vmem:[#allocation8 + $0x218] sm:$0xff]   ;;  %v12055_v9 = vld [vmem:[#allocation9 + $0xa8] sm:$0xff]  }
 0x92e   : > { %10988 = vmatprep.subr.bf16.mxu1 %v11994_v46  ;;  %v6372_v5 = vor.u32 %v6371_v0, %v6368_v63  ;;  %v9984_v46 = vcombine.low %v6307_v12, %v6307_v12  ;;  %v12047_v12 = vld [vmem:[#allocation9 + $0x98] sm:$0xff]   ;;  %v12056_v51 = vld [vmem:[#allocation9 + $0x68] sm:$0xff]   ;;  %v12062_v53 = vld [vmem:[#allocation9 + $0x30] sm:$0xff]  }
 0x92f   : > { %v6380_v42 = vor.u32 %v6379_v55, %v6376_v54  ;;  %v6398_v3 = vsel %vm902_vm11, %v6396_v58, %v6397_v1  ;;  %v12063_v54 = vld [vmem:[#allocation9 + $0xb8] sm:$0xff]   ;;  %v12067_v58 = vld [vmem:[#allocation9 + $0x1c0] sm:$0xff]  }
 0x930   : > { %10959 = vmatpush3.bf16.msra.mxu0 %v11993_v47  ;;  %7103 = vmatmul.mubr.bf16.gmra.mrb[100].mxu1 %v6347_v14  ;;  %v12015_v14 = vld [vmem:[#allocation8 + $0x1b0] sm:$0xff]   ;;  %v12064_v55 = vld [vmem:[#allocation9 + $0x78] sm:$0xff]   ;;  %v12073_v63 = vld [vmem:[#allocation9 + $0x140] sm:$0xff]  }
 0x931   : > { %10989 = vmatpush3.bf16.msra.mxu1 %v11995_v60  ;;  %10960 = vmatprep.subr.bf16.mxu0 %v11996_v4  ;;  %v6381_v40 = vsel %vm1033_vm12, %v6372_v5, %v6380_v42  ;;  %v12027_v47 = vld [vmem:[#allocation8 + $0x210] sm:$0xff]   ;;  %v6426_v60 = vrot.slane %v9988_v56, 3  ;;  %v6427_v4 = vrot.slane %v13800_v43, 3  ;;  %v12034_v43 = vld [vmem:[#allocation9 + $0xc0] sm:$0xff]  }
 0x932   : > { %7190 = vmatprep.mubr.bf16.mxu1 %v6420_v27  ;;  %10990 = vmatprep.subr.bf16.mxu1 %v12002_v35  ;;  %v12033_v27 = vld [vmem:[#allocation8 + $0x238] sm:$0xff]  }
 0x933   : > { %7055 = vmatmul.mubr.bf16.gmra.mrb[96].mxu0 %v11999_v19  ;;  %v6428_v35 = vsel %vm900_vm7, %v6426_v60, %v6427_v4  ;;  %v12035_v19 = vld [vmem:[#allocation9 + $0x80] sm:$0xff]  }
 0x934   : > { %10961 = vmatpush3.bf16.msra.mxu0 %v12000_v24  ;;  %7142 = vmatprep.mubr.bf16.mxu0 %v9983_v26  ;;  %v12032_v24 = vld [vmem:[#allocation8 + $0x230] sm:$0xff]   ;;  %v12038_v26 = vld [vmem:[#allocation9] sm:$0xff]  }
 0x935   : > { %10991 = vmatpush3.bf16.msra.mxu1 %v12003_v20  ;;  %10962 = vmatprep.subr.bf16.mxu0 %v12004_v22  ;;  %v12036_v20 = vld [vmem:[#allocation9 + $0x40] sm:$0xff]   ;;  %v12037_v22 = vld [vmem:[#allocation9 + $0xc8] sm:$0xff]  }
 0x936   : > { %10992 = vmatprep.subr.bf16.mxu1 %v12006_v28  ;;  %v12039_v28 = vld [vmem:[#allocation9 + $0x88] sm:$0xff]  }
 0x938   : > { %10963 = vmatpush3.bf16.msra.mxu0 %v12005_v44  ;;  %v12040_v44 = vld [vmem:[#allocation9 + $0x48] sm:$0xff]  }
 0x939   : > { %10993 = vmatpush3.bf16.msra.mxu1 %v12007_v31  ;;  %10964 = vmatprep.subr.bf16.mxu0 %v12008_v33  ;;  %v12041_v31 = vld [vmem:[#allocation9 + $0xd0] sm:$0xff]   ;;  %v12042_v33 = vld [vmem:[#allocation9 + $0x8] sm:$0xff]  }
 0x93a   : > { %10994 = vmatprep.subr.bf16.mxu1 %v12010_v36  ;;  %v12043_v36 = vld [vmem:[#allocation9 + $0x90] sm:$0xff]  }
 0x93c   : > { %10965 = vmatpush3.bf16.msra.mxu0 %v12009_v37  ;;  %v12044_v37 = vld [vmem:[#allocation9 + $0x50] sm:$0xff]  }
 0x93d   : > { %10995 = vmatpush3.bf16.msra.mxu1 %v12011_v34  ;;  %10966 = vmatprep.subr.bf16.mxu0 %v12012_v38  ;;  %v12045_v34 = vld [vmem:[#allocation9 + $0xd8] sm:$0xff]   ;;  %v12046_v38 = vld [vmem:[#allocation9 + $0x10] sm:$0xff]  }
 0x93e   : > { %10996 = vmatprep.subr.bf16.mxu1 %v12014_v21  ;;  %v12048_v21 = vld [vmem:[#allocation9 + $0x58] sm:$0xff]  }
 0x940   : > { %10967 = vmatpush3.bf16.msra.mxu0 %v12013_v49  ;;  %v12050_v49 = vld [vmem:[#allocation9 + $0x18] sm:$0xff]  }
 0x941   : > { %10997 = vmatpush3.bf16.msra.mxu1 %v12015_v14  ;;  %10968 = vmatprep.subr.bf16.mxu0 %v12016_v7  ;;  %v12051_v14 = vld [vmem:[#allocation9 + $0xa0] sm:$0xff]  }
 0x942   : > { %10998 = vmatprep.subr.bf16.mxu1 %v12018_v41  ;;  %v12052_v7 = vld [vmem:[#allocation9 + $0x60] sm:$0xff]   ;;  %v12053_v41 = vld [vmem:[#allocation9 + $0xe8] sm:$0xff]  }
 0x944   : > { %10969 = vmatpush3.bf16.msra.mxu0 %v12017_v16  ;;  %v12057_v16 = vld [vmem:[#allocation9 + $0xf0] sm:$0xff]  }
 0x945   : > { %10999 = vmatpush3.bf16.msra.mxu1 %v12019_v52  ;;  %10970 = vmatprep.subr.bf16.mxu0 %v12020_v18  ;;  %v12060_v52 = vld [vmem:[#allocation9 + $0x70] sm:$0xff]   ;;  %v12061_v18 = vld [vmem:[#allocation9 + $0xf8] sm:$0xff]  }
 0x946   : > { %11022 = vmatprep.subr.bf16.mxu1 %v12036_v20 }
 0x948   : > { %10971 = vmatpush3.bf16.msra.mxu0 %v12021_v61  ;;  %7191 = vmatmul.mubr.bf16.vlgmr.msra.gmra.mrb[104].mxu1 %v6398_v3  ;;  %v12068_v61 = vld [vmem:[#allocation9 + $0x38] sm:$0xff]  }
 0x949   : > { %7198 = vmatprep.mubr.bf16.mxu1 %v13809_v57  ;;  %11392 = vmatprep.subr.bf16.mxu0 %v12024_v2  ;;  %v12030_v57 = vld [vmem:[#allocation8 + $0x220] sm:$0xff]  }
 0x94a   : > { %11023 = vmatpush3.bf16.msra.mxu1 %v12038_v26 }
 0x94b   : > { %7143 = vmatmul.mubr.bf16.vlgmr.msra.gmra.mrb[100].mxu0 %v6381_v40  ;;  %11024 = vmatprep.subr.bf16.mxu1 %v12040_v44 }
 0x94c   : > { %7150 = vmatprep.mubr.bf16.mxu0 %v9984_v46  ;;  %11393 = vmatpush3.bf16.msra.mxu0 %v12024_v2 }
 0x94d   : > { %11394 = vmatprep.subr.bf16.mxu0 %v12026_v30 }
 0x94e   : > { %11025 = vmatpush3.bf16.msra.mxu1 %v12042_v33 }
 0x94f   : > { %11026 = vmatprep.subr.bf16.mxu1 %v12044_v37 }
 0x950   : > { %11395 = vmatpush3.bf16.msra.mxu0 %v12026_v30  ;;  %7199 = vmatmul.mubr.bf16.gmra.mrb[108].mxu1 %v6397_v1  ;;  %v9989_v30 = vld [vmem:[%s14039_s2] ss:$0 sm:$0xff] }
 0x951   : > { %11396 = vmatprep.subr.bf16.mxu0 %v12027_v47 }
 0x952   : > { %11027 = vmatpush3.bf16.msra.mxu1 %v12046_v38 }
 0x953   : > { %7151 = vmatmul.mubr.bf16.gmra.mrb[104].mxu0 %v6380_v42  ;;  %11028 = vmatprep.subr.bf16.mxu1 %v12048_v21 }
 0x954   : > { %11397 = vmatpush3.bf16.msra.mxu0 %v12027_v47  ;;  %11408 = vmatprep.mubr.bf16.mxu0 %v6428_v35 }
 0x955   : > { %11398 = vmatprep.subr.bf16.mxu0 %v12029_v15 }
 0x956   : > { %11029 = vmatpush3.bf16.msra.mxu1 %v12050_v49 }
 0x957   : > { %11030 = vmatprep.subr.bf16.mxu1 %v12052_v7 }
 0x958   : > { %11399 = vmatpush3.bf16.msra.mxu0 %v12029_v15 }
 0x959   : > { %11400 = vmatprep.subr.bf16.mxu0 %v12030_v57 }
 0x95a   : > { %11031 = vmatpush3.bf16.msra.mxu1 %v12054_v50 }
 0x95b   : > { %11032 = vmatprep.subr.bf16.mxu1 %v12056_v51 }
 0x95c   : > { %11401 = vmatpush3.bf16.msra.mxu0 %v12030_v57 }
 0x95d   : > { %11402 = vmatprep.subr.bf16.mxu0 %v12031_v32 }
 0x95e   : > { %11033 = vmatpush3.bf16.msra.mxu1 %v12058_v29 }
 0x95f   : > { %11034 = vmatprep.subr.bf16.mxu1 %v12060_v52 }
 0x960   : > { %11403 = vmatpush3.bf16.msra.mxu0 %v12031_v32 }
 0x961   : > { %11404 = vmatprep.subr.bf16.mxu0 %v12032_v24 }
 0x962   : > { %11035 = vmatpush3.bf16.msra.mxu1 %v12062_v53 }
 0x963   : > { %11036 = vmatprep.subr.bf16.mxu1 %v12064_v55 }
 0x964   : > { %11405 = vmatpush3.bf16.msra.mxu0 %v12032_v24 }
 0x965   : > { %11406 = vmatprep.subr.bf16.mxu0 %v12033_v27 }
 0x966   : > { %11037 = vmatpush3.bf16.msra.mxu1 %v12068_v61 }
 0x967   : > { %11078 = vmatprep.subr.bf16.mxu1 %v12073_v63 }
 0x968   : > { %11407 = vmatpush3.bf16.msra.mxu0 %v12033_v27 }
 0x969   : > { %11050 = vmatprep.subr.bf16.mxu0 %v12034_v43 }
 0x96b   : > { %11409 = vmatmul.mubr.bf16.vlgmr.msra.gmra.mrb[108].mxu0 %v6427_v4 }
 0x96c   : > { %11051 = vmatpush3.bf16.msra.mxu0 %v12035_v19 }
 0x96d   : > { %11052 = vmatprep.subr.bf16.mxu0 %v12037_v22 }
 0x970   : > { %11053 = vmatpush3.bf16.msra.mxu0 %v12039_v28 }
 0x971   : > { %11054 = vmatprep.subr.bf16.mxu0 %v12041_v31 }
 0x974   : > { %11055 = vmatpush3.bf16.msra.mxu0 %v12043_v36 }
 0x975   : > { %11056 = vmatprep.subr.bf16.mxu0 %v12045_v34 }
 0x978   : > { %11057 = vmatpush3.bf16.msra.mxu0 %v12047_v12 }
 0x979   : > { %11058 = vmatprep.subr.bf16.mxu0 %v12049_v48 }
 0x97c   : > { %11059 = vmatpush3.bf16.msra.mxu0 %v12051_v14 }
 0x97d   : > { %11060 = vmatprep.subr.bf16.mxu0 %v12053_v41 }
 0x980   : > { %11061 = vmatpush3.bf16.msra.mxu0 %v12055_v9 }
 0x981   : > { %11062 = vmatprep.subr.bf16.mxu0 %v12057_v16 }
 0x984   : > { %11063 = vmatpush3.bf16.msra.mxu0 %v12059_v17 }
 0x985   : > { %11064 = vmatprep.subr.bf16.mxu0 %v12061_v18 }
 0x988   : > { %11065 = vmatpush3.bf16.msra.mxu0 %v12063_v54 }
 0x989   : > { %11106 = vmatprep.subr.bf16.mxu0 %v12067_v58 }
 0x9fb   : > { %v10944_v0 = vpop.f32.mrb[96].mxu1 }
 0x9fc   : > { %v10945_v1 = vpop.f32.mrb[97].mxu1 }
 0x9fd   : > { %v10946_v2 = vadd.f32 %v10945_v1, %v10944_v0  ;;  %v10947_v42 = vpop.f32.mrb[98].mxu1 }
 0x9fe   : > { %v10916_v3 = vpop.f32.mrb[92].mxu0  ;;  %v10948_v5 = vpop.f32.mrb[99].mxu1 }
 0x9ff   : > { %v10917_v40 = vpop.f32.mrb[93].mxu0  ;;  %v10949_v46 = vadd.f32 %v10948_v5, %v10947_v42 }
 0xa00   : > { %v10918_v8 = vadd.f32 %v10917_v40, %v10916_v3  ;;  %v10919_v56 = vpop.f32.mrb[94].mxu0 }
 0xa01   : > { %v10920_v47 = vpop.f32.mrb[95].mxu0 }
 0xa02   : > { %v7049_v60 = vadd.f32 %v10918_v8, %v9989_v30  ;;  %v10921_v4 = vadd.f32 %v10920_v47, %v10919_v56  ;;  %v7257_v56 = vld [vmem:[#allocation2] sm:$0x8] }
 0xa03   : > { %v10950_v15 = vpop.f32.mrb[100].mxu1 }
 0xa04   : > { %v7052_v35 = vadd.f32 %v10921_v4, %v9989_v30  ;;  %v10951_v57 = vpop.f32.mrb[101].mxu1  ;;  %v7097_v32 = vadd.f32 %v10946_v2, %v7049_v60 }
 0xa05   : > { %v10952_v24 = vadd.f32 %v10951_v57, %v10950_v15  ;;  %v10953_v27 = vpop.f32.mrb[102].mxu1  ;;  %v7261_v57 = vunpack.c.l.bf16 %v7257_v56 }
 0xa06   : > { %v10922_v43 = vpop.f32.mrb[96].mxu0  ;;  %v10954_v19 = vpop.f32.mrb[103].mxu1  ;;  %v7100_v20 = vadd.f32 %v10949_v46, %v7052_v35  ;;  %v7258_v27 = vld [vmem:[#allocation2 + $0x4] sm:$0xff]  }
 0xa07   : > { %v10923_v22 = vpop.f32.mrb[97].mxu0 }
 0xa08   : > { %v10924_v26 = vadd.f32 %v10923_v22, %v10922_v43  ;;  %v10925_v28 = vpop.f32.mrb[98].mxu0 }
 0xa09   : > { %v10926_v44 = vpop.f32.mrb[99].mxu0  ;;  %v7263_v28 = vunpack.c.h.bf16 %v7258_v27 }
 0xa0a   : > { %v7057_v31 = vadd.f32 %v10924_v26, %v9989_v30  ;;  %v7260_v30 = vld [vmem:[#allocation2 + $0xc] sm:$0x7]  ;;  %v7262_v26 = vunpack.c.l.bf16 %v7258_v27 }
 0xa0b   : > { %v7264_v15 = vunpack.c.l.bf16 %v7260_v30  ;;  %v12071_v30 = vld [vmem:[#allocation9 + $0x180] sm:$0xff]  }
 0xa0c   : > { %v7105_v33 = vadd.f32 %v10952_v24, %v7057_v31 }
 0xa1b   : > { %v11000_v36 = vpop.f32.mrb[104].mxu1 }
 0xa1c   : > { %v11001_v37 = vpop.f32.mrb[105].mxu1 }
 0xa1d   : > { %v11002_v34 = vadd.f32 %v11001_v37, %v11000_v36  ;;  %v11003_v38 = vpop.f32.mrb[106].mxu1 }
 0xa1e   : > { %v10972_v12 = vpop.f32.mrb[100].mxu0  ;;  %v11004_v21 = vpop.f32.mrb[107].mxu1 }
 0xa1f   : > { %v10973_v48 = vpop.f32.mrb[101].mxu0  ;;  %v11005_v49 = vadd.f32 %v11004_v21, %v11003_v38  ;;  %v7305_v38 = vld [vmem:[#allocation2 + $0xc] sm:$0x7] }
 0xa20   : > { %v10974_v14 = vadd.f32 %v10973_v48, %v10972_v12  ;;  %v10975_v7 = vpop.f32.mrb[102].mxu0 }
 0xa21   : > { %v10976_v41 = vpop.f32.mrb[103].mxu0 }
 0xa22   : > { %v7145_v50 = vadd.f32 %v10974_v14, %v7097_v32  ;;  %v10977_v9 = vadd.f32 %v10976_v41, %v10975_v7 }
 0xa23   : > { %v11006_v51 = vpop.f32.mrb[108].mxu1 }
 0xa24   : > { %v7148_v16 = vadd.f32 %v10977_v9, %v7100_v20  ;;  %v11007_v29 = vpop.f32.mrb[109].mxu1  ;;  %v7193_v17 = vadd.f32 %v11002_v34, %v7145_v50  ;;  %v7319_v9 = vld [vmem:[#allocation2 + $0x10] sm:$0x3] }
 0xa25   : > { %v11008_v52 = vadd.f32 %v11007_v29, %v11006_v51  ;;  %v11009_v18 = vpop.f32.mrb[110].mxu1 }
 0xa26   : > { %v10978_v53 = vpop.f32.mrb[104].mxu0  ;;  %v11010_v54 = vpop.f32.mrb[111].mxu1  ;;  %v7196_v55 = vadd.f32 %v11005_v49, %v7148_v16 }
 0xa27   : > { %v10979_v58 = vpop.f32.mrb[105].mxu0 }
 0xa28   : > { %v10980_v61 = vadd.f32 %v10979_v58, %v10978_v53  ;;  %v10981_v63 = vpop.f32.mrb[106].mxu0 }
 0xa29   : > { %v10982_v0 = vpop.f32.mrb[107].mxu0 }
 0xa2a   : > { %v7153_v1 = vadd.f32 %v10980_v61, %v7105_v33 }
 0xa2c   : > { %v7201_v2 = vadd.f32 %v11008_v52, %v7153_v1 }
 0xa3e   : > { %v11410_v42 = vpop.f32.mrb[108].mxu0 }
 0xa3f   : > { %v7249_v3 = vadd.f32 %v11410_v42, %v7201_v2  ;;  %v7240_v5 = vpop.f32.mrb[109].mxu0 }
 0xa40   : > { %v7241_v40 = vadd.f32 %v7240_v5, %v7193_v17  ;;  %v11411_v46 = vpop.f32.mrb[110].mxu0 }
 0xa41   : > { %v7256_v8 = vmax.f32 %v7249_v3, 0.0  ;;  %v7243_v47 = vpop.f32.mrb[111].mxu0 }
 0xa42   : > { %v7254_v60 = vmax.f32 %v7241_v40, 0.0  ;;  %v7244_v4 = vadd.f32 %v7243_v47, %v7196_v55 }
 0xa43   : > { %v7271_v35 = vrot.slane %v7256_v8, 1 }
 0xa44   : > { %v7268_v32 = vrot.slane %v7254_v60, 1  ;;  %v7255_v24 = vmax.f32 %v7244_v4, 0.0  ;;  %v12074_v4 = vld [vmem:[#allocation9 + $0x1c8] sm:$0xff]  }
 0xa45   : > { %v7280_v43 = vadd.f32 %v7271_v35, %v7264_v15 }
 0xa46   : > { %v7277_v19 = vadd.f32 %v7268_v32, %v7261_v57  ;;  %v7269_v20 = vrot.slane %v7255_v24, 1 }
 0xa47   : > { %v7284_v22 = vmul.f32 %v7280_v43, %v13412_v10 }
 0xa48   : > { %v7281_v44 = vmul.f32 %v7277_v19, %v13415_v13  ;;  %v7270_v31 = vsel %vm1012_vm5, %v7268_v32, %v7269_v20  ;;  %v7272_v33 = vsel %vm1012_vm5, %v7269_v20, %v7271_v35  ;;  %v12076_v20 = vld [vmem:[#allocation9 + $0x188] sm:$0xff]  }
 0xa49   : > { %v10268_v36 = vpack.c.bf16 %v7284_v22, %v7284_v22  ;;  %v7278_v37 = vadd.f32 %v7270_v31, %v7262_v26  ;;  %v7279_v34 = vadd.f32 %v7272_v33, %v7263_v28  ;;  %v12075_v22 = vld [vmem:[#allocation9 + $0x100] sm:$0xff]   ;;  %v12077_v33 = vld [vmem:[#allocation9 + $0x148] sm:$0xff]  }
 0xa4a   : > { %v10265_v12 = vpack.c.bf16 %v7281_v44, %v7281_v44 }
 0xa4b   : > { %v7306_v21 = vsel %vm12814_vm3, %v10268_v36, %v7305_v38  ;;  %v7282_v48 = vmul.f32 %v7278_v37, %v13424_v39  ;;  %v7283_v49 = vmul.f32 %v7279_v34, %v13428_v25  ;;  %v12078_v36 = vld [vmem:[#allocation9 + $0x1d0] sm:$0xff]  }
 0xa4c   : > { %7307 = vst [vmem:[#allocation2 + $0xc] sm:$0x7] %v7306_v21  ;;  %v7301_v14 = vsel %vm12809_vm15, %v10265_v12, %v7257_v56  ;;  %v12080_v38 = vld [vmem:[#allocation9 + $0x190] sm:$0xff]   ;;  %v12079_v12 = vld [vmem:[#allocation9 + $0x108] sm:$0xff]  }
 0xa4d   : > { %7302 = vst [vmem:[#allocation2] sm:$0x8] %v7301_v14  ;;  %v10266_v7 = vpack.c.bf16 %v7282_v48, %v7282_v48  ;;  %v10267_v41 = vpack.c.bf16 %v7283_v49, %v7283_v49  ;;  %v12084_v48 = vld [vmem:[#allocation9 + $0x1d8] sm:$0xff]   ;;  %v12083_v49 = vld [vmem:[#allocation9 + $0x150] sm:$0xff]  }
 0xa4f   : > { %7304 = vst [vmem:[#allocation2 + $0x8] sm:$0xf] %v10267_v41  ;;  %7303 = vst [vmem:[#allocation2 + $0x4] sm:$0xf] %v10266_v7  ;;  %v12087_v7 = vld [vmem:[#allocation9 + $0x198] sm:$0xff]   ;;  %v12086_v41 = vld [vmem:[#allocation9 + $0x110] sm:$0xff]  }
 0xa53   : > { %v13839_v50 = vld [vmem:[#allocation2 + $0xc] sm:$0xf] }
 0xa54   : > { %v7313_v51 = vld [vmem:[#allocation2] sm:$0x8]  ;;  %v7314_v16 = vld [vmem:[#allocation2 + $0xc] sm:$0x3]  ;;  %v13846_v53 = vcombine.low %v13839_v50, %v7319_v9 }
 0xa55   : > { %v7312_v29 = vld [vmem:[#allocation2] sm:$0xe] }
 0xa56   : > { %v13841_v17 = vld [vmem:[#allocation2 + $0x4] sm:$0xf]  ;;  %v13843_v52 = vld [vmem:[#allocation2 + $0x8] sm:$0xf]  ;;  %v7308_v63 = vld [vmem:[#allocation2] sm:$0xf] }
 0xa57   : > { %v7316_v18 = vld [vmem:[#allocation2 + $0x4] sm:$0xc]  ;;  %v13849_v54 = vcombine.low %v7313_v51, %v13841_v17  ;;  %v10071_v55 = vcombine.low %v13843_v52, %v7314_v16  ;;  %v10068_v58 = vcombine.low %v13843_v52, %v13843_v52  ;;  %v10069_v61 = vcombine.low %v7312_v29, %v13841_v17  ;;  %v12085_v9 = vld [vmem:[#allocation2 + $0x8] ss:$0 sps:$4 sm:$0x77]  }
 0xa58   : > { %v10066_v0 = vcombine.low %v7308_v63, %v13841_v17  ;;  %v13857_v1 = vcombine.low %v7316_v18, %v13843_v52  ;;  %v7421_v8 = vshrl.u32 %v13846_v53, 16  ;;  %v7424_v56 = vshll.u32 %v13846_v53, 16  ;;  %v12089_v51 = vld [vmem:[#allocation9 + $0x158] sm:$0xff]   ;;  %v12090_v16 = vld [vmem:[#allocation9 + $0x1e0] sm:$0xff]   ;;  %v12096_v63 = vld [vmem:[#allocation9 + $0x1a8] sm:$0xff]  }
 0xa59   : > { %v7365_v2 = vrot.slane %v13849_v54, 3  ;;  %v7366_v42 = vrot.slane %v10071_v55, 3  ;;  %v7354_v3 = vrot.slane %v10069_v61, 1  ;;  %v7355_v5 = vrot.slane %v10068_v58, 1  ;;  %v12092_v18 = vld [vmem:[#allocation9 + $0x1a0] sm:$0xff]   ;;  %v12091_v55 = vld [vmem:[#allocation9 + $0x118] sm:$0xff]  }
 0xa5a   : > { %v7337_v40 = vshll.u32 %v10066_v0, 16  ;;  %v7342_v46 = vshll.u32 %v10068_v58, 16  ;;  %v7413_v15 = vshrl.u32 %v13857_v1, 16  ;;  %v7416_v35 = vshll.u32 %v13857_v1, 16  ;;  %v12093_v61 = vld [vmem:[#allocation9 + $0x160] sm:$0xff]  }
 0xa5b   : > { %v7367_v47 = vsel %vm900_vm7, %v7365_v2, %v7366_v42  ;;  %v7356_v60 = vsel %vm1012_vm5, %v7354_v3, %v7355_v5  ;;  %v7335_v57 = vshrl.u32 %v10066_v0, 16  ;;  %v7346_v26 = vshrl.u32 %v10068_v58, 16  ;;  %v12094_v58 = vld [vmem:[#allocation9 + $0x1e8] sm:$0xff]   ;;  %v12098_v2 = vld [vmem:[#allocation9 + $0x1f0] sm:$0xff]   ;;  %v7315_v3 = vld [vmem:[#allocation2 + $0xc] sm:$0x7] }
 0xa5c   : > { %8102 = vmatprep.mubr.bf16.mxu0 %v7367_v47  ;;  %v7339_v32 = vrot.slane %v7337_v40, 1  ;;  %v7344_v24 = vrot.slane %v7342_v46, 1  ;;  %v7415_v27 = vrot.slane %v7413_v15, 2  ;;  %v7418_v43 = vrot.slane %v7416_v35, 3  ;;  %v12102_v40 = vld [vmem:[#allocation9 + $0x1f8] sm:$0xff]  }
 0xa5d   : > { %8103 = vmatmul.mubr.bf16.vlgmr.msra.gmra.mrb[112].mxu0 %v7356_v60  ;;  %v7423_v28 = vrot.slane %v7421_v8, 2  ;;  %v7426_v44 = vrot.slane %v7424_v56, 3  ;;  %v10073_v29 = vcombine.low %v13841_v17, %v13843_v52  ;;  %v10072_v17 = vcombine.low %v13843_v52, %v7315_v3  ;;  %v7318_v46 = vld [vmem:[#allocation2 + $0x10] sm:$0x1]  ;;  %v12101_v8 = vld [vmem:[#allocation9 + $0x170] sm:$0xff]   ;;  %v12104_v15 = vld [vmem:[#allocation9 + $0x1b8] sm:$0xff]  }
 0xa5e   : > { %11107 = vmatpush3.bf16.msra.mxu0 %v12071_v30  ;;  %8110 = vmatprep.mubr.bf16.mxu0 %v7366_v42  ;;  %v7340_v19 = vor.u32 %v7339_v32, %v7335_v57  ;;  %v7348_v37 = vor.u32 %v7346_v26, %v7344_v24  ;;  %v7419_v34 = vor.u32 %v7418_v43, %v7415_v27  ;;  %v12097_v42 = vld [vmem:[#allocation9 + $0x168] sm:$0xff]   ;;  %v7374_v56 = vshrl.u32 %v13849_v54, 16  ;;  %v12103_v57 = vld [vmem:[#allocation9 + $0x130] sm:$0xff]   ;;  %v12105_v32 = vld [vmem:[#allocation9 + $0x178] sm:$0xff]  }
 0xa5f   : > { %11108 = vmatprep.subr.bf16.mxu0 %v12074_v4  ;;  %v13867_v21 = vor.u32 %v7426_v44, %v7423_v28  ;;  %v12099_v30 = vld [vmem:[#allocation9 + $0x128] sm:$0xff]   ;;  %v7377_v47 = vshll.u32 %v13849_v54, 16  ;;  %v7382_v60 = vshrl.u32 %v10072_v17, 16  ;;  %v7385_v4 = vshll.u32 %v10072_v17, 16  ;;  %v12107_v54 = vld [vmem:[#allocation9 + $0x138] sm:$0xff]   ;;  %v12109_v28 = vld [vmem:[#allocation9 + $0x200] sm:$0xff]  }
 0xa60   : > { %v7345_v31 = vsel %vm991_vm0, %v7340_v19, %v7344_v24  ;;  %v10076_v35 = vcombine.low %v13839_v50, %v7318_v46  ;;  %v7404_v24 = vrot.slane %v13857_v1, 2  ;;  %v7376_v27 = vrot.slane %v7374_v56, 3  ;;  %v12111_v1 = vld [vmem:[#allocation9 + $0x208] sm:$0xff]   ;;  %v12134_v17 = vld [vmem:[#allocation11 + $0x18] sm:$0xff]  }
 0xa61   : > { %8054 = vmatprep.mubr.bf16.mxu1 %v7345_v31  ;;  %v7428_v14 = vsel %vm1074_vm8, %v7419_v34, %v13867_v21  ;;  %v7379_v43 = vrot.slane %v7377_v47, 4  ;;  %v7384_v19 = vrot.slane %v7382_v60, 3  ;;  %v7320_v31 = vld [vmem:[#allocation2 + $0x4] sm:$0x8]  ;;  %v12112_v34 = vld [vmem:[#allocation9 + $0x210] sm:$0xff]   ;;  %v12139_v46 = vld [vmem:[#allocation11 + $0xe8] sm:$0xff]  }
 0xa62   : > { %8055 = vmatmul.mubr.bf16.vlgmr.msra.gmra.mrb[112].mxu1 %v10066_v0  ;;  %11109 = vmatpush3.bf16.msra.mxu0 %v12076_v20  ;;  %v12095_v0 = vld [vmem:[#allocation9 + $0x120] sm:$0xff]   ;;  %v7387_v20 = vrot.slane %v7385_v4, 4  ;;  %v12141_v56 = vld [vmem:[#allocation11 + $0x68] sm:$0xff]   ;;  %v12143_v60 = vld [vmem:[#allocation11 + $0xf0] sm:$0xff]  }
 0xa63   : > { %11079 = vmatpush3.bf16.msra.mxu1 %v12075_v22  ;;  %8062 = vmatprep.mubr.bf16.mxu1 %v7348_v37  ;;  %v7405_v22 = vrot.slane %v10076_v35, 2  ;;  %v7380_v50 = vor.u32 %v7379_v43, %v7376_v27  ;;  %v10078_v37 = vcombine.low %v7320_v31, %v13843_v52  ;;  %v12116_v52 = vld [vmem:[#allocation9 + $0x228] sm:$0xff]   ;;  %v12144_v35 = vld [vmem:[#allocation11 + $0xb0] sm:$0xff]   ;;  %v12148_v27 = vld [vmem:[#allocation11 + $0xb8] sm:$0xff]  }
 0xa64   : > { %11080 = vmatprep.subr.bf16.mxu1 %v12077_v33  ;;  %11110 = vmatprep.subr.bf16.mxu0 %v12078_v36  ;;  %v7388_v44 = vor.u32 %v7387_v20, %v7384_v19  ;;  %v10074_v36 = vcombine.low %v7315_v3, %v7315_v3  ;;  %v12133_v3 = vld [vmem:[#allocation11 + $0x58] sm:$0xff]   ;;  %v12140_v47 = vld [vmem:[#allocation11 + $0xa8] sm:$0xff]   ;;  %v12153_v43 = vld [vmem:[#allocation11 + $0x1c0] sm:$0xff]  }
 0xa65   : > { %8111 = vmatmul.mubr.bf16.gmra.mrb[116].mxu0 %v7355_v5  ;;  %v12100_v5 = vld [vmem:[#allocation9 + $0x1b0] sm:$0xff]   ;;  %v7406_v26 = vsel %vm902_vm11, %v7404_v24, %v7405_v22  ;;  %v12142_v4 = vld [vmem:[#allocation11 + $0x28] sm:$0xff]   ;;  %v12149_v24 = vld [vmem:[#allocation11 + $0x78] sm:$0xff]  }
 0xa66   : > { %11111 = vmatpush3.bf16.msra.mxu0 %v12080_v38  ;;  %8198 = vmatprep.mubr.bf16.mxu0 %v7428_v14  ;;  %v7389_v33 = vsel %vm1033_vm12, %v7380_v50, %v7388_v44  ;;  %v7434_v38 = vrot.slane %v10078_v37, 3  ;;  %v12117_v14 = vld [vmem:[#allocation9 + $0x230] sm:$0xff]   ;;  %v12150_v19 = vld [vmem:[#allocation11 + $0x38] sm:$0xff]   ;;  %v12158_v20 = vld [vmem:[#allocation11 + $0x140] sm:$0xff]  }
 0xa67   : > { %11081 = vmatpush3.bf16.msra.mxu1 %v12079_v12  ;;  %11112 = vmatprep.subr.bf16.mxu0 %v12084_v48  ;;  %v7435_v12 = vrot.slane %v13846_v53, 3  ;;  %v12119_v53 = vld [vmem:[#allocation11 + $0xc0] sm:$0xff]  }
 0xa68   : > { %11082 = vmatprep.subr.bf16.mxu1 %v12083_v49  ;;  %v12115_v49 = vld [vmem:[#allocation9 + $0x220] sm:$0xff]  }
 0xa69   : > { %v7436_v48 = vsel %vm900_vm7, %v7434_v38, %v7435_v12 }
 0xa6a   : > { %8063 = vmatmul.mubr.bf16.gmra.mrb[116].mxu1 %v12085_v9  ;;  %11113 = vmatpush3.bf16.msra.mxu0 %v12087_v7  ;;  %v12118_v7 = vld [vmem:[#allocation9 + $0x238] sm:$0xff]   ;;  %v12121_v9 = vld [vmem:[#allocation11 + $0x40] sm:$0xff]  }
 0xa6b   : > { %11083 = vmatpush3.bf16.msra.mxu1 %v12086_v41  ;;  %8150 = vmatprep.mubr.bf16.mxu1 %v10073_v29  ;;  %v12120_v41 = vld [vmem:[#allocation11 + $0x80] sm:$0xff]   ;;  %v12124_v29 = vld [vmem:[#allocation11 + $0x88] sm:$0xff]  }
 0xa6c   : > { %11084 = vmatprep.subr.bf16.mxu1 %v12089_v51  ;;  %11114 = vmatprep.subr.bf16.mxu0 %v12090_v16  ;;  %v12122_v51 = vld [vmem:[#allocation11] sm:$0xff]   ;;  %v12123_v16 = vld [vmem:[#allocation11 + $0xc8] sm:$0xff]  }
 0xa6e   : > { %11115 = vmatpush3.bf16.msra.mxu0 %v12092_v18  ;;  %v12125_v18 = vld [vmem:[#allocation11 + $0x48] sm:$0xff]  }
 0xa6f   : > { %11085 = vmatpush3.bf16.msra.mxu1 %v12091_v55  ;;  %11116 = vmatprep.subr.bf16.mxu0 %v12094_v58  ;;  %v12126_v55 = vld [vmem:[#allocation11 + $0x8] sm:$0xff]   ;;  %v12127_v58 = vld [vmem:[#allocation11 + $0xd0] sm:$0xff]  }
 0xa70   : > { %11086 = vmatprep.subr.bf16.mxu1 %v12093_v61  ;;  %v12128_v61 = vld [vmem:[#allocation11 + $0x90] sm:$0xff]  }
 0xa72   : > { %11117 = vmatpush3.bf16.msra.mxu0 %v12096_v63  ;;  %v12129_v63 = vld [vmem:[#allocation11 + $0x50] sm:$0xff]  }
 0xa73   : > { %11087 = vmatpush3.bf16.msra.mxu1 %v12095_v0  ;;  %11118 = vmatprep.subr.bf16.mxu0 %v12098_v2  ;;  %v12130_v0 = vld [vmem:[#allocation11 + $0x10] sm:$0xff]   ;;  %v12131_v2 = vld [vmem:[#allocation11 + $0xd8] sm:$0xff]  }
 0xa74   : > { %11088 = vmatprep.subr.bf16.mxu1 %v12097_v42  ;;  %v12132_v42 = vld [vmem:[#allocation11 + $0x98] sm:$0xff]  }
 0xa76   : > { %11119 = vmatpush3.bf16.msra.mxu0 %v12100_v5  ;;  %v12135_v5 = vld [vmem:[#allocation11 + $0xe0] sm:$0xff]  }
 0xa77   : > { %11089 = vmatpush3.bf16.msra.mxu1 %v12099_v30  ;;  %11120 = vmatprep.subr.bf16.mxu0 %v12102_v40  ;;  %v12137_v30 = vld [vmem:[#allocation11 + $0x60] sm:$0xff]  }
 0xa78   : > { %11090 = vmatprep.subr.bf16.mxu1 %v12101_v8  ;;  %v12136_v40 = vld [vmem:[#allocation11 + $0xa0] sm:$0xff]  }
 0xa79   : > { %v12138_v8 = vld [vmem:[#allocation11 + $0x20] sm:$0xff]  }
 0xa7a   : > { %11121 = vmatpush3.bf16.msra.mxu0 %v12104_v15  ;;  %v12145_v15 = vld [vmem:[#allocation11 + $0x70] sm:$0xff]  }
 0xa7b   : > { %11091 = vmatpush3.bf16.msra.mxu1 %v12103_v57  ;;  %11144 = vmatprep.subr.bf16.mxu0 %v12121_v9  ;;  %v12147_v57 = vld [vmem:[#allocation11 + $0xf8] sm:$0xff]  }
 0xa7c   : > { %11092 = vmatprep.subr.bf16.mxu1 %v12105_v32  ;;  %v12146_v32 = vld [vmem:[#allocation11 + $0x30] sm:$0xff]  }
 0xa7d   : > { %8199 = vmatmul.mubr.bf16.vlgmr.msra.gmra.mrb[120].mxu0 %v7406_v26 }
 0xa7e   : > { %8206 = vmatprep.mubr.bf16.mxu0 %v13867_v21  ;;  %v12114_v21 = vld [vmem:[#allocation9 + $0x218] sm:$0xff]   ;;  %11145 = vmatpush3.bf16.msra.mxu0 %v12122_v51 }
 0xa7f   : > { %11093 = vmatpush3.bf16.msra.mxu1 %v12107_v54  ;;  %11146 = vmatprep.subr.bf16.mxu0 %v12125_v18 }
 0xa80   : > { %11412 = vmatprep.subr.bf16.mxu1 %v12109_v28 }
 0xa82   : > { %8151 = vmatmul.mubr.bf16.vlgmr.msra.gmra.mrb[120].mxu1 %v7389_v33  ;;  %11147 = vmatpush3.bf16.msra.mxu0 %v12126_v55 }
 0xa83   : > { %8158 = vmatprep.mubr.bf16.mxu1 %v10074_v36  ;;  %11413 = vmatpush3.bf16.msra.mxu1 %v12109_v28 }
 0xa84   : > { %11414 = vmatprep.subr.bf16.mxu1 %v12111_v1  ;;  %11148 = vmatprep.subr.bf16.mxu0 %v12129_v63 }
 0xa85   : > { %8207 = vmatmul.mubr.bf16.gmra.mrb[124].mxu0 %v7405_v22 }
 0xa86   : > { %11149 = vmatpush3.bf16.msra.mxu0 %v12130_v0 }
 0xa87   : > { %11415 = vmatpush3.bf16.msra.mxu1 %v12111_v1  ;;  %11150 = vmatprep.subr.bf16.mxu0 %v12133_v3  ;;  %v10079_v1 = vld [vmem:[%s14040_s8] ss:$0 sm:$0xff] }
 0xa88   : > { %11416 = vmatprep.subr.bf16.mxu1 %v12112_v34 }
 0xa8a   : > { %8159 = vmatmul.mubr.bf16.gmra.mrb[124].mxu1 %v7388_v44  ;;  %11151 = vmatpush3.bf16.msra.mxu0 %v12134_v17 }
 0xa8b   : > { %11417 = vmatpush3.bf16.msra.mxu1 %v12112_v34  ;;  %11428 = vmatprep.mubr.bf16.mxu1 %v7436_v48 }
 0xa8c   : > { %11418 = vmatprep.subr.bf16.mxu1 %v12114_v21  ;;  %11152 = vmatprep.subr.bf16.mxu0 %v12137_v30 }
 0xa8e   : > { %11153 = vmatpush3.bf16.msra.mxu0 %v12138_v8 }
 0xa8f   : > { %11419 = vmatpush3.bf16.msra.mxu1 %v12114_v21  ;;  %11154 = vmatprep.subr.bf16.mxu0 %v12141_v56 }
 0xa90   : > { %11420 = vmatprep.subr.bf16.mxu1 %v12115_v49 }
 0xa92   : > { %11155 = vmatpush3.bf16.msra.mxu0 %v12142_v4 }
 0xa93   : > { %11421 = vmatpush3.bf16.msra.mxu1 %v12115_v49  ;;  %11156 = vmatprep.subr.bf16.mxu0 %v12145_v15 }
 0xa94   : > { %11422 = vmatprep.subr.bf16.mxu1 %v12116_v52 }
 0xa96   : > { %11157 = vmatpush3.bf16.msra.mxu0 %v12146_v32 }
 0xa97   : > { %11423 = vmatpush3.bf16.msra.mxu1 %v12116_v52  ;;  %11158 = vmatprep.subr.bf16.mxu0 %v12149_v24 }
 0xa98   : > { %11424 = vmatprep.subr.bf16.mxu1 %v12117_v14 }
 0xa9a   : > { %11159 = vmatpush3.bf16.msra.mxu0 %v12150_v19 }
 0xa9b   : > { %11425 = vmatpush3.bf16.msra.mxu1 %v12117_v14  ;;  %11200 = vmatprep.subr.bf16.mxu0 %v12158_v20 }
 0xa9c   : > { %11426 = vmatprep.subr.bf16.mxu1 %v12118_v7 }
 0xa9f   : > { %11427 = vmatpush3.bf16.msra.mxu1 %v12118_v7 }
 0xaa0   : > { %11172 = vmatprep.subr.bf16.mxu1 %v12119_v53 }
 0xaa2   : > { %11429 = vmatmul.mubr.bf16.vlgmr.msra.gmra.mrb[128].mxu1 %v7435_v12 }
 0xaa3   : > { %11173 = vmatpush3.bf16.msra.mxu1 %v12120_v41 }
 0xaa4   : > { %11174 = vmatprep.subr.bf16.mxu1 %v12123_v16 }
 0xaa7   : > { %11175 = vmatpush3.bf16.msra.mxu1 %v12124_v29 }
 0xaa8   : > { %11176 = vmatprep.subr.bf16.mxu1 %v12127_v58 }
 0xaab   : > { %11177 = vmatpush3.bf16.msra.mxu1 %v12128_v61 }
 0xaac   : > { %11178 = vmatprep.subr.bf16.mxu1 %v12131_v2 }
 0xaaf   : > { %11179 = vmatpush3.bf16.msra.mxu1 %v12132_v42 }
 0xab0   : > { %11180 = vmatprep.subr.bf16.mxu1 %v12135_v5 }
 0xab3   : > { %11181 = vmatpush3.bf16.msra.mxu1 %v12136_v40 }
 0xab4   : > { %11182 = vmatprep.subr.bf16.mxu1 %v12139_v46 }
 0xab7   : > { %11183 = vmatpush3.bf16.msra.mxu1 %v12140_v47 }
 0xab8   : > { %11184 = vmatprep.subr.bf16.mxu1 %v12143_v60 }
 0xabb   : > { %11185 = vmatpush3.bf16.msra.mxu1 %v12144_v35 }
 0xabc   : > { %11186 = vmatprep.subr.bf16.mxu1 %v12147_v57 }
 0xabf   : > { %11187 = vmatpush3.bf16.msra.mxu1 %v12148_v27 }
 0xac0   : > { %11228 = vmatprep.subr.bf16.mxu1 %v12153_v43 }
 0xb30   : > { %v11066_v22 = vpop.f32.mrb[112].mxu0 }
 0xb31   : > { %v11067_v54 = vpop.f32.mrb[113].mxu0 }
 0xb32   : > { %v11068_v26 = vadd.f32 %v11067_v54, %v11066_v22  ;;  %v11069_v28 = vpop.f32.mrb[114].mxu0 }
 0xb33   : > { %v11070_v50 = vpop.f32.mrb[115].mxu0 }
 0xb34   : > { %v11071_v44 = vadd.f32 %v11070_v50, %v11069_v28 }
 0xb35   : > { %v11038_v31 = vpop.f32.mrb[112].mxu1 }
 0xb36   : > { %v11039_v33 = vpop.f32.mrb[113].mxu1 }
 0xb37   : > { %v11040_v36 = vadd.f32 %v11039_v33, %v11038_v31  ;;  %v11041_v37 = vpop.f32.mrb[114].mxu1 }
 0xb38   : > { %v11042_v34 = vpop.f32.mrb[115].mxu1  ;;  %v11072_v38 = vpop.f32.mrb[116].mxu0 }
 0xb39   : > { %v8057_v12 = vadd.f32 %v11040_v36, %v10079_v1  ;;  %v11043_v21 = vadd.f32 %v11042_v34, %v11041_v37  ;;  %v11073_v48 = vpop.f32.mrb[117].mxu0 }
 0xb3a   : > { %v11074_v49 = vadd.f32 %v11073_v48, %v11072_v38  ;;  %v11075_v52 = vpop.f32.mrb[118].mxu0 }
 0xb3b   : > { %v8060_v14 = vadd.f32 %v11043_v21, %v10079_v1  ;;  %v11076_v7 = vpop.f32.mrb[119].mxu0  ;;  %v8105_v53 = vadd.f32 %v11068_v26, %v8057_v12 }
 0xb3d   : > { %v11044_v41 = vpop.f32.mrb[116].mxu1  ;;  %v8108_v9 = vadd.f32 %v11071_v44, %v8060_v14 }
 0xb3e   : > { %v11045_v51 = vpop.f32.mrb[117].mxu1 }
 0xb3f   : > { %v11046_v16 = vadd.f32 %v11045_v51, %v11044_v41  ;;  %v11047_v29 = vpop.f32.mrb[118].mxu1 }
 0xb40   : > { %v11048_v18 = vpop.f32.mrb[119].mxu1 }
 0xb41   : > { %v8065_v55 = vadd.f32 %v11046_v16, %v10079_v1 }
 0xb43   : > { %v8113_v58 = vadd.f32 %v11074_v49, %v8065_v55 }
 0xb50   : > { %v11122_v61 = vpop.f32.mrb[120].mxu0 }
 0xb51   : > { %v11123_v63 = vpop.f32.mrb[121].mxu0 }
 0xb52   : > { %v11124_v0 = vadd.f32 %v11123_v63, %v11122_v61  ;;  %v11125_v2 = vpop.f32.mrb[122].mxu0 }
 0xb53   : > { %v11126_v42 = vpop.f32.mrb[123].mxu0 }
 0xb54   : > { %v11127_v3 = vadd.f32 %v11126_v42, %v11125_v2  ;;  %v8316_v42 = vld [vmem:[#allocation3 + $0xc] sm:$0x7] }
 0xb55   : > { %v11094_v17 = vpop.f32.mrb[120].mxu1 }
 0xb56   : > { %v11095_v5 = vpop.f32.mrb[121].mxu1 }
 0xb57   : > { %v11096_v30 = vadd.f32 %v11095_v5, %v11094_v17  ;;  %v11097_v40 = vpop.f32.mrb[122].mxu1 }
 0xb58   : > { %v11098_v46 = vpop.f32.mrb[123].mxu1  ;;  %v11128_v8 = vpop.f32.mrb[124].mxu0 }
 0xb59   : > { %v8153_v56 = vadd.f32 %v11096_v30, %v8105_v53  ;;  %v11099_v47 = vadd.f32 %v11098_v46, %v11097_v40  ;;  %v11129_v60 = vpop.f32.mrb[125].mxu0 }
 0xb5a   : > { %v11130_v4 = vadd.f32 %v11129_v60, %v11128_v8  ;;  %v11131_v15 = vpop.f32.mrb[126].mxu0 }
 0xb5b   : > { %v8156_v35 = vadd.f32 %v11099_v47, %v8108_v9  ;;  %v11132_v57 = vpop.f32.mrb[127].mxu0  ;;  %v8201_v32 = vadd.f32 %v11124_v0, %v8153_v56 }
 0xb5d   : > { %v11100_v24 = vpop.f32.mrb[124].mxu1  ;;  %v8204_v27 = vadd.f32 %v11127_v3, %v8156_v35  ;;  %v8330_v35 = vld [vmem:[#allocation3 + $0x10] sm:$0x3] }
 0xb5e   : > { %v11101_v43 = vpop.f32.mrb[125].mxu1 }
 0xb5f   : > { %v11102_v19 = vadd.f32 %v11101_v43, %v11100_v24  ;;  %v11103_v20 = vpop.f32.mrb[126].mxu1 }
 0xb60   : > { %v11104_v22 = vpop.f32.mrb[127].mxu1 }
 0xb61   : > { %v8161_v54 = vadd.f32 %v11102_v19, %v8113_v58 }
 0xb63   : > { %v8209_v26 = vadd.f32 %v11130_v4, %v8161_v54 }
 0xb75   : > { %v11430_v28 = vpop.f32.mrb[128].mxu1 }
 0xb76   : > { %v8257_v50 = vadd.f32 %v11430_v28, %v8209_v26  ;;  %v8248_v44 = vpop.f32.mrb[129].mxu1 }
 0xb77   : > { %v8249_v31 = vadd.f32 %v8248_v44, %v8201_v32  ;;  %v11431_v1 = vpop.f32.mrb[130].mxu1  ;;  %v12156_v44 = vld [vmem:[#allocation11 + $0x180] sm:$0xff]  }
 0xb78   : > { %v8264_v33 = vmax.f32 %v8257_v50, 0.0  ;;  %v8251_v36 = vpop.f32.mrb[131].mxu1 }
 0xb79   : > { %v8262_v37 = vmax.f32 %v8249_v31, 0.0  ;;  %v8252_v34 = vadd.f32 %v8251_v36, %v8204_v27 }
 0xb7a   : > { %v8267_v38 = vmul.f32 %v8264_v33, %v13112_v23  ;;  %v8311_v23 = vld [vmem:[#allocation3] sm:$0x8] }
 0xb7b   : > { %v8265_v12 = vmul.f32 %v8262_v37, %v13110_v45  ;;  %v8263_v21 = vmax.f32 %v8252_v34, 0.0 }
 0xb7c   : > { %v10271_v48 = vpack.c.bf16 %v8267_v38, %v8267_v38 }
 0xb7d   : > { %v10269_v49 = vpack.c.bf16 %v8265_v12, %v8265_v12  ;;  %v8266_v52 = vmul.f32 %v8263_v21, %v13116_v59  ;;  %v12160_v21 = vld [vmem:[#allocation11 + $0x1c8] sm:$0xff]  }
 0xb7e   : > { %v8298_v14 = vshll.u32 %v10271_v48, 16  ;;  %v8302_v7 = vshrl.u32 %v10271_v48, 16 }
 0xb7f   : > { %v8279_v53 = vshll.u32 %v10269_v49, 16  ;;  %v8282_v41 = vshrl.u32 %v10269_v49, 16  ;;  %v10270_v9 = vpack.c.bf16 %v8266_v52, %v8266_v52 }
 0xb80   : > { %v8300_v51 = vrot.slane %v8298_v14, 5  ;;  %v8304_v16 = vrot.slane %v8302_v7, 4  ;;  %v12159_v14 = vld [vmem:[#allocation11 + $0x100] sm:$0xff]  }
 0xb81   : > { %v8281_v29 = vrot.slane %v8279_v53, 5  ;;  %v8284_v18 = vrot.slane %v8282_v41, 4  ;;  %v8288_v55 = vshll.u32 %v10270_v9, 16  ;;  %v8292_v58 = vshrl.u32 %v10270_v9, 16  ;;  %v12161_v41 = vld [vmem:[#allocation11 + $0x188] sm:$0xff]  }
 0xb82   : > { %v8305_v61 = vor.u32 %v8304_v16, %v8300_v51  ;;  %v12162_v9 = vld [vmem:[#allocation11 + $0x148] sm:$0xff]  }
 0xb83   : > { %v8285_v63 = vor.u32 %v8284_v18, %v8281_v29  ;;  %v8312_v45 = vsel %vm12809_vm15, %v8281_v29, %v8311_v23  ;;  %v8290_v0 = vrot.slane %v8288_v55, 5  ;;  %v8294_v2 = vrot.slane %v8292_v58, 4  ;;  %v12164_v29 = vld [vmem:[#allocation11 + $0x1d0] sm:$0xff]   ;;  %v12163_v58 = vld [vmem:[#allocation11 + $0x108] sm:$0xff]  }
 0xb84   : > { %v8306_v59 = vrot.slane %v8305_v61, 4  ;;  %8313 = vst [vmem:[#allocation3] sm:$0x8] %v8312_v45  ;;  %v12165_v61 = vld [vmem:[#allocation11 + $0x190] sm:$0xff]   ;;  %v12172_v45 = vld [vmem:[#allocation11 + $0x1d8] sm:$0xff]  }
 0xb85   : > { %v8286_v3 = vrot.slane %v8285_v63, 4  ;;  %v8295_v17 = vor.u32 %v8294_v2, %v8290_v0  ;;  %v12166_v23 = vld [vmem:[#allocation11 + $0x150] sm:$0xff]  }
 0xb86   : > { %v8317_v5 = vsel %vm12814_vm3, %v8306_v59, %v8316_v42  ;;  %v12170_v2 = vld [vmem:[#allocation11 + $0x110] sm:$0xff]  }
 0xb87   : > { %8318 = vst [vmem:[#allocation3 + $0xc] sm:$0x7] %v8317_v5  ;;  %v8291_v30 = vsel %vm12822_vm6, %v8286_v3, %v8290_v0  ;;  %v8296_v40 = vrot.slane %v8295_v17, 4  ;;  %v12173_v3 = vld [vmem:[#allocation11 + $0x198] sm:$0xff]  }
 0xb88   : > { %8314 = vst [vmem:[#allocation3 + $0x4] sm:$0xf] %v8291_v30  ;;  %v12174_v17 = vld [vmem:[#allocation11 + $0x158] sm:$0xff]   ;;  %v12176_v30 = vld [vmem:[#allocation11 + $0x1e0] sm:$0xff]  }
 0xb89   : > { %v8301_v62 = vsel %vm12822_vm6, %v8296_v40, %v8300_v51  ;;  %v12175_v40 = vld [vmem:[#allocation11 + $0x118] sm:$0xff]  }
 0xb8a   : > { %8315 = vst [vmem:[#allocation3 + $0x8] sm:$0xf] %v8301_v62  ;;  %v12177_v62 = vld [vmem:[#allocation11 + $0x1a0] sm:$0xff]  }
 0xb8b   : > { %v8324_v46 = vld [vmem:[#allocation3] sm:$0x8] }
 0xb8c   : > { %v8323_v56 = vld [vmem:[#allocation3] sm:$0xe] }
 0xb8d   : > { %v8319_v47 = vld [vmem:[#allocation3] sm:$0xf] }
 0xb8e   : > { %v13905_v15 = vld [vmem:[#allocation3 + $0xc] sm:$0xf] }
 0xb8f   : > { %v13898_v8 = vld [vmem:[#allocation3 + $0x4] sm:$0xf]  ;;  %v8325_v11 = vld [vmem:[#allocation3 + $0xc] sm:$0x3]  ;;  %v13917_v22 = vcombine.low %v13905_v15, %v8330_v35 }
 0xb90   : > { %v13901_v60 = vcombine.low %v8324_v46, %v13898_v8  ;;  %v10158_v6 = vcombine.low %v8323_v56, %v13898_v8  ;;  %v10155_v4 = vcombine.low %v8319_v47, %v13898_v8  ;;  %v8327_v27 = vld [vmem:[#allocation3 + $0x4] sm:$0xc]  ;;  %v12178_v46 = vld [vmem:[#allocation11 + $0x160] sm:$0xff]   ;;  %v12180_v56 = vld [vmem:[#allocation11 + $0x1e8] sm:$0xff]  }
 0xb91   : > { %v13907_v57 = vld [vmem:[#allocation3 + $0x8] sm:$0xf]  ;;  %v8432_v49 = vshrl.u32 %v13917_v22, 16  ;;  %v8435_v52 = vshll.u32 %v13917_v22, 16  ;;  %v12179_v47 = vld [vmem:[#allocation11 + $0x120] sm:$0xff]  }
 0xb92   : > { %v10160_v32 = vcombine.low %v13907_v57, %v8325_v11  ;;  %v10157_v24 = vcombine.low %v13907_v57, %v13907_v57  ;;  %v8376_v43 = vrot.slane %v13901_v60, 3  ;;  %v8348_v19 = vshll.u32 %v10155_v4, 16  ;;  %v12169_v42 = vld [vmem:[#allocation3 + $0x8] ss:$0 sps:$4 sm:$0x77]  }
 0xb93   : > { %v13914_v20 = vcombine.low %v8327_v27, %v13907_v57  ;;  %v8365_v26 = vrot.slane %v10158_v6, 1  ;;  %v8346_v31 = vshrl.u32 %v10155_v4, 16  ;;  %v8434_v18 = vrot.slane %v8432_v49, 2  ;;  %v12181_v6 = vld [vmem:[#allocation11 + $0x1a8] sm:$0xff]   ;;  %v8326_v35 = vld [vmem:[#allocation3 + $0xc] sm:$0x7] }
 0xb94   : > { %v8377_v54 = vrot.slane %v10160_v32, 3  ;;  %v8366_v28 = vrot.slane %v10157_v24, 1  ;;  %v8353_v50 = vshll.u32 %v10157_v24, 16  ;;  %v8350_v1 = vrot.slane %v8348_v19, 1  ;;  %v12183_v32 = vld [vmem:[#allocation11 + $0x128] sm:$0xff]   ;;  %v12186_v27 = vld [vmem:[#allocation11 + $0x170] sm:$0xff]  }
 0xb95   : > { %v8424_v33 = vshrl.u32 %v13914_v20, 16  ;;  %v8427_v36 = vshll.u32 %v13914_v20, 16  ;;  %v8357_v12 = vshrl.u32 %v10157_v24, 16  ;;  %v8437_v55 = vrot.slane %v8435_v52, 3  ;;  %v12185_v24 = vld [vmem:[#allocation11 + $0x1b0] sm:$0xff]   ;;  %v12194_v49 = vld [vmem:[#allocation11 + $0x200] sm:$0xff]  }
 0xb96   : > { %v8378_v37 = vsel %vm900_vm7, %v8376_v43, %v8377_v54  ;;  %v8367_v34 = vsel %vm1012_vm5, %v8365_v26, %v8366_v28  ;;  %v8355_v38 = vrot.slane %v8353_v50, 1  ;;  %v8351_v48 = vor.u32 %v8350_v1, %v8346_v31  ;;  %v12188_v43 = vld [vmem:[#allocation11 + $0x1f8] sm:$0xff]  }
 0xb97   : > { %9113 = vmatprep.mubr.bf16.mxu1 %v8378_v37  ;;  %v8426_v51 = vrot.slane %v8424_v33, 2  ;;  %v8429_v16 = vrot.slane %v8427_v36, 3  ;;  %v13926_v0 = vor.u32 %v8437_v55, %v8434_v18  ;;  %v10162_v5 = vcombine.low %v13898_v8, %v13907_v57  ;;  %v12184_v8 = vld [vmem:[#allocation11 + $0x1f0] sm:$0xff]   ;;  %v8329_v19 = vld [vmem:[#allocation3 + $0x10] sm:$0x1]  ;;  %v12200_v55 = vld [vmem:[#allocation11 + $0x220] sm:$0xff]  }
 0xb98   : > { %9114 = vmatmul.mubr.bf16.vlgmr.msra.gmra.mrb[132].mxu1 %v8367_v34  ;;  %v8359_v7 = vor.u32 %v8357_v12, %v8355_v38  ;;  %v8356_v53 = vsel %vm991_vm0, %v8351_v48, %v8355_v38  ;;  %v10161_v11 = vcombine.low %v13907_v57, %v8326_v35  ;;  %v8385_v50 = vshrl.u32 %v13901_v60, 16  ;;  %v12189_v31 = vld [vmem:[#allocation11 + $0x1b8] sm:$0xff]  }
 0xb99   : > { %11229 = vmatpush3.bf16.msra.mxu1 %v12156_v44  ;;  %9121 = vmatprep.mubr.bf16.mxu1 %v8377_v54  ;;  %v8430_v63 = vor.u32 %v8429_v16, %v8426_v51  ;;  %v8388_v44 = vshll.u32 %v13901_v60, 16  ;;  %v12190_v1 = vld [vmem:[#allocation11 + $0x178] sm:$0xff]   ;;  %v10165_v33 = vcombine.low %v13905_v15, %v8329_v19  ;;  %v8415_v34 = vrot.slane %v13914_v20, 2  ;;  %v12196_v15 = vld [vmem:[#allocation11 + $0x208] sm:$0xff]  }
 0xb9a   : > { %9065 = vmatprep.mubr.bf16.mxu0 %v8356_v53  ;;  %11230 = vmatprep.subr.bf16.mxu1 %v12160_v21  ;;  %v8393_v54 = vshrl.u32 %v10161_v11, 16  ;;  %v8396_v26 = vshll.u32 %v10161_v11, 16  ;;  %v12191_v38 = vld [vmem:[#allocation11 + $0x138] sm:$0xff]   ;;  %v8387_v12 = vrot.slane %v8385_v50, 3  ;;  %v8331_v53 = vld [vmem:[#allocation3 + $0x4] sm:$0x8] }
 0xb9b   : > { %9066 = vmatmul.mubr.bf16.vlgmr.msra.gmra.mrb[128].mxu0 %v10155_v4  ;;  %v8439_v59 = vsel %vm1074_vm8, %v8430_v63, %v13926_v0  ;;  %v12182_v4 = vld [vmem:[#allocation11 + $0x168] sm:$0xff]   ;;  %v8390_v21 = vrot.slane %v8388_v44, 4  ;;  %v8416_v48 = vrot.slane %v10165_v33, 2  ;;  %v8446_v16 = vrot.slane %v13917_v22, 3 }
 0xb9c   : > { %11201 = vmatpush3.bf16.msra.mxu0 %v12159_v14  ;;  %9073 = vmatprep.mubr.bf16.mxu0 %v8359_v7  ;;  %v8395_v36 = vrot.slane %v8393_v54, 3  ;;  %v8398_v37 = vrot.slane %v8396_v26, 4  ;;  %v10163_v7 = vcombine.low %v8326_v35, %v8326_v35 }
 0xb9d   : > { %11231 = vmatpush3.bf16.msra.mxu1 %v12161_v41  ;;  %11202 = vmatprep.subr.bf16.mxu0 %v12162_v9  ;;  %v8417_v52 = vsel %vm902_vm11, %v8415_v34, %v8416_v48  ;;  %v8391_v14 = vor.u32 %v8390_v21, %v8387_v12  ;;  %v10167_v41 = vcombine.low %v8331_v53, %v13907_v57  ;;  %v12197_v9 = vld [vmem:[#allocation11 + $0x210] sm:$0xff]   ;;  %v12201_v57 = vld [vmem:[#allocation11 + $0x228] sm:$0xff]  }
 0xb9e   : > { %11232 = vmatprep.subr.bf16.mxu1 %v12164_v29  ;;  %v8399_v60 = vor.u32 %v8398_v37, %v8395_v36  ;;  %v12199_v29 = vld [vmem:[#allocation11 + $0x218] sm:$0xff]  }
 0xb9f   : > { %v8445_v51 = vrot.slane %v10167_v41, 3 }
 0xba0   : > { %11203 = vmatpush3.bf16.msra.mxu0 %v12163_v58  ;;  %9122 = vmatmul.mubr.bf16.gmra.mrb[136].mxu1 %v8366_v28  ;;  %v12187_v28 = vld [vmem:[#allocation11 + $0x130] sm:$0xff]   ;;  %v8400_v20 = vsel %vm1033_vm12, %v8391_v14, %v8399_v60 }
 0xba1   : > { %11233 = vmatpush3.bf16.msra.mxu1 %v12165_v61  ;;  %11204 = vmatprep.subr.bf16.mxu0 %v12166_v23  ;;  %v8447_v18 = vsel %vm900_vm7, %v8445_v51, %v8446_v16  ;;  %v12202_v58 = vld [vmem:[#allocation11 + $0x230] sm:$0xff]   ;;  %v12203_v61 = vld [vmem:[#allocation11 + $0x238] sm:$0xff]  }
 0xba2   : > { %9209 = vmatprep.mubr.bf16.mxu1 %v8439_v59  ;;  %11234 = vmatprep.subr.bf16.mxu1 %v12172_v45  ;;  %v10168_v59 = vld [vmem:[%s14041_s27] ss:$0 sm:$0xff] }
 0xba3   : > { %9074 = vmatmul.mubr.bf16.gmra.mrb[132].mxu0 %v12169_v42 }
 0xba4   : > { %11205 = vmatpush3.bf16.msra.mxu0 %v12170_v2  ;;  %9161 = vmatprep.mubr.bf16.mxu0 %v10162_v5 }
 0xba5   : > { %11235 = vmatpush3.bf16.msra.mxu1 %v12173_v3  ;;  %11206 = vmatprep.subr.bf16.mxu0 %v12174_v17 }
 0xba6   : > { %11236 = vmatprep.subr.bf16.mxu1 %v12176_v30 }
 0xba8   : > { %11207 = vmatpush3.bf16.msra.mxu0 %v12175_v40 }
 0xba9   : > { %11237 = vmatpush3.bf16.msra.mxu1 %v12177_v62  ;;  %11208 = vmatprep.subr.bf16.mxu0 %v12178_v46 }
 0xbaa   : > { %11238 = vmatprep.subr.bf16.mxu1 %v12180_v56 }
 0xbac   : > { %11209 = vmatpush3.bf16.msra.mxu0 %v12179_v47 }
 0xbad   : > { %11239 = vmatpush3.bf16.msra.mxu1 %v12181_v6  ;;  %11210 = vmatprep.subr.bf16.mxu0 %v12182_v4 }
 0xbae   : > { %11240 = vmatprep.subr.bf16.mxu1 %v12184_v8 }
 0xbb0   : > { %11211 = vmatpush3.bf16.msra.mxu0 %v12183_v32 }
 0xbb1   : > { %11241 = vmatpush3.bf16.msra.mxu1 %v12185_v24  ;;  %11212 = vmatprep.subr.bf16.mxu0 %v12186_v27 }
 0xbb2   : > { %11242 = vmatprep.subr.bf16.mxu1 %v12188_v43 }
 0xbb4   : > { %11213 = vmatpush3.bf16.msra.mxu0 %v12187_v28 }
 0xbb5   : > { %11243 = vmatpush3.bf16.msra.mxu1 %v12189_v31  ;;  %11214 = vmatprep.subr.bf16.mxu0 %v12190_v1 }
 0xbb8   : > { %11215 = vmatpush3.bf16.msra.mxu0 %v12191_v38  ;;  %9210 = vmatmul.mubr.bf16.vlgmr.msra.gmra.mrb[140].mxu1 %v8417_v52 }
 0xbb9   : > { %9217 = vmatprep.mubr.bf16.mxu1 %v13926_v0  ;;  %11432 = vmatprep.subr.bf16.mxu0 %v12194_v49 }
 0xbbb   : > { %9162 = vmatmul.mubr.bf16.vlgmr.msra.gmra.mrb[136].mxu0 %v8400_v20 }
 0xbbc   : > { %9169 = vmatprep.mubr.bf16.mxu0 %v10163_v7  ;;  %11433 = vmatpush3.bf16.msra.mxu0 %v12194_v49 }
 0xbbd   : > { %11434 = vmatprep.subr.bf16.mxu0 %v12196_v15 }
 0xbc0   : > { %11435 = vmatpush3.bf16.msra.mxu0 %v12196_v15  ;;  %9218 = vmatmul.mubr.bf16.gmra.mrb[144].mxu1 %v8416_v48 }
 0xbc1   : > { %11436 = vmatprep.subr.bf16.mxu0 %v12197_v9 }
 0xbc3   : > { %9170 = vmatmul.mubr.bf16.gmra.mrb[140].mxu0 %v8399_v60 }
 0xbc4   : > { %11437 = vmatpush3.bf16.msra.mxu0 %v12197_v9  ;;  %11448 = vmatprep.mubr.bf16.mxu0 %v8447_v18 }
 0xbc5   : > { %11438 = vmatprep.subr.bf16.mxu0 %v12199_v29 }
 0xbc8   : > { %11439 = vmatpush3.bf16.msra.mxu0 %v12199_v29 }
 0xbc9   : > { %11440 = vmatprep.subr.bf16.mxu0 %v12200_v55 }
 0xbcc   : > { %11441 = vmatpush3.bf16.msra.mxu0 %v12200_v55 }
 0xbcd   : > { %11442 = vmatprep.subr.bf16.mxu0 %v12201_v57 }
 0xbd0   : > { %11443 = vmatpush3.bf16.msra.mxu0 %v12201_v57 }
 0xbd1   : > { %11444 = vmatprep.subr.bf16.mxu0 %v12202_v58 }
 0xbd4   : > { %11445 = vmatpush3.bf16.msra.mxu0 %v12202_v58 }
 0xbd5   : > { %11446 = vmatprep.subr.bf16.mxu0 %v12203_v61 }
 0xbd8   : > { %11447 = vmatpush3.bf16.msra.mxu0 %v12203_v61 }
 0xbdb   : > { %11449 = vmatmul.mubr.bf16.vlgmr.msra.gmra.mrb[144].mxu0 %v8446_v16 }
 0xc6b   : > { %v11188_v22 = vpop.f32.mrb[132].mxu1 }
 0xc6c   : > { %v11189_v23 = vpop.f32.mrb[133].mxu1 }
 0xc6d   : > { %v11190_v63 = vadd.f32 %v11189_v23, %v11188_v22  ;;  %v11191_v45 = vpop.f32.mrb[134].mxu1  ;;  %v9279_v22 = vld [vmem:[#allocation2 + $0xc] sm:$0x7] }
 0xc6e   : > { %v11160_v0 = vpop.f32.mrb[128].mxu0  ;;  %v11192_v2 = vpop.f32.mrb[135].mxu1 }
 0xc6f   : > { %v11161_v42 = vpop.f32.mrb[129].mxu0  ;;  %v11193_v3 = vadd.f32 %v11192_v2, %v11191_v45 }
 0xc70   : > { %v11162_v17 = vadd.f32 %v11161_v42, %v11160_v0  ;;  %v11163_v5 = vpop.f32.mrb[130].mxu0  ;;  %v9276_v0 = vld [vmem:[#allocation2] sm:$0x8] }
 0xc71   : > { %v11164_v30 = vpop.f32.mrb[131].mxu0 }
 0xc72   : > { %v9068_v40 = vadd.f32 %v11162_v17, %v10168_v59  ;;  %v11165_v62 = vadd.f32 %v11164_v30, %v11163_v5  ;;  %v9280_v5 = vunpack.c.l.bf16 %v9276_v0 }
 0xc73   : > { %v11194_v46 = vpop.f32.mrb[136].mxu1 }
 0xc74   : > { %v9071_v56 = vadd.f32 %v11165_v62, %v10168_v59  ;;  %v11195_v47 = vpop.f32.mrb[137].mxu1  ;;  %v9116_v6 = vadd.f32 %v11190_v63, %v9068_v40  ;;  %v9277_v62 = vld [vmem:[#allocation2 + $0x4] sm:$0xff]  }
 0xc75   : > { %v11196_v4 = vadd.f32 %v11195_v47, %v11194_v46  ;;  %v11197_v35 = vpop.f32.mrb[138].mxu1 }
 0xc76   : > { %v11166_v8 = vpop.f32.mrb[132].mxu0  ;;  %v11198_v11 = vpop.f32.mrb[139].mxu1  ;;  %v9119_v32 = vadd.f32 %v11193_v3, %v9071_v56  ;;  %v9283_v3 = vunpack.c.l.bf16 %v9279_v22 }
 0xc77   : > { %v11167_v24 = vpop.f32.mrb[133].mxu0 }
 0xc78   : > { %v11168_v27 = vadd.f32 %v11167_v24, %v11166_v8  ;;  %v11169_v43 = vpop.f32.mrb[134].mxu0 }
 0xc79   : > { %v11170_v19 = vpop.f32.mrb[135].mxu0 }
 0xc7a   : > { %v9076_v54 = vadd.f32 %v11168_v27, %v10168_v59 }
 0xc7c   : > { %v9124_v26 = vadd.f32 %v11196_v4, %v9076_v54  ;;  %v9282_v4 = vunpack.c.h.bf16 %v9277_v62 }
 0xc8b   : > { %v11244_v28 = vpop.f32.mrb[140].mxu1 }
 0xc8c   : > { %v11245_v50 = vpop.f32.mrb[141].mxu1 }
 0xc8d   : > { %v11246_v44 = vadd.f32 %v11245_v50, %v11244_v28  ;;  %v11247_v31 = vpop.f32.mrb[142].mxu1 }
 0xc8e   : > { %v11216_v1 = vpop.f32.mrb[136].mxu0  ;;  %v11248_v33 = vpop.f32.mrb[143].mxu1 }
 0xc8f   : > { %v11217_v36 = vpop.f32.mrb[137].mxu0  ;;  %v11249_v37 = vadd.f32 %v11248_v33, %v11247_v31 }
 0xc90   : > { %v11218_v34 = vadd.f32 %v11217_v36, %v11216_v1  ;;  %v11219_v38 = vpop.f32.mrb[138].mxu0 }
 0xc91   : > { %v11220_v12 = vpop.f32.mrb[139].mxu0 }
 0xc92   : > { %v9164_v21 = vadd.f32 %v11218_v34, %v9116_v6  ;;  %v11221_v48 = vadd.f32 %v11220_v12, %v11219_v38  ;;  %v9281_v6 = vunpack.c.l.bf16 %v9277_v62 }
 0xc93   : > { %v11250_v49 = vpop.f32.mrb[144].mxu1 }
 0xc94   : > { %v9167_v60 = vadd.f32 %v11221_v48, %v9119_v32  ;;  %v11251_v52 = vpop.f32.mrb[145].mxu1  ;;  %v9212_v14 = vadd.f32 %v11246_v44, %v9164_v21 }
 0xc95   : > { %v11252_v15 = vadd.f32 %v11251_v52, %v11250_v49  ;;  %v11253_v20 = vpop.f32.mrb[146].mxu1 }
 0xc96   : > { %v11222_v7 = vpop.f32.mrb[140].mxu0  ;;  %v11254_v53 = vpop.f32.mrb[147].mxu1  ;;  %v9215_v41 = vadd.f32 %v11249_v37, %v9167_v60 }
 0xc97   : > { %v11223_v9 = vpop.f32.mrb[141].mxu0 }
 0xc98   : > { %v11224_v51 = vadd.f32 %v11223_v9, %v11222_v7  ;;  %v11225_v16 = vpop.f32.mrb[142].mxu0 }
 0xc99   : > { %v11226_v29 = vpop.f32.mrb[143].mxu0 }
 0xc9a   : > { %v9172_v18 = vadd.f32 %v11224_v51, %v9124_v26 }
 0xc9c   : > { %v9220_v55 = vadd.f32 %v11252_v15, %v9172_v18 }
 0xcae   : > { %v11450_v57 = vpop.f32.mrb[144].mxu0 }
 0xcaf   : > { %v9268_v58 = vadd.f32 %v11450_v57, %v9220_v55  ;;  %v9259_v61 = vpop.f32.mrb[145].mxu0 }
 0xcb0   : > { %v9260_v23 = vadd.f32 %v9259_v61, %v9212_v14  ;;  %v11451_v63 = vpop.f32.mrb[146].mxu0 }
 0xcb1   : > { %v9275_v45 = vmax.f32 %v9268_v58, 0.0  ;;  %v9262_v2 = vpop.f32.mrb[147].mxu0 }
 0xcb2   : > { %v9273_v59 = vmax.f32 %v9260_v23, 0.0  ;;  %v9263_v42 = vadd.f32 %v9262_v2, %v9215_v41 }
 0xcb3   : > { %v9290_v17 = vrot.slane %v9275_v45, 1 }
 0xcb4   : > { %v9287_v30 = vrot.slane %v9273_v59, 1  ;;  %v9274_v40 = vmax.f32 %v9263_v42, 0.0 }
 0xcb5   : > { %v9299_v46 = vadd.f32 %v9290_v17, %v9283_v3 }
 0xcb6   : > { %v9296_v56 = vadd.f32 %v9287_v30, %v9280_v5  ;;  %v9288_v47 = vrot.slane %v9274_v40, 1 }
 0xcb7   : > { %v9303_v35 = vmul.f32 %v9299_v46, %v13412_v10 }
 0xcb8   : > { %v9300_v8 = vmul.f32 %v9296_v56, %v13415_v13  ;;  %v9289_v11 = vsel %vm1012_vm5, %v9287_v30, %v9288_v47  ;;  %v9291_v32 = vsel %vm1012_vm5, %v9288_v47, %v9290_v17 }
 0xcb9   : > { %v9297_v24 = vadd.f32 %v9289_v11, %v9281_v6  ;;  %v9298_v27 = vadd.f32 %v9291_v32, %v9282_v4  ;;  %v9318_v54 = vrot.slane %v9303_v35, 5 }
 0xcba   : > { %v9306_v26 = vrot.slane %v9300_v8, 7 }
 0xcbb   : > { %v9301_v43 = vmul.f32 %v9297_v24, %v13424_v39  ;;  %v9302_v19 = vmul.f32 %v9298_v27, %v13428_v25 }
 0xcbd   : > { %v9307_v28 = vrot.slane %v9301_v43, 7  ;;  %v9311_v50 = vrot.slane %v9301_v43, 1  ;;  %v9312_v44 = vrot.slane %v9302_v19, 1  ;;  %v9315_v31 = vrot.slane %v9302_v19, 3 }
 0xcbf   : > { %v9308_v10 = vsel %vm905_vm9, %v9306_v26, %v9307_v28  ;;  %v9313_v13 = vsel %vm1012_vm5, %v9311_v50, %v9312_v44  ;;  %v9321_v1 = vsel %vm862_vm1, %v9315_v31, %v9318_v54 }
 0xcc0   : > { %v9320_v39 = vsel %vm862_vm1, %v9308_v10, %v9313_v13 }
 0xcc1   : > { %v10277_v25 = vpack.c.bf16 %v9321_v1, %v9320_v39 }
 0xcc3   : > { %10278 = vst [vmem:[%s857_s22] sm:$0xff] %v10277_v25  }
 0xcc4 PF: > { %s14043_s24 = sld [smem:[#allocation15_spill]] }
 0xcca   : > { %s38_s5 = sadd.s32 1, %s14043_s24  }
 0xccb   : > { %p35_p6 = scmp.ge.s32.totalorder %s38_s5, 4  }
 0xccd   :  { %37 = sbr.rel (!%p35_p6) target bundleno = 17 (0x11), region = 181 }
 0xcd4   :  { %9369 = vsyncpa [#allocation5], 1 }
 0xcd5   :  { %9371 = vsyncpa [#allocation5 + $0x1], 1 }
 0xcd6   :  { %9372 = vsyncpa [#allocation7], 1 }
 0xcd7   :  { %9373 = vsyncpa [#allocation10], 1 }

</bundles_post_ra>
